<compile_context>
chip_gen: v6e
topology: v6e:2x2x1
jax: 0.10.0
libtpu: 0.0.40
codegen_flags: <defaults>
</compile_context>

<pallas_src>
import numpy as np
import jax
import jax.numpy as jnp
from jax import lax
from jax.experimental import pallas as pl
from jax.experimental.pallas import tpu as pltpu

N_STEPS = 8        # fixed RK4 steps over t in [0, 1]
GN_EPS = 1e-5      # PyTorch GroupNorm default eps


# ---------------- static helpers (host side) ----------------

def _tap_offsets(W):
    # tap order matches the PyTorch conv-weight (ky, kx) raster order.
    return [(ky - 1) * W + (kx - 1) for ky in range(3) for kx in range(3)]


def _build_masks(H, W):
    # mask[tap, h*W+w] = 1 iff the (dy, dx) tap reads an in-bounds input pixel.
    m = np.zeros((9, H * W), np.float32)
    for ti in range(9):
        dy, dx = ti // 3 - 1, ti % 3 - 1
        for h in range(H):
            for w in range(W):
                if 0 <= h + dy < H and 0 <= w + dx < W:
                    m[ti, h * W + w] = 1.0
    return m


def choose_block_batch(N, C, max_rows=64):
    """Largest divisor b of N with b*C <= max_rows, preferring grid length >= 2 (v7x)."""
    best = 1
    for b in range(1, N + 1):
        if N % b != 0 or b * C > max_rows:
            continue
        if (N // b) >= 2 or N == 1:
            best = max(best, b)
    return best


def pack_params(raw, H, W, block_b):
    """Convert PyTorch-layout parameters into the kernel's (B*C)-row layout."""
    (w1, b1, w2, b2, g1, be1, g2, be2, g3, be3) = raw
    w1 = np.asarray(w1); w2 = np.asarray(w2)
    C = w1.shape[0]
    hw = H * W
    BC = block_b * C
    masks = _build_masks(H, W)                                      # (9, hw)

    def conv_pack(w, b):
        # w: (C_out, C_in+1, 3, 3); input channel 0 is the constant-t channel.
        w_x = np.transpose(w[:, 1:, :, :], (2, 3, 0, 1)).reshape(9, C, C)   # (tap, cout, cin)
        # block-diagonal weight: row = b*C + cout, col = tap*BC + b*C + cin.
        w_bd = np.zeros((BC, 9 * BC), np.float32)
        for tap in range(9):
            for bb in range(block_b):
                w_bd[bb * C:(bb + 1) * C,
                     tap * BC + bb * C: tap * BC + (bb + 1) * C] = w_x[tap]
        w_t = np.transpose(w[:, 0, :, :], (1, 2, 0)).reshape(9, C)          # (tap, cout)
        t_bias = w_t.T @ masks                                               # (C, hw): padded-t fold
        t_bias_t = np.tile(t_bias, (block_b, 1)).astype(np.float32)         # (BC, hw)
        b_t = np.tile(np.asarray(b, np.float32).reshape(C, 1), (block_b, 1))  # (BC, 1)
        return jnp.asarray(w_bd), jnp.asarray(b_t), jnp.asarray(t_bias_t)

    w1x, b1f, tb1 = conv_pack(w1, b1)
    w2x, b2f, tb2 = conv_pack(w2, b2)
    # border masks pre-broadcast over the BC rows: row = tap*BC + r.
    maskb = np.tile(masks[:, None, :], (1, BC, 1)).reshape(9 * BC, hw)
    gn = lambda v: jnp.asarray(
        np.tile(np.asarray(v, np.float32).reshape(C, 1), (block_b, 1)))
    return (w1x, b1f, tb1, w2x, b2f, tb2,
            gn(g1), gn(be1), gn(g2), gn(be2), gn(g3), gn(be3),
            jnp.asarray(maskb))


# ---------------- Pallas kernel ----------------

def _make_kernel(C, H, W, block_b):
    hw = H * W
    BC = block_b * C
    offsets = _tap_offsets(W)

    def kernel(x_ref, w1_ref, b1_ref, tb1_ref, w2_ref, b2_ref, tb2_ref,
               g1_ref, be1_ref, g2_ref, be2_ref, g3_ref, be3_ref,
               maskb_ref, o_ref):

        def group_norm(h, g_ref, be_ref):
            # one-pass stats; var clamped >= 0 to guard rsqrt against cancellation.
            mean = jnp.mean(h, axis=1, keepdims=True)                   # (BC, 1)
            msq = jnp.mean(h * h, axis=1, keepdims=True)
            var = jnp.maximum(msq - mean * mean, 0.0)
            scale = g_ref[...] * lax.rsqrt(var + GN_EPS)
            shift = be_ref[...] - mean * scale
            return h * scale + shift

        def conv3x3(h, t, w_ref, b_ref, tb_ref):
            # Patch-first 3x3 "same" conv with implicit t-channel:
            #   build 9 rolled + border-masked copies of h (XLU rotate + VPU mask),
            #   one block-diagonal (BC, 9BC) x (9BC, hw) MXU matmul does the
            #   per-sample channel contraction AND the 9-tap accumulation;
            #   the zero-padded t channel contributes t * t_bias.
            slabs = []
            for ti, off in enumerate(offsets):
                if off == 0:
                    slabs.append(h)                                      # center tap: always valid
                else:
                    rolled = pltpu.roll(h, (-off) % hw, axis=1)          # [r,p] = h[r, p+off]
                    slabs.append(rolled * maskb_ref[ti * BC:(ti + 1) * BC, :])
            patch = jnp.concatenate(slabs, axis=0)                       # (9*BC, hw)
            y = jnp.dot(w_ref[...], patch, preferred_element_type=jnp.float32)
            return y + b_ref[...] + t * tb_ref[...]

        def odefunc(t, h):
            h = group_norm(h, g1_ref, be1_ref)
            h = jnp.maximum(h, 0.0)
            h = conv3x3(h, t, w1_ref, b1_ref, tb1_ref)
            h = group_norm(h, g2_ref, be2_ref)
            h = jnp.maximum(h, 0.0)
            h = conv3x3(h, t, w2_ref, b2_ref, tb2_ref)
            return group_norm(h, g3_ref, be3_ref)

        dt = 1.0 / N_STEPS
        x0 = x_ref[0]                                                    # (BC, hw)

        def rk4_step(i, x):
            t = i.astype(jnp.float32) * dt
            k1 = odefunc(t, x)
            k2 = odefunc(t + 0.5 * dt, x + (0.5 * dt) * k1)
            k3 = odefunc(t + 0.5 * dt, x + (0.5 * dt) * k2)
            k4 = odefunc(t + dt, x + dt * k3)
            return x + (dt / 6.0) * (k1 + 2.0 * k2 + 2.0 * k3 + k4)

        # manual 2x unroll of the fixed-trip-count RK4 loop (N_STEPS is even).
        def two_steps(i, x):
            x = rk4_step(2 * i, x)
            return rk4_step(2 * i + 1, x)

        o_ref[0] = lax.fori_loop(0, N_STEPS // 2, two_steps, x0)

    return kernel


def odeblock_forward(x_nchw, raw_params, block_b=None):
    """x_nchw: (N, C, H, W) float32 (PyTorch layout).  Returns (N, C, H, W)."""
    N, C, H, W = x_nchw.shape
    assert C <= 32, "GroupNorm(min(32,C), C) one-channel-per-group path"
    hw = H * W
    if block_b is None:
        block_b = choose_block_batch(N, C)
    assert N % block_b == 0
    G = N // block_b
    BC = block_b * C

    packed = pack_params(raw_params, H, W, block_b)
    params = list(packed)

    # batch fused into sublanes: (G, B*C, H*W); NCHW flattening needs no transpose.
    x = x_nchw.reshape(G, BC, hw).astype(jnp.float32)

    def const_spec(p):
        nd = p.ndim
        return pl.BlockSpec(p.shape, lambda g, _nd=nd: (0,) * _nd)

    in_specs = [pl.BlockSpec((1, BC, hw), lambda g: (g, 0, 0))]
    in_specs += [const_spec(p) for p in params]

    out = pl.pallas_call(
        _make_kernel(C, H, W, block_b),
        out_shape=jax.ShapeDtypeStruct((G, BC, hw), jnp.float32),
        grid_spec=pltpu.PrefetchScalarGridSpec(
            num_scalar_prefetch=0,
            grid=(G,),
            in_specs=in_specs,
            out_specs=pl.BlockSpec((1, BC, hw), lambda g: (g, 0, 0)),
        ),
        compiler_params=pltpu.CompilerParams(
            dimension_semantics=("parallel",)),
    )(x, *params)
    return out.reshape(N, C, H, W)


# ---------------- plain-JAX reference (NCHW, real conv + t-concat) ----------------

def _ref_odefunc(t, x, raw):
    (w1, b1, w2, b2, g1, be1, g2, be2, g3, be3) = raw

    def gn(h, gamma, beta):
        mean = jnp.mean(h, axis=(2, 3), keepdims=True)
        var = jnp.mean((h - mean) ** 2, axis=(2, 3), keepdims=True)
        return ((h - mean) * lax.rsqrt(var + GN_EPS)
                * gamma.reshape(1, -1, 1, 1) + beta.reshape(1, -1, 1, 1))

    def concat_conv(h, t, w, b):
        n, c, hh, ww = h.shape
        tt = jnp.full((n, 1, hh, ww), t, h.dtype)
        hin = jnp.concatenate([tt, h], axis=1)
        out = lax.conv_general_dilated(
            hin, w, window_strides=(1, 1), padding=((1, 1), (1, 1)),
            dimension_numbers=("NCHW", "OIHW", "NCHW"))
        return out + b.reshape(1, -1, 1, 1)

    h = gn(x, g1, be1); h = jnp.maximum(h, 0.0); h = concat_conv(h, t, w1, b1)
    h = gn(h, g2, be2); h = jnp.maximum(h, 0.0); h = concat_conv(h, t, w2, b2)
    return gn(h, g3, be3)


def _ref_forward(x, raw):
    dt = 1.0 / N_STEPS

    def step(i, x):
        t = i.astype(jnp.float32) * dt
        k1 = _ref_odefunc(t, x, raw)
        k2 = _ref_odefunc(t + 0.5 * dt, x + 0.5 * dt * k1, raw)
        k3 = _ref_odefunc(t + 0.5 * dt, x + 0.5 * dt * k2, raw)
        k4 = _ref_odefunc(t + dt, x + dt * k3, raw)
        return x + (dt / 6.0) * (k1 + 2.0 * k2 + 2.0 * k3 + k4)

    return lax.fori_loop(0, N_STEPS, step, x)


# ---------------- deterministic parameter init (PyTorch layouts) ----------------

def init_raw_params(key, C):
    ks = jax.random.split(key, 10)
    w1 = 0.1 * jax.random.normal(ks[0], (C, C + 1, 3, 3), jnp.float32)
    b1 = 0.05 * jax.random.normal(ks[1], (C,), jnp.float32)
    w2 = 0.1 * jax.random.normal(ks[2], (C, C + 1, 3, 3), jnp.float32)
    b2 = 0.05 * jax.random.normal(ks[3], (C,), jnp.float32)
    g1 = 1.0 + 0.1 * jax.random.normal(ks[4], (C,), jnp.float32)
    be1 = 0.1 * jax.random.normal(ks[5], (C,), jnp.float32)
    g2 = 1.0 + 0.1 * jax.random.normal(ks[6], (C,), jnp.float32)
    be2 = 0.1 * jax.random.normal(ks[7], (C,), jnp.float32)
    g3 = 1.0 + 0.1 * jax.random.normal(ks[8], (C,), jnp.float32)
    be3 = 0.1 * jax.random.normal(ks[9], (C,), jnp.float32)
    return (w1, b1, w2, b2, g1, be1, g2, be2, g3, be3)


if __name__ == "__main__":
    key = jax.random.PRNGKey(0)
    kx, kp = jax.random.split(key)
    # N=4 exercises the batch-fused path: block_b=2 samples per grid step,
    # grid=(2,) (keeps both v7x TensorCores busy).
    N, C, H, W = 4, 4, 16, 16
    x = jax.random.normal(kx, (N, C, H, W), jnp.float32)
    raw = init_raw_params(kp, C)

    out = jax.block_until_ready(odeblock_forward(x, raw))
    assert out.shape == (N, C, H, W)

    # plain-JAX reference with the real t-channel concat + lax.conv validates the
    # batch-in-sublane relayout, block-diagonal weight repacking, t-bias fold,
    # and the pltpu.roll/mask tap construction.
    ref = jax.block_until_ready(jax.jit(_ref_forward)(x, raw))
    np.testing.assert_allclose(np.asarray(out), np.asarray(ref),
                               rtol=5e-3, atol=5e-3)
    print("KERNEL_OK")
</pallas_src>

<mosaic_0001>
module attributes {stable_mosaic.version = 11 : i64} {
  func.func @kernel(%arg0: i32, %arg1: memref<1x8x256xf32, #tpu.memory_space<vmem>>, %arg2: memref<8x72xf32, #tpu.memory_space<vmem>>, %arg3: memref<8x1xf32, #tpu.memory_space<vmem>>, %arg4: memref<8x256xf32, #tpu.memory_space<vmem>>, %arg5: memref<8x72xf32, #tpu.memory_space<vmem>>, %arg6: memref<8x1xf32, #tpu.memory_space<vmem>>, %arg7: memref<8x256xf32, #tpu.memory_space<vmem>>, %arg8: memref<8x1xf32, #tpu.memory_space<vmem>>, %arg9: memref<8x1xf32, #tpu.memory_space<vmem>>, %arg10: memref<8x1xf32, #tpu.memory_space<vmem>>, %arg11: memref<8x1xf32, #tpu.memory_space<vmem>>, %arg12: memref<8x1xf32, #tpu.memory_space<vmem>>, %arg13: memref<8x1xf32, #tpu.memory_space<vmem>>, %arg14: memref<72x256xf32, #tpu.memory_space<vmem>>, %arg15: memref<1x8x256xf32, #tpu.memory_space<vmem>>) attributes {dimension_semantics = [#tpu.dimension_semantics<parallel>], iteration_bounds = array<i64: 2>, scalar_prefetch = 0 : i64, scratch_operands = 0 : i64, tpu.core_type = #tpu.core_type<tc>, window_params = [{transform_indices = @transform_0, window_bounds = array<i64: 1, 8, 256>}, {pipeline_mode = #tpu.pipeline_mode<synchronous>, transform_indices = @transform_1, window_bounds = array<i64: 8, 72>}, {pipeline_mode = #tpu.pipeline_mode<synchronous>, transform_indices = @transform_2, window_bounds = array<i64: 8, 1>}, {pipeline_mode = #tpu.pipeline_mode<synchronous>, transform_indices = @transform_3, window_bounds = array<i64: 8, 256>}, {pipeline_mode = #tpu.pipeline_mode<synchronous>, transform_indices = @transform_4, window_bounds = array<i64: 8, 72>}, {pipeline_mode = #tpu.pipeline_mode<synchronous>, transform_indices = @transform_5, window_bounds = array<i64: 8, 1>}, {pipeline_mode = #tpu.pipeline_mode<synchronous>, transform_indices = @transform_6, window_bounds = array<i64: 8, 256>}, {pipeline_mode = #tpu.pipeline_mode<synchronous>, transform_indices = @transform_7, window_bounds = array<i64: 8, 1>}, {pipeline_mode = #tpu.pipeline_mode<synchronous>, transform_indices = @transform_8, window_bounds = array<i64: 8, 1>}, {pipeline_mode = #tpu.pipeline_mode<synchronous>, transform_indices = @transform_9, window_bounds = array<i64: 8, 1>}, {pipeline_mode = #tpu.pipeline_mode<synchronous>, transform_indices = @transform_10, window_bounds = array<i64: 8, 1>}, {pipeline_mode = #tpu.pipeline_mode<synchronous>, transform_indices = @transform_11, window_bounds = array<i64: 8, 1>}, {pipeline_mode = #tpu.pipeline_mode<synchronous>, transform_indices = @transform_12, window_bounds = array<i64: 8, 1>}, {pipeline_mode = #tpu.pipeline_mode<synchronous>, transform_indices = @transform_13, window_bounds = array<i64: 72, 256>}, {transform_indices = @transform_14, window_bounds = array<i64: 1, 8, 256>}]} {
    %c0 = arith.constant 0 : index
    %c0_0 = arith.constant 0 : index
    %c0_1 = arith.constant 0 : index
    %0 = vector.load %arg1[%c0, %c0_0, %c0_1] : memref<1x8x256xf32, #tpu.memory_space<vmem>>, vector<1x8x256xf32>
    %1 = vector.shape_cast %0 : vector<1x8x256xf32> to vector<8x256xf32>
    %c0_i32 = arith.constant 0 : i32
    %c4_i32 = arith.constant 4 : i32
    %2 = arith.addi %c0_i32, %c4_i32 : i32
    %c1_i32 = arith.constant 1 : i32
    %3 = scf.for %arg16 = %c0_i32 to %2 step %c1_i32 iter_args(%arg17 = %1) -> (vector<8x256xf32>)  : i32 {
      %c2_i32 = arith.constant 2 : i32
      %7 = arith.muli %c2_i32, %arg16 : i32
      %8 = arith.sitofp %7 : i32 to f32
      %cst = arith.constant 1.250000e-01 : f32
      %9 = arith.mulf %8, %cst : f32
      %cst_6 = arith.constant dense<0.000000e+00> : vector<8xf32>
      %10 = vector.multi_reduction <add>, %arg17, %cst_6 [1] : vector<8x256xf32> to vector<8xf32>
      %11 = vector.shape_cast %10 : vector<8xf32> to vector<8x1xf32>
      %cst_7 = arith.constant 2.560000e+02 : f32
      %12 = vector.broadcast %cst_7 : f32 to vector<8x1xf32>
      %13 = arith.divf %11, %12 : vector<8x1xf32>
      %14 = arith.mulf %arg17, %arg17 : vector<8x256xf32>
      %cst_8 = arith.constant dense<0.000000e+00> : vector<8xf32>
      %15 = vector.multi_reduction <add>, %14, %cst_8 [1] : vector<8x256xf32> to vector<8xf32>
      %16 = vector.shape_cast %15 : vector<8xf32> to vector<8x1xf32>
      %cst_9 = arith.constant 2.560000e+02 : f32
      %17 = vector.broadcast %cst_9 : f32 to vector<8x1xf32>
      %18 = arith.divf %16, %17 : vector<8x1xf32>
      %19 = arith.mulf %13, %13 : vector<8x1xf32>
      %20 = arith.subf %18, %19 : vector<8x1xf32>
      %cst_10 = arith.constant 0.000000e+00 : f32
      %21 = vector.broadcast %cst_10 : f32 to vector<8x1xf32>
      %22 = arith.maximumf %20, %21 : vector<8x1xf32>
      %c0_11 = arith.constant 0 : index
      %c0_12 = arith.constant 0 : index
      %23 = vector.load %arg8[%c0_11, %c0_12] : memref<8x1xf32, #tpu.memory_space<vmem>>, vector<8x1xf32>
      %cst_13 = arith.constant 9.99999974E-6 : f32
      %24 = vector.broadcast %cst_13 : f32 to vector<8x1xf32>
      %25 = arith.addf %22, %24 : vector<8x1xf32>
      %26 = math.rsqrt %25 : vector<8x1xf32>
      %27 = arith.mulf %23, %26 : vector<8x1xf32>
      %c0_14 = arith.constant 0 : index
      %c0_15 = arith.constant 0 : index
      %28 = vector.load %arg9[%c0_14, %c0_15] : memref<8x1xf32, #tpu.memory_space<vmem>>, vector<8x1xf32>
      %29 = arith.mulf %13, %27 : vector<8x1xf32>
      %30 = arith.subf %28, %29 : vector<8x1xf32>
      %31 = vector.broadcast %27 : vector<8x1xf32> to vector<8x256xf32>
      %32 = arith.mulf %arg17, %31 : vector<8x256xf32>
      %33 = vector.broadcast %30 : vector<8x1xf32> to vector<8x256xf32>
      %34 = arith.addf %32, %33 : vector<8x256xf32>
      %cst_16 = arith.constant 0.000000e+00 : f32
      %35 = vector.broadcast %cst_16 : f32 to vector<8x256xf32>
      %36 = arith.maximumf %34, %35 : vector<8x256xf32>
      %c17_i32 = arith.constant 17 : i32
      %37 = tpu.dynamic_rotate %36 by %c17_i32 dim 1 : vector<8x256xf32>, i32 -> vector<8x256xf32>
      %c0_17 = arith.constant 0 : index
      %c0_18 = arith.constant 0 : index
      %38 = vector.load %arg14[%c0_17, %c0_18] : memref<72x256xf32, #tpu.memory_space<vmem>>, vector<8x256xf32>
      %39 = arith.mulf %37, %38 : vector<8x256xf32>
      %c16_i32 = arith.constant 16 : i32
      %40 = tpu.dynamic_rotate %36 by %c16_i32 dim 1 : vector<8x256xf32>, i32 -> vector<8x256xf32>
      %c8 = arith.constant 8 : index
      %c0_19 = arith.constant 0 : index
      %41 = vector.load %arg14[%c8, %c0_19] : memref<72x256xf32, #tpu.memory_space<vmem>>, vector<8x256xf32>
      %42 = arith.mulf %40, %41 : vector<8x256xf32>
      %c15_i32 = arith.constant 15 : i32
      %43 = tpu.dynamic_rotate %36 by %c15_i32 dim 1 : vector<8x256xf32>, i32 -> vector<8x256xf32>
      %c16 = arith.constant 16 : index
      %c0_20 = arith.constant 0 : index
      %44 = vector.load %arg14[%c16, %c0_20] : memref<72x256xf32, #tpu.memory_space<vmem>>, vector<8x256xf32>
      %45 = arith.mulf %43, %44 : vector<8x256xf32>
      %c1_i32_21 = arith.constant 1 : i32
      %46 = tpu.dynamic_rotate %36 by %c1_i32_21 dim 1 : vector<8x256xf32>, i32 -> vector<8x256xf32>
      %c24 = arith.constant 24 : index
      %c0_22 = arith.constant 0 : index
      %47 = vector.load %arg14[%c24, %c0_22] : memref<72x256xf32, #tpu.memory_space<vmem>>, vector<8x256xf32>
      %48 = arith.mulf %46, %47 : vector<8x256xf32>
      %c255_i32 = arith.constant 255 : i32
      %49 = tpu.dynamic_rotate %36 by %c255_i32 dim 1 : vector<8x256xf32>, i32 -> vector<8x256xf32>
      %c40 = arith.constant 40 : index
      %c0_23 = arith.constant 0 : index
      %50 = vector.load %arg14[%c40, %c0_23] : memref<72x256xf32, #tpu.memory_space<vmem>>, vector<8x256xf32>
      %51 = arith.mulf %49, %50 : vector<8x256xf32>
      %c241_i32 = arith.constant 241 : i32
      %52 = tpu.dynamic_rotate %36 by %c241_i32 dim 1 : vector<8x256xf32>, i32 -> vector<8x256xf32>
      %c48 = arith.constant 48 : index
      %c0_24 = arith.constant 0 : index
      %53 = vector.load %arg14[%c48, %c0_24] : memref<72x256xf32, #tpu.memory_space<vmem>>, vector<8x256xf32>
      %54 = arith.mulf %52, %53 : vector<8x256xf32>
      %c240_i32 = arith.constant 240 : i32
      %55 = tpu.dynamic_rotate %36 by %c240_i32 dim 1 : vector<8x256xf32>, i32 -> vector<8x256xf32>
      %c56 = arith.constant 56 : index
      %c0_25 = arith.constant 0 : index
      %56 = vector.load %arg14[%c56, %c0_25] : memref<72x256xf32, #tpu.memory_space<vmem>>, vector<8x256xf32>
      %57 = arith.mulf %55, %56 : vector<8x256xf32>
      %c239_i32 = arith.constant 239 : i32
      %58 = tpu.dynamic_rotate %36 by %c239_i32 dim 1 : vector<8x256xf32>, i32 -> vector<8x256xf32>
      %c64 = arith.constant 64 : index
      %c0_26 = arith.constant 0 : index
      %59 = vector.load %arg14[%c64, %c0_26] : memref<72x256xf32, #tpu.memory_space<vmem>>, vector<8x256xf32>
      %60 = arith.mulf %58, %59 : vector<8x256xf32>
      %61 = tpu.concatenate %39, %42, %45, %48, %36, %51, %54, %57, %60 in 0 : vector<8x256xf32>, vector<8x256xf32>, vector<8x256xf32>, vector<8x256xf32>, vector<8x256xf32>, vector<8x256xf32>, vector<8x256xf32>, vector<8x256xf32>, vector<8x256xf32> -> vector<72x256xf32>
      %c0_27 = arith.constant 0 : index
      %c0_28 = arith.constant 0 : index
      %62 = vector.load %arg2[%c0_27, %c0_28] : memref<8x72xf32, #tpu.memory_space<vmem>>, vector<8x72xf32>
      %cst_29 = arith.constant dense<0.000000e+00> : vector<8x256xf32>
      %63 = tpu.matmul %62, %61, %cst_29 {dimension_numbers = #tpu.dot_dimension_numbers<[1], [0], [0], [1], [0, 0, 1, 1], [], []>} : vector<8x72xf32>, vector<72x256xf32>, vector<8x256xf32> -> vector<8x256xf32>
      %c0_30 = arith.constant 0 : index
      %c0_31 = arith.constant 0 : index
      %64 = vector.load %arg3[%c0_30, %c0_31] : memref<8x1xf32, #tpu.memory_space<vmem>>, vector<8x1xf32>
      %65 = vector.broadcast %64 : vector<8x1xf32> to vector<8x256xf32>
      %66 = arith.addf %63, %65 : vector<8x256xf32>
      %c0_32 = arith.constant 0 : index
      %c0_33 = arith.constant 0 : index
      %67 = vector.load %arg4[%c0_32, %c0_33] : memref<8x256xf32, #tpu.memory_space<vmem>>, vector<8x256xf32>
      %68 = vector.broadcast %9 : f32 to vector<8x256xf32>
      %69 = arith.mulf %68, %67 : vector<8x256xf32>
      %70 = arith.addf %66, %69 : vector<8x256xf32>
      %cst_34 = arith.constant dense<0.000000e+00> : vector<8xf32>
      %71 = vector.multi_reduction <add>, %70, %cst_34 [1] : vector<8x256xf32> to vector<8xf32>
      %72 = vector.shape_cast %71 : vector<8xf32> to vector<8x1xf32>
      %cst_35 = arith.constant 2.560000e+02 : f32
      %73 = vector.broadcast %cst_35 : f32 to vector<8x1xf32>
      %74 = arith.divf %72, %73 : vector<8x1xf32>
      %75 = arith.mulf %70, %70 : vector<8x256xf32>
      %cst_36 = arith.constant dense<0.000000e+00> : vector<8xf32>
      %76 = vector.multi_reduction <add>, %75, %cst_36 [1] : vector<8x256xf32> to vector<8xf32>
      %77 = vector.shape_cast %76 : vector<8xf32> to vector<8x1xf32>
      %cst_37 = arith.constant 2.560000e+02 : f32
      %78 = vector.broadcast %cst_37 : f32 to vector<8x1xf32>
      %79 = arith.divf %77, %78 : vector<8x1xf32>
      %80 = arith.mulf %74, %74 : vector<8x1xf32>
      %81 = arith.subf %79, %80 : vector<8x1xf32>
      %cst_38 = arith.constant 0.000000e+00 : f32
      %82 = vector.broadcast %cst_38 : f32 to vector<8x1xf32>
      %83 = arith.maximumf %81, %82 : vector<8x1xf32>
      %c0_39 = arith.constant 0 : index
      %c0_40 = arith.constant 0 : index
      %84 = vector.load %arg10[%c0_39, %c0_40] : memref<8x1xf32, #tpu.memory_space<vmem>>, vector<8x1xf32>
      %cst_41 = arith.constant 9.99999974E-6 : f32
      %85 = vector.broadcast %cst_41 : f32 to vector<8x1xf32>
      %86 = arith.addf %83, %85 : vector<8x1xf32>
      %87 = math.rsqrt %86 : vector<8x1xf32>
      %88 = arith.mulf %84, %87 : vector<8x1xf32>
      %c0_42 = arith.constant 0 : index
      %c0_43 = arith.constant 0 : index
      %89 = vector.load %arg11[%c0_42, %c0_43] : memref<8x1xf32, #tpu.memory_space<vmem>>, vector<8x1xf32>
      %90 = arith.mulf %74, %88 : vector<8x1xf32>
      %91 = arith.subf %89, %90 : vector<8x1xf32>
      %92 = vector.broadcast %88 : vector<8x1xf32> to vector<8x256xf32>
      %93 = arith.mulf %70, %92 : vector<8x256xf32>
      %94 = vector.broadcast %91 : vector<8x1xf32> to vector<8x256xf32>
      %95 = arith.addf %93, %94 : vector<8x256xf32>
      %cst_44 = arith.constant 0.000000e+00 : f32
      %96 = vector.broadcast %cst_44 : f32 to vector<8x256xf32>
      %97 = arith.maximumf %95, %96 : vector<8x256xf32>
      %c17_i32_45 = arith.constant 17 : i32
      %98 = tpu.dynamic_rotate %97 by %c17_i32_45 dim 1 : vector<8x256xf32>, i32 -> vector<8x256xf32>
      %c0_46 = arith.constant 0 : index
      %c0_47 = arith.constant 0 : index
      %99 = vector.load %arg14[%c0_46, %c0_47] : memref<72x256xf32, #tpu.memory_space<vmem>>, vector<8x256xf32>
      %100 = arith.mulf %98, %99 : vector<8x256xf32>
      %c16_i32_48 = arith.constant 16 : i32
      %101 = tpu.dynamic_rotate %97 by %c16_i32_48 dim 1 : vector<8x256xf32>, i32 -> vector<8x256xf32>
      %c8_49 = arith.constant 8 : index
      %c0_50 = arith.constant 0 : index
      %102 = vector.load %arg14[%c8_49, %c0_50] : memref<72x256xf32, #tpu.memory_space<vmem>>, vector<8x256xf32>
      %103 = arith.mulf %101, %102 : vector<8x256xf32>
      %c15_i32_51 = arith.constant 15 : i32
      %104 = tpu.dynamic_rotate %97 by %c15_i32_51 dim 1 : vector<8x256xf32>, i32 -> vector<8x256xf32>
      %c16_52 = arith.constant 16 : index
      %c0_53 = arith.constant 0 : index
      %105 = vector.load %arg14[%c16_52, %c0_53] : memref<72x256xf32, #tpu.memory_space<vmem>>, vector<8x256xf32>
      %106 = arith.mulf %104, %105 : vector<8x256xf32>
      %c1_i32_54 = arith.constant 1 : i32
      %107 = tpu.dynamic_rotate %97 by %c1_i32_54 dim 1 : vector<8x256xf32>, i32 -> vector<8x256xf32>
      %c24_55 = arith.constant 24 : index
      %c0_56 = arith.constant 0 : index
      %108 = vector.load %arg14[%c24_55, %c0_56] : memref<72x256xf32, #tpu.memory_space<vmem>>, vector<8x256xf32>
      %109 = arith.mulf %107, %108 : vector<8x256xf32>
      %c255_i32_57 = arith.constant 255 : i32
      %110 = tpu.dynamic_rotate %97 by %c255_i32_57 dim 1 : vector<8x256xf32>, i32 -> vector<8x256xf32>
      %c40_58 = arith.constant 40 : index
      %c0_59 = arith.constant 0 : index
      %111 = vector.load %arg14[%c40_58, %c0_59] : memref<72x256xf32, #tpu.memory_space<vmem>>, vector<8x256xf32>
      %112 = arith.mulf %110, %111 : vector<8x256xf32>
      %c241_i32_60 = arith.constant 241 : i32
      %113 = tpu.dynamic_rotate %97 by %c241_i32_60 dim 1 : vector<8x256xf32>, i32 -> vector<8x256xf32>
      %c48_61 = arith.constant 48 : index
      %c0_62 = arith.constant 0 : index
      %114 = vector.load %arg14[%c48_61, %c0_62] : memref<72x256xf32, #tpu.memory_space<vmem>>, vector<8x256xf32>
      %115 = arith.mulf %113, %114 : vector<8x256xf32>
      %c240_i32_63 = arith.constant 240 : i32
      %116 = tpu.dynamic_rotate %97 by %c240_i32_63 dim 1 : vector<8x256xf32>, i32 -> vector<8x256xf32>
      %c56_64 = arith.constant 56 : index
      %c0_65 = arith.constant 0 : index
      %117 = vector.load %arg14[%c56_64, %c0_65] : memref<72x256xf32, #tpu.memory_space<vmem>>, vector<8x256xf32>
      %118 = arith.mulf %116, %117 : vector<8x256xf32>
      %c239_i32_66 = arith.constant 239 : i32
      %119 = tpu.dynamic_rotate %97 by %c239_i32_66 dim 1 : vector<8x256xf32>, i32 -> vector<8x256xf32>
      %c64_67 = arith.constant 64 : index
      %c0_68 = arith.constant 0 : index
      %120 = vector.load %arg14[%c64_67, %c0_68] : memref<72x256xf32, #tpu.memory_space<vmem>>, vector<8x256xf32>
      %121 = arith.mulf %119, %120 : vector<8x256xf32>
      %122 = tpu.concatenate %100, %103, %106, %109, %97, %112, %115, %118, %121 in 0 : vector<8x256xf32>, vector<8x256xf32>, vector<8x256xf32>, vector<8x256xf32>, vector<8x256xf32>, vector<8x256xf32>, vector<8x256xf32>, vector<8x256xf32>, vector<8x256xf32> -> vector<72x256xf32>
      %c0_69 = arith.constant 0 : index
      %c0_70 = arith.constant 0 : index
      %123 = vector.load %arg5[%c0_69, %c0_70] : memref<8x72xf32, #tpu.memory_space<vmem>>, vector<8x72xf32>
      %cst_71 = arith.constant dense<0.000000e+00> : vector<8x256xf32>
      %124 = tpu.matmul %123, %122, %cst_71 {dimension_numbers = #tpu.dot_dimension_numbers<[1], [0], [0], [1], [0, 0, 1, 1], [], []>} : vector<8x72xf32>, vector<72x256xf32>, vector<8x256xf32> -> vector<8x256xf32>
      %c0_72 = arith.constant 0 : index
      %c0_73 = arith.constant 0 : index
      %125 = vector.load %arg6[%c0_72, %c0_73] : memref<8x1xf32, #tpu.memory_space<vmem>>, vector<8x1xf32>
      %126 = vector.broadcast %125 : vector<8x1xf32> to vector<8x256xf32>
      %127 = arith.addf %124, %126 : vector<8x256xf32>
      %c0_74 = arith.constant 0 : index
      %c0_75 = arith.constant 0 : index
      %128 = vector.load %arg7[%c0_74, %c0_75] : memref<8x256xf32, #tpu.memory_space<vmem>>, vector<8x256xf32>
      %129 = vector.broadcast %9 : f32 to vector<8x256xf32>
      %130 = arith.mulf %129, %128 : vector<8x256xf32>
      %131 = arith.addf %127, %130 : vector<8x256xf32>
      %cst_76 = arith.constant dense<0.000000e+00> : vector<8xf32>
      %132 = vector.multi_reduction <add>, %131, %cst_76 [1] : vector<8x256xf32> to vector<8xf32>
      %133 = vector.shape_cast %132 : vector<8xf32> to vector<8x1xf32>
      %cst_77 = arith.constant 2.560000e+02 : f32
      %134 = vector.broadcast %cst_77 : f32 to vector<8x1xf32>
      %135 = arith.divf %133, %134 : vector<8x1xf32>
      %136 = arith.mulf %131, %131 : vector<8x256xf32>
      %cst_78 = arith.constant dense<0.000000e+00> : vector<8xf32>
      %137 = vector.multi_reduction <add>, %136, %cst_78 [1] : vector<8x256xf32> to vector<8xf32>
      %138 = vector.shape_cast %137 : vector<8xf32> to vector<8x1xf32>
      %cst_79 = arith.constant 2.560000e+02 : f32
      %139 = vector.broadcast %cst_79 : f32 to vector<8x1xf32>
      %140 = arith.divf %138, %139 : vector<8x1xf32>
      %141 = arith.mulf %135, %135 : vector<8x1xf32>
      %142 = arith.subf %140, %141 : vector<8x1xf32>
      %cst_80 = arith.constant 0.000000e+00 : f32
      %143 = vector.broadcast %cst_80 : f32 to vector<8x1xf32>
      %144 = arith.maximumf %142, %143 : vector<8x1xf32>
      %c0_81 = arith.constant 0 : index
      %c0_82 = arith.constant 0 : index
      %145 = vector.load %arg12[%c0_81, %c0_82] : memref<8x1xf32, #tpu.memory_space<vmem>>, vector<8x1xf32>
      %cst_83 = arith.constant 9.99999974E-6 : f32
      %146 = vector.broadcast %cst_83 : f32 to vector<8x1xf32>
      %147 = arith.addf %144, %146 : vector<8x1xf32>
      %148 = math.rsqrt %147 : vector<8x1xf32>
      %149 = arith.mulf %145, %148 : vector<8x1xf32>
      %c0_84 = arith.constant 0 : index
      %c0_85 = arith.constant 0 : index
      %150 = vector.load %arg13[%c0_84, %c0_85] : memref<8x1xf32, #tpu.memory_space<vmem>>, vector<8x1xf32>
      %151 = arith.mulf %135, %149 : vector<8x1xf32>
      %152 = arith.subf %150, %151 : vector<8x1xf32>
      %153 = vector.broadcast %149 : vector<8x1xf32> to vector<8x256xf32>
      %154 = arith.mulf %131, %153 : vector<8x256xf32>
      %155 = vector.broadcast %152 : vector<8x1xf32> to vector<8x256xf32>
      %156 = arith.addf %154, %155 : vector<8x256xf32>
      %cst_86 = arith.constant 6.250000e-02 : f32
      %157 = arith.addf %9, %cst_86 : f32
      %cst_87 = arith.constant 6.250000e-02 : f32
      %158 = vector.broadcast %cst_87 : f32 to vector<8x256xf32>
      %159 = arith.mulf %158, %156 : vector<8x256xf32>
      %160 = arith.addf %arg17, %159 : vector<8x256xf32>
      %cst_88 = arith.constant dense<0.000000e+00> : vector<8xf32>
      %161 = vector.multi_reduction <add>, %160, %cst_88 [1] : vector<8x256xf32> to vector<8xf32>
      %162 = vector.shape_cast %161 : vector<8xf32> to vector<8x1xf32>
      %cst_89 = arith.constant 2.560000e+02 : f32
      %163 = vector.broadcast %cst_89 : f32 to vector<8x1xf32>
      %164 = arith.divf %162, %163 : vector<8x1xf32>
      %165 = arith.mulf %160, %160 : vector<8x256xf32>
      %cst_90 = arith.constant dense<0.000000e+00> : vector<8xf32>
      %166 = vector.multi_reduction <add>, %165, %cst_90 [1] : vector<8x256xf32> to vector<8xf32>
      %167 = vector.shape_cast %166 : vector<8xf32> to vector<8x1xf32>
      %cst_91 = arith.constant 2.560000e+02 : f32
      %168 = vector.broadcast %cst_91 : f32 to vector<8x1xf32>
      %169 = arith.divf %167, %168 : vector<8x1xf32>
      %170 = arith.mulf %164, %164 : vector<8x1xf32>
      %171 = arith.subf %169, %170 : vector<8x1xf32>
      %cst_92 = arith.constant 0.000000e+00 : f32
      %172 = vector.broadcast %cst_92 : f32 to vector<8x1xf32>
      %173 = arith.maximumf %171, %172 : vector<8x1xf32>
      %c0_93 = arith.constant 0 : index
      %c0_94 = arith.constant 0 : index
      %174 = vector.load %arg8[%c0_93, %c0_94] : memref<8x1xf32, #tpu.memory_space<vmem>>, vector<8x1xf32>
      %cst_95 = arith.constant 9.99999974E-6 : f32
      %175 = vector.broadcast %cst_95 : f32 to vector<8x1xf32>
      %176 = arith.addf %173, %175 : vector<8x1xf32>
      %177 = math.rsqrt %176 : vector<8x1xf32>
      %178 = arith.mulf %174, %177 : vector<8x1xf32>
      %c0_96 = arith.constant 0 : index
      %c0_97 = arith.constant 0 : index
      %179 = vector.load %arg9[%c0_96, %c0_97] : memref<8x1xf32, #tpu.memory_space<vmem>>, vector<8x1xf32>
      %180 = arith.mulf %164, %178 : vector<8x1xf32>
      %181 = arith.subf %179, %180 : vector<8x1xf32>
      %182 = vector.broadcast %178 : vector<8x1xf32> to vector<8x256xf32>
      %183 = arith.mulf %160, %182 : vector<8x256xf32>
      %184 = vector.broadcast %181 : vector<8x1xf32> to vector<8x256xf32>
      %185 = arith.addf %183, %184 : vector<8x256xf32>
      %cst_98 = arith.constant 0.000000e+00 : f32
      %186 = vector.broadcast %cst_98 : f32 to vector<8x256xf32>
      %187 = arith.maximumf %185, %186 : vector<8x256xf32>
      %c17_i32_99 = arith.constant 17 : i32
      %188 = tpu.dynamic_rotate %187 by %c17_i32_99 dim 1 : vector<8x256xf32>, i32 -> vector<8x256xf32>
      %c0_100 = arith.constant 0 : index
      %c0_101 = arith.constant 0 : index
      %189 = vector.load %arg14[%c0_100, %c0_101] : memref<72x256xf32, #tpu.memory_space<vmem>>, vector<8x256xf32>
      %190 = arith.mulf %188, %189 : vector<8x256xf32>
      %c16_i32_102 = arith.constant 16 : i32
      %191 = tpu.dynamic_rotate %187 by %c16_i32_102 dim 1 : vector<8x256xf32>, i32 -> vector<8x256xf32>
      %c8_103 = arith.constant 8 : index
      %c0_104 = arith.constant 0 : index
      %192 = vector.load %arg14[%c8_103, %c0_104] : memref<72x256xf32, #tpu.memory_space<vmem>>, vector<8x256xf32>
      %193 = arith.mulf %191, %192 : vector<8x256xf32>
      %c15_i32_105 = arith.constant 15 : i32
      %194 = tpu.dynamic_rotate %187 by %c15_i32_105 dim 1 : vector<8x256xf32>, i32 -> vector<8x256xf32>
      %c16_106 = arith.constant 16 : index
      %c0_107 = arith.constant 0 : index
      %195 = vector.load %arg14[%c16_106, %c0_107] : memref<72x256xf32, #tpu.memory_space<vmem>>, vector<8x256xf32>
      %196 = arith.mulf %194, %195 : vector<8x256xf32>
      %c1_i32_108 = arith.constant 1 : i32
      %197 = tpu.dynamic_rotate %187 by %c1_i32_108 dim 1 : vector<8x256xf32>, i32 -> vector<8x256xf32>
      %c24_109 = arith.constant 24 : index
      %c0_110 = arith.constant 0 : index
      %198 = vector.load %arg14[%c24_109, %c0_110] : memref<72x256xf32, #tpu.memory_space<vmem>>, vector<8x256xf32>
      %199 = arith.mulf %197, %198 : vector<8x256xf32>
      %c255_i32_111 = arith.constant 255 : i32
      %200 = tpu.dynamic_rotate %187 by %c255_i32_111 dim 1 : vector<8x256xf32>, i32 -> vector<8x256xf32>
      %c40_112 = arith.constant 40 : index
      %c0_113 = arith.constant 0 : index
      %201 = vector.load %arg14[%c40_112, %c0_113] : memref<72x256xf32, #tpu.memory_space<vmem>>, vector<8x256xf32>
      %202 = arith.mulf %200, %201 : vector<8x256xf32>
      %c241_i32_114 = arith.constant 241 : i32
      %203 = tpu.dynamic_rotate %187 by %c241_i32_114 dim 1 : vector<8x256xf32>, i32 -> vector<8x256xf32>
      %c48_115 = arith.constant 48 : index
      %c0_116 = arith.constant 0 : index
      %204 = vector.load %arg14[%c48_115, %c0_116] : memref<72x256xf32, #tpu.memory_space<vmem>>, vector<8x256xf32>
      %205 = arith.mulf %203, %204 : vector<8x256xf32>
      %c240_i32_117 = arith.constant 240 : i32
      %206 = tpu.dynamic_rotate %187 by %c240_i32_117 dim 1 : vector<8x256xf32>, i32 -> vector<8x256xf32>
      %c56_118 = arith.constant 56 : index
      %c0_119 = arith.constant 0 : index
      %207 = vector.load %arg14[%c56_118, %c0_119] : memref<72x256xf32, #tpu.memory_space<vmem>>, vector<8x256xf32>
      %208 = arith.mulf %206, %207 : vector<8x256xf32>
      %c239_i32_120 = arith.constant 239 : i32
      %209 = tpu.dynamic_rotate %187 by %c239_i32_120 dim 1 : vector<8x256xf32>, i32 -> vector<8x256xf32>
      %c64_121 = arith.constant 64 : index
      %c0_122 = arith.constant 0 : index
      %210 = vector.load %arg14[%c64_121, %c0_122] : memref<72x256xf32, #tpu.memory_space<vmem>>, vector<8x256xf32>
      %211 = arith.mulf %209, %210 : vector<8x256xf32>
      %212 = tpu.concatenate %190, %193, %196, %199, %187, %202, %205, %208, %211 in 0 : vector<8x256xf32>, vector<8x256xf32>, vector<8x256xf32>, vector<8x256xf32>, vector<8x256xf32>, vector<8x256xf32>, vector<8x256xf32>, vector<8x256xf32>, vector<8x256xf32> -> vector<72x256xf32>
      %c0_123 = arith.constant 0 : index
      %c0_124 = arith.constant 0 : index
      %213 = vector.load %arg2[%c0_123, %c0_124] : memref<8x72xf32, #tpu.memory_space<vmem>>, vector<8x72xf32>
      %cst_125 = arith.constant dense<0.000000e+00> : vector<8x256xf32>
      %214 = tpu.matmul %213, %212, %cst_125 {dimension_numbers = #tpu.dot_dimension_numbers<[1], [0], [0], [1], [0, 0, 1, 1], [], []>} : vector<8x72xf32>, vector<72x256xf32>, vector<8x256xf32> -> vector<8x256xf32>
      %c0_126 = arith.constant 0 : index
      %c0_127 = arith.constant 0 : index
      %215 = vector.load %arg3[%c0_126, %c0_127] : memref<8x1xf32, #tpu.memory_space<vmem>>, vector<8x1xf32>
      %216 = vector.broadcast %215 : vector<8x1xf32> to vector<8x256xf32>
      %217 = arith.addf %214, %216 : vector<8x256xf32>
      %c0_128 = arith.constant 0 : index
      %c0_129 = arith.constant 0 : index
      %218 = vector.load %arg4[%c0_128, %c0_129] : memref<8x256xf32, #tpu.memory_space<vmem>>, vector<8x256xf32>
      %219 = vector.broadcast %157 : f32 to vector<8x256xf32>
      %220 = arith.mulf %219, %218 : vector<8x256xf32>
      %221 = arith.addf %217, %220 : vector<8x256xf32>
      %cst_130 = arith.constant dense<0.000000e+00> : vector<8xf32>
      %222 = vector.multi_reduction <add>, %221, %cst_130 [1] : vector<8x256xf32> to vector<8xf32>
      %223 = vector.shape_cast %222 : vector<8xf32> to vector<8x1xf32>
      %cst_131 = arith.constant 2.560000e+02 : f32
      %224 = vector.broadcast %cst_131 : f32 to vector<8x1xf32>
      %225 = arith.divf %223, %224 : vector<8x1xf32>
      %226 = arith.mulf %221, %221 : vector<8x256xf32>
      %cst_132 = arith.constant dense<0.000000e+00> : vector<8xf32>
      %227 = vector.multi_reduction <add>, %226, %cst_132 [1] : vector<8x256xf32> to vector<8xf32>
      %228 = vector.shape_cast %227 : vector<8xf32> to vector<8x1xf32>
      %cst_133 = arith.constant 2.560000e+02 : f32
      %229 = vector.broadcast %cst_133 : f32 to vector<8x1xf32>
      %230 = arith.divf %228, %229 : vector<8x1xf32>
      %231 = arith.mulf %225, %225 : vector<8x1xf32>
      %232 = arith.subf %230, %231 : vector<8x1xf32>
      %cst_134 = arith.constant 0.000000e+00 : f32
      %233 = vector.broadcast %cst_134 : f32 to vector<8x1xf32>
      %234 = arith.maximumf %232, %233 : vector<8x1xf32>
      %c0_135 = arith.constant 0 : index
      %c0_136 = arith.constant 0 : index
      %235 = vector.load %arg10[%c0_135, %c0_136] : memref<8x1xf32, #tpu.memory_space<vmem>>, vector<8x1xf32>
      %cst_137 = arith.constant 9.99999974E-6 : f32
      %236 = vector.broadcast %cst_137 : f32 to vector<8x1xf32>
      %237 = arith.addf %234, %236 : vector<8x1xf32>
      %238 = math.rsqrt %237 : vector<8x1xf32>
      %239 = arith.mulf %235, %238 : vector<8x1xf32>
      %c0_138 = arith.constant 0 : index
      %c0_139 = arith.constant 0 : index
      %240 = vector.load %arg11[%c0_138, %c0_139] : memref<8x1xf32, #tpu.memory_space<vmem>>, vector<8x1xf32>
      %241 = arith.mulf %225, %239 : vector<8x1xf32>
      %242 = arith.subf %240, %241 : vector<8x1xf32>
      %243 = vector.broadcast %239 : vector<8x1xf32> to vector<8x256xf32>
      %244 = arith.mulf %221, %243 : vector<8x256xf32>
      %245 = vector.broadcast %242 : vector<8x1xf32> to vector<8x256xf32>
      %246 = arith.addf %244, %245 : vector<8x256xf32>
      %cst_140 = arith.constant 0.000000e+00 : f32
      %247 = vector.broadcast %cst_140 : f32 to vector<8x256xf32>
      %248 = arith.maximumf %246, %247 : vector<8x256xf32>
      %c17_i32_141 = arith.constant 17 : i32
      %249 = tpu.dynamic_rotate %248 by %c17_i32_141 dim 1 : vector<8x256xf32>, i32 -> vector<8x256xf32>
      %c0_142 = arith.constant 0 : index
      %c0_143 = arith.constant 0 : index
      %250 = vector.load %arg14[%c0_142, %c0_143] : memref<72x256xf32, #tpu.memory_space<vmem>>, vector<8x256xf32>
      %251 = arith.mulf %249, %250 : vector<8x256xf32>
      %c16_i32_144 = arith.constant 16 : i32
      %252 = tpu.dynamic_rotate %248 by %c16_i32_144 dim 1 : vector<8x256xf32>, i32 -> vector<8x256xf32>
      %c8_145 = arith.constant 8 : index
      %c0_146 = arith.constant 0 : index
      %253 = vector.load %arg14[%c8_145, %c0_146] : memref<72x256xf32, #tpu.memory_space<vmem>>, vector<8x256xf32>
      %254 = arith.mulf %252, %253 : vector<8x256xf32>
      %c15_i32_147 = arith.constant 15 : i32
      %255 = tpu.dynamic_rotate %248 by %c15_i32_147 dim 1 : vector<8x256xf32>, i32 -> vector<8x256xf32>
      %c16_148 = arith.constant 16 : index
      %c0_149 = arith.constant 0 : index
      %256 = vector.load %arg14[%c16_148, %c0_149] : memref<72x256xf32, #tpu.memory_space<vmem>>, vector<8x256xf32>
      %257 = arith.mulf %255, %256 : vector<8x256xf32>
      %c1_i32_150 = arith.constant 1 : i32
      %258 = tpu.dynamic_rotate %248 by %c1_i32_150 dim 1 : vector<8x256xf32>, i32 -> vector<8x256xf32>
      %c24_151 = arith.constant 24 : index
      %c0_152 = arith.constant 0 : index
      %259 = vector.load %arg14[%c24_151, %c0_152] : memref<72x256xf32, #tpu.memory_space<vmem>>, vector<8x256xf32>
      %260 = arith.mulf %258, %259 : vector<8x256xf32>
      %c255_i32_153 = arith.constant 255 : i32
      %261 = tpu.dynamic_rotate %248 by %c255_i32_153 dim 1 : vector<8x256xf32>, i32 -> vector<8x256xf32>
      %c40_154 = arith.constant 40 : index
      %c0_155 = arith.constant 0 : index
      %262 = vector.load %arg14[%c40_154, %c0_155] : memref<72x256xf32, #tpu.memory_space<vmem>>, vector<8x256xf32>
      %263 = arith.mulf %261, %262 : vector<8x256xf32>
      %c241_i32_156 = arith.constant 241 : i32
      %264 = tpu.dynamic_rotate %248 by %c241_i32_156 dim 1 : vector<8x256xf32>, i32 -> vector<8x256xf32>
      %c48_157 = arith.constant 48 : index
      %c0_158 = arith.constant 0 : index
      %265 = vector.load %arg14[%c48_157, %c0_158] : memref<72x256xf32, #tpu.memory_space<vmem>>, vector<8x256xf32>
      %266 = arith.mulf %264, %265 : vector<8x256xf32>
      %c240_i32_159 = arith.constant 240 : i32
      %267 = tpu.dynamic_rotate %248 by %c240_i32_159 dim 1 : vector<8x256xf32>, i32 -> vector<8x256xf32>
      %c56_160 = arith.constant 56 : index
      %c0_161 = arith.constant 0 : index
      %268 = vector.load %arg14[%c56_160, %c0_161] : memref<72x256xf32, #tpu.memory_space<vmem>>, vector<8x256xf32>
      %269 = arith.mulf %267, %268 : vector<8x256xf32>
      %c239_i32_162 = arith.constant 239 : i32
      %270 = tpu.dynamic_rotate %248 by %c239_i32_162 dim 1 : vector<8x256xf32>, i32 -> vector<8x256xf32>
      %c64_163 = arith.constant 64 : index
      %c0_164 = arith.constant 0 : index
      %271 = vector.load %arg14[%c64_163, %c0_164] : memref<72x256xf32, #tpu.memory_space<vmem>>, vector<8x256xf32>
      %272 = arith.mulf %270, %271 : vector<8x256xf32>
      %273 = tpu.concatenate %251, %254, %257, %260, %248, %263, %266, %269, %272 in 0 : vector<8x256xf32>, vector<8x256xf32>, vector<8x256xf32>, vector<8x256xf32>, vector<8x256xf32>, vector<8x256xf32>, vector<8x256xf32>, vector<8x256xf32>, vector<8x256xf32> -> vector<72x256xf32>
      %c0_165 = arith.constant 0 : index
      %c0_166 = arith.constant 0 : index
      %274 = vector.load %arg5[%c0_165, %c0_166] : memref<8x72xf32, #tpu.memory_space<vmem>>, vector<8x72xf32>
      %cst_167 = arith.constant dense<0.000000e+00> : vector<8x256xf32>
      %275 = tpu.matmul %274, %273, %cst_167 {dimension_numbers = #tpu.dot_dimension_numbers<[1], [0], [0], [1], [0, 0, 1, 1], [], []>} : vector<8x72xf32>, vector<72x256xf32>, vector<8x256xf32> -> vector<8x256xf32>
      %c0_168 = arith.constant 0 : index
      %c0_169 = arith.constant 0 : index
      %276 = vector.load %arg6[%c0_168, %c0_169] : memref<8x1xf32, #tpu.memory_space<vmem>>, vector<8x1xf32>
      %277 = vector.broadcast %276 : vector<8x1xf32> to vector<8x256xf32>
      %278 = arith.addf %275, %277 : vector<8x256xf32>
      %c0_170 = arith.constant 0 : index
      %c0_171 = arith.constant 0 : index
      %279 = vector.load %arg7[%c0_170, %c0_171] : memref<8x256xf32, #tpu.memory_space<vmem>>, vector<8x256xf32>
      %280 = vector.broadcast %157 : f32 to vector<8x256xf32>
      %281 = arith.mulf %280, %279 : vector<8x256xf32>
      %282 = arith.addf %278, %281 : vector<8x256xf32>
      %cst_172 = arith.constant dense<0.000000e+00> : vector<8xf32>
      %283 = vector.multi_reduction <add>, %282, %cst_172 [1] : vector<8x256xf32> to vector<8xf32>
      %284 = vector.shape_cast %283 : vector<8xf32> to vector<8x1xf32>
      %cst_173 = arith.constant 2.560000e+02 : f32
      %285 = vector.broadcast %cst_173 : f32 to vector<8x1xf32>
      %286 = arith.divf %284, %285 : vector<8x1xf32>
      %287 = arith.mulf %282, %282 : vector<8x256xf32>
      %cst_174 = arith.constant dense<0.000000e+00> : vector<8xf32>
      %288 = vector.multi_reduction <add>, %287, %cst_174 [1] : vector<8x256xf32> to vector<8xf32>
      %289 = vector.shape_cast %288 : vector<8xf32> to vector<8x1xf32>
      %cst_175 = arith.constant 2.560000e+02 : f32
      %290 = vector.broadcast %cst_175 : f32 to vector<8x1xf32>
      %291 = arith.divf %289, %290 : vector<8x1xf32>
      %292 = arith.mulf %286, %286 : vector<8x1xf32>
      %293 = arith.subf %291, %292 : vector<8x1xf32>
      %cst_176 = arith.constant 0.000000e+00 : f32
      %294 = vector.broadcast %cst_176 : f32 to vector<8x1xf32>
      %295 = arith.maximumf %293, %294 : vector<8x1xf32>
      %c0_177 = arith.constant 0 : index
      %c0_178 = arith.constant 0 : index
      %296 = vector.load %arg12[%c0_177, %c0_178] : memref<8x1xf32, #tpu.memory_space<vmem>>, vector<8x1xf32>
      %cst_179 = arith.constant 9.99999974E-6 : f32
      %297 = vector.broadcast %cst_179 : f32 to vector<8x1xf32>
      %298 = arith.addf %295, %297 : vector<8x1xf32>
      %299 = math.rsqrt %298 : vector<8x1xf32>
      %300 = arith.mulf %296, %299 : vector<8x1xf32>
      %c0_180 = arith.constant 0 : index
      %c0_181 = arith.constant 0 : index
      %301 = vector.load %arg13[%c0_180, %c0_181] : memref<8x1xf32, #tpu.memory_space<vmem>>, vector<8x1xf32>
      %302 = arith.mulf %286, %300 : vector<8x1xf32>
      %303 = arith.subf %301, %302 : vector<8x1xf32>
      %304 = vector.broadcast %300 : vector<8x1xf32> to vector<8x256xf32>
      %305 = arith.mulf %282, %304 : vector<8x256xf32>
      %306 = vector.broadcast %303 : vector<8x1xf32> to vector<8x256xf32>
      %307 = arith.addf %305, %306 : vector<8x256xf32>
      %cst_182 = arith.constant 6.250000e-02 : f32
      %308 = arith.addf %9, %cst_182 : f32
      %cst_183 = arith.constant 6.250000e-02 : f32
      %309 = vector.broadcast %cst_183 : f32 to vector<8x256xf32>
      %310 = arith.mulf %309, %307 : vector<8x256xf32>
      %311 = arith.addf %arg17, %310 : vector<8x256xf32>
      %cst_184 = arith.constant dense<0.000000e+00> : vector<8xf32>
      %312 = vector.multi_reduction <add>, %311, %cst_184 [1] : vector<8x256xf32> to vector<8xf32>
      %313 = vector.shape_cast %312 : vector<8xf32> to vector<8x1xf32>
      %cst_185 = arith.constant 2.560000e+02 : f32
      %314 = vector.broadcast %cst_185 : f32 to vector<8x1xf32>
      %315 = arith.divf %313, %314 : vector<8x1xf32>
      %316 = arith.mulf %311, %311 : vector<8x256xf32>
      %cst_186 = arith.constant dense<0.000000e+00> : vector<8xf32>
      %317 = vector.multi_reduction <add>, %316, %cst_186 [1] : vector<8x256xf32> to vector<8xf32>
      %318 = vector.shape_cast %317 : vector<8xf32> to vector<8x1xf32>
      %cst_187 = arith.constant 2.560000e+02 : f32
      %319 = vector.broadcast %cst_187 : f32 to vector<8x1xf32>
      %320 = arith.divf %318, %319 : vector<8x1xf32>
      %321 = arith.mulf %315, %315 : vector<8x1xf32>
      %322 = arith.subf %320, %321 : vector<8x1xf32>
      %cst_188 = arith.constant 0.000000e+00 : f32
      %323 = vector.broadcast %cst_188 : f32 to vector<8x1xf32>
      %324 = arith.maximumf %322, %323 : vector<8x1xf32>
      %c0_189 = arith.constant 0 : index
      %c0_190 = arith.constant 0 : index
      %325 = vector.load %arg8[%c0_189, %c0_190] : memref<8x1xf32, #tpu.memory_space<vmem>>, vector<8x1xf32>
      %cst_191 = arith.constant 9.99999974E-6 : f32
      %326 = vector.broadcast %cst_191 : f32 to vector<8x1xf32>
      %327 = arith.addf %324, %326 : vector<8x1xf32>
      %328 = math.rsqrt %327 : vector<8x1xf32>
      %329 = arith.mulf %325, %328 : vector<8x1xf32>
      %c0_192 = arith.constant 0 : index
      %c0_193 = arith.constant 0 : index
      %330 = vector.load %arg9[%c0_192, %c0_193] : memref<8x1xf32, #tpu.memory_space<vmem>>, vector<8x1xf32>
      %331 = arith.mulf %315, %329 : vector<8x1xf32>
      %332 = arith.subf %330, %331 : vector<8x1xf32>
      %333 = vector.broadcast %329 : vector<8x1xf32> to vector<8x256xf32>
      %334 = arith.mulf %311, %333 : vector<8x256xf32>
      %335 = vector.broadcast %332 : vector<8x1xf32> to vector<8x256xf32>
      %336 = arith.addf %334, %335 : vector<8x256xf32>
      %cst_194 = arith.constant 0.000000e+00 : f32
      %337 = vector.broadcast %cst_194 : f32 to vector<8x256xf32>
      %338 = arith.maximumf %336, %337 : vector<8x256xf32>
      %c17_i32_195 = arith.constant 17 : i32
      %339 = tpu.dynamic_rotate %338 by %c17_i32_195 dim 1 : vector<8x256xf32>, i32 -> vector<8x256xf32>
      %c0_196 = arith.constant 0 : index
      %c0_197 = arith.constant 0 : index
      %340 = vector.load %arg14[%c0_196, %c0_197] : memref<72x256xf32, #tpu.memory_space<vmem>>, vector<8x256xf32>
      %341 = arith.mulf %339, %340 : vector<8x256xf32>
      %c16_i32_198 = arith.constant 16 : i32
      %342 = tpu.dynamic_rotate %338 by %c16_i32_198 dim 1 : vector<8x256xf32>, i32 -> vector<8x256xf32>
      %c8_199 = arith.constant 8 : index
      %c0_200 = arith.constant 0 : index
      %343 = vector.load %arg14[%c8_199, %c0_200] : memref<72x256xf32, #tpu.memory_space<vmem>>, vector<8x256xf32>
      %344 = arith.mulf %342, %343 : vector<8x256xf32>
      %c15_i32_201 = arith.constant 15 : i32
      %345 = tpu.dynamic_rotate %338 by %c15_i32_201 dim 1 : vector<8x256xf32>, i32 -> vector<8x256xf32>
      %c16_202 = arith.constant 16 : index
      %c0_203 = arith.constant 0 : index
      %346 = vector.load %arg14[%c16_202, %c0_203] : memref<72x256xf32, #tpu.memory_space<vmem>>, vector<8x256xf32>
      %347 = arith.mulf %345, %346 : vector<8x256xf32>
      %c1_i32_204 = arith.constant 1 : i32
      %348 = tpu.dynamic_rotate %338 by %c1_i32_204 dim 1 : vector<8x256xf32>, i32 -> vector<8x256xf32>
      %c24_205 = arith.constant 24 : index
      %c0_206 = arith.constant 0 : index
      %349 = vector.load %arg14[%c24_205, %c0_206] : memref<72x256xf32, #tpu.memory_space<vmem>>, vector<8x256xf32>
      %350 = arith.mulf %348, %349 : vector<8x256xf32>
      %c255_i32_207 = arith.constant 255 : i32
      %351 = tpu.dynamic_rotate %338 by %c255_i32_207 dim 1 : vector<8x256xf32>, i32 -> vector<8x256xf32>
      %c40_208 = arith.constant 40 : index
      %c0_209 = arith.constant 0 : index
      %352 = vector.load %arg14[%c40_208, %c0_209] : memref<72x256xf32, #tpu.memory_space<vmem>>, vector<8x256xf32>
      %353 = arith.mulf %351, %352 : vector<8x256xf32>
      %c241_i32_210 = arith.constant 241 : i32
      %354 = tpu.dynamic_rotate %338 by %c241_i32_210 dim 1 : vector<8x256xf32>, i32 -> vector<8x256xf32>
      %c48_211 = arith.constant 48 : index
      %c0_212 = arith.constant 0 : index
      %355 = vector.load %arg14[%c48_211, %c0_212] : memref<72x256xf32, #tpu.memory_space<vmem>>, vector<8x256xf32>
      %356 = arith.mulf %354, %355 : vector<8x256xf32>
      %c240_i32_213 = arith.constant 240 : i32
      %357 = tpu.dynamic_rotate %338 by %c240_i32_213 dim 1 : vector<8x256xf32>, i32 -> vector<8x256xf32>
      %c56_214 = arith.constant 56 : index
      %c0_215 = arith.constant 0 : index
      %358 = vector.load %arg14[%c56_214, %c0_215] : memref<72x256xf32, #tpu.memory_space<vmem>>, vector<8x256xf32>
      %359 = arith.mulf %357, %358 : vector<8x256xf32>
      %c239_i32_216 = arith.constant 239 : i32
      %360 = tpu.dynamic_rotate %338 by %c239_i32_216 dim 1 : vector<8x256xf32>, i32 -> vector<8x256xf32>
      %c64_217 = arith.constant 64 : index
      %c0_218 = arith.constant 0 : index
      %361 = vector.load %arg14[%c64_217, %c0_218] : memref<72x256xf32, #tpu.memory_space<vmem>>, vector<8x256xf32>
      %362 = arith.mulf %360, %361 : vector<8x256xf32>
      %363 = tpu.concatenate %341, %344, %347, %350, %338, %353, %356, %359, %362 in 0 : vector<8x256xf32>, vector<8x256xf32>, vector<8x256xf32>, vector<8x256xf32>, vector<8x256xf32>, vector<8x256xf32>, vector<8x256xf32>, vector<8x256xf32>, vector<8x256xf32> -> vector<72x256xf32>
      %c0_219 = arith.constant 0 : index
      %c0_220 = arith.constant 0 : index
      %364 = vector.load %arg2[%c0_219, %c0_220] : memref<8x72xf32, #tpu.memory_space<vmem>>, vector<8x72xf32>
      %cst_221 = arith.constant dense<0.000000e+00> : vector<8x256xf32>
      %365 = tpu.matmul %364, %363, %cst_221 {dimension_numbers = #tpu.dot_dimension_numbers<[1], [0], [0], [1], [0, 0, 1, 1], [], []>} : vector<8x72xf32>, vector<72x256xf32>, vector<8x256xf32> -> vector<8x256xf32>
      %c0_222 = arith.constant 0 : index
      %c0_223 = arith.constant 0 : index
      %366 = vector.load %arg3[%c0_222, %c0_223] : memref<8x1xf32, #tpu.memory_space<vmem>>, vector<8x1xf32>
      %367 = vector.broadcast %366 : vector<8x1xf32> to vector<8x256xf32>
      %368 = arith.addf %365, %367 : vector<8x256xf32>
      %c0_224 = arith.constant 0 : index
      %c0_225 = arith.constant 0 : index
      %369 = vector.load %arg4[%c0_224, %c0_225] : memref<8x256xf32, #tpu.memory_space<vmem>>, vector<8x256xf32>
      %370 = vector.broadcast %308 : f32 to vector<8x256xf32>
      %371 = arith.mulf %370, %369 : vector<8x256xf32>
      %372 = arith.addf %368, %371 : vector<8x256xf32>
      %cst_226 = arith.constant dense<0.000000e+00> : vector<8xf32>
      %373 = vector.multi_reduction <add>, %372, %cst_226 [1] : vector<8x256xf32> to vector<8xf32>
      %374 = vector.shape_cast %373 : vector<8xf32> to vector<8x1xf32>
      %cst_227 = arith.constant 2.560000e+02 : f32
      %375 = vector.broadcast %cst_227 : f32 to vector<8x1xf32>
      %376 = arith.divf %374, %375 : vector<8x1xf32>
      %377 = arith.mulf %372, %372 : vector<8x256xf32>
      %cst_228 = arith.constant dense<0.000000e+00> : vector<8xf32>
      %378 = vector.multi_reduction <add>, %377, %cst_228 [1] : vector<8x256xf32> to vector<8xf32>
      %379 = vector.shape_cast %378 : vector<8xf32> to vector<8x1xf32>
      %cst_229 = arith.constant 2.560000e+02 : f32
      %380 = vector.broadcast %cst_229 : f32 to vector<8x1xf32>
      %381 = arith.divf %379, %380 : vector<8x1xf32>
      %382 = arith.mulf %376, %376 : vector<8x1xf32>
      %383 = arith.subf %381, %382 : vector<8x1xf32>
      %cst_230 = arith.constant 0.000000e+00 : f32
      %384 = vector.broadcast %cst_230 : f32 to vector<8x1xf32>
      %385 = arith.maximumf %383, %384 : vector<8x1xf32>
      %c0_231 = arith.constant 0 : index
      %c0_232 = arith.constant 0 : index
      %386 = vector.load %arg10[%c0_231, %c0_232] : memref<8x1xf32, #tpu.memory_space<vmem>>, vector<8x1xf32>
      %cst_233 = arith.constant 9.99999974E-6 : f32
      %387 = vector.broadcast %cst_233 : f32 to vector<8x1xf32>
      %388 = arith.addf %385, %387 : vector<8x1xf32>
      %389 = math.rsqrt %388 : vector<8x1xf32>
      %390 = arith.mulf %386, %389 : vector<8x1xf32>
      %c0_234 = arith.constant 0 : index
      %c0_235 = arith.constant 0 : index
      %391 = vector.load %arg11[%c0_234, %c0_235] : memref<8x1xf32, #tpu.memory_space<vmem>>, vector<8x1xf32>
      %392 = arith.mulf %376, %390 : vector<8x1xf32>
      %393 = arith.subf %391, %392 : vector<8x1xf32>
      %394 = vector.broadcast %390 : vector<8x1xf32> to vector<8x256xf32>
      %395 = arith.mulf %372, %394 : vector<8x256xf32>
      %396 = vector.broadcast %393 : vector<8x1xf32> to vector<8x256xf32>
      %397 = arith.addf %395, %396 : vector<8x256xf32>
      %cst_236 = arith.constant 0.000000e+00 : f32
      %398 = vector.broadcast %cst_236 : f32 to vector<8x256xf32>
      %399 = arith.maximumf %397, %398 : vector<8x256xf32>
      %c17_i32_237 = arith.constant 17 : i32
      %400 = tpu.dynamic_rotate %399 by %c17_i32_237 dim 1 : vector<8x256xf32>, i32 -> vector<8x256xf32>
      %c0_238 = arith.constant 0 : index
      %c0_239 = arith.constant 0 : index
      %401 = vector.load %arg14[%c0_238, %c0_239] : memref<72x256xf32, #tpu.memory_space<vmem>>, vector<8x256xf32>
      %402 = arith.mulf %400, %401 : vector<8x256xf32>
      %c16_i32_240 = arith.constant 16 : i32
      %403 = tpu.dynamic_rotate %399 by %c16_i32_240 dim 1 : vector<8x256xf32>, i32 -> vector<8x256xf32>
      %c8_241 = arith.constant 8 : index
      %c0_242 = arith.constant 0 : index
      %404 = vector.load %arg14[%c8_241, %c0_242] : memref<72x256xf32, #tpu.memory_space<vmem>>, vector<8x256xf32>
      %405 = arith.mulf %403, %404 : vector<8x256xf32>
      %c15_i32_243 = arith.constant 15 : i32
      %406 = tpu.dynamic_rotate %399 by %c15_i32_243 dim 1 : vector<8x256xf32>, i32 -> vector<8x256xf32>
      %c16_244 = arith.constant 16 : index
      %c0_245 = arith.constant 0 : index
      %407 = vector.load %arg14[%c16_244, %c0_245] : memref<72x256xf32, #tpu.memory_space<vmem>>, vector<8x256xf32>
      %408 = arith.mulf %406, %407 : vector<8x256xf32>
      %c1_i32_246 = arith.constant 1 : i32
      %409 = tpu.dynamic_rotate %399 by %c1_i32_246 dim 1 : vector<8x256xf32>, i32 -> vector<8x256xf32>
      %c24_247 = arith.constant 24 : index
      %c0_248 = arith.constant 0 : index
      %410 = vector.load %arg14[%c24_247, %c0_248] : memref<72x256xf32, #tpu.memory_space<vmem>>, vector<8x256xf32>
      %411 = arith.mulf %409, %410 : vector<8x256xf32>
      %c255_i32_249 = arith.constant 255 : i32
      %412 = tpu.dynamic_rotate %399 by %c255_i32_249 dim 1 : vector<8x256xf32>, i32 -> vector<8x256xf32>
      %c40_250 = arith.constant 40 : index
      %c0_251 = arith.constant 0 : index
      %413 = vector.load %arg14[%c40_250, %c0_251] : memref<72x256xf32, #tpu.memory_space<vmem>>, vector<8x256xf32>
      %414 = arith.mulf %412, %413 : vector<8x256xf32>
      %c241_i32_252 = arith.constant 241 : i32
      %415 = tpu.dynamic_rotate %399 by %c241_i32_252 dim 1 : vector<8x256xf32>, i32 -> vector<8x256xf32>
      %c48_253 = arith.constant 48 : index
      %c0_254 = arith.constant 0 : index
      %416 = vector.load %arg14[%c48_253, %c0_254] : memref<72x256xf32, #tpu.memory_space<vmem>>, vector<8x256xf32>
      %417 = arith.mulf %415, %416 : vector<8x256xf32>
      %c240_i32_255 = arith.constant 240 : i32
      %418 = tpu.dynamic_rotate %399 by %c240_i32_255 dim 1 : vector<8x256xf32>, i32 -> vector<8x256xf32>
      %c56_256 = arith.constant 56 : index
      %c0_257 = arith.constant 0 : index
      %419 = vector.load %arg14[%c56_256, %c0_257] : memref<72x256xf32, #tpu.memory_space<vmem>>, vector<8x256xf32>
      %420 = arith.mulf %418, %419 : vector<8x256xf32>
      %c239_i32_258 = arith.constant 239 : i32
      %421 = tpu.dynamic_rotate %399 by %c239_i32_258 dim 1 : vector<8x256xf32>, i32 -> vector<8x256xf32>
      %c64_259 = arith.constant 64 : index
      %c0_260 = arith.constant 0 : index
      %422 = vector.load %arg14[%c64_259, %c0_260] : memref<72x256xf32, #tpu.memory_space<vmem>>, vector<8x256xf32>
      %423 = arith.mulf %421, %422 : vector<8x256xf32>
      %424 = tpu.concatenate %402, %405, %408, %411, %399, %414, %417, %420, %423 in 0 : vector<8x256xf32>, vector<8x256xf32>, vector<8x256xf32>, vector<8x256xf32>, vector<8x256xf32>, vector<8x256xf32>, vector<8x256xf32>, vector<8x256xf32>, vector<8x256xf32> -> vector<72x256xf32>
      %c0_261 = arith.constant 0 : index
      %c0_262 = arith.constant 0 : index
      %425 = vector.load %arg5[%c0_261, %c0_262] : memref<8x72xf32, #tpu.memory_space<vmem>>, vector<8x72xf32>
      %cst_263 = arith.constant dense<0.000000e+00> : vector<8x256xf32>
      %426 = tpu.matmul %425, %424, %cst_263 {dimension_numbers = #tpu.dot_dimension_numbers<[1], [0], [0], [1], [0, 0, 1, 1], [], []>} : vector<8x72xf32>, vector<72x256xf32>, vector<8x256xf32> -> vector<8x256xf32>
      %c0_264 = arith.constant 0 : index
      %c0_265 = arith.constant 0 : index
      %427 = vector.load %arg6[%c0_264, %c0_265] : memref<8x1xf32, #tpu.memory_space<vmem>>, vector<8x1xf32>
      %428 = vector.broadcast %427 : vector<8x1xf32> to vector<8x256xf32>
      %429 = arith.addf %426, %428 : vector<8x256xf32>
      %c0_266 = arith.constant 0 : index
      %c0_267 = arith.constant 0 : index
      %430 = vector.load %arg7[%c0_266, %c0_267] : memref<8x256xf32, #tpu.memory_space<vmem>>, vector<8x256xf32>
      %431 = vector.broadcast %308 : f32 to vector<8x256xf32>
      %432 = arith.mulf %431, %430 : vector<8x256xf32>
      %433 = arith.addf %429, %432 : vector<8x256xf32>
      %cst_268 = arith.constant dense<0.000000e+00> : vector<8xf32>
      %434 = vector.multi_reduction <add>, %433, %cst_268 [1] : vector<8x256xf32> to vector<8xf32>
      %435 = vector.shape_cast %434 : vector<8xf32> to vector<8x1xf32>
      %cst_269 = arith.constant 2.560000e+02 : f32
      %436 = vector.broadcast %cst_269 : f32 to vector<8x1xf32>
      %437 = arith.divf %435, %436 : vector<8x1xf32>
      %438 = arith.mulf %433, %433 : vector<8x256xf32>
      %cst_270 = arith.constant dense<0.000000e+00> : vector<8xf32>
      %439 = vector.multi_reduction <add>, %438, %cst_270 [1] : vector<8x256xf32> to vector<8xf32>
      %440 = vector.shape_cast %439 : vector<8xf32> to vector<8x1xf32>
      %cst_271 = arith.constant 2.560000e+02 : f32
      %441 = vector.broadcast %cst_271 : f32 to vector<8x1xf32>
      %442 = arith.divf %440, %441 : vector<8x1xf32>
      %443 = arith.mulf %437, %437 : vector<8x1xf32>
      %444 = arith.subf %442, %443 : vector<8x1xf32>
      %cst_272 = arith.constant 0.000000e+00 : f32
      %445 = vector.broadcast %cst_272 : f32 to vector<8x1xf32>
      %446 = arith.maximumf %444, %445 : vector<8x1xf32>
      %c0_273 = arith.constant 0 : index
      %c0_274 = arith.constant 0 : index
      %447 = vector.load %arg12[%c0_273, %c0_274] : memref<8x1xf32, #tpu.memory_space<vmem>>, vector<8x1xf32>
      %cst_275 = arith.constant 9.99999974E-6 : f32
      %448 = vector.broadcast %cst_275 : f32 to vector<8x1xf32>
      %449 = arith.addf %446, %448 : vector<8x1xf32>
      %450 = math.rsqrt %449 : vector<8x1xf32>
      %451 = arith.mulf %447, %450 : vector<8x1xf32>
      %c0_276 = arith.constant 0 : index
      %c0_277 = arith.constant 0 : index
      %452 = vector.load %arg13[%c0_276, %c0_277] : memref<8x1xf32, #tpu.memory_space<vmem>>, vector<8x1xf32>
      %453 = arith.mulf %437, %451 : vector<8x1xf32>
      %454 = arith.subf %452, %453 : vector<8x1xf32>
      %455 = vector.broadcast %451 : vector<8x1xf32> to vector<8x256xf32>
      %456 = arith.mulf %433, %455 : vector<8x256xf32>
      %457 = vector.broadcast %454 : vector<8x1xf32> to vector<8x256xf32>
      %458 = arith.addf %456, %457 : vector<8x256xf32>
      %cst_278 = arith.constant 1.250000e-01 : f32
      %459 = arith.addf %9, %cst_278 : f32
      %cst_279 = arith.constant 1.250000e-01 : f32
      %460 = vector.broadcast %cst_279 : f32 to vector<8x256xf32>
      %461 = arith.mulf %460, %458 : vector<8x256xf32>
      %462 = arith.addf %arg17, %461 : vector<8x256xf32>
      %cst_280 = arith.constant dense<0.000000e+00> : vector<8xf32>
      %463 = vector.multi_reduction <add>, %462, %cst_280 [1] : vector<8x256xf32> to vector<8xf32>
      %464 = vector.shape_cast %463 : vector<8xf32> to vector<8x1xf32>
      %cst_281 = arith.constant 2.560000e+02 : f32
      %465 = vector.broadcast %cst_281 : f32 to vector<8x1xf32>
      %466 = arith.divf %464, %465 : vector<8x1xf32>
      %467 = arith.mulf %462, %462 : vector<8x256xf32>
      %cst_282 = arith.constant dense<0.000000e+00> : vector<8xf32>
      %468 = vector.multi_reduction <add>, %467, %cst_282 [1] : vector<8x256xf32> to vector<8xf32>
      %469 = vector.shape_cast %468 : vector<8xf32> to vector<8x1xf32>
      %cst_283 = arith.constant 2.560000e+02 : f32
      %470 = vector.broadcast %cst_283 : f32 to vector<8x1xf32>
      %471 = arith.divf %469, %470 : vector<8x1xf32>
      %472 = arith.mulf %466, %466 : vector<8x1xf32>
      %473 = arith.subf %471, %472 : vector<8x1xf32>
      %cst_284 = arith.constant 0.000000e+00 : f32
      %474 = vector.broadcast %cst_284 : f32 to vector<8x1xf32>
      %475 = arith.maximumf %473, %474 : vector<8x1xf32>
      %c0_285 = arith.constant 0 : index
      %c0_286 = arith.constant 0 : index
      %476 = vector.load %arg8[%c0_285, %c0_286] : memref<8x1xf32, #tpu.memory_space<vmem>>, vector<8x1xf32>
      %cst_287 = arith.constant 9.99999974E-6 : f32
      %477 = vector.broadcast %cst_287 : f32 to vector<8x1xf32>
      %478 = arith.addf %475, %477 : vector<8x1xf32>
      %479 = math.rsqrt %478 : vector<8x1xf32>
      %480 = arith.mulf %476, %479 : vector<8x1xf32>
      %c0_288 = arith.constant 0 : index
      %c0_289 = arith.constant 0 : index
      %481 = vector.load %arg9[%c0_288, %c0_289] : memref<8x1xf32, #tpu.memory_space<vmem>>, vector<8x1xf32>
      %482 = arith.mulf %466, %480 : vector<8x1xf32>
      %483 = arith.subf %481, %482 : vector<8x1xf32>
      %484 = vector.broadcast %480 : vector<8x1xf32> to vector<8x256xf32>
      %485 = arith.mulf %462, %484 : vector<8x256xf32>
      %486 = vector.broadcast %483 : vector<8x1xf32> to vector<8x256xf32>
      %487 = arith.addf %485, %486 : vector<8x256xf32>
      %cst_290 = arith.constant 0.000000e+00 : f32
      %488 = vector.broadcast %cst_290 : f32 to vector<8x256xf32>
      %489 = arith.maximumf %487, %488 : vector<8x256xf32>
      %c17_i32_291 = arith.constant 17 : i32
      %490 = tpu.dynamic_rotate %489 by %c17_i32_291 dim 1 : vector<8x256xf32>, i32 -> vector<8x256xf32>
      %c0_292 = arith.constant 0 : index
      %c0_293 = arith.constant 0 : index
      %491 = vector.load %arg14[%c0_292, %c0_293] : memref<72x256xf32, #tpu.memory_space<vmem>>, vector<8x256xf32>
      %492 = arith.mulf %490, %491 : vector<8x256xf32>
      %c16_i32_294 = arith.constant 16 : i32
      %493 = tpu.dynamic_rotate %489 by %c16_i32_294 dim 1 : vector<8x256xf32>, i32 -> vector<8x256xf32>
      %c8_295 = arith.constant 8 : index
      %c0_296 = arith.constant 0 : index
      %494 = vector.load %arg14[%c8_295, %c0_296] : memref<72x256xf32, #tpu.memory_space<vmem>>, vector<8x256xf32>
      %495 = arith.mulf %493, %494 : vector<8x256xf32>
      %c15_i32_297 = arith.constant 15 : i32
      %496 = tpu.dynamic_rotate %489 by %c15_i32_297 dim 1 : vector<8x256xf32>, i32 -> vector<8x256xf32>
      %c16_298 = arith.constant 16 : index
      %c0_299 = arith.constant 0 : index
      %497 = vector.load %arg14[%c16_298, %c0_299] : memref<72x256xf32, #tpu.memory_space<vmem>>, vector<8x256xf32>
      %498 = arith.mulf %496, %497 : vector<8x256xf32>
      %c1_i32_300 = arith.constant 1 : i32
      %499 = tpu.dynamic_rotate %489 by %c1_i32_300 dim 1 : vector<8x256xf32>, i32 -> vector<8x256xf32>
      %c24_301 = arith.constant 24 : index
      %c0_302 = arith.constant 0 : index
      %500 = vector.load %arg14[%c24_301, %c0_302] : memref<72x256xf32, #tpu.memory_space<vmem>>, vector<8x256xf32>
      %501 = arith.mulf %499, %500 : vector<8x256xf32>
      %c255_i32_303 = arith.constant 255 : i32
      %502 = tpu.dynamic_rotate %489 by %c255_i32_303 dim 1 : vector<8x256xf32>, i32 -> vector<8x256xf32>
      %c40_304 = arith.constant 40 : index
      %c0_305 = arith.constant 0 : index
      %503 = vector.load %arg14[%c40_304, %c0_305] : memref<72x256xf32, #tpu.memory_space<vmem>>, vector<8x256xf32>
      %504 = arith.mulf %502, %503 : vector<8x256xf32>
      %c241_i32_306 = arith.constant 241 : i32
      %505 = tpu.dynamic_rotate %489 by %c241_i32_306 dim 1 : vector<8x256xf32>, i32 -> vector<8x256xf32>
      %c48_307 = arith.constant 48 : index
      %c0_308 = arith.constant 0 : index
      %506 = vector.load %arg14[%c48_307, %c0_308] : memref<72x256xf32, #tpu.memory_space<vmem>>, vector<8x256xf32>
      %507 = arith.mulf %505, %506 : vector<8x256xf32>
      %c240_i32_309 = arith.constant 240 : i32
      %508 = tpu.dynamic_rotate %489 by %c240_i32_309 dim 1 : vector<8x256xf32>, i32 -> vector<8x256xf32>
      %c56_310 = arith.constant 56 : index
      %c0_311 = arith.constant 0 : index
      %509 = vector.load %arg14[%c56_310, %c0_311] : memref<72x256xf32, #tpu.memory_space<vmem>>, vector<8x256xf32>
      %510 = arith.mulf %508, %509 : vector<8x256xf32>
      %c239_i32_312 = arith.constant 239 : i32
      %511 = tpu.dynamic_rotate %489 by %c239_i32_312 dim 1 : vector<8x256xf32>, i32 -> vector<8x256xf32>
      %c64_313 = arith.constant 64 : index
      %c0_314 = arith.constant 0 : index
      %512 = vector.load %arg14[%c64_313, %c0_314] : memref<72x256xf32, #tpu.memory_space<vmem>>, vector<8x256xf32>
      %513 = arith.mulf %511, %512 : vector<8x256xf32>
      %514 = tpu.concatenate %492, %495, %498, %501, %489, %504, %507, %510, %513 in 0 : vector<8x256xf32>, vector<8x256xf32>, vector<8x256xf32>, vector<8x256xf32>, vector<8x256xf32>, vector<8x256xf32>, vector<8x256xf32>, vector<8x256xf32>, vector<8x256xf32> -> vector<72x256xf32>
      %c0_315 = arith.constant 0 : index
      %c0_316 = arith.constant 0 : index
      %515 = vector.load %arg2[%c0_315, %c0_316] : memref<8x72xf32, #tpu.memory_space<vmem>>, vector<8x72xf32>
      %cst_317 = arith.constant dense<0.000000e+00> : vector<8x256xf32>
      %516 = tpu.matmul %515, %514, %cst_317 {dimension_numbers = #tpu.dot_dimension_numbers<[1], [0], [0], [1], [0, 0, 1, 1], [], []>} : vector<8x72xf32>, vector<72x256xf32>, vector<8x256xf32> -> vector<8x256xf32>
      %c0_318 = arith.constant 0 : index
      %c0_319 = arith.constant 0 : index
      %517 = vector.load %arg3[%c0_318, %c0_319] : memref<8x1xf32, #tpu.memory_space<vmem>>, vector<8x1xf32>
      %518 = vector.broadcast %517 : vector<8x1xf32> to vector<8x256xf32>
      %519 = arith.addf %516, %518 : vector<8x256xf32>
      %c0_320 = arith.constant 0 : index
      %c0_321 = arith.constant 0 : index
      %520 = vector.load %arg4[%c0_320, %c0_321] : memref<8x256xf32, #tpu.memory_space<vmem>>, vector<8x256xf32>
      %521 = vector.broadcast %459 : f32 to vector<8x256xf32>
      %522 = arith.mulf %521, %520 : vector<8x256xf32>
      %523 = arith.addf %519, %522 : vector<8x256xf32>
      %cst_322 = arith.constant dense<0.000000e+00> : vector<8xf32>
      %524 = vector.multi_reduction <add>, %523, %cst_322 [1] : vector<8x256xf32> to vector<8xf32>
      %525 = vector.shape_cast %524 : vector<8xf32> to vector<8x1xf32>
      %cst_323 = arith.constant 2.560000e+02 : f32
      %526 = vector.broadcast %cst_323 : f32 to vector<8x1xf32>
      %527 = arith.divf %525, %526 : vector<8x1xf32>
      %528 = arith.mulf %523, %523 : vector<8x256xf32>
      %cst_324 = arith.constant dense<0.000000e+00> : vector<8xf32>
      %529 = vector.multi_reduction <add>, %528, %cst_324 [1] : vector<8x256xf32> to vector<8xf32>
      %530 = vector.shape_cast %529 : vector<8xf32> to vector<8x1xf32>
      %cst_325 = arith.constant 2.560000e+02 : f32
      %531 = vector.broadcast %cst_325 : f32 to vector<8x1xf32>
      %532 = arith.divf %530, %531 : vector<8x1xf32>
      %533 = arith.mulf %527, %527 : vector<8x1xf32>
      %534 = arith.subf %532, %533 : vector<8x1xf32>
      %cst_326 = arith.constant 0.000000e+00 : f32
      %535 = vector.broadcast %cst_326 : f32 to vector<8x1xf32>
      %536 = arith.maximumf %534, %535 : vector<8x1xf32>
      %c0_327 = arith.constant 0 : index
      %c0_328 = arith.constant 0 : index
      %537 = vector.load %arg10[%c0_327, %c0_328] : memref<8x1xf32, #tpu.memory_space<vmem>>, vector<8x1xf32>
      %cst_329 = arith.constant 9.99999974E-6 : f32
      %538 = vector.broadcast %cst_329 : f32 to vector<8x1xf32>
      %539 = arith.addf %536, %538 : vector<8x1xf32>
      %540 = math.rsqrt %539 : vector<8x1xf32>
      %541 = arith.mulf %537, %540 : vector<8x1xf32>
      %c0_330 = arith.constant 0 : index
      %c0_331 = arith.constant 0 : index
      %542 = vector.load %arg11[%c0_330, %c0_331] : memref<8x1xf32, #tpu.memory_space<vmem>>, vector<8x1xf32>
      %543 = arith.mulf %527, %541 : vector<8x1xf32>
      %544 = arith.subf %542, %543 : vector<8x1xf32>
      %545 = vector.broadcast %541 : vector<8x1xf32> to vector<8x256xf32>
      %546 = arith.mulf %523, %545 : vector<8x256xf32>
      %547 = vector.broadcast %544 : vector<8x1xf32> to vector<8x256xf32>
      %548 = arith.addf %546, %547 : vector<8x256xf32>
      %cst_332 = arith.constant 0.000000e+00 : f32
      %549 = vector.broadcast %cst_332 : f32 to vector<8x256xf32>
      %550 = arith.maximumf %548, %549 : vector<8x256xf32>
      %c17_i32_333 = arith.constant 17 : i32
      %551 = tpu.dynamic_rotate %550 by %c17_i32_333 dim 1 : vector<8x256xf32>, i32 -> vector<8x256xf32>
      %c0_334 = arith.constant 0 : index
      %c0_335 = arith.constant 0 : index
      %552 = vector.load %arg14[%c0_334, %c0_335] : memref<72x256xf32, #tpu.memory_space<vmem>>, vector<8x256xf32>
      %553 = arith.mulf %551, %552 : vector<8x256xf32>
      %c16_i32_336 = arith.constant 16 : i32
      %554 = tpu.dynamic_rotate %550 by %c16_i32_336 dim 1 : vector<8x256xf32>, i32 -> vector<8x256xf32>
      %c8_337 = arith.constant 8 : index
      %c0_338 = arith.constant 0 : index
      %555 = vector.load %arg14[%c8_337, %c0_338] : memref<72x256xf32, #tpu.memory_space<vmem>>, vector<8x256xf32>
      %556 = arith.mulf %554, %555 : vector<8x256xf32>
      %c15_i32_339 = arith.constant 15 : i32
      %557 = tpu.dynamic_rotate %550 by %c15_i32_339 dim 1 : vector<8x256xf32>, i32 -> vector<8x256xf32>
      %c16_340 = arith.constant 16 : index
      %c0_341 = arith.constant 0 : index
      %558 = vector.load %arg14[%c16_340, %c0_341] : memref<72x256xf32, #tpu.memory_space<vmem>>, vector<8x256xf32>
      %559 = arith.mulf %557, %558 : vector<8x256xf32>
      %c1_i32_342 = arith.constant 1 : i32
      %560 = tpu.dynamic_rotate %550 by %c1_i32_342 dim 1 : vector<8x256xf32>, i32 -> vector<8x256xf32>
      %c24_343 = arith.constant 24 : index
      %c0_344 = arith.constant 0 : index
      %561 = vector.load %arg14[%c24_343, %c0_344] : memref<72x256xf32, #tpu.memory_space<vmem>>, vector<8x256xf32>
      %562 = arith.mulf %560, %561 : vector<8x256xf32>
      %c255_i32_345 = arith.constant 255 : i32
      %563 = tpu.dynamic_rotate %550 by %c255_i32_345 dim 1 : vector<8x256xf32>, i32 -> vector<8x256xf32>
      %c40_346 = arith.constant 40 : index
      %c0_347 = arith.constant 0 : index
      %564 = vector.load %arg14[%c40_346, %c0_347] : memref<72x256xf32, #tpu.memory_space<vmem>>, vector<8x256xf32>
      %565 = arith.mulf %563, %564 : vector<8x256xf32>
      %c241_i32_348 = arith.constant 241 : i32
      %566 = tpu.dynamic_rotate %550 by %c241_i32_348 dim 1 : vector<8x256xf32>, i32 -> vector<8x256xf32>
      %c48_349 = arith.constant 48 : index
      %c0_350 = arith.constant 0 : index
      %567 = vector.load %arg14[%c48_349, %c0_350] : memref<72x256xf32, #tpu.memory_space<vmem>>, vector<8x256xf32>
      %568 = arith.mulf %566, %567 : vector<8x256xf32>
      %c240_i32_351 = arith.constant 240 : i32
      %569 = tpu.dynamic_rotate %550 by %c240_i32_351 dim 1 : vector<8x256xf32>, i32 -> vector<8x256xf32>
      %c56_352 = arith.constant 56 : index
      %c0_353 = arith.constant 0 : index
      %570 = vector.load %arg14[%c56_352, %c0_353] : memref<72x256xf32, #tpu.memory_space<vmem>>, vector<8x256xf32>
      %571 = arith.mulf %569, %570 : vector<8x256xf32>
      %c239_i32_354 = arith.constant 239 : i32
      %572 = tpu.dynamic_rotate %550 by %c239_i32_354 dim 1 : vector<8x256xf32>, i32 -> vector<8x256xf32>
      %c64_355 = arith.constant 64 : index
      %c0_356 = arith.constant 0 : index
      %573 = vector.load %arg14[%c64_355, %c0_356] : memref<72x256xf32, #tpu.memory_space<vmem>>, vector<8x256xf32>
      %574 = arith.mulf %572, %573 : vector<8x256xf32>
      %575 = tpu.concatenate %553, %556, %559, %562, %550, %565, %568, %571, %574 in 0 : vector<8x256xf32>, vector<8x256xf32>, vector<8x256xf32>, vector<8x256xf32>, vector<8x256xf32>, vector<8x256xf32>, vector<8x256xf32>, vector<8x256xf32>, vector<8x256xf32> -> vector<72x256xf32>
      %c0_357 = arith.constant 0 : index
      %c0_358 = arith.constant 0 : index
      %576 = vector.load %arg5[%c0_357, %c0_358] : memref<8x72xf32, #tpu.memory_space<vmem>>, vector<8x72xf32>
      %cst_359 = arith.constant dense<0.000000e+00> : vector<8x256xf32>
      %577 = tpu.matmul %576, %575, %cst_359 {dimension_numbers = #tpu.dot_dimension_numbers<[1], [0], [0], [1], [0, 0, 1, 1], [], []>} : vector<8x72xf32>, vector<72x256xf32>, vector<8x256xf32> -> vector<8x256xf32>
      %c0_360 = arith.constant 0 : index
      %c0_361 = arith.constant 0 : index
      %578 = vector.load %arg6[%c0_360, %c0_361] : memref<8x1xf32, #tpu.memory_space<vmem>>, vector<8x1xf32>
      %579 = vector.broadcast %578 : vector<8x1xf32> to vector<8x256xf32>
      %580 = arith.addf %577, %579 : vector<8x256xf32>
      %c0_362 = arith.constant 0 : index
      %c0_363 = arith.constant 0 : index
      %581 = vector.load %arg7[%c0_362, %c0_363] : memref<8x256xf32, #tpu.memory_space<vmem>>, vector<8x256xf32>
      %582 = vector.broadcast %459 : f32 to vector<8x256xf32>
      %583 = arith.mulf %582, %581 : vector<8x256xf32>
      %584 = arith.addf %580, %583 : vector<8x256xf32>
      %cst_364 = arith.constant dense<0.000000e+00> : vector<8xf32>
      %585 = vector.multi_reduction <add>, %584, %cst_364 [1] : vector<8x256xf32> to vector<8xf32>
      %586 = vector.shape_cast %585 : vector<8xf32> to vector<8x1xf32>
      %cst_365 = arith.constant 2.560000e+02 : f32
      %587 = vector.broadcast %cst_365 : f32 to vector<8x1xf32>
      %588 = arith.divf %586, %587 : vector<8x1xf32>
      %589 = arith.mulf %584, %584 : vector<8x256xf32>
      %cst_366 = arith.constant dense<0.000000e+00> : vector<8xf32>
      %590 = vector.multi_reduction <add>, %589, %cst_366 [1] : vector<8x256xf32> to vector<8xf32>
      %591 = vector.shape_cast %590 : vector<8xf32> to vector<8x1xf32>
      %cst_367 = arith.constant 2.560000e+02 : f32
      %592 = vector.broadcast %cst_367 : f32 to vector<8x1xf32>
      %593 = arith.divf %591, %592 : vector<8x1xf32>
      %594 = arith.mulf %588, %588 : vector<8x1xf32>
      %595 = arith.subf %593, %594 : vector<8x1xf32>
      %cst_368 = arith.constant 0.000000e+00 : f32
      %596 = vector.broadcast %cst_368 : f32 to vector<8x1xf32>
      %597 = arith.maximumf %595, %596 : vector<8x1xf32>
      %c0_369 = arith.constant 0 : index
      %c0_370 = arith.constant 0 : index
      %598 = vector.load %arg12[%c0_369, %c0_370] : memref<8x1xf32, #tpu.memory_space<vmem>>, vector<8x1xf32>
      %cst_371 = arith.constant 9.99999974E-6 : f32
      %599 = vector.broadcast %cst_371 : f32 to vector<8x1xf32>
      %600 = arith.addf %597, %599 : vector<8x1xf32>
      %601 = math.rsqrt %600 : vector<8x1xf32>
      %602 = arith.mulf %598, %601 : vector<8x1xf32>
      %c0_372 = arith.constant 0 : index
      %c0_373 = arith.constant 0 : index
      %603 = vector.load %arg13[%c0_372, %c0_373] : memref<8x1xf32, #tpu.memory_space<vmem>>, vector<8x1xf32>
      %604 = arith.mulf %588, %602 : vector<8x1xf32>
      %605 = arith.subf %603, %604 : vector<8x1xf32>
      %606 = vector.broadcast %602 : vector<8x1xf32> to vector<8x256xf32>
      %607 = arith.mulf %584, %606 : vector<8x256xf32>
      %608 = vector.broadcast %605 : vector<8x1xf32> to vector<8x256xf32>
      %609 = arith.addf %607, %608 : vector<8x256xf32>
      %cst_374 = arith.constant 2.000000e+00 : f32
      %610 = vector.broadcast %cst_374 : f32 to vector<8x256xf32>
      %611 = arith.mulf %610, %307 : vector<8x256xf32>
      %612 = arith.addf %156, %611 : vector<8x256xf32>
      %cst_375 = arith.constant 2.000000e+00 : f32
      %613 = vector.broadcast %cst_375 : f32 to vector<8x256xf32>
      %614 = arith.mulf %613, %458 : vector<8x256xf32>
      %615 = arith.addf %612, %614 : vector<8x256xf32>
      %616 = arith.addf %615, %609 : vector<8x256xf32>
      %cst_376 = arith.constant 0.020833334 : f32
      %617 = vector.broadcast %cst_376 : f32 to vector<8x256xf32>
      %618 = arith.mulf %617, %616 : vector<8x256xf32>
      %619 = arith.addf %arg17, %618 : vector<8x256xf32>
      %c2_i32_377 = arith.constant 2 : i32
      %620 = arith.muli %c2_i32_377, %arg16 : i32
      %c1_i32_378 = arith.constant 1 : i32
      %621 = arith.addi %620, %c1_i32_378 : i32
      %622 = arith.sitofp %621 : i32 to f32
      %cst_379 = arith.constant 1.250000e-01 : f32
      %623 = arith.mulf %622, %cst_379 : f32
      %cst_380 = arith.constant dense<0.000000e+00> : vector<8xf32>
      %624 = vector.multi_reduction <add>, %619, %cst_380 [1] : vector<8x256xf32> to vector<8xf32>
      %625 = vector.shape_cast %624 : vector<8xf32> to vector<8x1xf32>
      %cst_381 = arith.constant 2.560000e+02 : f32
      %626 = vector.broadcast %cst_381 : f32 to vector<8x1xf32>
      %627 = arith.divf %625, %626 : vector<8x1xf32>
      %628 = arith.mulf %619, %619 : vector<8x256xf32>
      %cst_382 = arith.constant dense<0.000000e+00> : vector<8xf32>
      %629 = vector.multi_reduction <add>, %628, %cst_382 [1] : vector<8x256xf32> to vector<8xf32>
      %630 = vector.shape_cast %629 : vector<8xf32> to vector<8x1xf32>
      %cst_383 = arith.constant 2.560000e+02 : f32
      %631 = vector.broadcast %cst_383 : f32 to vector<8x1xf32>
      %632 = arith.divf %630, %631 : vector<8x1xf32>
      %633 = arith.mulf %627, %627 : vector<8x1xf32>
      %634 = arith.subf %632, %633 : vector<8x1xf32>
      %cst_384 = arith.constant 0.000000e+00 : f32
      %635 = vector.broadcast %cst_384 : f32 to vector<8x1xf32>
      %636 = arith.maximumf %634, %635 : vector<8x1xf32>
      %c0_385 = arith.constant 0 : index
      %c0_386 = arith.constant 0 : index
      %637 = vector.load %arg8[%c0_385, %c0_386] : memref<8x1xf32, #tpu.memory_space<vmem>>, vector<8x1xf32>
      %cst_387 = arith.constant 9.99999974E-6 : f32
      %638 = vector.broadcast %cst_387 : f32 to vector<8x1xf32>
      %639 = arith.addf %636, %638 : vector<8x1xf32>
      %640 = math.rsqrt %639 : vector<8x1xf32>
      %641 = arith.mulf %637, %640 : vector<8x1xf32>
      %c0_388 = arith.constant 0 : index
      %c0_389 = arith.constant 0 : index
      %642 = vector.load %arg9[%c0_388, %c0_389] : memref<8x1xf32, #tpu.memory_space<vmem>>, vector<8x1xf32>
      %643 = arith.mulf %627, %641 : vector<8x1xf32>
      %644 = arith.subf %642, %643 : vector<8x1xf32>
      %645 = vector.broadcast %641 : vector<8x1xf32> to vector<8x256xf32>
      %646 = arith.mulf %619, %645 : vector<8x256xf32>
      %647 = vector.broadcast %644 : vector<8x1xf32> to vector<8x256xf32>
      %648 = arith.addf %646, %647 : vector<8x256xf32>
      %cst_390 = arith.constant 0.000000e+00 : f32
      %649 = vector.broadcast %cst_390 : f32 to vector<8x256xf32>
      %650 = arith.maximumf %648, %649 : vector<8x256xf32>
      %c17_i32_391 = arith.constant 17 : i32
      %651 = tpu.dynamic_rotate %650 by %c17_i32_391 dim 1 : vector<8x256xf32>, i32 -> vector<8x256xf32>
      %c0_392 = arith.constant 0 : index
      %c0_393 = arith.constant 0 : index
      %652 = vector.load %arg14[%c0_392, %c0_393] : memref<72x256xf32, #tpu.memory_space<vmem>>, vector<8x256xf32>
      %653 = arith.mulf %651, %652 : vector<8x256xf32>
      %c16_i32_394 = arith.constant 16 : i32
      %654 = tpu.dynamic_rotate %650 by %c16_i32_394 dim 1 : vector<8x256xf32>, i32 -> vector<8x256xf32>
      %c8_395 = arith.constant 8 : index
      %c0_396 = arith.constant 0 : index
      %655 = vector.load %arg14[%c8_395, %c0_396] : memref<72x256xf32, #tpu.memory_space<vmem>>, vector<8x256xf32>
      %656 = arith.mulf %654, %655 : vector<8x256xf32>
      %c15_i32_397 = arith.constant 15 : i32
      %657 = tpu.dynamic_rotate %650 by %c15_i32_397 dim 1 : vector<8x256xf32>, i32 -> vector<8x256xf32>
      %c16_398 = arith.constant 16 : index
      %c0_399 = arith.constant 0 : index
      %658 = vector.load %arg14[%c16_398, %c0_399] : memref<72x256xf32, #tpu.memory_space<vmem>>, vector<8x256xf32>
      %659 = arith.mulf %657, %658 : vector<8x256xf32>
      %c1_i32_400 = arith.constant 1 : i32
      %660 = tpu.dynamic_rotate %650 by %c1_i32_400 dim 1 : vector<8x256xf32>, i32 -> vector<8x256xf32>
      %c24_401 = arith.constant 24 : index
      %c0_402 = arith.constant 0 : index
      %661 = vector.load %arg14[%c24_401, %c0_402] : memref<72x256xf32, #tpu.memory_space<vmem>>, vector<8x256xf32>
      %662 = arith.mulf %660, %661 : vector<8x256xf32>
      %c255_i32_403 = arith.constant 255 : i32
      %663 = tpu.dynamic_rotate %650 by %c255_i32_403 dim 1 : vector<8x256xf32>, i32 -> vector<8x256xf32>
      %c40_404 = arith.constant 40 : index
      %c0_405 = arith.constant 0 : index
      %664 = vector.load %arg14[%c40_404, %c0_405] : memref<72x256xf32, #tpu.memory_space<vmem>>, vector<8x256xf32>
      %665 = arith.mulf %663, %664 : vector<8x256xf32>
      %c241_i32_406 = arith.constant 241 : i32
      %666 = tpu.dynamic_rotate %650 by %c241_i32_406 dim 1 : vector<8x256xf32>, i32 -> vector<8x256xf32>
      %c48_407 = arith.constant 48 : index
      %c0_408 = arith.constant 0 : index
      %667 = vector.load %arg14[%c48_407, %c0_408] : memref<72x256xf32, #tpu.memory_space<vmem>>, vector<8x256xf32>
      %668 = arith.mulf %666, %667 : vector<8x256xf32>
      %c240_i32_409 = arith.constant 240 : i32
      %669 = tpu.dynamic_rotate %650 by %c240_i32_409 dim 1 : vector<8x256xf32>, i32 -> vector<8x256xf32>
      %c56_410 = arith.constant 56 : index
      %c0_411 = arith.constant 0 : index
      %670 = vector.load %arg14[%c56_410, %c0_411] : memref<72x256xf32, #tpu.memory_space<vmem>>, vector<8x256xf32>
      %671 = arith.mulf %669, %670 : vector<8x256xf32>
      %c239_i32_412 = arith.constant 239 : i32
      %672 = tpu.dynamic_rotate %650 by %c239_i32_412 dim 1 : vector<8x256xf32>, i32 -> vector<8x256xf32>
      %c64_413 = arith.constant 64 : index
      %c0_414 = arith.constant 0 : index
      %673 = vector.load %arg14[%c64_413, %c0_414] : memref<72x256xf32, #tpu.memory_space<vmem>>, vector<8x256xf32>
      %674 = arith.mulf %672, %673 : vector<8x256xf32>
      %675 = tpu.concatenate %653, %656, %659, %662, %650, %665, %668, %671, %674 in 0 : vector<8x256xf32>, vector<8x256xf32>, vector<8x256xf32>, vector<8x256xf32>, vector<8x256xf32>, vector<8x256xf32>, vector<8x256xf32>, vector<8x256xf32>, vector<8x256xf32> -> vector<72x256xf32>
      %c0_415 = arith.constant 0 : index
      %c0_416 = arith.constant 0 : index
      %676 = vector.load %arg2[%c0_415, %c0_416] : memref<8x72xf32, #tpu.memory_space<vmem>>, vector<8x72xf32>
      %cst_417 = arith.constant dense<0.000000e+00> : vector<8x256xf32>
      %677 = tpu.matmul %676, %675, %cst_417 {dimension_numbers = #tpu.dot_dimension_numbers<[1], [0], [0], [1], [0, 0, 1, 1], [], []>} : vector<8x72xf32>, vector<72x256xf32>, vector<8x256xf32> -> vector<8x256xf32>
      %c0_418 = arith.constant 0 : index
      %c0_419 = arith.constant 0 : index
      %678 = vector.load %arg3[%c0_418, %c0_419] : memref<8x1xf32, #tpu.memory_space<vmem>>, vector<8x1xf32>
      %679 = vector.broadcast %678 : vector<8x1xf32> to vector<8x256xf32>
      %680 = arith.addf %677, %679 : vector<8x256xf32>
      %c0_420 = arith.constant 0 : index
      %c0_421 = arith.constant 0 : index
      %681 = vector.load %arg4[%c0_420, %c0_421] : memref<8x256xf32, #tpu.memory_space<vmem>>, vector<8x256xf32>
      %682 = vector.broadcast %623 : f32 to vector<8x256xf32>
      %683 = arith.mulf %682, %681 : vector<8x256xf32>
      %684 = arith.addf %680, %683 : vector<8x256xf32>
      %cst_422 = arith.constant dense<0.000000e+00> : vector<8xf32>
      %685 = vector.multi_reduction <add>, %684, %cst_422 [1] : vector<8x256xf32> to vector<8xf32>
      %686 = vector.shape_cast %685 : vector<8xf32> to vector<8x1xf32>
      %cst_423 = arith.constant 2.560000e+02 : f32
      %687 = vector.broadcast %cst_423 : f32 to vector<8x1xf32>
      %688 = arith.divf %686, %687 : vector<8x1xf32>
      %689 = arith.mulf %684, %684 : vector<8x256xf32>
      %cst_424 = arith.constant dense<0.000000e+00> : vector<8xf32>
      %690 = vector.multi_reduction <add>, %689, %cst_424 [1] : vector<8x256xf32> to vector<8xf32>
      %691 = vector.shape_cast %690 : vector<8xf32> to vector<8x1xf32>
      %cst_425 = arith.constant 2.560000e+02 : f32
      %692 = vector.broadcast %cst_425 : f32 to vector<8x1xf32>
      %693 = arith.divf %691, %692 : vector<8x1xf32>
      %694 = arith.mulf %688, %688 : vector<8x1xf32>
      %695 = arith.subf %693, %694 : vector<8x1xf32>
      %cst_426 = arith.constant 0.000000e+00 : f32
      %696 = vector.broadcast %cst_426 : f32 to vector<8x1xf32>
      %697 = arith.maximumf %695, %696 : vector<8x1xf32>
      %c0_427 = arith.constant 0 : index
      %c0_428 = arith.constant 0 : index
      %698 = vector.load %arg10[%c0_427, %c0_428] : memref<8x1xf32, #tpu.memory_space<vmem>>, vector<8x1xf32>
      %cst_429 = arith.constant 9.99999974E-6 : f32
      %699 = vector.broadcast %cst_429 : f32 to vector<8x1xf32>
      %700 = arith.addf %697, %699 : vector<8x1xf32>
      %701 = math.rsqrt %700 : vector<8x1xf32>
      %702 = arith.mulf %698, %701 : vector<8x1xf32>
      %c0_430 = arith.constant 0 : index
      %c0_431 = arith.constant 0 : index
      %703 = vector.load %arg11[%c0_430, %c0_431] : memref<8x1xf32, #tpu.memory_space<vmem>>, vector<8x1xf32>
      %704 = arith.mulf %688, %702 : vector<8x1xf32>
      %705 = arith.subf %703, %704 : vector<8x1xf32>
      %706 = vector.broadcast %702 : vector<8x1xf32> to vector<8x256xf32>
      %707 = arith.mulf %684, %706 : vector<8x256xf32>
      %708 = vector.broadcast %705 : vector<8x1xf32> to vector<8x256xf32>
      %709 = arith.addf %707, %708 : vector<8x256xf32>
      %cst_432 = arith.constant 0.000000e+00 : f32
      %710 = vector.broadcast %cst_432 : f32 to vector<8x256xf32>
      %711 = arith.maximumf %709, %710 : vector<8x256xf32>
      %c17_i32_433 = arith.constant 17 : i32
      %712 = tpu.dynamic_rotate %711 by %c17_i32_433 dim 1 : vector<8x256xf32>, i32 -> vector<8x256xf32>
      %c0_434 = arith.constant 0 : index
      %c0_435 = arith.constant 0 : index
      %713 = vector.load %arg14[%c0_434, %c0_435] : memref<72x256xf32, #tpu.memory_space<vmem>>, vector<8x256xf32>
      %714 = arith.mulf %712, %713 : vector<8x256xf32>
      %c16_i32_436 = arith.constant 16 : i32
      %715 = tpu.dynamic_rotate %711 by %c16_i32_436 dim 1 : vector<8x256xf32>, i32 -> vector<8x256xf32>
      %c8_437 = arith.constant 8 : index
      %c0_438 = arith.constant 0 : index
      %716 = vector.load %arg14[%c8_437, %c0_438] : memref<72x256xf32, #tpu.memory_space<vmem>>, vector<8x256xf32>
      %717 = arith.mulf %715, %716 : vector<8x256xf32>
      %c15_i32_439 = arith.constant 15 : i32
      %718 = tpu.dynamic_rotate %711 by %c15_i32_439 dim 1 : vector<8x256xf32>, i32 -> vector<8x256xf32>
      %c16_440 = arith.constant 16 : index
      %c0_441 = arith.constant 0 : index
      %719 = vector.load %arg14[%c16_440, %c0_441] : memref<72x256xf32, #tpu.memory_space<vmem>>, vector<8x256xf32>
      %720 = arith.mulf %718, %719 : vector<8x256xf32>
      %c1_i32_442 = arith.constant 1 : i32
      %721 = tpu.dynamic_rotate %711 by %c1_i32_442 dim 1 : vector<8x256xf32>, i32 -> vector<8x256xf32>
      %c24_443 = arith.constant 24 : index
      %c0_444 = arith.constant 0 : index
      %722 = vector.load %arg14[%c24_443, %c0_444] : memref<72x256xf32, #tpu.memory_space<vmem>>, vector<8x256xf32>
      %723 = arith.mulf %721, %722 : vector<8x256xf32>
      %c255_i32_445 = arith.constant 255 : i32
      %724 = tpu.dynamic_rotate %711 by %c255_i32_445 dim 1 : vector<8x256xf32>, i32 -> vector<8x256xf32>
      %c40_446 = arith.constant 40 : index
      %c0_447 = arith.constant 0 : index
      %725 = vector.load %arg14[%c40_446, %c0_447] : memref<72x256xf32, #tpu.memory_space<vmem>>, vector<8x256xf32>
      %726 = arith.mulf %724, %725 : vector<8x256xf32>
      %c241_i32_448 = arith.constant 241 : i32
      %727 = tpu.dynamic_rotate %711 by %c241_i32_448 dim 1 : vector<8x256xf32>, i32 -> vector<8x256xf32>
      %c48_449 = arith.constant 48 : index
      %c0_450 = arith.constant 0 : index
      %728 = vector.load %arg14[%c48_449, %c0_450] : memref<72x256xf32, #tpu.memory_space<vmem>>, vector<8x256xf32>
      %729 = arith.mulf %727, %728 : vector<8x256xf32>
      %c240_i32_451 = arith.constant 240 : i32
      %730 = tpu.dynamic_rotate %711 by %c240_i32_451 dim 1 : vector<8x256xf32>, i32 -> vector<8x256xf32>
      %c56_452 = arith.constant 56 : index
      %c0_453 = arith.constant 0 : index
      %731 = vector.load %arg14[%c56_452, %c0_453] : memref<72x256xf32, #tpu.memory_space<vmem>>, vector<8x256xf32>
      %732 = arith.mulf %730, %731 : vector<8x256xf32>
      %c239_i32_454 = arith.constant 239 : i32
      %733 = tpu.dynamic_rotate %711 by %c239_i32_454 dim 1 : vector<8x256xf32>, i32 -> vector<8x256xf32>
      %c64_455 = arith.constant 64 : index
      %c0_456 = arith.constant 0 : index
      %734 = vector.load %arg14[%c64_455, %c0_456] : memref<72x256xf32, #tpu.memory_space<vmem>>, vector<8x256xf32>
      %735 = arith.mulf %733, %734 : vector<8x256xf32>
      %736 = tpu.concatenate %714, %717, %720, %723, %711, %726, %729, %732, %735 in 0 : vector<8x256xf32>, vector<8x256xf32>, vector<8x256xf32>, vector<8x256xf32>, vector<8x256xf32>, vector<8x256xf32>, vector<8x256xf32>, vector<8x256xf32>, vector<8x256xf32> -> vector<72x256xf32>
      %c0_457 = arith.constant 0 : index
      %c0_458 = arith.constant 0 : index
      %737 = vector.load %arg5[%c0_457, %c0_458] : memref<8x72xf32, #tpu.memory_space<vmem>>, vector<8x72xf32>
      %cst_459 = arith.constant dense<0.000000e+00> : vector<8x256xf32>
      %738 = tpu.matmul %737, %736, %cst_459 {dimension_numbers = #tpu.dot_dimension_numbers<[1], [0], [0], [1], [0, 0, 1, 1], [], []>} : vector<8x72xf32>, vector<72x256xf32>, vector<8x256xf32> -> vector<8x256xf32>
      %c0_460 = arith.constant 0 : index
      %c0_461 = arith.constant 0 : index
      %739 = vector.load %arg6[%c0_460, %c0_461] : memref<8x1xf32, #tpu.memory_space<vmem>>, vector<8x1xf32>
      %740 = vector.broadcast %739 : vector<8x1xf32> to vector<8x256xf32>
      %741 = arith.addf %738, %740 : vector<8x256xf32>
      %c0_462 = arith.constant 0 : index
      %c0_463 = arith.constant 0 : index
      %742 = vector.load %arg7[%c0_462, %c0_463] : memref<8x256xf32, #tpu.memory_space<vmem>>, vector<8x256xf32>
      %743 = vector.broadcast %623 : f32 to vector<8x256xf32>
      %744 = arith.mulf %743, %742 : vector<8x256xf32>
      %745 = arith.addf %741, %744 : vector<8x256xf32>
      %cst_464 = arith.constant dense<0.000000e+00> : vector<8xf32>
      %746 = vector.multi_reduction <add>, %745, %cst_464 [1] : vector<8x256xf32> to vector<8xf32>
      %747 = vector.shape_cast %746 : vector<8xf32> to vector<8x1xf32>
      %cst_465 = arith.constant 2.560000e+02 : f32
      %748 = vector.broadcast %cst_465 : f32 to vector<8x1xf32>
      %749 = arith.divf %747, %748 : vector<8x1xf32>
      %750 = arith.mulf %745, %745 : vector<8x256xf32>
      %cst_466 = arith.constant dense<0.000000e+00> : vector<8xf32>
      %751 = vector.multi_reduction <add>, %750, %cst_466 [1] : vector<8x256xf32> to vector<8xf32>
      %752 = vector.shape_cast %751 : vector<8xf32> to vector<8x1xf32>
      %cst_467 = arith.constant 2.560000e+02 : f32
      %753 = vector.broadcast %cst_467 : f32 to vector<8x1xf32>
      %754 = arith.divf %752, %753 : vector<8x1xf32>
      %755 = arith.mulf %749, %749 : vector<8x1xf32>
      %756 = arith.subf %754, %755 : vector<8x1xf32>
      %cst_468 = arith.constant 0.000000e+00 : f32
      %757 = vector.broadcast %cst_468 : f32 to vector<8x1xf32>
      %758 = arith.maximumf %756, %757 : vector<8x1xf32>
      %c0_469 = arith.constant 0 : index
      %c0_470 = arith.constant 0 : index
      %759 = vector.load %arg12[%c0_469, %c0_470] : memref<8x1xf32, #tpu.memory_space<vmem>>, vector<8x1xf32>
      %cst_471 = arith.constant 9.99999974E-6 : f32
      %760 = vector.broadcast %cst_471 : f32 to vector<8x1xf32>
      %761 = arith.addf %758, %760 : vector<8x1xf32>
      %762 = math.rsqrt %761 : vector<8x1xf32>
      %763 = arith.mulf %759, %762 : vector<8x1xf32>
      %c0_472 = arith.constant 0 : index
      %c0_473 = arith.constant 0 : index
      %764 = vector.load %arg13[%c0_472, %c0_473] : memref<8x1xf32, #tpu.memory_space<vmem>>, vector<8x1xf32>
      %765 = arith.mulf %749, %763 : vector<8x1xf32>
      %766 = arith.subf %764, %765 : vector<8x1xf32>
      %767 = vector.broadcast %763 : vector<8x1xf32> to vector<8x256xf32>
      %768 = arith.mulf %745, %767 : vector<8x256xf32>
      %769 = vector.broadcast %766 : vector<8x1xf32> to vector<8x256xf32>
      %770 = arith.addf %768, %769 : vector<8x256xf32>
      %cst_474 = arith.constant 6.250000e-02 : f32
      %771 = arith.addf %623, %cst_474 : f32
      %cst_475 = arith.constant 6.250000e-02 : f32
      %772 = vector.broadcast %cst_475 : f32 to vector<8x256xf32>
      %773 = arith.mulf %772, %770 : vector<8x256xf32>
      %774 = arith.addf %619, %773 : vector<8x256xf32>
      %cst_476 = arith.constant dense<0.000000e+00> : vector<8xf32>
      %775 = vector.multi_reduction <add>, %774, %cst_476 [1] : vector<8x256xf32> to vector<8xf32>
      %776 = vector.shape_cast %775 : vector<8xf32> to vector<8x1xf32>
      %cst_477 = arith.constant 2.560000e+02 : f32
      %777 = vector.broadcast %cst_477 : f32 to vector<8x1xf32>
      %778 = arith.divf %776, %777 : vector<8x1xf32>
      %779 = arith.mulf %774, %774 : vector<8x256xf32>
      %cst_478 = arith.constant dense<0.000000e+00> : vector<8xf32>
      %780 = vector.multi_reduction <add>, %779, %cst_478 [1] : vector<8x256xf32> to vector<8xf32>
      %781 = vector.shape_cast %780 : vector<8xf32> to vector<8x1xf32>
      %cst_479 = arith.constant 2.560000e+02 : f32
      %782 = vector.broadcast %cst_479 : f32 to vector<8x1xf32>
      %783 = arith.divf %781, %782 : vector<8x1xf32>
      %784 = arith.mulf %778, %778 : vector<8x1xf32>
      %785 = arith.subf %783, %784 : vector<8x1xf32>
      %cst_480 = arith.constant 0.000000e+00 : f32
      %786 = vector.broadcast %cst_480 : f32 to vector<8x1xf32>
      %787 = arith.maximumf %785, %786 : vector<8x1xf32>
      %c0_481 = arith.constant 0 : index
      %c0_482 = arith.constant 0 : index
      %788 = vector.load %arg8[%c0_481, %c0_482] : memref<8x1xf32, #tpu.memory_space<vmem>>, vector<8x1xf32>
      %cst_483 = arith.constant 9.99999974E-6 : f32
      %789 = vector.broadcast %cst_483 : f32 to vector<8x1xf32>
      %790 = arith.addf %787, %789 : vector<8x1xf32>
      %791 = math.rsqrt %790 : vector<8x1xf32>
      %792 = arith.mulf %788, %791 : vector<8x1xf32>
      %c0_484 = arith.constant 0 : index
      %c0_485 = arith.constant 0 : index
      %793 = vector.load %arg9[%c0_484, %c0_485] : memref<8x1xf32, #tpu.memory_space<vmem>>, vector<8x1xf32>
      %794 = arith.mulf %778, %792 : vector<8x1xf32>
      %795 = arith.subf %793, %794 : vector<8x1xf32>
      %796 = vector.broadcast %792 : vector<8x1xf32> to vector<8x256xf32>
      %797 = arith.mulf %774, %796 : vector<8x256xf32>
      %798 = vector.broadcast %795 : vector<8x1xf32> to vector<8x256xf32>
      %799 = arith.addf %797, %798 : vector<8x256xf32>
      %cst_486 = arith.constant 0.000000e+00 : f32
      %800 = vector.broadcast %cst_486 : f32 to vector<8x256xf32>
      %801 = arith.maximumf %799, %800 : vector<8x256xf32>
      %c17_i32_487 = arith.constant 17 : i32
      %802 = tpu.dynamic_rotate %801 by %c17_i32_487 dim 1 : vector<8x256xf32>, i32 -> vector<8x256xf32>
      %c0_488 = arith.constant 0 : index
      %c0_489 = arith.constant 0 : index
      %803 = vector.load %arg14[%c0_488, %c0_489] : memref<72x256xf32, #tpu.memory_space<vmem>>, vector<8x256xf32>
      %804 = arith.mulf %802, %803 : vector<8x256xf32>
      %c16_i32_490 = arith.constant 16 : i32
      %805 = tpu.dynamic_rotate %801 by %c16_i32_490 dim 1 : vector<8x256xf32>, i32 -> vector<8x256xf32>
      %c8_491 = arith.constant 8 : index
      %c0_492 = arith.constant 0 : index
      %806 = vector.load %arg14[%c8_491, %c0_492] : memref<72x256xf32, #tpu.memory_space<vmem>>, vector<8x256xf32>
      %807 = arith.mulf %805, %806 : vector<8x256xf32>
      %c15_i32_493 = arith.constant 15 : i32
      %808 = tpu.dynamic_rotate %801 by %c15_i32_493 dim 1 : vector<8x256xf32>, i32 -> vector<8x256xf32>
      %c16_494 = arith.constant 16 : index
      %c0_495 = arith.constant 0 : index
      %809 = vector.load %arg14[%c16_494, %c0_495] : memref<72x256xf32, #tpu.memory_space<vmem>>, vector<8x256xf32>
      %810 = arith.mulf %808, %809 : vector<8x256xf32>
      %c1_i32_496 = arith.constant 1 : i32
      %811 = tpu.dynamic_rotate %801 by %c1_i32_496 dim 1 : vector<8x256xf32>, i32 -> vector<8x256xf32>
      %c24_497 = arith.constant 24 : index
      %c0_498 = arith.constant 0 : index
      %812 = vector.load %arg14[%c24_497, %c0_498] : memref<72x256xf32, #tpu.memory_space<vmem>>, vector<8x256xf32>
      %813 = arith.mulf %811, %812 : vector<8x256xf32>
      %c255_i32_499 = arith.constant 255 : i32
      %814 = tpu.dynamic_rotate %801 by %c255_i32_499 dim 1 : vector<8x256xf32>, i32 -> vector<8x256xf32>
      %c40_500 = arith.constant 40 : index
      %c0_501 = arith.constant 0 : index
      %815 = vector.load %arg14[%c40_500, %c0_501] : memref<72x256xf32, #tpu.memory_space<vmem>>, vector<8x256xf32>
      %816 = arith.mulf %814, %815 : vector<8x256xf32>
      %c241_i32_502 = arith.constant 241 : i32
      %817 = tpu.dynamic_rotate %801 by %c241_i32_502 dim 1 : vector<8x256xf32>, i32 -> vector<8x256xf32>
      %c48_503 = arith.constant 48 : index
      %c0_504 = arith.constant 0 : index
      %818 = vector.load %arg14[%c48_503, %c0_504] : memref<72x256xf32, #tpu.memory_space<vmem>>, vector<8x256xf32>
      %819 = arith.mulf %817, %818 : vector<8x256xf32>
      %c240_i32_505 = arith.constant 240 : i32
      %820 = tpu.dynamic_rotate %801 by %c240_i32_505 dim 1 : vector<8x256xf32>, i32 -> vector<8x256xf32>
      %c56_506 = arith.constant 56 : index
      %c0_507 = arith.constant 0 : index
      %821 = vector.load %arg14[%c56_506, %c0_507] : memref<72x256xf32, #tpu.memory_space<vmem>>, vector<8x256xf32>
      %822 = arith.mulf %820, %821 : vector<8x256xf32>
      %c239_i32_508 = arith.constant 239 : i32
      %823 = tpu.dynamic_rotate %801 by %c239_i32_508 dim 1 : vector<8x256xf32>, i32 -> vector<8x256xf32>
      %c64_509 = arith.constant 64 : index
      %c0_510 = arith.constant 0 : index
      %824 = vector.load %arg14[%c64_509, %c0_510] : memref<72x256xf32, #tpu.memory_space<vmem>>, vector<8x256xf32>
      %825 = arith.mulf %823, %824 : vector<8x256xf32>
      %826 = tpu.concatenate %804, %807, %810, %813, %801, %816, %819, %822, %825 in 0 : vector<8x256xf32>, vector<8x256xf32>, vector<8x256xf32>, vector<8x256xf32>, vector<8x256xf32>, vector<8x256xf32>, vector<8x256xf32>, vector<8x256xf32>, vector<8x256xf32> -> vector<72x256xf32>
      %c0_511 = arith.constant 0 : index
      %c0_512 = arith.constant 0 : index
      %827 = vector.load %arg2[%c0_511, %c0_512] : memref<8x72xf32, #tpu.memory_space<vmem>>, vector<8x72xf32>
      %cst_513 = arith.constant dense<0.000000e+00> : vector<8x256xf32>
      %828 = tpu.matmul %827, %826, %cst_513 {dimension_numbers = #tpu.dot_dimension_numbers<[1], [0], [0], [1], [0, 0, 1, 1], [], []>} : vector<8x72xf32>, vector<72x256xf32>, vector<8x256xf32> -> vector<8x256xf32>
      %c0_514 = arith.constant 0 : index
      %c0_515 = arith.constant 0 : index
      %829 = vector.load %arg3[%c0_514, %c0_515] : memref<8x1xf32, #tpu.memory_space<vmem>>, vector<8x1xf32>
      %830 = vector.broadcast %829 : vector<8x1xf32> to vector<8x256xf32>
      %831 = arith.addf %828, %830 : vector<8x256xf32>
      %c0_516 = arith.constant 0 : index
      %c0_517 = arith.constant 0 : index
      %832 = vector.load %arg4[%c0_516, %c0_517] : memref<8x256xf32, #tpu.memory_space<vmem>>, vector<8x256xf32>
      %833 = vector.broadcast %771 : f32 to vector<8x256xf32>
      %834 = arith.mulf %833, %832 : vector<8x256xf32>
      %835 = arith.addf %831, %834 : vector<8x256xf32>
      %cst_518 = arith.constant dense<0.000000e+00> : vector<8xf32>
      %836 = vector.multi_reduction <add>, %835, %cst_518 [1] : vector<8x256xf32> to vector<8xf32>
      %837 = vector.shape_cast %836 : vector<8xf32> to vector<8x1xf32>
      %cst_519 = arith.constant 2.560000e+02 : f32
      %838 = vector.broadcast %cst_519 : f32 to vector<8x1xf32>
      %839 = arith.divf %837, %838 : vector<8x1xf32>
      %840 = arith.mulf %835, %835 : vector<8x256xf32>
      %cst_520 = arith.constant dense<0.000000e+00> : vector<8xf32>
      %841 = vector.multi_reduction <add>, %840, %cst_520 [1] : vector<8x256xf32> to vector<8xf32>
      %842 = vector.shape_cast %841 : vector<8xf32> to vector<8x1xf32>
      %cst_521 = arith.constant 2.560000e+02 : f32
      %843 = vector.broadcast %cst_521 : f32 to vector<8x1xf32>
      %844 = arith.divf %842, %843 : vector<8x1xf32>
      %845 = arith.mulf %839, %839 : vector<8x1xf32>
      %846 = arith.subf %844, %845 : vector<8x1xf32>
      %cst_522 = arith.constant 0.000000e+00 : f32
      %847 = vector.broadcast %cst_522 : f32 to vector<8x1xf32>
      %848 = arith.maximumf %846, %847 : vector<8x1xf32>
      %c0_523 = arith.constant 0 : index
      %c0_524 = arith.constant 0 : index
      %849 = vector.load %arg10[%c0_523, %c0_524] : memref<8x1xf32, #tpu.memory_space<vmem>>, vector<8x1xf32>
      %cst_525 = arith.constant 9.99999974E-6 : f32
      %850 = vector.broadcast %cst_525 : f32 to vector<8x1xf32>
      %851 = arith.addf %848, %850 : vector<8x1xf32>
      %852 = math.rsqrt %851 : vector<8x1xf32>
      %853 = arith.mulf %849, %852 : vector<8x1xf32>
      %c0_526 = arith.constant 0 : index
      %c0_527 = arith.constant 0 : index
      %854 = vector.load %arg11[%c0_526, %c0_527] : memref<8x1xf32, #tpu.memory_space<vmem>>, vector<8x1xf32>
      %855 = arith.mulf %839, %853 : vector<8x1xf32>
      %856 = arith.subf %854, %855 : vector<8x1xf32>
      %857 = vector.broadcast %853 : vector<8x1xf32> to vector<8x256xf32>
      %858 = arith.mulf %835, %857 : vector<8x256xf32>
      %859 = vector.broadcast %856 : vector<8x1xf32> to vector<8x256xf32>
      %860 = arith.addf %858, %859 : vector<8x256xf32>
      %cst_528 = arith.constant 0.000000e+00 : f32
      %861 = vector.broadcast %cst_528 : f32 to vector<8x256xf32>
      %862 = arith.maximumf %860, %861 : vector<8x256xf32>
      %c17_i32_529 = arith.constant 17 : i32
      %863 = tpu.dynamic_rotate %862 by %c17_i32_529 dim 1 : vector<8x256xf32>, i32 -> vector<8x256xf32>
      %c0_530 = arith.constant 0 : index
      %c0_531 = arith.constant 0 : index
      %864 = vector.load %arg14[%c0_530, %c0_531] : memref<72x256xf32, #tpu.memory_space<vmem>>, vector<8x256xf32>
      %865 = arith.mulf %863, %864 : vector<8x256xf32>
      %c16_i32_532 = arith.constant 16 : i32
      %866 = tpu.dynamic_rotate %862 by %c16_i32_532 dim 1 : vector<8x256xf32>, i32 -> vector<8x256xf32>
      %c8_533 = arith.constant 8 : index
      %c0_534 = arith.constant 0 : index
      %867 = vector.load %arg14[%c8_533, %c0_534] : memref<72x256xf32, #tpu.memory_space<vmem>>, vector<8x256xf32>
      %868 = arith.mulf %866, %867 : vector<8x256xf32>
      %c15_i32_535 = arith.constant 15 : i32
      %869 = tpu.dynamic_rotate %862 by %c15_i32_535 dim 1 : vector<8x256xf32>, i32 -> vector<8x256xf32>
      %c16_536 = arith.constant 16 : index
      %c0_537 = arith.constant 0 : index
      %870 = vector.load %arg14[%c16_536, %c0_537] : memref<72x256xf32, #tpu.memory_space<vmem>>, vector<8x256xf32>
      %871 = arith.mulf %869, %870 : vector<8x256xf32>
      %c1_i32_538 = arith.constant 1 : i32
      %872 = tpu.dynamic_rotate %862 by %c1_i32_538 dim 1 : vector<8x256xf32>, i32 -> vector<8x256xf32>
      %c24_539 = arith.constant 24 : index
      %c0_540 = arith.constant 0 : index
      %873 = vector.load %arg14[%c24_539, %c0_540] : memref<72x256xf32, #tpu.memory_space<vmem>>, vector<8x256xf32>
      %874 = arith.mulf %872, %873 : vector<8x256xf32>
      %c255_i32_541 = arith.constant 255 : i32
      %875 = tpu.dynamic_rotate %862 by %c255_i32_541 dim 1 : vector<8x256xf32>, i32 -> vector<8x256xf32>
      %c40_542 = arith.constant 40 : index
      %c0_543 = arith.constant 0 : index
      %876 = vector.load %arg14[%c40_542, %c0_543] : memref<72x256xf32, #tpu.memory_space<vmem>>, vector<8x256xf32>
      %877 = arith.mulf %875, %876 : vector<8x256xf32>
      %c241_i32_544 = arith.constant 241 : i32
      %878 = tpu.dynamic_rotate %862 by %c241_i32_544 dim 1 : vector<8x256xf32>, i32 -> vector<8x256xf32>
      %c48_545 = arith.constant 48 : index
      %c0_546 = arith.constant 0 : index
      %879 = vector.load %arg14[%c48_545, %c0_546] : memref<72x256xf32, #tpu.memory_space<vmem>>, vector<8x256xf32>
      %880 = arith.mulf %878, %879 : vector<8x256xf32>
      %c240_i32_547 = arith.constant 240 : i32
      %881 = tpu.dynamic_rotate %862 by %c240_i32_547 dim 1 : vector<8x256xf32>, i32 -> vector<8x256xf32>
      %c56_548 = arith.constant 56 : index
      %c0_549 = arith.constant 0 : index
      %882 = vector.load %arg14[%c56_548, %c0_549] : memref<72x256xf32, #tpu.memory_space<vmem>>, vector<8x256xf32>
      %883 = arith.mulf %881, %882 : vector<8x256xf32>
      %c239_i32_550 = arith.constant 239 : i32
      %884 = tpu.dynamic_rotate %862 by %c239_i32_550 dim 1 : vector<8x256xf32>, i32 -> vector<8x256xf32>
      %c64_551 = arith.constant 64 : index
      %c0_552 = arith.constant 0 : index
      %885 = vector.load %arg14[%c64_551, %c0_552] : memref<72x256xf32, #tpu.memory_space<vmem>>, vector<8x256xf32>
      %886 = arith.mulf %884, %885 : vector<8x256xf32>
      %887 = tpu.concatenate %865, %868, %871, %874, %862, %877, %880, %883, %886 in 0 : vector<8x256xf32>, vector<8x256xf32>, vector<8x256xf32>, vector<8x256xf32>, vector<8x256xf32>, vector<8x256xf32>, vector<8x256xf32>, vector<8x256xf32>, vector<8x256xf32> -> vector<72x256xf32>
      %c0_553 = arith.constant 0 : index
      %c0_554 = arith.constant 0 : index
      %888 = vector.load %arg5[%c0_553, %c0_554] : memref<8x72xf32, #tpu.memory_space<vmem>>, vector<8x72xf32>
      %cst_555 = arith.constant dense<0.000000e+00> : vector<8x256xf32>
      %889 = tpu.matmul %888, %887, %cst_555 {dimension_numbers = #tpu.dot_dimension_numbers<[1], [0], [0], [1], [0, 0, 1, 1], [], []>} : vector<8x72xf32>, vector<72x256xf32>, vector<8x256xf32> -> vector<8x256xf32>
      %c0_556 = arith.constant 0 : index
      %c0_557 = arith.constant 0 : index
      %890 = vector.load %arg6[%c0_556, %c0_557] : memref<8x1xf32, #tpu.memory_space<vmem>>, vector<8x1xf32>
      %891 = vector.broadcast %890 : vector<8x1xf32> to vector<8x256xf32>
      %892 = arith.addf %889, %891 : vector<8x256xf32>
      %c0_558 = arith.constant 0 : index
      %c0_559 = arith.constant 0 : index
      %893 = vector.load %arg7[%c0_558, %c0_559] : memref<8x256xf32, #tpu.memory_space<vmem>>, vector<8x256xf32>
      %894 = vector.broadcast %771 : f32 to vector<8x256xf32>
      %895 = arith.mulf %894, %893 : vector<8x256xf32>
      %896 = arith.addf %892, %895 : vector<8x256xf32>
      %cst_560 = arith.constant dense<0.000000e+00> : vector<8xf32>
      %897 = vector.multi_reduction <add>, %896, %cst_560 [1] : vector<8x256xf32> to vector<8xf32>
      %898 = vector.shape_cast %897 : vector<8xf32> to vector<8x1xf32>
      %cst_561 = arith.constant 2.560000e+02 : f32
      %899 = vector.broadcast %cst_561 : f32 to vector<8x1xf32>
      %900 = arith.divf %898, %899 : vector<8x1xf32>
      %901 = arith.mulf %896, %896 : vector<8x256xf32>
      %cst_562 = arith.constant dense<0.000000e+00> : vector<8xf32>
      %902 = vector.multi_reduction <add>, %901, %cst_562 [1] : vector<8x256xf32> to vector<8xf32>
      %903 = vector.shape_cast %902 : vector<8xf32> to vector<8x1xf32>
      %cst_563 = arith.constant 2.560000e+02 : f32
      %904 = vector.broadcast %cst_563 : f32 to vector<8x1xf32>
      %905 = arith.divf %903, %904 : vector<8x1xf32>
      %906 = arith.mulf %900, %900 : vector<8x1xf32>
      %907 = arith.subf %905, %906 : vector<8x1xf32>
      %cst_564 = arith.constant 0.000000e+00 : f32
      %908 = vector.broadcast %cst_564 : f32 to vector<8x1xf32>
      %909 = arith.maximumf %907, %908 : vector<8x1xf32>
      %c0_565 = arith.constant 0 : index
      %c0_566 = arith.constant 0 : index
      %910 = vector.load %arg12[%c0_565, %c0_566] : memref<8x1xf32, #tpu.memory_space<vmem>>, vector<8x1xf32>
      %cst_567 = arith.constant 9.99999974E-6 : f32
      %911 = vector.broadcast %cst_567 : f32 to vector<8x1xf32>
      %912 = arith.addf %909, %911 : vector<8x1xf32>
      %913 = math.rsqrt %912 : vector<8x1xf32>
      %914 = arith.mulf %910, %913 : vector<8x1xf32>
      %c0_568 = arith.constant 0 : index
      %c0_569 = arith.constant 0 : index
      %915 = vector.load %arg13[%c0_568, %c0_569] : memref<8x1xf32, #tpu.memory_space<vmem>>, vector<8x1xf32>
      %916 = arith.mulf %900, %914 : vector<8x1xf32>
      %917 = arith.subf %915, %916 : vector<8x1xf32>
      %918 = vector.broadcast %914 : vector<8x1xf32> to vector<8x256xf32>
      %919 = arith.mulf %896, %918 : vector<8x256xf32>
      %920 = vector.broadcast %917 : vector<8x1xf32> to vector<8x256xf32>
      %921 = arith.addf %919, %920 : vector<8x256xf32>
      %cst_570 = arith.constant 6.250000e-02 : f32
      %922 = arith.addf %623, %cst_570 : f32
      %cst_571 = arith.constant 6.250000e-02 : f32
      %923 = vector.broadcast %cst_571 : f32 to vector<8x256xf32>
      %924 = arith.mulf %923, %921 : vector<8x256xf32>
      %925 = arith.addf %619, %924 : vector<8x256xf32>
      %cst_572 = arith.constant dense<0.000000e+00> : vector<8xf32>
      %926 = vector.multi_reduction <add>, %925, %cst_572 [1] : vector<8x256xf32> to vector<8xf32>
      %927 = vector.shape_cast %926 : vector<8xf32> to vector<8x1xf32>
      %cst_573 = arith.constant 2.560000e+02 : f32
      %928 = vector.broadcast %cst_573 : f32 to vector<8x1xf32>
      %929 = arith.divf %927, %928 : vector<8x1xf32>
      %930 = arith.mulf %925, %925 : vector<8x256xf32>
      %cst_574 = arith.constant dense<0.000000e+00> : vector<8xf32>
      %931 = vector.multi_reduction <add>, %930, %cst_574 [1] : vector<8x256xf32> to vector<8xf32>
      %932 = vector.shape_cast %931 : vector<8xf32> to vector<8x1xf32>
      %cst_575 = arith.constant 2.560000e+02 : f32
      %933 = vector.broadcast %cst_575 : f32 to vector<8x1xf32>
      %934 = arith.divf %932, %933 : vector<8x1xf32>
      %935 = arith.mulf %929, %929 : vector<8x1xf32>
      %936 = arith.subf %934, %935 : vector<8x1xf32>
      %cst_576 = arith.constant 0.000000e+00 : f32
      %937 = vector.broadcast %cst_576 : f32 to vector<8x1xf32>
      %938 = arith.maximumf %936, %937 : vector<8x1xf32>
      %c0_577 = arith.constant 0 : index
      %c0_578 = arith.constant 0 : index
      %939 = vector.load %arg8[%c0_577, %c0_578] : memref<8x1xf32, #tpu.memory_space<vmem>>, vector<8x1xf32>
      %cst_579 = arith.constant 9.99999974E-6 : f32
      %940 = vector.broadcast %cst_579 : f32 to vector<8x1xf32>
      %941 = arith.addf %938, %940 : vector<8x1xf32>
      %942 = math.rsqrt %941 : vector<8x1xf32>
      %943 = arith.mulf %939, %942 : vector<8x1xf32>
      %c0_580 = arith.constant 0 : index
      %c0_581 = arith.constant 0 : index
      %944 = vector.load %arg9[%c0_580, %c0_581] : memref<8x1xf32, #tpu.memory_space<vmem>>, vector<8x1xf32>
      %945 = arith.mulf %929, %943 : vector<8x1xf32>
      %946 = arith.subf %944, %945 : vector<8x1xf32>
      %947 = vector.broadcast %943 : vector<8x1xf32> to vector<8x256xf32>
      %948 = arith.mulf %925, %947 : vector<8x256xf32>
      %949 = vector.broadcast %946 : vector<8x1xf32> to vector<8x256xf32>
      %950 = arith.addf %948, %949 : vector<8x256xf32>
      %cst_582 = arith.constant 0.000000e+00 : f32
      %951 = vector.broadcast %cst_582 : f32 to vector<8x256xf32>
      %952 = arith.maximumf %950, %951 : vector<8x256xf32>
      %c17_i32_583 = arith.constant 17 : i32
      %953 = tpu.dynamic_rotate %952 by %c17_i32_583 dim 1 : vector<8x256xf32>, i32 -> vector<8x256xf32>
      %c0_584 = arith.constant 0 : index
      %c0_585 = arith.constant 0 : index
      %954 = vector.load %arg14[%c0_584, %c0_585] : memref<72x256xf32, #tpu.memory_space<vmem>>, vector<8x256xf32>
      %955 = arith.mulf %953, %954 : vector<8x256xf32>
      %c16_i32_586 = arith.constant 16 : i32
      %956 = tpu.dynamic_rotate %952 by %c16_i32_586 dim 1 : vector<8x256xf32>, i32 -> vector<8x256xf32>
      %c8_587 = arith.constant 8 : index
      %c0_588 = arith.constant 0 : index
      %957 = vector.load %arg14[%c8_587, %c0_588] : memref<72x256xf32, #tpu.memory_space<vmem>>, vector<8x256xf32>
      %958 = arith.mulf %956, %957 : vector<8x256xf32>
      %c15_i32_589 = arith.constant 15 : i32
      %959 = tpu.dynamic_rotate %952 by %c15_i32_589 dim 1 : vector<8x256xf32>, i32 -> vector<8x256xf32>
      %c16_590 = arith.constant 16 : index
      %c0_591 = arith.constant 0 : index
      %960 = vector.load %arg14[%c16_590, %c0_591] : memref<72x256xf32, #tpu.memory_space<vmem>>, vector<8x256xf32>
      %961 = arith.mulf %959, %960 : vector<8x256xf32>
      %c1_i32_592 = arith.constant 1 : i32
      %962 = tpu.dynamic_rotate %952 by %c1_i32_592 dim 1 : vector<8x256xf32>, i32 -> vector<8x256xf32>
      %c24_593 = arith.constant 24 : index
      %c0_594 = arith.constant 0 : index
      %963 = vector.load %arg14[%c24_593, %c0_594] : memref<72x256xf32, #tpu.memory_space<vmem>>, vector<8x256xf32>
      %964 = arith.mulf %962, %963 : vector<8x256xf32>
      %c255_i32_595 = arith.constant 255 : i32
      %965 = tpu.dynamic_rotate %952 by %c255_i32_595 dim 1 : vector<8x256xf32>, i32 -> vector<8x256xf32>
      %c40_596 = arith.constant 40 : index
      %c0_597 = arith.constant 0 : index
      %966 = vector.load %arg14[%c40_596, %c0_597] : memref<72x256xf32, #tpu.memory_space<vmem>>, vector<8x256xf32>
      %967 = arith.mulf %965, %966 : vector<8x256xf32>
      %c241_i32_598 = arith.constant 241 : i32
      %968 = tpu.dynamic_rotate %952 by %c241_i32_598 dim 1 : vector<8x256xf32>, i32 -> vector<8x256xf32>
      %c48_599 = arith.constant 48 : index
      %c0_600 = arith.constant 0 : index
      %969 = vector.load %arg14[%c48_599, %c0_600] : memref<72x256xf32, #tpu.memory_space<vmem>>, vector<8x256xf32>
      %970 = arith.mulf %968, %969 : vector<8x256xf32>
      %c240_i32_601 = arith.constant 240 : i32
      %971 = tpu.dynamic_rotate %952 by %c240_i32_601 dim 1 : vector<8x256xf32>, i32 -> vector<8x256xf32>
      %c56_602 = arith.constant 56 : index
      %c0_603 = arith.constant 0 : index
      %972 = vector.load %arg14[%c56_602, %c0_603] : memref<72x256xf32, #tpu.memory_space<vmem>>, vector<8x256xf32>
      %973 = arith.mulf %971, %972 : vector<8x256xf32>
      %c239_i32_604 = arith.constant 239 : i32
      %974 = tpu.dynamic_rotate %952 by %c239_i32_604 dim 1 : vector<8x256xf32>, i32 -> vector<8x256xf32>
      %c64_605 = arith.constant 64 : index
      %c0_606 = arith.constant 0 : index
      %975 = vector.load %arg14[%c64_605, %c0_606] : memref<72x256xf32, #tpu.memory_space<vmem>>, vector<8x256xf32>
      %976 = arith.mulf %974, %975 : vector<8x256xf32>
      %977 = tpu.concatenate %955, %958, %961, %964, %952, %967, %970, %973, %976 in 0 : vector<8x256xf32>, vector<8x256xf32>, vector<8x256xf32>, vector<8x256xf32>, vector<8x256xf32>, vector<8x256xf32>, vector<8x256xf32>, vector<8x256xf32>, vector<8x256xf32> -> vector<72x256xf32>
      %c0_607 = arith.constant 0 : index
      %c0_608 = arith.constant 0 : index
      %978 = vector.load %arg2[%c0_607, %c0_608] : memref<8x72xf32, #tpu.memory_space<vmem>>, vector<8x72xf32>
      %cst_609 = arith.constant dense<0.000000e+00> : vector<8x256xf32>
      %979 = tpu.matmul %978, %977, %cst_609 {dimension_numbers = #tpu.dot_dimension_numbers<[1], [0], [0], [1], [0, 0, 1, 1], [], []>} : vector<8x72xf32>, vector<72x256xf32>, vector<8x256xf32> -> vector<8x256xf32>
      %c0_610 = arith.constant 0 : index
      %c0_611 = arith.constant 0 : index
      %980 = vector.load %arg3[%c0_610, %c0_611] : memref<8x1xf32, #tpu.memory_space<vmem>>, vector<8x1xf32>
      %981 = vector.broadcast %980 : vector<8x1xf32> to vector<8x256xf32>
      %982 = arith.addf %979, %981 : vector<8x256xf32>
      %c0_612 = arith.constant 0 : index
      %c0_613 = arith.constant 0 : index
      %983 = vector.load %arg4[%c0_612, %c0_613] : memref<8x256xf32, #tpu.memory_space<vmem>>, vector<8x256xf32>
      %984 = vector.broadcast %922 : f32 to vector<8x256xf32>
      %985 = arith.mulf %984, %983 : vector<8x256xf32>
      %986 = arith.addf %982, %985 : vector<8x256xf32>
      %cst_614 = arith.constant dense<0.000000e+00> : vector<8xf32>
      %987 = vector.multi_reduction <add>, %986, %cst_614 [1] : vector<8x256xf32> to vector<8xf32>
      %988 = vector.shape_cast %987 : vector<8xf32> to vector<8x1xf32>
      %cst_615 = arith.constant 2.560000e+02 : f32
      %989 = vector.broadcast %cst_615 : f32 to vector<8x1xf32>
      %990 = arith.divf %988, %989 : vector<8x1xf32>
      %991 = arith.mulf %986, %986 : vector<8x256xf32>
      %cst_616 = arith.constant dense<0.000000e+00> : vector<8xf32>
      %992 = vector.multi_reduction <add>, %991, %cst_616 [1] : vector<8x256xf32> to vector<8xf32>
      %993 = vector.shape_cast %992 : vector<8xf32> to vector<8x1xf32>
      %cst_617 = arith.constant 2.560000e+02 : f32
      %994 = vector.broadcast %cst_617 : f32 to vector<8x1xf32>
      %995 = arith.divf %993, %994 : vector<8x1xf32>
      %996 = arith.mulf %990, %990 : vector<8x1xf32>
      %997 = arith.subf %995, %996 : vector<8x1xf32>
      %cst_618 = arith.constant 0.000000e+00 : f32
      %998 = vector.broadcast %cst_618 : f32 to vector<8x1xf32>
      %999 = arith.maximumf %997, %998 : vector<8x1xf32>
      %c0_619 = arith.constant 0 : index
      %c0_620 = arith.constant 0 : index
      %1000 = vector.load %arg10[%c0_619, %c0_620] : memref<8x1xf32, #tpu.memory_space<vmem>>, vector<8x1xf32>
      %cst_621 = arith.constant 9.99999974E-6 : f32
      %1001 = vector.broadcast %cst_621 : f32 to vector<8x1xf32>
      %1002 = arith.addf %999, %1001 : vector<8x1xf32>
      %1003 = math.rsqrt %1002 : vector<8x1xf32>
      %1004 = arith.mulf %1000, %1003 : vector<8x1xf32>
      %c0_622 = arith.constant 0 : index
      %c0_623 = arith.constant 0 : index
      %1005 = vector.load %arg11[%c0_622, %c0_623] : memref<8x1xf32, #tpu.memory_space<vmem>>, vector<8x1xf32>
      %1006 = arith.mulf %990, %1004 : vector<8x1xf32>
      %1007 = arith.subf %1005, %1006 : vector<8x1xf32>
      %1008 = vector.broadcast %1004 : vector<8x1xf32> to vector<8x256xf32>
      %1009 = arith.mulf %986, %1008 : vector<8x256xf32>
      %1010 = vector.broadcast %1007 : vector<8x1xf32> to vector<8x256xf32>
      %1011 = arith.addf %1009, %1010 : vector<8x256xf32>
      %cst_624 = arith.constant 0.000000e+00 : f32
      %1012 = vector.broadcast %cst_624 : f32 to vector<8x256xf32>
      %1013 = arith.maximumf %1011, %1012 : vector<8x256xf32>
      %c17_i32_625 = arith.constant 17 : i32
      %1014 = tpu.dynamic_rotate %1013 by %c17_i32_625 dim 1 : vector<8x256xf32>, i32 -> vector<8x256xf32>
      %c0_626 = arith.constant 0 : index
      %c0_627 = arith.constant 0 : index
      %1015 = vector.load %arg14[%c0_626, %c0_627] : memref<72x256xf32, #tpu.memory_space<vmem>>, vector<8x256xf32>
      %1016 = arith.mulf %1014, %1015 : vector<8x256xf32>
      %c16_i32_628 = arith.constant 16 : i32
      %1017 = tpu.dynamic_rotate %1013 by %c16_i32_628 dim 1 : vector<8x256xf32>, i32 -> vector<8x256xf32>
      %c8_629 = arith.constant 8 : index
      %c0_630 = arith.constant 0 : index
      %1018 = vector.load %arg14[%c8_629, %c0_630] : memref<72x256xf32, #tpu.memory_space<vmem>>, vector<8x256xf32>
      %1019 = arith.mulf %1017, %1018 : vector<8x256xf32>
      %c15_i32_631 = arith.constant 15 : i32
      %1020 = tpu.dynamic_rotate %1013 by %c15_i32_631 dim 1 : vector<8x256xf32>, i32 -> vector<8x256xf32>
      %c16_632 = arith.constant 16 : index
      %c0_633 = arith.constant 0 : index
      %1021 = vector.load %arg14[%c16_632, %c0_633] : memref<72x256xf32, #tpu.memory_space<vmem>>, vector<8x256xf32>
      %1022 = arith.mulf %1020, %1021 : vector<8x256xf32>
      %c1_i32_634 = arith.constant 1 : i32
      %1023 = tpu.dynamic_rotate %1013 by %c1_i32_634 dim 1 : vector<8x256xf32>, i32 -> vector<8x256xf32>
      %c24_635 = arith.constant 24 : index
      %c0_636 = arith.constant 0 : index
      %1024 = vector.load %arg14[%c24_635, %c0_636] : memref<72x256xf32, #tpu.memory_space<vmem>>, vector<8x256xf32>
      %1025 = arith.mulf %1023, %1024 : vector<8x256xf32>
      %c255_i32_637 = arith.constant 255 : i32
      %1026 = tpu.dynamic_rotate %1013 by %c255_i32_637 dim 1 : vector<8x256xf32>, i32 -> vector<8x256xf32>
      %c40_638 = arith.constant 40 : index
      %c0_639 = arith.constant 0 : index
      %1027 = vector.load %arg14[%c40_638, %c0_639] : memref<72x256xf32, #tpu.memory_space<vmem>>, vector<8x256xf32>
      %1028 = arith.mulf %1026, %1027 : vector<8x256xf32>
      %c241_i32_640 = arith.constant 241 : i32
      %1029 = tpu.dynamic_rotate %1013 by %c241_i32_640 dim 1 : vector<8x256xf32>, i32 -> vector<8x256xf32>
      %c48_641 = arith.constant 48 : index
      %c0_642 = arith.constant 0 : index
      %1030 = vector.load %arg14[%c48_641, %c0_642] : memref<72x256xf32, #tpu.memory_space<vmem>>, vector<8x256xf32>
      %1031 = arith.mulf %1029, %1030 : vector<8x256xf32>
      %c240_i32_643 = arith.constant 240 : i32
      %1032 = tpu.dynamic_rotate %1013 by %c240_i32_643 dim 1 : vector<8x256xf32>, i32 -> vector<8x256xf32>
      %c56_644 = arith.constant 56 : index
      %c0_645 = arith.constant 0 : index
      %1033 = vector.load %arg14[%c56_644, %c0_645] : memref<72x256xf32, #tpu.memory_space<vmem>>, vector<8x256xf32>
      %1034 = arith.mulf %1032, %1033 : vector<8x256xf32>
      %c239_i32_646 = arith.constant 239 : i32
      %1035 = tpu.dynamic_rotate %1013 by %c239_i32_646 dim 1 : vector<8x256xf32>, i32 -> vector<8x256xf32>
      %c64_647 = arith.constant 64 : index
      %c0_648 = arith.constant 0 : index
      %1036 = vector.load %arg14[%c64_647, %c0_648] : memref<72x256xf32, #tpu.memory_space<vmem>>, vector<8x256xf32>
      %1037 = arith.mulf %1035, %1036 : vector<8x256xf32>
      %1038 = tpu.concatenate %1016, %1019, %1022, %1025, %1013, %1028, %1031, %1034, %1037 in 0 : vector<8x256xf32>, vector<8x256xf32>, vector<8x256xf32>, vector<8x256xf32>, vector<8x256xf32>, vector<8x256xf32>, vector<8x256xf32>, vector<8x256xf32>, vector<8x256xf32> -> vector<72x256xf32>
      %c0_649 = arith.constant 0 : index
      %c0_650 = arith.constant 0 : index
      %1039 = vector.load %arg5[%c0_649, %c0_650] : memref<8x72xf32, #tpu.memory_space<vmem>>, vector<8x72xf32>
      %cst_651 = arith.constant dense<0.000000e+00> : vector<8x256xf32>
      %1040 = tpu.matmul %1039, %1038, %cst_651 {dimension_numbers = #tpu.dot_dimension_numbers<[1], [0], [0], [1], [0, 0, 1, 1], [], []>} : vector<8x72xf32>, vector<72x256xf32>, vector<8x256xf32> -> vector<8x256xf32>
      %c0_652 = arith.constant 0 : index
      %c0_653 = arith.constant 0 : index
      %1041 = vector.load %arg6[%c0_652, %c0_653] : memref<8x1xf32, #tpu.memory_space<vmem>>, vector<8x1xf32>
      %1042 = vector.broadcast %1041 : vector<8x1xf32> to vector<8x256xf32>
      %1043 = arith.addf %1040, %1042 : vector<8x256xf32>
      %c0_654 = arith.constant 0 : index
      %c0_655 = arith.constant 0 : index
      %1044 = vector.load %arg7[%c0_654, %c0_655] : memref<8x256xf32, #tpu.memory_space<vmem>>, vector<8x256xf32>
      %1045 = vector.broadcast %922 : f32 to vector<8x256xf32>
      %1046 = arith.mulf %1045, %1044 : vector<8x256xf32>
      %1047 = arith.addf %1043, %1046 : vector<8x256xf32>
      %cst_656 = arith.constant dense<0.000000e+00> : vector<8xf32>
      %1048 = vector.multi_reduction <add>, %1047, %cst_656 [1] : vector<8x256xf32> to vector<8xf32>
      %1049 = vector.shape_cast %1048 : vector<8xf32> to vector<8x1xf32>
      %cst_657 = arith.constant 2.560000e+02 : f32
      %1050 = vector.broadcast %cst_657 : f32 to vector<8x1xf32>
      %1051 = arith.divf %1049, %1050 : vector<8x1xf32>
      %1052 = arith.mulf %1047, %1047 : vector<8x256xf32>
      %cst_658 = arith.constant dense<0.000000e+00> : vector<8xf32>
      %1053 = vector.multi_reduction <add>, %1052, %cst_658 [1] : vector<8x256xf32> to vector<8xf32>
      %1054 = vector.shape_cast %1053 : vector<8xf32> to vector<8x1xf32>
      %cst_659 = arith.constant 2.560000e+02 : f32
      %1055 = vector.broadcast %cst_659 : f32 to vector<8x1xf32>
      %1056 = arith.divf %1054, %1055 : vector<8x1xf32>
      %1057 = arith.mulf %1051, %1051 : vector<8x1xf32>
      %1058 = arith.subf %1056, %1057 : vector<8x1xf32>
      %cst_660 = arith.constant 0.000000e+00 : f32
      %1059 = vector.broadcast %cst_660 : f32 to vector<8x1xf32>
      %1060 = arith.maximumf %1058, %1059 : vector<8x1xf32>
      %c0_661 = arith.constant 0 : index
      %c0_662 = arith.constant 0 : index
      %1061 = vector.load %arg12[%c0_661, %c0_662] : memref<8x1xf32, #tpu.memory_space<vmem>>, vector<8x1xf32>
      %cst_663 = arith.constant 9.99999974E-6 : f32
      %1062 = vector.broadcast %cst_663 : f32 to vector<8x1xf32>
      %1063 = arith.addf %1060, %1062 : vector<8x1xf32>
      %1064 = math.rsqrt %1063 : vector<8x1xf32>
      %1065 = arith.mulf %1061, %1064 : vector<8x1xf32>
      %c0_664 = arith.constant 0 : index
      %c0_665 = arith.constant 0 : index
      %1066 = vector.load %arg13[%c0_664, %c0_665] : memref<8x1xf32, #tpu.memory_space<vmem>>, vector<8x1xf32>
      %1067 = arith.mulf %1051, %1065 : vector<8x1xf32>
      %1068 = arith.subf %1066, %1067 : vector<8x1xf32>
      %1069 = vector.broadcast %1065 : vector<8x1xf32> to vector<8x256xf32>
      %1070 = arith.mulf %1047, %1069 : vector<8x256xf32>
      %1071 = vector.broadcast %1068 : vector<8x1xf32> to vector<8x256xf32>
      %1072 = arith.addf %1070, %1071 : vector<8x256xf32>
      %cst_666 = arith.constant 1.250000e-01 : f32
      %1073 = arith.addf %623, %cst_666 : f32
      %cst_667 = arith.constant 1.250000e-01 : f32
      %1074 = vector.broadcast %cst_667 : f32 to vector<8x256xf32>
      %1075 = arith.mulf %1074, %1072 : vector<8x256xf32>
      %1076 = arith.addf %619, %1075 : vector<8x256xf32>
      %cst_668 = arith.constant dense<0.000000e+00> : vector<8xf32>
      %1077 = vector.multi_reduction <add>, %1076, %cst_668 [1] : vector<8x256xf32> to vector<8xf32>
      %1078 = vector.shape_cast %1077 : vector<8xf32> to vector<8x1xf32>
      %cst_669 = arith.constant 2.560000e+02 : f32
      %1079 = vector.broadcast %cst_669 : f32 to vector<8x1xf32>
      %1080 = arith.divf %1078, %1079 : vector<8x1xf32>
      %1081 = arith.mulf %1076, %1076 : vector<8x256xf32>
      %cst_670 = arith.constant dense<0.000000e+00> : vector<8xf32>
      %1082 = vector.multi_reduction <add>, %1081, %cst_670 [1] : vector<8x256xf32> to vector<8xf32>
      %1083 = vector.shape_cast %1082 : vector<8xf32> to vector<8x1xf32>
      %cst_671 = arith.constant 2.560000e+02 : f32
      %1084 = vector.broadcast %cst_671 : f32 to vector<8x1xf32>
      %1085 = arith.divf %1083, %1084 : vector<8x1xf32>
      %1086 = arith.mulf %1080, %1080 : vector<8x1xf32>
      %1087 = arith.subf %1085, %1086 : vector<8x1xf32>
      %cst_672 = arith.constant 0.000000e+00 : f32
      %1088 = vector.broadcast %cst_672 : f32 to vector<8x1xf32>
      %1089 = arith.maximumf %1087, %1088 : vector<8x1xf32>
      %c0_673 = arith.constant 0 : index
      %c0_674 = arith.constant 0 : index
      %1090 = vector.load %arg8[%c0_673, %c0_674] : memref<8x1xf32, #tpu.memory_space<vmem>>, vector<8x1xf32>
      %cst_675 = arith.constant 9.99999974E-6 : f32
      %1091 = vector.broadcast %cst_675 : f32 to vector<8x1xf32>
      %1092 = arith.addf %1089, %1091 : vector<8x1xf32>
      %1093 = math.rsqrt %1092 : vector<8x1xf32>
      %1094 = arith.mulf %1090, %1093 : vector<8x1xf32>
      %c0_676 = arith.constant 0 : index
      %c0_677 = arith.constant 0 : index
      %1095 = vector.load %arg9[%c0_676, %c0_677] : memref<8x1xf32, #tpu.memory_space<vmem>>, vector<8x1xf32>
      %1096 = arith.mulf %1080, %1094 : vector<8x1xf32>
      %1097 = arith.subf %1095, %1096 : vector<8x1xf32>
      %1098 = vector.broadcast %1094 : vector<8x1xf32> to vector<8x256xf32>
      %1099 = arith.mulf %1076, %1098 : vector<8x256xf32>
      %1100 = vector.broadcast %1097 : vector<8x1xf32> to vector<8x256xf32>
      %1101 = arith.addf %1099, %1100 : vector<8x256xf32>
      %cst_678 = arith.constant 0.000000e+00 : f32
      %1102 = vector.broadcast %cst_678 : f32 to vector<8x256xf32>
      %1103 = arith.maximumf %1101, %1102 : vector<8x256xf32>
      %c17_i32_679 = arith.constant 17 : i32
      %1104 = tpu.dynamic_rotate %1103 by %c17_i32_679 dim 1 : vector<8x256xf32>, i32 -> vector<8x256xf32>
      %c0_680 = arith.constant 0 : index
      %c0_681 = arith.constant 0 : index
      %1105 = vector.load %arg14[%c0_680, %c0_681] : memref<72x256xf32, #tpu.memory_space<vmem>>, vector<8x256xf32>
      %1106 = arith.mulf %1104, %1105 : vector<8x256xf32>
      %c16_i32_682 = arith.constant 16 : i32
      %1107 = tpu.dynamic_rotate %1103 by %c16_i32_682 dim 1 : vector<8x256xf32>, i32 -> vector<8x256xf32>
      %c8_683 = arith.constant 8 : index
      %c0_684 = arith.constant 0 : index
      %1108 = vector.load %arg14[%c8_683, %c0_684] : memref<72x256xf32, #tpu.memory_space<vmem>>, vector<8x256xf32>
      %1109 = arith.mulf %1107, %1108 : vector<8x256xf32>
      %c15_i32_685 = arith.constant 15 : i32
      %1110 = tpu.dynamic_rotate %1103 by %c15_i32_685 dim 1 : vector<8x256xf32>, i32 -> vector<8x256xf32>
      %c16_686 = arith.constant 16 : index
      %c0_687 = arith.constant 0 : index
      %1111 = vector.load %arg14[%c16_686, %c0_687] : memref<72x256xf32, #tpu.memory_space<vmem>>, vector<8x256xf32>
      %1112 = arith.mulf %1110, %1111 : vector<8x256xf32>
      %c1_i32_688 = arith.constant 1 : i32
      %1113 = tpu.dynamic_rotate %1103 by %c1_i32_688 dim 1 : vector<8x256xf32>, i32 -> vector<8x256xf32>
      %c24_689 = arith.constant 24 : index
      %c0_690 = arith.constant 0 : index
      %1114 = vector.load %arg14[%c24_689, %c0_690] : memref<72x256xf32, #tpu.memory_space<vmem>>, vector<8x256xf32>
      %1115 = arith.mulf %1113, %1114 : vector<8x256xf32>
      %c255_i32_691 = arith.constant 255 : i32
      %1116 = tpu.dynamic_rotate %1103 by %c255_i32_691 dim 1 : vector<8x256xf32>, i32 -> vector<8x256xf32>
      %c40_692 = arith.constant 40 : index
      %c0_693 = arith.constant 0 : index
      %1117 = vector.load %arg14[%c40_692, %c0_693] : memref<72x256xf32, #tpu.memory_space<vmem>>, vector<8x256xf32>
      %1118 = arith.mulf %1116, %1117 : vector<8x256xf32>
      %c241_i32_694 = arith.constant 241 : i32
      %1119 = tpu.dynamic_rotate %1103 by %c241_i32_694 dim 1 : vector<8x256xf32>, i32 -> vector<8x256xf32>
      %c48_695 = arith.constant 48 : index
      %c0_696 = arith.constant 0 : index
      %1120 = vector.load %arg14[%c48_695, %c0_696] : memref<72x256xf32, #tpu.memory_space<vmem>>, vector<8x256xf32>
      %1121 = arith.mulf %1119, %1120 : vector<8x256xf32>
      %c240_i32_697 = arith.constant 240 : i32
      %1122 = tpu.dynamic_rotate %1103 by %c240_i32_697 dim 1 : vector<8x256xf32>, i32 -> vector<8x256xf32>
      %c56_698 = arith.constant 56 : index
      %c0_699 = arith.constant 0 : index
      %1123 = vector.load %arg14[%c56_698, %c0_699] : memref<72x256xf32, #tpu.memory_space<vmem>>, vector<8x256xf32>
      %1124 = arith.mulf %1122, %1123 : vector<8x256xf32>
      %c239_i32_700 = arith.constant 239 : i32
      %1125 = tpu.dynamic_rotate %1103 by %c239_i32_700 dim 1 : vector<8x256xf32>, i32 -> vector<8x256xf32>
      %c64_701 = arith.constant 64 : index
      %c0_702 = arith.constant 0 : index
      %1126 = vector.load %arg14[%c64_701, %c0_702] : memref<72x256xf32, #tpu.memory_space<vmem>>, vector<8x256xf32>
      %1127 = arith.mulf %1125, %1126 : vector<8x256xf32>
      %1128 = tpu.concatenate %1106, %1109, %1112, %1115, %1103, %1118, %1121, %1124, %1127 in 0 : vector<8x256xf32>, vector<8x256xf32>, vector<8x256xf32>, vector<8x256xf32>, vector<8x256xf32>, vector<8x256xf32>, vector<8x256xf32>, vector<8x256xf32>, vector<8x256xf32> -> vector<72x256xf32>
      %c0_703 = arith.constant 0 : index
      %c0_704 = arith.constant 0 : index
      %1129 = vector.load %arg2[%c0_703, %c0_704] : memref<8x72xf32, #tpu.memory_space<vmem>>, vector<8x72xf32>
      %cst_705 = arith.constant dense<0.000000e+00> : vector<8x256xf32>
      %1130 = tpu.matmul %1129, %1128, %cst_705 {dimension_numbers = #tpu.dot_dimension_numbers<[1], [0], [0], [1], [0, 0, 1, 1], [], []>} : vector<8x72xf32>, vector<72x256xf32>, vector<8x256xf32> -> vector<8x256xf32>
      %c0_706 = arith.constant 0 : index
      %c0_707 = arith.constant 0 : index
      %1131 = vector.load %arg3[%c0_706, %c0_707] : memref<8x1xf32, #tpu.memory_space<vmem>>, vector<8x1xf32>
      %1132 = vector.broadcast %1131 : vector<8x1xf32> to vector<8x256xf32>
      %1133 = arith.addf %1130, %1132 : vector<8x256xf32>
      %c0_708 = arith.constant 0 : index
      %c0_709 = arith.constant 0 : index
      %1134 = vector.load %arg4[%c0_708, %c0_709] : memref<8x256xf32, #tpu.memory_space<vmem>>, vector<8x256xf32>
      %1135 = vector.broadcast %1073 : f32 to vector<8x256xf32>
      %1136 = arith.mulf %1135, %1134 : vector<8x256xf32>
      %1137 = arith.addf %1133, %1136 : vector<8x256xf32>
      %cst_710 = arith.constant dense<0.000000e+00> : vector<8xf32>
      %1138 = vector.multi_reduction <add>, %1137, %cst_710 [1] : vector<8x256xf32> to vector<8xf32>
      %1139 = vector.shape_cast %1138 : vector<8xf32> to vector<8x1xf32>
      %cst_711 = arith.constant 2.560000e+02 : f32
      %1140 = vector.broadcast %cst_711 : f32 to vector<8x1xf32>
      %1141 = arith.divf %1139, %1140 : vector<8x1xf32>
      %1142 = arith.mulf %1137, %1137 : vector<8x256xf32>
      %cst_712 = arith.constant dense<0.000000e+00> : vector<8xf32>
      %1143 = vector.multi_reduction <add>, %1142, %cst_712 [1] : vector<8x256xf32> to vector<8xf32>
      %1144 = vector.shape_cast %1143 : vector<8xf32> to vector<8x1xf32>
      %cst_713 = arith.constant 2.560000e+02 : f32
      %1145 = vector.broadcast %cst_713 : f32 to vector<8x1xf32>
      %1146 = arith.divf %1144, %1145 : vector<8x1xf32>
      %1147 = arith.mulf %1141, %1141 : vector<8x1xf32>
      %1148 = arith.subf %1146, %1147 : vector<8x1xf32>
      %cst_714 = arith.constant 0.000000e+00 : f32
      %1149 = vector.broadcast %cst_714 : f32 to vector<8x1xf32>
      %1150 = arith.maximumf %1148, %1149 : vector<8x1xf32>
      %c0_715 = arith.constant 0 : index
      %c0_716 = arith.constant 0 : index
      %1151 = vector.load %arg10[%c0_715, %c0_716] : memref<8x1xf32, #tpu.memory_space<vmem>>, vector<8x1xf32>
      %cst_717 = arith.constant 9.99999974E-6 : f32
      %1152 = vector.broadcast %cst_717 : f32 to vector<8x1xf32>
      %1153 = arith.addf %1150, %1152 : vector<8x1xf32>
      %1154 = math.rsqrt %1153 : vector<8x1xf32>
      %1155 = arith.mulf %1151, %1154 : vector<8x1xf32>
      %c0_718 = arith.constant 0 : index
      %c0_719 = arith.constant 0 : index
      %1156 = vector.load %arg11[%c0_718, %c0_719] : memref<8x1xf32, #tpu.memory_space<vmem>>, vector<8x1xf32>
      %1157 = arith.mulf %1141, %1155 : vector<8x1xf32>
      %1158 = arith.subf %1156, %1157 : vector<8x1xf32>
      %1159 = vector.broadcast %1155 : vector<8x1xf32> to vector<8x256xf32>
      %1160 = arith.mulf %1137, %1159 : vector<8x256xf32>
      %1161 = vector.broadcast %1158 : vector<8x1xf32> to vector<8x256xf32>
      %1162 = arith.addf %1160, %1161 : vector<8x256xf32>
      %cst_720 = arith.constant 0.000000e+00 : f32
      %1163 = vector.broadcast %cst_720 : f32 to vector<8x256xf32>
      %1164 = arith.maximumf %1162, %1163 : vector<8x256xf32>
      %c17_i32_721 = arith.constant 17 : i32
      %1165 = tpu.dynamic_rotate %1164 by %c17_i32_721 dim 1 : vector<8x256xf32>, i32 -> vector<8x256xf32>
      %c0_722 = arith.constant 0 : index
      %c0_723 = arith.constant 0 : index
      %1166 = vector.load %arg14[%c0_722, %c0_723] : memref<72x256xf32, #tpu.memory_space<vmem>>, vector<8x256xf32>
      %1167 = arith.mulf %1165, %1166 : vector<8x256xf32>
      %c16_i32_724 = arith.constant 16 : i32
      %1168 = tpu.dynamic_rotate %1164 by %c16_i32_724 dim 1 : vector<8x256xf32>, i32 -> vector<8x256xf32>
      %c8_725 = arith.constant 8 : index
      %c0_726 = arith.constant 0 : index
      %1169 = vector.load %arg14[%c8_725, %c0_726] : memref<72x256xf32, #tpu.memory_space<vmem>>, vector<8x256xf32>
      %1170 = arith.mulf %1168, %1169 : vector<8x256xf32>
      %c15_i32_727 = arith.constant 15 : i32
      %1171 = tpu.dynamic_rotate %1164 by %c15_i32_727 dim 1 : vector<8x256xf32>, i32 -> vector<8x256xf32>
      %c16_728 = arith.constant 16 : index
      %c0_729 = arith.constant 0 : index
      %1172 = vector.load %arg14[%c16_728, %c0_729] : memref<72x256xf32, #tpu.memory_space<vmem>>, vector<8x256xf32>
      %1173 = arith.mulf %1171, %1172 : vector<8x256xf32>
      %c1_i32_730 = arith.constant 1 : i32
      %1174 = tpu.dynamic_rotate %1164 by %c1_i32_730 dim 1 : vector<8x256xf32>, i32 -> vector<8x256xf32>
      %c24_731 = arith.constant 24 : index
      %c0_732 = arith.constant 0 : index
      %1175 = vector.load %arg14[%c24_731, %c0_732] : memref<72x256xf32, #tpu.memory_space<vmem>>, vector<8x256xf32>
      %1176 = arith.mulf %1174, %1175 : vector<8x256xf32>
      %c255_i32_733 = arith.constant 255 : i32
      %1177 = tpu.dynamic_rotate %1164 by %c255_i32_733 dim 1 : vector<8x256xf32>, i32 -> vector<8x256xf32>
      %c40_734 = arith.constant 40 : index
      %c0_735 = arith.constant 0 : index
      %1178 = vector.load %arg14[%c40_734, %c0_735] : memref<72x256xf32, #tpu.memory_space<vmem>>, vector<8x256xf32>
      %1179 = arith.mulf %1177, %1178 : vector<8x256xf32>
      %c241_i32_736 = arith.constant 241 : i32
      %1180 = tpu.dynamic_rotate %1164 by %c241_i32_736 dim 1 : vector<8x256xf32>, i32 -> vector<8x256xf32>
      %c48_737 = arith.constant 48 : index
      %c0_738 = arith.constant 0 : index
      %1181 = vector.load %arg14[%c48_737, %c0_738] : memref<72x256xf32, #tpu.memory_space<vmem>>, vector<8x256xf32>
      %1182 = arith.mulf %1180, %1181 : vector<8x256xf32>
      %c240_i32_739 = arith.constant 240 : i32
      %1183 = tpu.dynamic_rotate %1164 by %c240_i32_739 dim 1 : vector<8x256xf32>, i32 -> vector<8x256xf32>
      %c56_740 = arith.constant 56 : index
      %c0_741 = arith.constant 0 : index
      %1184 = vector.load %arg14[%c56_740, %c0_741] : memref<72x256xf32, #tpu.memory_space<vmem>>, vector<8x256xf32>
      %1185 = arith.mulf %1183, %1184 : vector<8x256xf32>
      %c239_i32_742 = arith.constant 239 : i32
      %1186 = tpu.dynamic_rotate %1164 by %c239_i32_742 dim 1 : vector<8x256xf32>, i32 -> vector<8x256xf32>
      %c64_743 = arith.constant 64 : index
      %c0_744 = arith.constant 0 : index
      %1187 = vector.load %arg14[%c64_743, %c0_744] : memref<72x256xf32, #tpu.memory_space<vmem>>, vector<8x256xf32>
      %1188 = arith.mulf %1186, %1187 : vector<8x256xf32>
      %1189 = tpu.concatenate %1167, %1170, %1173, %1176, %1164, %1179, %1182, %1185, %1188 in 0 : vector<8x256xf32>, vector<8x256xf32>, vector<8x256xf32>, vector<8x256xf32>, vector<8x256xf32>, vector<8x256xf32>, vector<8x256xf32>, vector<8x256xf32>, vector<8x256xf32> -> vector<72x256xf32>
      %c0_745 = arith.constant 0 : index
      %c0_746 = arith.constant 0 : index
      %1190 = vector.load %arg5[%c0_745, %c0_746] : memref<8x72xf32, #tpu.memory_space<vmem>>, vector<8x72xf32>
      %cst_747 = arith.constant dense<0.000000e+00> : vector<8x256xf32>
      %1191 = tpu.matmul %1190, %1189, %cst_747 {dimension_numbers = #tpu.dot_dimension_numbers<[1], [0], [0], [1], [0, 0, 1, 1], [], []>} : vector<8x72xf32>, vector<72x256xf32>, vector<8x256xf32> -> vector<8x256xf32>
      %c0_748 = arith.constant 0 : index
      %c0_749 = arith.constant 0 : index
      %1192 = vector.load %arg6[%c0_748, %c0_749] : memref<8x1xf32, #tpu.memory_space<vmem>>, vector<8x1xf32>
      %1193 = vector.broadcast %1192 : vector<8x1xf32> to vector<8x256xf32>
      %1194 = arith.addf %1191, %1193 : vector<8x256xf32>
      %c0_750 = arith.constant 0 : index
      %c0_751 = arith.constant 0 : index
      %1195 = vector.load %arg7[%c0_750, %c0_751] : memref<8x256xf32, #tpu.memory_space<vmem>>, vector<8x256xf32>
      %1196 = vector.broadcast %1073 : f32 to vector<8x256xf32>
      %1197 = arith.mulf %1196, %1195 : vector<8x256xf32>
      %1198 = arith.addf %1194, %1197 : vector<8x256xf32>
      %cst_752 = arith.constant dense<0.000000e+00> : vector<8xf32>
      %1199 = vector.multi_reduction <add>, %1198, %cst_752 [1] : vector<8x256xf32> to vector<8xf32>
      %1200 = vector.shape_cast %1199 : vector<8xf32> to vector<8x1xf32>
      %cst_753 = arith.constant 2.560000e+02 : f32
      %1201 = vector.broadcast %cst_753 : f32 to vector<8x1xf32>
      %1202 = arith.divf %1200, %1201 : vector<8x1xf32>
      %1203 = arith.mulf %1198, %1198 : vector<8x256xf32>
      %cst_754 = arith.constant dense<0.000000e+00> : vector<8xf32>
      %1204 = vector.multi_reduction <add>, %1203, %cst_754 [1] : vector<8x256xf32> to vector<8xf32>
      %1205 = vector.shape_cast %1204 : vector<8xf32> to vector<8x1xf32>
      %cst_755 = arith.constant 2.560000e+02 : f32
      %1206 = vector.broadcast %cst_755 : f32 to vector<8x1xf32>
      %1207 = arith.divf %1205, %1206 : vector<8x1xf32>
      %1208 = arith.mulf %1202, %1202 : vector<8x1xf32>
      %1209 = arith.subf %1207, %1208 : vector<8x1xf32>
      %cst_756 = arith.constant 0.000000e+00 : f32
      %1210 = vector.broadcast %cst_756 : f32 to vector<8x1xf32>
      %1211 = arith.maximumf %1209, %1210 : vector<8x1xf32>
      %c0_757 = arith.constant 0 : index
      %c0_758 = arith.constant 0 : index
      %1212 = vector.load %arg12[%c0_757, %c0_758] : memref<8x1xf32, #tpu.memory_space<vmem>>, vector<8x1xf32>
      %cst_759 = arith.constant 9.99999974E-6 : f32
      %1213 = vector.broadcast %cst_759 : f32 to vector<8x1xf32>
      %1214 = arith.addf %1211, %1213 : vector<8x1xf32>
      %1215 = math.rsqrt %1214 : vector<8x1xf32>
      %1216 = arith.mulf %1212, %1215 : vector<8x1xf32>
      %c0_760 = arith.constant 0 : index
      %c0_761 = arith.constant 0 : index
      %1217 = vector.load %arg13[%c0_760, %c0_761] : memref<8x1xf32, #tpu.memory_space<vmem>>, vector<8x1xf32>
      %1218 = arith.mulf %1202, %1216 : vector<8x1xf32>
      %1219 = arith.subf %1217, %1218 : vector<8x1xf32>
      %1220 = vector.broadcast %1216 : vector<8x1xf32> to vector<8x256xf32>
      %1221 = arith.mulf %1198, %1220 : vector<8x256xf32>
      %1222 = vector.broadcast %1219 : vector<8x1xf32> to vector<8x256xf32>
      %1223 = arith.addf %1221, %1222 : vector<8x256xf32>
      %cst_762 = arith.constant 2.000000e+00 : f32
      %1224 = vector.broadcast %cst_762 : f32 to vector<8x256xf32>
      %1225 = arith.mulf %1224, %921 : vector<8x256xf32>
      %1226 = arith.addf %770, %1225 : vector<8x256xf32>
      %cst_763 = arith.constant 2.000000e+00 : f32
      %1227 = vector.broadcast %cst_763 : f32 to vector<8x256xf32>
      %1228 = arith.mulf %1227, %1072 : vector<8x256xf32>
      %1229 = arith.addf %1226, %1228 : vector<8x256xf32>
      %1230 = arith.addf %1229, %1223 : vector<8x256xf32>
      %cst_764 = arith.constant 0.020833334 : f32
      %1231 = vector.broadcast %cst_764 : f32 to vector<8x256xf32>
      %1232 = arith.mulf %1231, %1230 : vector<8x256xf32>
      %1233 = arith.addf %619, %1232 : vector<8x256xf32>
      scf.yield %1233 : vector<8x256xf32>
    }
    %c4_i32_2 = arith.constant 4 : i32
    %c0_3 = arith.constant 0 : index
    %c0_4 = arith.constant 0 : index
    %c0_5 = arith.constant 0 : index
    %4 = vector.load %arg15[%c0_3, %c0_4, %c0_5] : memref<1x8x256xf32, #tpu.memory_space<vmem>>, vector<1x8x256xf32>
    %5 = vector.shape_cast %4 : vector<1x8x256xf32> to vector<8x256xf32>
    %6 = vector.shape_cast %3 : vector<8x256xf32> to vector<1x8x256xf32>
    tpu.vector_store %arg15[%c0_3, %c0_4, %c0_5], %6 {strides = array<i32>} : memref<1x8x256xf32, #tpu.memory_space<vmem>>, vector<1x8x256xf32>,
    return
  }
  func.func @transform_0(%arg0: i32) -> (i32, i32, i32) {
    %c0_i32 = arith.constant 0 : i32
    %c0_i32_0 = arith.constant 0 : i32
    %c0_i32_1 = arith.constant 0 : i32
    return %arg0, %c0_i32, %c0_i32_0 : i32, i32, i32
  }
  func.func @transform_1(%arg0: i32) -> (i32, i32) {
    %c0_i32 = arith.constant 0 : i32
    %c0_i32_0 = arith.constant 0 : i32
    %c0_i32_1 = arith.constant 0 : i32
    return %c0_i32, %c0_i32_0 : i32, i32
  }
  func.func @transform_2(%arg0: i32) -> (i32, i32) {
    %c0_i32 = arith.constant 0 : i32
    %c0_i32_0 = arith.constant 0 : i32
    %c0_i32_1 = arith.constant 0 : i32
    return %c0_i32, %c0_i32_0 : i32, i32
  }
  func.func @transform_3(%arg0: i32) -> (i32, i32) {
    %c0_i32 = arith.constant 0 : i32
    %c0_i32_0 = arith.constant 0 : i32
    %c0_i32_1 = arith.constant 0 : i32
    return %c0_i32, %c0_i32_0 : i32, i32
  }
  func.func @transform_4(%arg0: i32) -> (i32, i32) {
    %c0_i32 = arith.constant 0 : i32
    %c0_i32_0 = arith.constant 0 : i32
    %c0_i32_1 = arith.constant 0 : i32
    return %c0_i32, %c0_i32_0 : i32, i32
  }
  func.func @transform_5(%arg0: i32) -> (i32, i32) {
    %c0_i32 = arith.constant 0 : i32
    %c0_i32_0 = arith.constant 0 : i32
    %c0_i32_1 = arith.constant 0 : i32
    return %c0_i32, %c0_i32_0 : i32, i32
  }
  func.func @transform_6(%arg0: i32) -> (i32, i32) {
    %c0_i32 = arith.constant 0 : i32
    %c0_i32_0 = arith.constant 0 : i32
    %c0_i32_1 = arith.constant 0 : i32
    return %c0_i32, %c0_i32_0 : i32, i32
  }
  func.func @transform_7(%arg0: i32) -> (i32, i32) {
    %c0_i32 = arith.constant 0 : i32
    %c0_i32_0 = arith.constant 0 : i32
    %c0_i32_1 = arith.constant 0 : i32
    return %c0_i32, %c0_i32_0 : i32, i32
  }
  func.func @transform_8(%arg0: i32) -> (i32, i32) {
    %c0_i32 = arith.constant 0 : i32
    %c0_i32_0 = arith.constant 0 : i32
    %c0_i32_1 = arith.constant 0 : i32
    return %c0_i32, %c0_i32_0 : i32, i32
  }
  func.func @transform_9(%arg0: i32) -> (i32, i32) {
    %c0_i32 = arith.constant 0 : i32
    %c0_i32_0 = arith.constant 0 : i32
    %c0_i32_1 = arith.constant 0 : i32
    return %c0_i32, %c0_i32_0 : i32, i32
  }
  func.func @transform_10(%arg0: i32) -> (i32, i32) {
    %c0_i32 = arith.constant 0 : i32
    %c0_i32_0 = arith.constant 0 : i32
    %c0_i32_1 = arith.constant 0 : i32
    return %c0_i32, %c0_i32_0 : i32, i32
  }
  func.func @transform_11(%arg0: i32) -> (i32, i32) {
    %c0_i32 = arith.constant 0 : i32
    %c0_i32_0 = arith.constant 0 : i32
    %c0_i32_1 = arith.constant 0 : i32
    return %c0_i32, %c0_i32_0 : i32, i32
  }
  func.func @transform_12(%arg0: i32) -> (i32, i32) {
    %c0_i32 = arith.constant 0 : i32
    %c0_i32_0 = arith.constant 0 : i32
    %c0_i32_1 = arith.constant 0 : i32
    return %c0_i32, %c0_i32_0 : i32, i32
  }
  func.func @transform_13(%arg0: i32) -> (i32, i32) {
    %c0_i32 = arith.constant 0 : i32
    %c0_i32_0 = arith.constant 0 : i32
    %c0_i32_1 = arith.constant 0 : i32
    return %c0_i32, %c0_i32_0 : i32, i32
  }
  func.func @transform_14(%arg0: i32) -> (i32, i32, i32) {
    %c0_i32 = arith.constant 0 : i32
    %c0_i32_0 = arith.constant 0 : i32
    %c0_i32_1 = arith.constant 0 : i32
    return %arg0, %c0_i32, %c0_i32_0 : i32, i32, i32
  }
}

</mosaic_0001>

<bundles_post_ra>
// kernel: tpu_custom_call.1
= control target key start
LH: loop header
LB: loop body
LE: loop exit
PB: predicated region body
PF: predicated region fallthrough
CT: control target
= control target key end

     0   :  { %s6194_s0 = inlined_call_operand.vmem [shape: f32[2,8,256], index: 0, kind: input, shape index: {}]   ;;  %s6195_s1 = inlined_call_operand.vmem [shape: f32[8,72], index: 1, kind: input, shape index: {}]   ;;  %s6196_s2 = inlined_call_operand.vmem [shape: f32[8,1], index: 2, kind: input, shape index: {}]   ;;  %s6197_s3 = inlined_call_operand.vmem [shape: f32[8,256], index: 3, kind: input, shape index: {}]   ;;  %s6198_s4 = inlined_call_operand.hbm [shape: f32[8,72], index: 4, kind: input, shape index: {}]   ;;  %s6199_s5 = inlined_call_operand.vmem [shape: f32[8,1], index: 5, kind: input, shape index: {}]   ;;  %s6200_s6 = inlined_call_operand.vmem [shape: f32[8,256], index: 6, kind: input, shape index: {}]   ;;  %s6201_s7 = inlined_call_operand.vmem [shape: f32[8,1], index: 7, kind: input, shape index: {}]   ;;  %s6202_s8 = inlined_call_operand.vmem [shape: f32[8,1], index: 8, kind: input, shape index: {}]   ;;  %s6203_s9 = inlined_call_operand.vmem [shape: f32[8,1], index: 9, kind: input, shape index: {}]   ;;  %s6204_s10 = inlined_call_operand.vmem [shape: f32[8,1], index: 10, kind: input, shape index: {}]   ;;  %s6205_s11 = inlined_call_operand.vmem [shape: f32[8,1], index: 11, kind: input, shape index: {}]   ;;  %s6206_s12 = inlined_call_operand.vmem [shape: f32[8,1], index: 12, kind: input, shape index: {}]   ;;  %s6207_s13 = inlined_call_operand.hbm [shape: f32[72,256], index: 13, kind: input, shape index: {}]   ;;  %s6208_s14 = inlined_call_operand.hbm [shape: f32[2,8,256], index: 14, kind: output, shape index: {}]  }
   0x1   :  { %6234 = sst [smem:[#allocation15_spill]] %s6194_s0 }
   0x2   :  { %6235 = sst [smem:[#allocation16_spill]] %s6196_s2 }
   0x3   :  { %6236 = sst [smem:[#allocation17_spill]] %s6198_s4 }
   0x4   :  { %6237 = sst [smem:[#allocation18_spill]] %s6199_s5 }
   0x5   :  { %6238 = sst [smem:[#allocation19_spill]] %s6207_s13 }
   0x6   :  { %19 = vsyncpa [#allocation3], 0 }
   0x7   :  { %20 = vsyncpa [#allocation6], 0 }
   0x8   :  { %21 = vsyncpa [#allocation4], 0 }
   0x9   :  { %23 = vsyncpa [#allocation4 + $0x1], 0  ;;  %s4256_s29 = smov 0   ;;  %s4258_s30 = smov 0  }
   0xa   :  { %s4260_s15 = smov 0   ;;  %s4262_s16 = smov 0  }
   0xb LB: > { %6239 = sst [smem:[#allocation11_spill]] %s4148_s15  ;;  %s4277_s17 = sadd.s32 4294967295, %s4152_s16   ;;  %s4152_s16 = sphi %s4262_s16, %s6272_s16   ;;  %s4148_s15 = sphi %s4260_s15, %s6274_s15   ;;  %s4144_s30 = sphi %s4258_s30, %s6276_s30   ;;  %s4140_s29 = sphi %s4256_s29, %s6275_s29  }
   0xc   : > { %s3755_s18 = sadd.s32 4294967294, %s4152_s16   ;;  %s4281_s19 = sadd.s32 1, %s4152_s16  }
   0xd   : > { %6240 = sst [smem:[#allocation12_spill]] %s4281_s19  ;;  %s335_s20 = sadd.s32 1, %s4148_s15 }
   0xe   : > { %s332_s21 = ssub.s32 %s4152_s16, %s4281_s19  ;;  %p345_p0 = scmp.ne.s32.totalorder %s4148_s15, %s4144_s30 }
   0xf   : > { %p333_p1 = scmp.eq.s32.totalorder %s332_s21, 0  ;;  %p346_p2 = scmp.eq.s32.totalorder %s4277_s17, 1 }
  0x10   : > { %p351_p3 = scmp.ne.s32.totalorder %s4144_s30, %s4140_s29  ;;  %p352_p4 = scmp.eq.s32.totalorder %s3755_s18, 1 }
  0x11   : > { %s4292_s22 = scalar_select %p333_p1, %s4148_s15, %s335_s20  }
  0x12   : > { %p4294_p5 = por %p346_p2, %p345_p0  ;;  %p4298_p6 = por %p352_p4, %p351_p3 }
  0x13   : > { %6241 = sst [smem:[#allocation13_spill]] %s4292_s22  ;;  %p3756_p7 = scmp.ge.s32.totalorder %s4152_s16, 1 }
  0x14   : > { %s6242_s23 = scalar_select %p4294_p5, 1, 0 }
  0x15   : > { %s6243_s24 = scalar_select %p4298_p6, 1, 0 }
  0x16   : > { %p359_p8 = scmp.lt.s32.totalorder %s4152_s16, 3  ;;  %p6209_p9 = scmp.eq.s32.totalorder %s4277_s17, 0 }
  0x17   : > { %6244 = sst [smem:[#allocation14_spill]] %s6243_s24  ;;  %s4166_s26 = smov [#allocation2]  }
  0x18   : > { %p4305_p10 = pnand %p3756_p7, %p359_p8  ;;  %s381_s27 = sshll.u32 %s4166_s26, 4  ;;  %s382_s27 = int_to_ptr.vmem [resolvable:$true] %s381_s27 }
  0x19   : > { %s4167_s28 = smov [#allocation5]   ;;  %s4031_s21 = scalar_lea.vmem %s382_s27, 128 }
  0x1a   : > { %s6245_s25 = scalar_select %p4305_p10, 1, 0 }
  0x1b   : > { %p3800_p11 = pneg %p4305_p10  ;;  %s415_s18 = sshll.u32 %s4167_s28, 4  ;;  %s416_s18 = int_to_ptr.vmem [resolvable:$true] %s415_s18 }
  0x1c   : > { %p4032_p0 = scmp.ne.s32.totalorder %s382_s27, %s4031_s21  ;;  %p4039_p3 = scmp.lt.s32.totalorder %s382_s27, %s382_s27 }
  0x1d   : > { %p4313_p12 = pnand %p6209_p9, %p3800_p11  ;;  %p4040_p4 = scmp.lt.s32.totalorder %s4031_s21, %s4031_s21 }
  0x1f   : > { %p4022_p13 = pneg %p4313_p12  ;;  %p4041_p7 = por %p4040_p4, %p4039_p3 }
  0x21   : > { %p4034_p1 = pnand %p4032_p0, %p4022_p13 }
  0x23   : > { %p4035_p2 = pneg %p4034_p1 }
  0x25   : > { %p4042_p8 = pnand %p4041_p7, %p4035_p2 }
  0x27   : > { %4045 = shalt.err (!%p4042_p8)
}
  0x28   : > { %s6247_s4 = sld [smem:[#allocation17_spill]]  ;;  %s4057_s22 = scalar_lea.vmem %s416_s18, 2304 }
  0x29   : > { %p4058_p11 = scmp.ne.s32.totalorder %s416_s18, %s4057_s22  ;;  %p4065_p0 = scmp.lt.s32.totalorder %s416_s18, %s416_s18 }
  0x2a   : > { %p4066_p1 = scmp.lt.s32.totalorder %s4057_s22, %s4057_s22 }
  0x2b   : > { %p4060_p9 = pnand %p4058_p11, %p4022_p13 }
  0x2c   : > { %p4067_p5 = por %p4066_p1, %p4065_p0 }
  0x2d   : > { %p4061_p6 = pneg %p4060_p9 }
  0x2e   : > { %3803 = dma.hbm_to_vmem [thread:$0]  (!%p4313_p12), %s6247_s4, 128, %s382_s27, [#allocation3]  }
  0x2f   : > { %p4068_p10 = pnand %p4067_p5, %p4061_p6 }
  0x31   : > { %4071 = shalt.err (!%p4068_p10)
}
  0x32   : > { %s4168_s21 = smov 256   ;;  %s4169_s15 = smov 16  }
  0x33   : > { %s6248_s13 = sld [smem:[#allocation19_spill]]  ;;  %p6249_p2 = scmp.ne.s32.totalorder %s6245_s25, 0 }
  0x34   : > { %p6250_p3 = scmp.eq.s32.totalorder (!%p6249_p2), %s4277_s17, 0 }
  0x35   : > { %439 = sbr.rel (%p6249_p2) target bundleno = 12826 (0x321a), region = 76 }
  0x39   : > { %3806 = dma.hbm_to_vmem [thread:$0]  (!%p4313_p12), %s6248_s13, 2304, %s416_s18, [#allocation6], %s4168_s21, %s4168_s21, %s4169_s15  }
  0x3a   : > { %4127 = dma.done.wait (%p6250_p3), [#allocation3], 128   ;;  %p6251_p9 = pmov %p6250_p3 }
  0x3b   : > { %p6252_p5 = pmov %p6250_p3 }
  0x3c   : > { %4129 = vsyncadd (%p6251_p9), [#allocation3], 4294967168 }
  0x3d   : > { %4131 = dma.done.wait (%p6252_p5), [#allocation6], 2304   ;;  %p6253_p6 = pmov %p6250_p3 }
  0x3e   : > { %p489_p10 = scmp.lt.s32.totalorder %s4277_s17, 1  ;;  %s6216_s15 = sand.u32 1, %s4144_s30  }
  0x3f   : > { %4133 = vsyncadd (%p6253_p6), [#allocation6], 4294964992  ;;  %s3763_s19 = sshll.u32 %s6216_s15, 4  ;;  %s6254_s0 = sld [smem:[#allocation15_spill]] }
  0x40   : > { %s490_s22 = scalar_select %p489_p10, %s4277_s17, 1 }
  0x41   : > { %s4353_s20 = scalar_lea.vmem [#allocation7], %s3763_s19  ;;  %s4359_s26 = smov 0  }
  0x42   : > { %s3788_s24 = sshll.u32 %s490_s22, 4 }
  0x45   : > { %s493_s18 = scalar_lea.vmem %s6254_s0, %s3788_s24 }
  0x46   : > { %v494_v0 = vld [vmem:[%s493_s18] sm:$0xff]   ;;  %v495_v1 = vld [vmem:[%s493_s18 + $0x8] sm:$0xff]  }
  0x47 LB: >> { %v507_v2 = vadd.f32 %v4156_v1, %v4160_v0  ;;  %v512_v3 = vmul.f32 %v4160_v0, %v4160_v0  ;;  %v513_v4 = vmul.f32 %v4156_v1, %v4156_v1  ;;  %v4170_v6 = vmov 0   ;;  %v4379_v15 = vld [vmem:[%s6201_s7] sm:$0xff]  ;;  %s6230_s24 = smov 111   ;;  %s6217_s25 = smov 112   ;;  %v4434_v33 = vld [vmem:[#allocation5 + $0x88] sm:$0xff]  ;;  %v4436_v34 = vld [vmem:[#allocation5 + $0x80] sm:$0xff]  ;;  %s4164_s26 = sphi %s4359_s26, %s501_s26   ;;  %v4160_v0 = vphi %v494_v0, %v6267_v0   ;;  %v4156_v1 = vphi %v495_v1, %v6266_v1  }
  0x48   : >> { %3886 = vset.pattern.permute.xlu1 %v4170_v6  ;;  %3887 = vset.pattern.permute.xlu0 %v4170_v6  ;;  %v4385_v18 = vld [vmem:[%s6202_s8] sm:$0xff]  ;;  %s6227_s27 = smov 127   ;;  %s6225_s18 = smov 1   ;;  %v4179_v29 = vmov 0.0   ;;  %v548_v31 = vlaneseq  ;;  %v4447_v43 = vld [vmem:[#allocation5 + $0x70] sm:$0xff]  ;;  %v4456_v51 = vld [vmem:[#allocation5 + $0x68] sm:$0xff] }
  0x49   : >> { %508 = vadd.xlane.f32.xlu0 %v507_v2  ;;  %v514_v5 = vadd.f32 %v513_v4, %v512_v3  ;;  %s6232_s28 = smov 113   ;;  %s6223_s21 = smov 15   ;;  %709 = vmatprep.mubr.f32.mxu0 %v4179_v29  ;;  %v4445_v42 = vld [vmem:[#allocation5 + $0x78] sm:$0xff]  ;;  %v4458_v52 = vld [vmem:[#allocation5 + $0x60] sm:$0xff]  ;;  %v4469_v60 = vld [vmem:[#allocation5 + $0x50] sm:$0xff]  ;;  %vm641_vm8 = vcmask 588800  }
  0x4a   : >> { %s6221_s19 = smov 16   ;;  %s6219_s22 = smov 17   ;;  %897 = vmatprep.mubr.f32.mxu1 %v4179_v29  ;;  %v4431_v32 = vand.u32 127, %v548_v31  ;;  %v4467_v59 = vld [vmem:[#allocation5 + $0x58] sm:$0xff]  ;;  %v4515_v31 = vld [vmem:[#allocation5] sm:$0xff] }
  0x4b   : >> { %s6255_s2 = sld [smem:[#allocation16_spill]]  ;;  %v4478_v4 = vld [vmem:[#allocation5 + $0x38] sm:$0xff]  ;;  %s6260_s15 = smov 16  }
  0x4c   : >> { %vm627_vm0 = vcmp.lt.s32.totalorder %v4431_v32, 111  ;;  %vm616_vm1 = vcmp.lt.s32.totalorder %v4431_v32, 112  ;;  %vm605_vm2 = vcmp.lt.s32.totalorder %v4431_v32, 113  ;;  %vm594_vm3 = vcmp.lt.s32.totalorder %v4431_v32, 127  ;;  %s6262_s5 = sld [smem:[#allocation18_spill]]  ;;  %s6265_s4 = sshll.u32 %s4164_s26, 1 }
  0x4d   : >> { %515 = vadd.xlane.f32.xlu0 %v514_v5  ;;  %vm583_vm4 = vcmp.lt.s32.totalorder %v4431_v32, 1  ;;  %v4480_v5 = vld [vmem:[#allocation5 + $0x30] sm:$0xff]  ;;  %vm572_vm5 = vcmp.lt.s32.totalorder %v4431_v32, 15  ;;  %vm561_vm6 = vcmp.lt.s32.totalorder %v4431_v32, 16  ;;  %vm550_vm7 = vcmp.lt.s32.totalorder %v4431_v32, 17 }
  0x51   : >> { %v635_v30 = vld [vmem:[%s6255_s2] sm:$0xff]  ;;  %s6263_s2 = smov 111  }
  0xd2   : >> { %v509_v7 = vpop.xlane.xlu0 %508 }
  0xd3   : >> { %v511_v8 = vmul.f32 0.00390625, %v509_v7 }
  0xd5   : >> { %v518_v10 = vmul.f32 %v511_v8, %v511_v8 }
  0xd6   : >> { %v516_v9 = vpop.xlane.xlu0 %515 }
  0xd7   : >> { %v517_v11 = vmul.f32 0.00390625, %v516_v9 }
  0xd9   : >> { %v519_v12 = vsub.f32 %v517_v11, %v518_v10 }
  0xdb   : >> { %v520_v13 = vmax.f32 %v519_v12, 0.0  ;;  %v4491_v12 = vld [vmem:[#allocation5 + $0x28] sm:$0xff] }
  0xdd   : >> { %v522_v14 = vadd.f32 1e-05, %v520_v13  ;;  %v4493_v13 = vld [vmem:[#allocation5 + $0x20] sm:$0xff] }
  0xdf   : >> { %3888 = vrsqrt.f32 %v522_v14 }
  0xec   : >> { %v3889_v16 = vpop.eup %3888 }
  0xed   : >> { %v524_v17 = vmul.f32 %v3889_v16, %v4379_v15 }
  0xef   : >> { %530 = vperm.xlu1 %3886, %v524_v17   ;;  %v526_v19 = vmul.f32 %v524_v17, %v511_v8 }
  0xf1   : >> { %v527_v20 = vsub.f32 %v4385_v18, %v526_v19 }
  0xf3   : >> { %537 = vperm.xlu1 %3886, %v527_v20  }
 0x16a   : >> { %v531_v21 = vpop.permute.xlu1 %530 }
 0x16b   : >> { %v533_v22 = vmul.f32 %v4160_v0, %v531_v21  ;;  %v534_v23 = vmul.f32 %v4156_v1, %v531_v21 }
 0x16e   : >> { %v538_v24 = vpop.permute.xlu1 %537 }
 0x16f   : >> { %v540_v25 = vadd.f32 %v538_v24, %v533_v22  ;;  %v541_v26 = vadd.f32 %v538_v24, %v534_v23  ;;  %v4502_v22 = vld [vmem:[#allocation5 + $0x18] sm:$0xff]  ;;  %v4504_v23 = vld [vmem:[#allocation5 + $0x10] sm:$0xff] }
 0x171   : >> { %v4390_v27 = vmax.f32 %v540_v25, 0.0  ;;  %v4392_v28 = vmax.f32 %v541_v26, 0.0 }
 0x173   : >> { %625 = vrot.lane.b32.xlu1 %v4392_v28, %s6230_s24  ;;  %623 = vrot.lane.b32.xlu0 %v4390_v27, %s6230_s24 }
 0x177   : >> { %612 = vrot.lane.b32.xlu1 %v4390_v27, %s6217_s25  ;;  %592 = vrot.lane.b32.xlu0 %v4392_v28, %s6227_s27 }
 0x17b   : >> { %614 = vrot.lane.b32.xlu1 %v4392_v28, %s6217_s25  ;;  %581 = vrot.lane.b32.xlu0 %v4392_v28, %s6225_s18  ;;  %s6256_s25 = smov 127  }
 0x17f   : >> { %601 = vrot.lane.b32.xlu1 %v4390_v27, %s6232_s28  ;;  %570 = vrot.lane.b32.xlu0 %v4392_v28, %s6223_s21 }
 0x183   : >> { %603 = vrot.lane.b32.xlu1 %v4392_v28, %s6232_s28  ;;  %559 = vrot.lane.b32.xlu0 %v4392_v28, %s6221_s19 }
 0x187   : >> { %590 = vrot.lane.b32.xlu1 %v4390_v27, %s6227_s27  ;;  %546 = vrot.lane.b32.xlu0 %v4392_v28, %s6219_s22  ;;  %s6257_s27 = smov 1  }
 0x18b   : >> { %579 = vrot.lane.b32.xlu1 %v4390_v27, %s6225_s18  ;;  %s6258_s18 = smov 112  }
 0x18f   : >> { %568 = vrot.lane.b32.xlu1 %v4390_v27, %s6223_s21 }
 0x193   : >> { %557 = vrot.lane.b32.xlu1 %v4390_v27, %s6221_s19 }
 0x197   : >> { %544 = vrot.lane.b32.xlu1 %v4390_v27, %s6219_s22  ;;  %s6229_s22 = sshll.u32 %s4164_s26, 1  ;;  %s501_s26 = sadd.s32 1, %s4164_s26  }
 0x198   : >> { %s505_s19 = scvt.s32.f32 %s6229_s22  ;;  %s6261_s22 = smov 17  }
 0x199   : >> { %p498_p12 = scmp.ge.s32.totalorder %s501_s26, 4  }
 0x19a   : >> { %s4534_s21 = smul.f32 0.125, %s505_s19  ;;  %s6259_s19 = smov 15  }
 0x19b   : >> { %638 = vperm.xlu1 %3886, %v635_v30   ;;  %v4513_v30 = vld [vmem:[#allocation5 + $0x8] sm:$0xff]  ;;  %p6269_p4 = scmp.ne.s32.totalorder (%p498_p12), %s6242_s23, 0  ;;  %s4180_s26 = smov (%p498_p12), [#allocation7]  }
 0x19c   : >> { %s944_s0 = sadd.f32 0.0625, %s4534_s21 }
 0x1e5   : >> { %v626_v35 = vpop.permute.xlu1 %625  ;;  %v624_v36 = vpop.permute.xlu0 %623 }
 0x1e6   : >> { %v629_v37 = vsel %vm627_vm0, %v626_v35, %v624_v36  ;;  %v628_v38 = vsel %vm627_vm0, %v624_v36, %v626_v35 }
 0x1e7   : >> { %v633_v39 = vmul.f32 %v4434_v33, %v629_v37  ;;  %v632_v40 = vmul.f32 %v4436_v34, %v628_v38 }
 0x1e9   : >> { %v613_v41 = vpop.permute.xlu1 %612  ;;  %659 = vmatprep.subr.mxu0 %v633_v39  ;;  %v593_v49 = vpop.permute.xlu0 %592 }
 0x1ea   : >> { %660 = vmatpush1.msra.mxu0 %v632_v40 }
 0x1ed   : >> { %v615_v44 = vpop.permute.xlu1 %614  ;;  %v582_v56 = vpop.permute.xlu0 %581 }
 0x1ee   : >> { %v617_v45 = vsel %vm616_vm1, %v613_v41, %v615_v44  ;;  %v618_v46 = vsel %vm616_vm1, %v615_v44, %v613_v41  ;;  %v4526_v41 = vld [vmem:[%s6195_s1] sm:$0xff] }
 0x1ef   : >> { %v622_v47 = vmul.f32 %v4445_v42, %v618_v46  ;;  %v621_v48 = vmul.f32 %v4447_v43, %v617_v45  ;;  %v4539_v44 = vld [vmem:[%s6197_s3] sm:$0xff]  ;;  %v4542_v45 = vstv %s4534_s21  ;;  %v4547_v46 = vld [vmem:[%s6197_s3 + $0x8] sm:$0xff] }
 0x1f1   : >> { %v602_v50 = vpop.permute.xlu1 %601  ;;  %661 = vmatprep.subr.mxu0 %v622_v47  ;;  %v571_v6 = vpop.permute.xlu0 %570  ;;  %v719_v47 = vmul.f32 %v4542_v45, %v4539_v44 }
 0x1f2   : >> { %662 = vmatpush1.msra.mxu0 %v621_v48 }
 0x1f5   : >> { %v604_v53 = vpop.permute.xlu1 %603  ;;  %v560_v19 = vpop.permute.xlu0 %559 }
 0x1f6   : >> { %v606_v54 = vsel %vm605_vm2, %v602_v50, %v604_v53  ;;  %v607_v55 = vsel %vm605_vm2, %v604_v53, %v602_v50  ;;  %v720_v53 = vmul.f32 %v4542_v45, %v4547_v46 }
 0x1f7   : >> { %v611_v57 = vmul.f32 %v4456_v51, %v607_v55  ;;  %v610_v58 = vmul.f32 %v4458_v52, %v606_v54 }
 0x1f9   : >> { %v591_v61 = vpop.permute.xlu1 %590  ;;  %663 = vmatprep.subr.mxu0 %v611_v57  ;;  %v547_v35 = vpop.permute.xlu0 %546 }
 0x1fa   : >> { %v595_v62 = vsel %vm594_vm3, %v591_v61, %v593_v49  ;;  %v596_v63 = vsel %vm594_vm3, %v593_v49, %v591_v61  ;;  %664 = vmatpush1.msra.mxu0 %v610_v58 }
 0x1fb   : >> { %v600_v2 = vmul.f32 %v4467_v59, %v596_v63  ;;  %v599_v3 = vmul.f32 %v4469_v60, %v595_v62 }
 0x1fd   : >> { %v580_v7 = vpop.permute.xlu1 %579  ;;  %665 = vmatprep.subr.mxu0 %v600_v2 }
 0x1fe   : >> { %v584_v8 = vsel %vm583_vm4, %v580_v7, %v582_v56  ;;  %v585_v9 = vsel %vm583_vm4, %v582_v56, %v580_v7  ;;  %666 = vmatpush1.msra.mxu0 %v599_v3 }
 0x1ff   : >> { %667 = vmatprep.subr.mxu0 %v4392_v28  ;;  %v589_v10 = vmul.f32 %v4478_v4, %v584_v8  ;;  %v588_v11 = vmul.f32 %v4480_v5, %v585_v9 }
 0x200   : >> { %668 = vmatpush1.msra.mxu0 %v4390_v27 }
 0x201   : >> { %v569_v14 = vpop.permute.xlu1 %568  ;;  %669 = vmatprep.subr.mxu0 %v589_v10 }
 0x202   : >> { %v573_v16 = vsel %vm572_vm5, %v569_v14, %v571_v6  ;;  %v574_v17 = vsel %vm572_vm5, %v571_v6, %v569_v14  ;;  %670 = vmatpush1.msra.mxu0 %v588_v11  ;;  %v4560_v14 = vld [vmem:[%s6203_s9] sm:$0xff] }
 0x203   : >> { %v578_v20 = vmul.f32 %v4491_v12, %v573_v16  ;;  %v577_v21 = vmul.f32 %v4493_v13, %v574_v17 }
 0x205   : >> { %v558_v24 = vpop.permute.xlu1 %557  ;;  %671 = vmatprep.subr.mxu0 %v578_v20 }
 0x206   : >> { %v562_v25 = vsel %vm561_vm6, %v558_v24, %v560_v19  ;;  %v563_v26 = vsel %vm561_vm6, %v560_v19, %v558_v24  ;;  %672 = vmatpush1.msra.mxu0 %v577_v21  ;;  %v4566_v19 = vld [vmem:[%s6204_s10] sm:$0xff] }
 0x207   : >> { %v567_v27 = vmul.f32 %v4502_v22, %v562_v25  ;;  %v566_v28 = vmul.f32 %v4504_v23, %v563_v26 }
 0x209   : >> { %v545_v36 = vpop.permute.xlu1 %544  ;;  %673 = vmatprep.subr.mxu0 %v567_v27 }
 0x20a   : >> { %v551_v37 = vsel %vm550_vm7, %v545_v36, %v547_v35  ;;  %v552_v38 = vsel %vm550_vm7, %v547_v35, %v545_v36  ;;  %674 = vmatpush1.msra.mxu0 %v566_v28 }
 0x20b   : >> { %v556_v39 = vmul.f32 %v4513_v30, %v551_v37  ;;  %v555_v40 = vmul.f32 %v4515_v31, %v552_v38  ;;  %v824_v38 = vld [vmem:[%s6262_s5] sm:$0xff]  ;;  %s2104_s5 = sadd.s32 1, %s6265_s4 }
 0x20c   : >> { %s2105_s13 = scvt.s32.f32 %s2104_s5 }
 0x20d   : >> { %675 = vmatprep.subr.mxu0 %v556_v39 }
 0x20e   : >> { %676 = vmatpush1.msra.mxu0 %v555_v40 }
 0x20f   : >> { %3767 = vmatmul.mubr.msk.f32.vlgmr.msra.gmra.mxu0 %vm641_vm8, %v4526_v41 }
 0x210   : >> { %1111 = vmatprep.mubr.f32.mxu0 %v4179_v29 }
 0x216   : >> { %v4551_v48 = vpop.permute.xlu1 %638 }
 0x2cf   : >> { %v711_v49 = vpop.f32.mrf.mxu0 }
 0x2d0   : >> { %v712_v50 = vadd.f32 %v711_v49, %v4551_v48 }
 0x2d1   : >> { %v713_v54 = vpop.f32.mrf.mxu0 }
 0x2d2   : >> { %v721_v55 = vadd.f32 %v719_v47, %v712_v50  ;;  %v714_v56 = vadd.f32 %v713_v54, %v4551_v48 }
 0x2d4   : >> { %v722_v57 = vadd.f32 %v720_v53, %v714_v56  ;;  %v727_v61 = vmul.f32 %v721_v55, %v721_v55 }
 0x2d6   : >> { %v723_v58 = vadd.f32 %v722_v57, %v721_v55  ;;  %v728_v62 = vmul.f32 %v722_v57, %v722_v57 }
 0x2d8   : >> { %724 = vadd.xlane.f32.xlu0 %v723_v58  ;;  %v729_v63 = vadd.f32 %v728_v62, %v727_v61 }
 0x2da   : >> { %730 = vadd.xlane.f32.xlu1 %v729_v63 }
 0x361   : >> { %v725_v2 = vpop.xlane.xlu0 %724 }
 0x362   : >> { %v726_v3 = vmul.f32 0.00390625, %v725_v2 }
 0x363   : >> { %v731_v6 = vpop.xlane.xlu1 %730 }
 0x364   : >> { %v733_v7 = vmul.f32 %v726_v3, %v726_v3  ;;  %v732_v8 = vmul.f32 0.00390625, %v731_v6 }
 0x366   : >> { %v734_v9 = vsub.f32 %v732_v8, %v733_v7 }
 0x368   : >> { %v735_v10 = vmax.f32 %v734_v9, 0.0 }
 0x36a   : >> { %v737_v11 = vadd.f32 1e-05, %v735_v10 }
 0x36c   : >> { %3890 = vrsqrt.f32 %v737_v11 }
 0x379   : >> { %v3891_v16 = vpop.eup %3890 }
 0x37a   : >> { %v739_v17 = vmul.f32 %v3891_v16, %v4560_v14 }
 0x37c   : >> { %745 = vperm.xlu0 %3887, %v739_v17   ;;  %v741_v20 = vmul.f32 %v739_v17, %v726_v3 }
 0x37e   : >> { %v742_v21 = vsub.f32 %v4566_v19, %v741_v20 }
 0x380   : >> { %752 = vperm.xlu1 %3886, %v742_v21  }
 0x3f7   : >> { %v746_v24 = vpop.permute.xlu0 %745 }
 0x3f8   : >> { %v748_v25 = vmul.f32 %v746_v24, %v721_v55  ;;  %v749_v26 = vmul.f32 %v746_v24, %v722_v57 }
 0x3fb   : >> { %v753_v27 = vpop.permute.xlu1 %752 }
 0x3fc   : >> { %v755_v28 = vadd.f32 %v753_v27, %v748_v25  ;;  %v756_v35 = vadd.f32 %v753_v27, %v749_v26 }
 0x3fe   : >> { %v757_v36 = vmax.f32 %v755_v28, 0.0  ;;  %v758_v37 = vmax.f32 %v756_v35, 0.0 }
 0x400   : >> { %801 = vrot.lane.b32.xlu0 %v758_v37, %s6232_s28  ;;  %815 = vrot.lane.b32.xlu1 %v757_v36, %s6230_s24 }
 0x404   : >> { %793 = vrot.lane.b32.xlu0 %v758_v37, %s6256_s25  ;;  %817 = vrot.lane.b32.xlu1 %v758_v37, %s6230_s24  ;;  %s1706_s24 = sadd.f32 0.125, %s4534_s21  ;;  %s5434_s21 = smul.f32 0.125, %s2105_s13 }
 0x405   : > { %s4076_s13 = sshll.u32 (%p498_p12), %s4180_s26, 4  ;;  %s4077_s13 = int_to_ptr.vmem [resolvable:$false] %s4076_s13 }
 0x406   : >> { %s2486_s5 = sadd.f32 0.0625, %s5434_s21 }
 0x408   : >> { %785 = vrot.lane.b32.xlu0 %v758_v37, %s6257_s27  ;;  %807 = vrot.lane.b32.xlu1 %v757_v36, %s6258_s18 }
 0x40c   : >> { %777 = vrot.lane.b32.xlu0 %v758_v37, %s6259_s19  ;;  %809 = vrot.lane.b32.xlu1 %v758_v37, %s6258_s18 }
 0x410   : >> { %769 = vrot.lane.b32.xlu0 %v758_v37, %s6260_s15  ;;  %799 = vrot.lane.b32.xlu1 %v757_v36, %s6232_s28  ;;  %s6264_s28 = smov 113  }
 0x414   : >> { %761 = vrot.lane.b32.xlu0 %v758_v37, %s6261_s22  ;;  %791 = vrot.lane.b32.xlu1 %v757_v36, %s6256_s25 }
 0x418   : >> { %783 = vrot.lane.b32.xlu1 %v757_v36, %s6257_s27 }
 0x41c   : >> { %775 = vrot.lane.b32.xlu1 %v757_v36, %s6259_s19 }
 0x420   : >> { %767 = vrot.lane.b32.xlu1 %v757_v36, %s6260_s15 }
 0x424   : >> { %759 = vrot.lane.b32.xlu1 %v757_v36, %s6261_s22 }
 0x428   : >> { %827 = vperm.xlu1 %3886, %v824_v38  }
 0x472   : >> { %v816_v39 = vpop.permute.xlu1 %815  ;;  %v802_v50 = vpop.permute.xlu0 %801 }
 0x476   : >> { %v818_v40 = vpop.permute.xlu1 %817  ;;  %v794_v56 = vpop.permute.xlu0 %793 }
 0x477   : >> { %v820_v47 = vsel %vm627_vm0, %v818_v40, %v816_v39  ;;  %v819_v49 = vsel %vm627_vm0, %v816_v39, %v818_v40 }
 0x478   : >> { %v822_v53 = vmul.f32 %v820_v47, %v4434_v33  ;;  %v821_v54 = vmul.f32 %v819_v49, %v4436_v34 }
 0x47a   : >> { %847 = vmatprep.subr.mxu1 %v822_v53  ;;  %v808_v55 = vpop.permute.xlu1 %807  ;;  %v786_v7 = vpop.permute.xlu0 %785 }
 0x47b   : >> { %848 = vmatpush1.msra.mxu1 %v821_v54 }
 0x47e   : >> { %v810_v57 = vpop.permute.xlu1 %809  ;;  %v778_v21 = vpop.permute.xlu0 %777 }
 0x47f   : >> { %v811_v58 = vsel %vm616_vm1, %v808_v55, %v810_v57  ;;  %v812_v61 = vsel %vm616_vm1, %v810_v57, %v808_v55 }
 0x480   : >> { %v814_v62 = vmul.f32 %v812_v61, %v4445_v42  ;;  %v813_v63 = vmul.f32 %v811_v58, %v4447_v43 }
 0x482   : >> { %849 = vmatprep.subr.mxu1 %v814_v62  ;;  %v800_v2 = vpop.permute.xlu1 %799  ;;  %v770_v40 = vpop.permute.xlu0 %769 }
 0x483   : >> { %v803_v3 = vsel %vm605_vm2, %v800_v2, %v802_v50  ;;  %v804_v6 = vsel %vm605_vm2, %v802_v50, %v800_v2  ;;  %850 = vmatpush1.msra.mxu1 %v813_v63  ;;  %v4636_v63 = vld [vmem:[#allocation2] sm:$0xff] }
 0x484   : >> { %v806_v8 = vmul.f32 %v804_v6, %v4456_v51  ;;  %v805_v9 = vmul.f32 %v803_v3, %v4458_v52  ;;  %v4644_v2 = vld [vmem:[%s6200_s6] sm:$0xff]  ;;  %v4649_v3 = vld [vmem:[%s6200_s6 + $0x8] sm:$0xff] }
 0x485   : >> { %v906_v6 = vmul.f32 %v4644_v2, %v4542_v45 }
 0x486   : >> { %851 = vmatprep.subr.mxu1 %v806_v8  ;;  %v792_v10 = vpop.permute.xlu1 %791  ;;  %v762_v55 = vpop.permute.xlu0 %761 }
 0x487   : >> { %v795_v11 = vsel %vm594_vm3, %v792_v10, %v794_v56  ;;  %v796_v16 = vsel %vm594_vm3, %v794_v56, %v792_v10  ;;  %852 = vmatpush1.msra.mxu1 %v805_v9  ;;  %v907_v10 = vmul.f32 %v4649_v3, %v4542_v45  ;;  %v4662_v45 = vld [vmem:[%s6205_s11] sm:$0xff] }
 0x488   : >> { %v798_v17 = vmul.f32 %v796_v16, %v4467_v59  ;;  %v797_v20 = vmul.f32 %v795_v11, %v4469_v60 }
 0x48a   : >> { %853 = vmatprep.subr.mxu1 %v798_v17  ;;  %v784_v24 = vpop.permute.xlu1 %783 }
 0x48b   : >> { %v787_v25 = vsel %vm583_vm4, %v784_v24, %v786_v7  ;;  %v788_v26 = vsel %vm583_vm4, %v786_v7, %v784_v24  ;;  %854 = vmatpush1.msra.mxu1 %v797_v20 }
 0x48c   : >> { %855 = vmatprep.subr.mxu1 %v758_v37  ;;  %v790_v27 = vmul.f32 %v787_v25, %v4478_v4  ;;  %v789_v28 = vmul.f32 %v788_v26, %v4480_v5 }
 0x48d   : >> { %856 = vmatpush1.msra.mxu1 %v757_v36 }
 0x48e   : >> { %857 = vmatprep.subr.mxu1 %v790_v27  ;;  %v776_v35 = vpop.permute.xlu1 %775 }
 0x48f   : >> { %v779_v38 = vsel %vm572_vm5, %v776_v35, %v778_v21  ;;  %v780_v39 = vsel %vm572_vm5, %v778_v21, %v776_v35  ;;  %858 = vmatpush1.msra.mxu1 %v789_v28 }
 0x490   : >> { %v782_v47 = vmul.f32 %v779_v38, %v4491_v12  ;;  %v781_v49 = vmul.f32 %v780_v39, %v4493_v13 }
 0x492   : >> { %859 = vmatprep.subr.mxu1 %v782_v47  ;;  %v768_v37 = vpop.permute.xlu1 %767 }
 0x493   : >> { %v771_v50 = vsel %vm561_vm6, %v768_v37, %v770_v40  ;;  %v772_v36 = vsel %vm561_vm6, %v770_v40, %v768_v37  ;;  %860 = vmatpush1.msra.mxu1 %v781_v49 }
 0x494   : >> { %v774_v53 = vmul.f32 %v771_v50, %v4502_v22  ;;  %v773_v54 = vmul.f32 %v772_v36, %v4504_v23  ;;  %v4668_v36 = vld [vmem:[%s6206_s12] sm:$0xff] }
 0x496   : >> { %861 = vmatprep.subr.mxu1 %v774_v53  ;;  %v760_v56 = vpop.permute.xlu1 %759 }
 0x497   : >> { %v763_v57 = vsel %vm550_vm7, %v760_v56, %v762_v55  ;;  %v764_v58 = vsel %vm550_vm7, %v762_v55, %v760_v56  ;;  %862 = vmatpush1.msra.mxu1 %v773_v54 }
 0x498   : >> { %v766_v61 = vmul.f32 %v763_v57, %v4513_v30  ;;  %v765_v62 = vmul.f32 %v764_v58, %v4515_v31 }
 0x49a   : >> { %863 = vmatprep.subr.mxu1 %v766_v61 }
 0x49b   : >> { %864 = vmatpush1.msra.mxu1 %v765_v62 }
 0x49c   : >> { %3768 = vmatmul.mubr.msk.f32.vlgmr.msra.gmra.mxu1 %vm641_vm8, %v4636_v63 }
 0x49d   : >> { %1285 = vmatprep.mubr.f32.mxu1 %v4179_v29 }
 0x4a3   : >> { %v4653_v7 = vpop.permute.xlu1 %827 }
 0x55c   : >> { %v899_v8 = vpop.f32.mrf.mxu1 }
 0x55d   : >> { %v900_v9 = vadd.f32 %v899_v8, %v4653_v7 }
 0x55e   : >> { %v901_v11 = vpop.f32.mrf.mxu1 }
 0x55f   : >> { %v908_v16 = vadd.f32 %v906_v6, %v900_v9  ;;  %v902_v17 = vadd.f32 %v901_v11, %v4653_v7 }
 0x561   : >> { %v909_v20 = vadd.f32 %v907_v10, %v902_v17  ;;  %v914_v24 = vmul.f32 %v908_v16, %v908_v16 }
 0x563   : >> { %v910_v21 = vadd.f32 %v909_v20, %v908_v16  ;;  %v915_v25 = vmul.f32 %v909_v20, %v909_v20 }
 0x565   : >> { %911 = vadd.xlane.f32.xlu0 %v910_v21  ;;  %v916_v26 = vadd.f32 %v915_v25, %v914_v24 }
 0x567   : >> { %917 = vadd.xlane.f32.xlu1 %v916_v26 }
 0x5ee   : >> { %v912_v27 = vpop.xlane.xlu0 %911 }
 0x5ef   : >> { %v913_v28 = vmul.f32 0.00390625, %v912_v27 }
 0x5f0   : >> { %v918_v35 = vpop.xlane.xlu1 %917 }
 0x5f1   : >> { %v920_v38 = vmul.f32 %v913_v28, %v913_v28  ;;  %v919_v39 = vmul.f32 0.00390625, %v918_v35 }
 0x5f3   : >> { %v921_v40 = vsub.f32 %v919_v39, %v920_v38 }
 0x5f5   : >> { %v922_v47 = vmax.f32 %v921_v40, 0.0 }
 0x5f7   : >> { %v924_v49 = vadd.f32 1e-05, %v922_v47 }
 0x5f9   : >> { %3892 = vrsqrt.f32 %v924_v49 }
 0x606   : >> { %v3893_v37 = vpop.eup %3892 }
 0x607   : >> { %v926_v50 = vmul.f32 %v3893_v37, %v4662_v45 }
 0x609   : >> { %932 = vperm.xlu0 %3887, %v926_v50   ;;  %v928_v53 = vmul.f32 %v926_v50, %v913_v28 }
 0x60b   : >> { %v929_v54 = vsub.f32 %v4668_v36, %v928_v53 }
 0x60d   : >> { %939 = vperm.xlu1 %3886, %v929_v54  }
 0x684   : >> { %v933_v55 = vpop.permute.xlu0 %932 }
 0x685   : >> { %v935_v56 = vmul.f32 %v933_v55, %v908_v16  ;;  %v936_v57 = vmul.f32 %v933_v55, %v909_v20 }
 0x688   : >> { %v940_v58 = vpop.permute.xlu1 %939 }
 0x689   : >> { %v4671_v61 = vadd.f32 %v940_v58, %v935_v56  ;;  %v4673_v62 = vadd.f32 %v940_v58, %v936_v57 }
 0x68b   : >> { %v945_v6 = vmul.f32 0.0625, %v4671_v61  ;;  %v946_v8 = vmul.f32 0.0625, %v4673_v62 }
 0x68d   : >> { %v947_v9 = vadd.f32 %v4160_v0, %v945_v6  ;;  %v948_v10 = vadd.f32 %v4156_v1, %v946_v8 }
 0x68f   : >> { %v949_v11 = vadd.f32 %v948_v10, %v947_v9  ;;  %v953_v17 = vmul.f32 %v947_v9, %v947_v9  ;;  %v954_v21 = vmul.f32 %v948_v10, %v948_v10 }
 0x691   : >> { %950 = vadd.xlane.f32.xlu0 %v949_v11  ;;  %v955_v24 = vadd.f32 %v954_v21, %v953_v17 }
 0x693   : >> { %956 = vadd.xlane.f32.xlu1 %v955_v24 }
 0x71a   : >> { %v951_v16 = vpop.xlane.xlu0 %950 }
 0x71b   : >> { %v952_v20 = vmul.f32 0.00390625, %v951_v16 }
 0x71c   : >> { %v957_v25 = vpop.xlane.xlu1 %956 }
 0x71d   : >> { %v959_v26 = vmul.f32 %v952_v20, %v952_v20  ;;  %v958_v27 = vmul.f32 0.00390625, %v957_v25 }
 0x71f   : >> { %v960_v28 = vsub.f32 %v958_v27, %v959_v26 }
 0x721   : >> { %v961_v35 = vmax.f32 %v960_v28, 0.0 }
 0x723   : >> { %v962_v38 = vadd.f32 1e-05, %v961_v35 }
 0x725   : >> { %3894 = vrsqrt.f32 %v962_v38 }
 0x732   : >> { %v3895_v39 = vpop.eup %3894 }
 0x733   : >> { %v964_v40 = vmul.f32 %v3895_v39, %v4379_v15 }
 0x735   : >> { %969 = vperm.xlu0 %3887, %v964_v40   ;;  %v965_v47 = vmul.f32 %v964_v40, %v952_v20 }
 0x737   : >> { %v966_v49 = vsub.f32 %v4385_v18, %v965_v47 }
 0x739   : >> { %976 = vperm.xlu1 %3886, %v966_v49  }
 0x7b0   : >> { %v970_v37 = vpop.permute.xlu0 %969 }
 0x7b1   : >> { %v972_v50 = vmul.f32 %v970_v37, %v947_v9  ;;  %v973_v53 = vmul.f32 %v970_v37, %v948_v10 }
 0x7b4   : >> { %v977_v54 = vpop.permute.xlu1 %976 }
 0x7b5   : >> { %v979_v55 = vadd.f32 %v977_v54, %v972_v50  ;;  %v980_v56 = vadd.f32 %v977_v54, %v973_v53 }
 0x7b7   : >> { %v981_v57 = vmax.f32 %v979_v55, 0.0  ;;  %v982_v58 = vmax.f32 %v980_v56, 0.0 }
 0x7b9   : >> { %1041 = vrot.lane.b32.xlu1 %v982_v58, %s6263_s2  ;;  %1039 = vrot.lane.b32.xlu0 %v981_v57, %s6263_s2 }
 0x7bd   : >> { %1033 = vrot.lane.b32.xlu1 %v982_v58, %s6258_s18  ;;  %1031 = vrot.lane.b32.xlu0 %v981_v57, %s6258_s18 }
 0x7c1   : >> { %1025 = vrot.lane.b32.xlu1 %v982_v58, %s6264_s28  ;;  %1023 = vrot.lane.b32.xlu0 %v981_v57, %s6264_s28 }
 0x7c5   : >> { %1017 = vrot.lane.b32.xlu1 %v982_v58, %s6256_s25  ;;  %1015 = vrot.lane.b32.xlu0 %v981_v57, %s6256_s25 }
 0x7c9   : >> { %1009 = vrot.lane.b32.xlu1 %v982_v58, %s6257_s27  ;;  %1007 = vrot.lane.b32.xlu0 %v981_v57, %s6257_s27 }
 0x7cd   : >> { %1001 = vrot.lane.b32.xlu1 %v982_v58, %s6259_s19  ;;  %999 = vrot.lane.b32.xlu0 %v981_v57, %s6259_s19 }
 0x7d1   : >> { %993 = vrot.lane.b32.xlu1 %v982_v58, %s6260_s15  ;;  %991 = vrot.lane.b32.xlu0 %v981_v57, %s6260_s15 }
 0x7d5   : >> { %985 = vrot.lane.b32.xlu1 %v982_v58, %s6261_s22  ;;  %983 = vrot.lane.b32.xlu0 %v981_v57, %s6261_s22 }
 0x82b   : >> { %v1042_v15 = vpop.permute.xlu1 %1041  ;;  %v1040_v18 = vpop.permute.xlu0 %1039 }
 0x82c   : >> { %v1043_v6 = vsel %vm627_vm0, %v1040_v18, %v1042_v15  ;;  %v1044_v8 = vsel %vm627_vm0, %v1042_v15, %v1040_v18 }
 0x82d   : >> { %v1045_v9 = vmul.f32 %v1043_v6, %v4436_v34  ;;  %v1046_v10 = vmul.f32 %v1044_v8, %v4434_v33 }
 0x82f   : >> { %v1034_v11 = vpop.permute.xlu1 %1033  ;;  %1061 = vmatprep.subr.mxu0 %v1046_v10  ;;  %v1032_v17 = vpop.permute.xlu0 %1031 }
 0x830   : >> { %v1035_v21 = vsel %vm616_vm1, %v1032_v17, %v1034_v11  ;;  %v1036_v24 = vsel %vm616_vm1, %v1034_v11, %v1032_v17  ;;  %1062 = vmatpush1.msra.mxu0 %v1045_v9 }
 0x831   : >> { %v1037_v16 = vmul.f32 %v1035_v21, %v4447_v43  ;;  %v1038_v20 = vmul.f32 %v1036_v24, %v4445_v42 }
 0x833   : >> { %v1026_v25 = vpop.permute.xlu1 %1025  ;;  %1063 = vmatprep.subr.mxu0 %v1038_v20  ;;  %v1024_v26 = vpop.permute.xlu0 %1023 }
 0x834   : >> { %v1027_v27 = vsel %vm605_vm2, %v1024_v26, %v1026_v25  ;;  %v1028_v28 = vsel %vm605_vm2, %v1026_v25, %v1024_v26  ;;  %1064 = vmatpush1.msra.mxu0 %v1037_v16 }
 0x835   : >> { %v1029_v35 = vmul.f32 %v1027_v27, %v4458_v52  ;;  %v1030_v38 = vmul.f32 %v1028_v28, %v4456_v51 }
 0x837   : >> { %v1018_v39 = vpop.permute.xlu1 %1017  ;;  %1065 = vmatprep.subr.mxu0 %v1030_v38  ;;  %v1016_v40 = vpop.permute.xlu0 %1015 }
 0x838   : >> { %v1019_v47 = vsel %vm594_vm3, %v1016_v40, %v1018_v39  ;;  %v1020_v49 = vsel %vm594_vm3, %v1018_v39, %v1016_v40  ;;  %1066 = vmatpush1.msra.mxu0 %v1029_v35  ;;  %v4749_v39 = vstv %s944_s0  ;;  %s3248_s0 = sadd.f32 0.125, %s5434_s21 }
 0x839   : >> { %v1021_v37 = vmul.f32 %v1019_v47, %v4469_v60  ;;  %v1022_v50 = vmul.f32 %v1020_v49, %v4467_v59  ;;  %v4753_v40 = vmul.f32 %v4749_v39, %v4539_v44 }
 0x83b   : >> { %v1010_v53 = vpop.permute.xlu1 %1009  ;;  %1067 = vmatprep.subr.mxu0 %v1022_v50  ;;  %v1008_v54 = vpop.permute.xlu0 %1007 }
 0x83c   : >> { %v1011_v55 = vsel %vm583_vm4, %v1008_v54, %v1010_v53  ;;  %v1012_v56 = vsel %vm583_vm4, %v1010_v53, %v1008_v54  ;;  %1068 = vmatpush1.msra.mxu0 %v1021_v37  ;;  %v4758_v37 = vmul.f32 %v4749_v39, %v4547_v46 }
 0x83d   : >> { %v1013_v15 = vmul.f32 %v1012_v56, %v4480_v5  ;;  %1069 = vmatprep.subr.mxu0 %v982_v58  ;;  %v1014_v18 = vmul.f32 %v1011_v55, %v4478_v4 }
 0x83e   : >> { %1070 = vmatpush1.msra.mxu0 %v981_v57 }
 0x83f   : >> { %v1002_v6 = vpop.permute.xlu1 %1001  ;;  %1071 = vmatprep.subr.mxu0 %v1014_v18  ;;  %v1000_v8 = vpop.permute.xlu0 %999 }
 0x840   : >> { %v1003_v9 = vsel %vm572_vm5, %v1000_v8, %v1002_v6  ;;  %v1004_v10 = vsel %vm572_vm5, %v1002_v6, %v1000_v8  ;;  %1072 = vmatpush1.msra.mxu0 %v1013_v15 }
 0x841   : >> { %v1005_v11 = vmul.f32 %v1004_v10, %v4493_v13  ;;  %v1006_v17 = vmul.f32 %v1003_v9, %v4491_v12 }
 0x843   : >> { %v994_v21 = vpop.permute.xlu1 %993  ;;  %1073 = vmatprep.subr.mxu0 %v1006_v17  ;;  %v992_v58 = vpop.permute.xlu0 %991 }
 0x844   : >> { %v995_v57 = vsel %vm561_vm6, %v992_v58, %v994_v21  ;;  %v996_v24 = vsel %vm561_vm6, %v994_v21, %v992_v58  ;;  %1074 = vmatpush1.msra.mxu0 %v1005_v11 }
 0x845   : >> { %v997_v16 = vmul.f32 %v996_v24, %v4504_v23  ;;  %v998_v20 = vmul.f32 %v995_v57, %v4502_v22 }
 0x847   : >> { %v986_v25 = vpop.permute.xlu1 %985  ;;  %1075 = vmatprep.subr.mxu0 %v998_v20  ;;  %v984_v26 = vpop.permute.xlu0 %983 }
 0x848   : >> { %v987_v27 = vsel %vm550_vm7, %v984_v26, %v986_v25  ;;  %v988_v28 = vsel %vm550_vm7, %v986_v25, %v984_v26  ;;  %1076 = vmatpush1.msra.mxu0 %v997_v16 }
 0x849   : >> { %v989_v35 = vmul.f32 %v988_v28, %v4515_v31  ;;  %v990_v38 = vmul.f32 %v987_v27, %v4513_v30 }
 0x84b   : >> { %1077 = vmatprep.subr.mxu0 %v990_v38 }
 0x84c   : >> { %1078 = vmatpush1.msra.mxu0 %v989_v35 }
 0x84d   : >> { %3769 = vmatmul.mubr.msk.f32.vlgmr.msra.gmra.mxu0 %vm641_vm8, %v4526_v41 }
 0x84e   : >> { %1494 = vmatprep.mubr.f32.mxu0 %v4179_v29 }
 0x90d   : >> { %v1113_v47 = vpop.f32.mrf.mxu0 }
 0x90e   : >> { %v1114_v49 = vadd.f32 %v1113_v47, %v4551_v48 }
 0x90f   : >> { %v1115_v50 = vpop.f32.mrf.mxu0 }
 0x910   : >> { %v1121_v53 = vadd.f32 %v4753_v40, %v1114_v49  ;;  %v1116_v41 = vadd.f32 %v1115_v50, %v4551_v48 }
 0x912   : >> { %v1122_v54 = vadd.f32 %v4758_v37, %v1116_v41  ;;  %v1127_v56 = vmul.f32 %v1121_v53, %v1121_v53 }
 0x914   : >> { %v1123_v55 = vadd.f32 %v1122_v54, %v1121_v53  ;;  %v1128_v15 = vmul.f32 %v1122_v54, %v1122_v54 }
 0x916   : >> { %1124 = vadd.xlane.f32.xlu0 %v1123_v55  ;;  %v1129_v44 = vadd.f32 %v1128_v15, %v1127_v56 }
 0x918   : >> { %1130 = vadd.xlane.f32.xlu1 %v1129_v44 }
 0x99f   : >> { %v1125_v18 = vpop.xlane.xlu0 %1124 }
 0x9a0   : >> { %v1126_v6 = vmul.f32 0.00390625, %v1125_v18 }
 0x9a1   : >> { %v1131_v8 = vpop.xlane.xlu1 %1130 }
 0x9a2   : >> { %v1133_v9 = vmul.f32 %v1126_v6, %v1126_v6  ;;  %v1132_v10 = vmul.f32 0.00390625, %v1131_v8 }
 0x9a4   : >> { %v1134_v46 = vsub.f32 %v1132_v10, %v1133_v9 }
 0x9a6   : >> { %v1135_v11 = vmax.f32 %v1134_v46, 0.0 }
 0x9a8   : >> { %v1136_v17 = vadd.f32 1e-05, %v1135_v11 }
 0x9aa   : >> { %3896 = vrsqrt.f32 %v1136_v17 }
 0x9b7   : >> { %v3897_v21 = vpop.eup %3896 }
 0x9b8   : >> { %v1138_v58 = vmul.f32 %v3897_v21, %v4560_v14 }
 0x9ba   : >> { %1143 = vperm.xlu0 %3887, %v1138_v58   ;;  %v1139_v57 = vmul.f32 %v1138_v58, %v1126_v6 }
 0x9bc   : >> { %v1140_v24 = vsub.f32 %v4566_v19, %v1139_v57 }
 0x9be   : >> { %1150 = vperm.xlu1 %3886, %v1140_v24  }
 0xa35   : >> { %v1144_v16 = vpop.permute.xlu0 %1143 }
 0xa36   : >> { %v1146_v20 = vmul.f32 %v1144_v16, %v1121_v53  ;;  %v1147_v25 = vmul.f32 %v1144_v16, %v1122_v54 }
 0xa39   : >> { %v1151_v26 = vpop.permute.xlu1 %1150 }
 0xa3a   : >> { %v1153_v27 = vadd.f32 %v1151_v26, %v1146_v20  ;;  %v1154_v28 = vadd.f32 %v1151_v26, %v1147_v25 }
 0xa3c   : >> { %v1155_v35 = vmax.f32 %v1153_v27, 0.0  ;;  %v1156_v38 = vmax.f32 %v1154_v28, 0.0 }
 0xa3e   : >> { %1215 = vrot.lane.b32.xlu1 %v1156_v38, %s6263_s2  ;;  %1213 = vrot.lane.b32.xlu0 %v1155_v35, %s6263_s2 }
 0xa42   : >> { %1207 = vrot.lane.b32.xlu1 %v1156_v38, %s6258_s18  ;;  %1205 = vrot.lane.b32.xlu0 %v1155_v35, %s6258_s18 }
 0xa46   : >> { %1199 = vrot.lane.b32.xlu1 %v1156_v38, %s6264_s28  ;;  %1197 = vrot.lane.b32.xlu0 %v1155_v35, %s6264_s28 }
 0xa4a   : >> { %1191 = vrot.lane.b32.xlu1 %v1156_v38, %s6256_s25  ;;  %1189 = vrot.lane.b32.xlu0 %v1155_v35, %s6256_s25 }
 0xa4e   : >> { %1183 = vrot.lane.b32.xlu1 %v1156_v38, %s6257_s27  ;;  %1181 = vrot.lane.b32.xlu0 %v1155_v35, %s6257_s27 }
 0xa52   : >> { %1175 = vrot.lane.b32.xlu1 %v1156_v38, %s6259_s19  ;;  %1173 = vrot.lane.b32.xlu0 %v1155_v35, %s6259_s19 }
 0xa56   : >> { %1167 = vrot.lane.b32.xlu1 %v1156_v38, %s6260_s15  ;;  %1165 = vrot.lane.b32.xlu0 %v1155_v35, %s6260_s15 }
 0xa5a   : >> { %1159 = vrot.lane.b32.xlu1 %v1156_v38, %s6261_s22  ;;  %1157 = vrot.lane.b32.xlu0 %v1155_v35, %s6261_s22 }
 0xab0   : >> { %v1216_v14 = vpop.permute.xlu1 %1215  ;;  %v1214_v19 = vpop.permute.xlu0 %1213 }
 0xab1   : >> { %v1217_v47 = vsel %vm627_vm0, %v1214_v19, %v1216_v14  ;;  %v1218_v49 = vsel %vm627_vm0, %v1216_v14, %v1214_v19 }
 0xab2   : >> { %v1219_v50 = vmul.f32 %v1217_v47, %v4436_v34  ;;  %v1220_v53 = vmul.f32 %v1218_v49, %v4434_v33 }
 0xab4   : >> { %v1208_v41 = vpop.permute.xlu1 %1207  ;;  %1235 = vmatprep.subr.mxu1 %v1220_v53  ;;  %v1206_v54 = vpop.permute.xlu0 %1205  ;;  %v4839_v53 = vmul.f32 %v4749_v39, %v4649_v3 }
 0xab5   : >> { %v1209_v55 = vsel %vm616_vm1, %v1206_v54, %v1208_v41  ;;  %v1210_v56 = vsel %vm616_vm1, %v1208_v41, %v1206_v54  ;;  %1236 = vmatpush1.msra.mxu1 %v1219_v50 }
 0xab6   : >> { %v1211_v15 = vmul.f32 %v1209_v55, %v4447_v43  ;;  %v1212_v44 = vmul.f32 %v1210_v56, %v4445_v42 }
 0xab8   : >> { %v1200_v18 = vpop.permute.xlu1 %1199  ;;  %1237 = vmatprep.subr.mxu1 %v1212_v44  ;;  %v1198_v6 = vpop.permute.xlu0 %1197 }
 0xab9   : >> { %v1201_v33 = vsel %vm605_vm2, %v1198_v6, %v1200_v18  ;;  %v1202_v34 = vsel %vm605_vm2, %v1200_v18, %v1198_v6  ;;  %1238 = vmatpush1.msra.mxu1 %v1211_v15 }
 0xaba   : >> { %v1203_v8 = vmul.f32 %v1201_v33, %v4458_v52  ;;  %v1204_v9 = vmul.f32 %v1202_v34, %v4456_v51 }
 0xabc   : >> { %v1192_v10 = vpop.permute.xlu1 %1191  ;;  %1239 = vmatprep.subr.mxu1 %v1204_v9  ;;  %v1190_v46 = vpop.permute.xlu0 %1189 }
 0xabd   : >> { %v1193_v42 = vsel %vm594_vm3, %v1190_v46, %v1192_v10  ;;  %v1194_v43 = vsel %vm594_vm3, %v1192_v10, %v1190_v46  ;;  %1240 = vmatpush1.msra.mxu1 %v1203_v8 }
 0xabe   : >> { %v1195_v11 = vmul.f32 %v1193_v42, %v4469_v60  ;;  %v1196_v17 = vmul.f32 %v1194_v43, %v4467_v59 }
 0xac0   : >> { %v1184_v21 = vpop.permute.xlu1 %1183  ;;  %1241 = vmatprep.subr.mxu1 %v1196_v17  ;;  %v1182_v58 = vpop.permute.xlu0 %1181 }
 0xac1   : >> { %v1185_v51 = vsel %vm583_vm4, %v1182_v58, %v1184_v21  ;;  %v1186_v52 = vsel %vm583_vm4, %v1184_v21, %v1182_v58  ;;  %1242 = vmatpush1.msra.mxu1 %v1195_v11 }
 0xac2   : >> { %v1187_v57 = vmul.f32 %v1186_v52, %v4480_v5  ;;  %1243 = vmatprep.subr.mxu1 %v1156_v38  ;;  %v1188_v24 = vmul.f32 %v1185_v51, %v4478_v4 }
 0xac3   : >> { %1244 = vmatpush1.msra.mxu1 %v1155_v35 }
 0xac4   : >> { %v1176_v16 = vpop.permute.xlu1 %1175  ;;  %1245 = vmatprep.subr.mxu1 %v1188_v24  ;;  %v1174_v60 = vpop.permute.xlu0 %1173 }
 0xac5   : >> { %v1177_v59 = vsel %vm572_vm5, %v1174_v60, %v1176_v16  ;;  %v1178_v20 = vsel %vm572_vm5, %v1176_v16, %v1174_v60  ;;  %1246 = vmatpush1.msra.mxu1 %v1187_v57 }
 0xac6   : >> { %v1179_v25 = vmul.f32 %v1178_v20, %v4493_v13  ;;  %v1180_v26 = vmul.f32 %v1177_v59, %v4491_v12 }
 0xac8   : >> { %v1168_v27 = vpop.permute.xlu1 %1167  ;;  %1247 = vmatprep.subr.mxu1 %v1180_v26  ;;  %v1166_v5 = vpop.permute.xlu0 %1165 }
 0xac9   : >> { %v1169_v4 = vsel %vm561_vm6, %v1166_v5, %v1168_v27  ;;  %v1170_v28 = vsel %vm561_vm6, %v1168_v27, %v1166_v5  ;;  %1248 = vmatpush1.msra.mxu1 %v1179_v25 }
 0xaca   : >> { %v1171_v35 = vmul.f32 %v1170_v28, %v4504_v23  ;;  %v1172_v38 = vmul.f32 %v1169_v4, %v4502_v22  ;;  %v4834_v22 = vmul.f32 %v4749_v39, %v4644_v2 }
 0xacc   : >> { %v1160_v14 = vpop.permute.xlu1 %1159  ;;  %1249 = vmatprep.subr.mxu1 %v1172_v38  ;;  %v1158_v19 = vpop.permute.xlu0 %1157  ;;  %v4857_v38 = vld [vmem:[%s6201_s7] sm:$0xff] }
 0xacd   : >> { %v1161_v12 = vsel %vm550_vm7, %v1158_v19, %v1160_v14  ;;  %v1162_v13 = vsel %vm550_vm7, %v1160_v14, %v1158_v19  ;;  %1250 = vmatpush1.msra.mxu1 %v1171_v35 }
 0xace   : >> { %v1163_v47 = vmul.f32 %v1162_v13, %v4515_v31  ;;  %v1164_v49 = vmul.f32 %v1161_v12, %v4513_v30  ;;  %v4863_v12 = vld [vmem:[%s6202_s8] sm:$0xff] }
 0xad0   : >> { %1251 = vmatprep.subr.mxu1 %v1164_v49 }
 0xad1   : >> { %1252 = vmatpush1.msra.mxu1 %v1163_v47 }
 0xad2   : >> { %3770 = vmatmul.mubr.msk.f32.vlgmr.msra.gmra.mxu1 %vm641_vm8, %v4636_v63 }
 0xad3   : >> { %1665 = vmatprep.mubr.f32.mxu1 %v4179_v29 }
 0xb92   : >> { %v1287_v23 = vpop.f32.mrf.mxu1 }
 0xb93   : >> { %v1288_v50 = vadd.f32 %v1287_v23, %v4653_v7 }
 0xb94   : >> { %v1289_v31 = vpop.f32.mrf.mxu1 }
 0xb95   : >> { %v1294_v30 = vadd.f32 %v4834_v22, %v1288_v50  ;;  %v1290_v41 = vadd.f32 %v1289_v31, %v4653_v7 }
 0xb97   : >> { %v1295_v63 = vadd.f32 %v4839_v53, %v1290_v41  ;;  %v1300_v55 = vmul.f32 %v1294_v30, %v1294_v30 }
 0xb99   : >> { %v1296_v54 = vadd.f32 %v1295_v63, %v1294_v30  ;;  %v1301_v56 = vmul.f32 %v1295_v63, %v1295_v63 }
 0xb9b   : >> { %1297 = vadd.xlane.f32.xlu0 %v1296_v54  ;;  %v1302_v2 = vadd.f32 %v1301_v56, %v1300_v55 }
 0xb9d   : >> { %1303 = vadd.xlane.f32.xlu1 %v1302_v2 }
 0xc24   : >> { %v1298_v15 = vpop.xlane.xlu0 %1297 }
 0xc25   : >> { %v1299_v44 = vmul.f32 0.00390625, %v1298_v15  ;;  %v4906_v15 = vld [vmem:[#allocation5 + $0x80] sm:$0xff] }
 0xc26   : >> { %v1304_v18 = vpop.xlane.xlu1 %1303 }
 0xc27   : >> { %v1306_v6 = vmul.f32 %v1299_v44, %v1299_v44  ;;  %v1305_v33 = vmul.f32 0.00390625, %v1304_v18  ;;  %v4909_v18 = vld [vmem:[#allocation5 + $0x88] sm:$0xff] }
 0xc29   : >> { %v1307_v3 = vsub.f32 %v1305_v33, %v1306_v6 }
 0xc2b   : >> { %v1308_v39 = vmax.f32 %v1307_v3, 0.0 }
 0xc2d   : >> { %v1309_v34 = vadd.f32 1e-05, %v1308_v39 }
 0xc2f   : >> { %3898 = vrsqrt.f32 %v1309_v34 }
 0xc3c   : >> { %v3899_v8 = vpop.eup %3898 }
 0xc3d   : >> { %v1311_v9 = vmul.f32 %v3899_v8, %v4662_v45  ;;  %v4916_v8 = vld [vmem:[#allocation5 + $0x70] sm:$0xff] }
 0xc3f   : >> { %1316 = vperm.xlu0 %3887, %v1311_v9   ;;  %v1312_v10 = vmul.f32 %v1311_v9, %v1299_v44 }
 0xc41   : >> { %v1313_v46 = vsub.f32 %v4668_v36, %v1312_v10  ;;  %v4919_v10 = vld [vmem:[#allocation5 + $0x78] sm:$0xff] }
 0xc43   : >> { %1323 = vperm.xlu1 %3886, %v1313_v46  }
 0xcba   : >> { %v1317_v42 = vpop.permute.xlu0 %1316 }
 0xcbb   : >> { %v1319_v43 = vmul.f32 %v1317_v42, %v1294_v30  ;;  %v1320_v11 = vmul.f32 %v1317_v42, %v1295_v63 }
 0xcbe   : >> { %v1324_v17 = vpop.permute.xlu1 %1323 }
 0xcbf   : >> { %v4846_v21 = vadd.f32 %v1324_v17, %v1319_v43  ;;  %v4848_v58 = vadd.f32 %v1324_v17, %v1320_v11 }
 0xcc1   : >> { %v1328_v51 = vmul.f32 0.0625, %v4846_v21  ;;  %v1329_v52 = vmul.f32 0.0625, %v4848_v58 }
 0xcc3   : >> { %v1330_v57 = vadd.f32 %v4160_v0, %v1328_v51  ;;  %v1331_v45 = vadd.f32 %v4156_v1, %v1329_v52  ;;  %v4926_v51 = vld [vmem:[#allocation5 + $0x60] sm:$0xff] }
 0xcc5   : >> { %v1332_v24 = vadd.f32 %v1331_v45, %v1330_v57  ;;  %v1336_v16 = vmul.f32 %v1330_v57, %v1330_v57  ;;  %v1337_v36 = vmul.f32 %v1331_v45, %v1331_v45 }
 0xcc7   : >> { %1333 = vadd.xlane.f32.xlu0 %v1332_v24  ;;  %v1338_v60 = vadd.f32 %v1337_v36, %v1336_v16 }
 0xcc9   : >> { %1339 = vadd.xlane.f32.xlu1 %v1338_v60 }
 0xd50   : >> { %v1334_v59 = vpop.xlane.xlu0 %1333 }
 0xd51   : >> { %v1335_v20 = vmul.f32 0.00390625, %v1334_v59  ;;  %v4936_v59 = vld [vmem:[#allocation5 + $0x50] sm:$0xff] }
 0xd52   : >> { %v1340_v25 = vpop.xlane.xlu1 %1339 }
 0xd53   : >> { %v1342_v26 = vmul.f32 %v1335_v20, %v1335_v20  ;;  %v1341_v27 = vmul.f32 0.00390625, %v1340_v25  ;;  %v4939_v25 = vld [vmem:[#allocation5 + $0x58] sm:$0xff] }
 0xd55   : >> { %v1343_v5 = vsub.f32 %v1341_v27, %v1342_v26 }
 0xd57   : >> { %v1344_v4 = vmax.f32 %v1343_v5, 0.0 }
 0xd59   : >> { %v1345_v28 = vadd.f32 1e-05, %v1344_v4 }
 0xd5b   : >> { %3900 = vrsqrt.f32 %v1345_v28 }
 0xd68   : >> { %v3901_v35 = vpop.eup %3900 }
 0xd69   : >> { %v1347_v14 = vmul.f32 %v4857_v38, %v3901_v35  ;;  %v4946_v35 = vld [vmem:[#allocation5 + $0x30] sm:$0xff] }
 0xd6b   : >> { %1352 = vperm.xlu0 %3887, %v1347_v14   ;;  %v1348_v19 = vmul.f32 %v1347_v14, %v1335_v20 }
 0xd6d   : >> { %v1349_v13 = vsub.f32 %v4863_v12, %v1348_v19  ;;  %v4950_v19 = vld [vmem:[#allocation5 + $0x38] sm:$0xff] }
 0xd6f   : >> { %1359 = vperm.xlu1 %3886, %v1349_v13  }
 0xde6   : >> { %v1353_v47 = vpop.permute.xlu0 %1352 }
 0xde7   : >> { %v1355_v49 = vmul.f32 %v1353_v47, %v1330_v57  ;;  %v1356_v23 = vmul.f32 %v1353_v47, %v1331_v45  ;;  %v4929_v57 = vld [vmem:[#allocation5 + $0x68] sm:$0xff] }
 0xdea   : >> { %v1360_v50 = vpop.permute.xlu1 %1359 }
 0xdeb   : >> { %v1362_v31 = vadd.f32 %v1360_v50, %v1355_v49  ;;  %v1363_v30 = vadd.f32 %v1360_v50, %v1356_v23 }
 0xded   : >> { %v4866_v41 = vmax.f32 %v1362_v31, 0.0  ;;  %v4868_v63 = vmax.f32 %v1363_v30, 0.0  ;;  %v4958_v31 = vld [vmem:[#allocation5 + $0x20] sm:$0xff] }
 0xdef   : >> { %1424 = vrot.lane.b32.xlu1 %v4868_v63, %s6263_s2  ;;  %1422 = vrot.lane.b32.xlu0 %v4866_v41, %s6263_s2 }
 0xdf3   : >> { %1416 = vrot.lane.b32.xlu1 %v4868_v63, %s6258_s18  ;;  %1414 = vrot.lane.b32.xlu0 %v4866_v41, %s6258_s18 }
 0xdf7   : >> { %1408 = vrot.lane.b32.xlu1 %v4868_v63, %s6264_s28  ;;  %1406 = vrot.lane.b32.xlu0 %v4866_v41, %s6264_s28 }
 0xdfb   : >> { %1400 = vrot.lane.b32.xlu1 %v4868_v63, %s6256_s25  ;;  %1398 = vrot.lane.b32.xlu0 %v4866_v41, %s6256_s25 }
 0xdff   : >> { %1392 = vrot.lane.b32.xlu1 %v4868_v63, %s6257_s27  ;;  %1390 = vrot.lane.b32.xlu0 %v4866_v41, %s6257_s27 }
 0xe03   : >> { %1384 = vrot.lane.b32.xlu1 %v4868_v63, %s6259_s19  ;;  %1382 = vrot.lane.b32.xlu0 %v4866_v41, %s6259_s19 }
 0xe07   : >> { %1376 = vrot.lane.b32.xlu1 %v4868_v63, %s6260_s15  ;;  %1374 = vrot.lane.b32.xlu0 %v4866_v41, %s6260_s15 }
 0xe0b   : >> { %1368 = vrot.lane.b32.xlu1 %v4868_v63, %s6261_s22  ;;  %1366 = vrot.lane.b32.xlu0 %v4866_v41, %s6261_s22 }
 0xe61   : >> { %v1425_v54 = vpop.permute.xlu1 %1424  ;;  %v1423_v55 = vpop.permute.xlu0 %1422 }
 0xe62   : >> { %v1426_v56 = vsel %vm627_vm0, %v1423_v55, %v1425_v54  ;;  %v1427_v2 = vsel %vm627_vm0, %v1425_v54, %v1423_v55 }
 0xe63   : >> { %v1428_v44 = vmul.f32 %v4906_v15, %v1426_v56  ;;  %v1429_v6 = vmul.f32 %v4909_v18, %v1427_v2 }
 0xe65   : >> { %v1417_v33 = vpop.permute.xlu1 %1416  ;;  %1444 = vmatprep.subr.mxu0 %v1429_v6  ;;  %v1415_v3 = vpop.permute.xlu0 %1414 }
 0xe66   : >> { %v1418_v39 = vsel %vm616_vm1, %v1415_v3, %v1417_v33  ;;  %v1419_v34 = vsel %vm616_vm1, %v1417_v33, %v1415_v3  ;;  %1445 = vmatpush1.msra.mxu0 %v1428_v44  ;;  %v4968_v44 = vld [vmem:[#allocation5 + $0x10] sm:$0xff]  ;;  %v4971_v33 = vld [vmem:[#allocation5 + $0x18] sm:$0xff] }
 0xe67   : >> { %v1420_v9 = vmul.f32 %v4916_v8, %v1418_v39  ;;  %v1421_v46 = vmul.f32 %v4919_v10, %v1419_v34 }
 0xe69   : >> { %v1409_v42 = vpop.permute.xlu1 %1408  ;;  %1446 = vmatprep.subr.mxu0 %v1421_v46  ;;  %v1407_v43 = vpop.permute.xlu0 %1406 }
 0xe6a   : >> { %v1410_v11 = vsel %vm605_vm2, %v1407_v43, %v1409_v42  ;;  %v1411_v17 = vsel %vm605_vm2, %v1409_v42, %v1407_v43  ;;  %1447 = vmatpush1.msra.mxu0 %v1420_v9  ;;  %v4978_v42 = vld [vmem:[#allocation5] sm:$0xff] }
 0xe6b   : >> { %v1412_v52 = vmul.f32 %v4926_v51, %v1410_v11  ;;  %v1413_v45 = vmul.f32 %v4929_v57, %v1411_v17  ;;  %v4981_v11 = vld [vmem:[#allocation5 + $0x8] sm:$0xff] }
 0xe6d   : >> { %v1401_v24 = vpop.permute.xlu1 %1400  ;;  %1448 = vmatprep.subr.mxu0 %v1413_v45  ;;  %v1399_v16 = vpop.permute.xlu0 %1398 }
 0xe6e   : >> { %v1402_v36 = vsel %vm594_vm3, %v1399_v16, %v1401_v24  ;;  %v1403_v60 = vsel %vm594_vm3, %v1401_v24, %v1399_v16  ;;  %1449 = vmatpush1.msra.mxu0 %v1412_v52  ;;  %v4987_v52 = vld [vmem:[%s6195_s1] sm:$0xff] }
 0xe6f   : >> { %v1404_v20 = vmul.f32 %v4936_v59, %v1402_v36  ;;  %v1405_v26 = vmul.f32 %v4939_v25, %v1403_v60 }
 0xe71   : >> { %v1393_v27 = vpop.permute.xlu1 %1392  ;;  %1450 = vmatprep.subr.mxu0 %v1405_v26  ;;  %v1391_v5 = vpop.permute.xlu0 %1390 }
 0xe72   : >> { %v1394_v4 = vsel %vm583_vm4, %v1391_v5, %v1393_v27  ;;  %v1395_v28 = vsel %vm583_vm4, %v1393_v27, %v1391_v5  ;;  %1451 = vmatpush1.msra.mxu0 %v1404_v20 }
 0xe73   : >> { %v1396_v14 = vmul.f32 %v4946_v35, %v1395_v28  ;;  %1452 = vmatprep.subr.mxu0 %v4868_v63  ;;  %v1397_v13 = vmul.f32 %v4950_v19, %v1394_v4  ;;  %v4961_v63 = vld [vmem:[#allocation5 + $0x28] sm:$0xff] }
 0xe74   : >> { %1453 = vmatpush1.msra.mxu0 %v4866_v41 }
 0xe75   : >> { %v1385_v47 = vpop.permute.xlu1 %1384  ;;  %1454 = vmatprep.subr.mxu0 %v1397_v13  ;;  %v1383_v49 = vpop.permute.xlu0 %1382 }
 0xe76   : >> { %v1386_v23 = vsel %vm572_vm5, %v1383_v49, %v1385_v47  ;;  %v1387_v50 = vsel %vm572_vm5, %v1385_v47, %v1383_v49  ;;  %1455 = vmatpush1.msra.mxu0 %v1396_v14 }
 0xe77   : >> { %v1388_v30 = vmul.f32 %v4958_v31, %v1387_v50  ;;  %v1389_v54 = vmul.f32 %v4961_v63, %v1386_v23 }
 0xe79   : >> { %v1377_v55 = vpop.permute.xlu1 %1376  ;;  %1456 = vmatprep.subr.mxu0 %v1389_v54  ;;  %v1375_v41 = vpop.permute.xlu0 %1374 }
 0xe7a   : >> { %v1378_v56 = vsel %vm561_vm6, %v1375_v41, %v1377_v55  ;;  %v1379_v2 = vsel %vm561_vm6, %v1377_v55, %v1375_v41  ;;  %1457 = vmatpush1.msra.mxu0 %v1388_v30  ;;  %v5005_v41 = vld [vmem:[%s6204_s10] sm:$0xff] }
 0xe7b   : >> { %v1380_v6 = vmul.f32 %v4968_v44, %v1379_v2  ;;  %v1381_v3 = vmul.f32 %v4971_v33, %v1378_v56 }
 0xe7d   : >> { %v1369_v39 = vpop.permute.xlu1 %1368  ;;  %1458 = vmatprep.subr.mxu0 %v1381_v3  ;;  %v1367_v34 = vpop.permute.xlu0 %1366 }
 0xe7e   : >> { %v1370_v9 = vsel %vm550_vm7, %v1367_v34, %v1369_v39  ;;  %v1371_v46 = vsel %vm550_vm7, %v1369_v39, %v1367_v34  ;;  %1459 = vmatpush1.msra.mxu0 %v1380_v6 }
 0xe7f   : >> { %v1372_v43 = vmul.f32 %v4978_v42, %v1371_v46  ;;  %v1373_v17 = vmul.f32 %v4981_v11, %v1370_v9 }
 0xe81   : >> { %1460 = vmatprep.subr.mxu0 %v1373_v17 }
 0xe82   : >> { %1461 = vmatpush1.msra.mxu0 %v1372_v43 }
 0xe83   : >> { %3771 = vmatmul.mubr.msk.f32.vlgmr.msra.gmra.mxu0 %vm641_vm8, %v4987_v52 }
 0xe84   : >> { %1873 = vmatprep.mubr.f32.mxu0 %v4179_v29 }
 0xf43   : >> { %v1496_v45 = vpop.f32.mrf.mxu0 }
 0xf44   : >> { %v1497_v24 = vadd.f32 %v1496_v45, %v4551_v48 }
 0xf45   : >> { %v1498_v16 = vpop.f32.mrf.mxu0 }
 0xf46   : >> { %v1501_v36 = vadd.f32 %v1497_v24, %v4753_v40  ;;  %v1499_v60 = vadd.f32 %v1498_v16, %v4551_v48 }
 0xf48   : >> { %v1502_v20 = vadd.f32 %v1499_v60, %v4758_v37  ;;  %v1507_v27 = vmul.f32 %v1501_v36, %v1501_v36  ;;  %v4999_v37 = vld [vmem:[%s6203_s9] sm:$0xff] }
 0xf4a   : >> { %v1503_v26 = vadd.f32 %v1502_v20, %v1501_v36  ;;  %v1508_v5 = vmul.f32 %v1502_v20, %v1502_v20 }
 0xf4c   : >> { %1504 = vadd.xlane.f32.xlu0 %v1503_v26  ;;  %v1509_v4 = vadd.f32 %v1508_v5, %v1507_v27 }
 0xf4e   : >> { %1510 = vadd.xlane.f32.xlu1 %v1509_v4 }
 0xfd5   : >> { %v1505_v28 = vpop.xlane.xlu0 %1504 }
 0xfd6   : >> { %v1506_v14 = vmul.f32 0.00390625, %v1505_v28 }
 0xfd7   : >> { %v1511_v13 = vpop.xlane.xlu1 %1510 }
 0xfd8   : >> { %v1513_v47 = vmul.f32 %v1506_v14, %v1506_v14  ;;  %v1512_v49 = vmul.f32 0.00390625, %v1511_v13 }
 0xfda   : >> { %v1514_v23 = vsub.f32 %v1512_v49, %v1513_v47 }
 0xfdc   : >> { %v1515_v50 = vmax.f32 %v1514_v23, 0.0 }
 0xfde   : >> { %v1516_v30 = vadd.f32 1e-05, %v1515_v50 }
 0xfe0   : >> { %3902 = vrsqrt.f32 %v1516_v30 }
 0xfed   : >> { %v3903_v40 = vpop.eup %3902 }
 0xfee   : >> { %v1518_v54 = vmul.f32 %v4999_v37, %v3903_v40 }
 0xff0   : >> { %1523 = vperm.xlu0 %3887, %v1518_v54   ;;  %v1519_v55 = vmul.f32 %v1518_v54, %v1506_v14 }
 0xff2   : >> { %v1520_v56 = vsub.f32 %v5005_v41, %v1519_v55 }
 0xff4   : >> { %1530 = vperm.xlu1 %3886, %v1520_v56  }
0x106b   : >> { %v1524_v2 = vpop.permute.xlu0 %1523 }
0x106c   : >> { %v1526_v6 = vmul.f32 %v1524_v2, %v1501_v36  ;;  %v1527_v3 = vmul.f32 %v1524_v2, %v1502_v20 }
0x106f   : >> { %v1531_v39 = vpop.permute.xlu1 %1530 }
0x1070   : >> { %v1533_v34 = vadd.f32 %v1531_v39, %v1526_v6  ;;  %v1534_v9 = vadd.f32 %v1531_v39, %v1527_v3 }
0x1072   : >> { %v1535_v46 = vmax.f32 %v1533_v34, 0.0  ;;  %v1536_v43 = vmax.f32 %v1534_v9, 0.0 }
0x1074   : >> { %1595 = vrot.lane.b32.xlu1 %v1536_v43, %s6263_s2  ;;  %1593 = vrot.lane.b32.xlu0 %v1535_v46, %s6263_s2 }
0x1078   : >> { %1587 = vrot.lane.b32.xlu1 %v1536_v43, %s6258_s18  ;;  %1585 = vrot.lane.b32.xlu0 %v1535_v46, %s6258_s18 }
0x107c   : >> { %1579 = vrot.lane.b32.xlu1 %v1536_v43, %s6264_s28  ;;  %1577 = vrot.lane.b32.xlu0 %v1535_v46, %s6264_s28 }
0x1080   : >> { %1571 = vrot.lane.b32.xlu1 %v1536_v43, %s6256_s25  ;;  %1569 = vrot.lane.b32.xlu0 %v1535_v46, %s6256_s25 }
0x1084   : >> { %1563 = vrot.lane.b32.xlu1 %v1536_v43, %s6257_s27  ;;  %1561 = vrot.lane.b32.xlu0 %v1535_v46, %s6257_s27 }
0x1088   : >> { %1555 = vrot.lane.b32.xlu1 %v1536_v43, %s6259_s19  ;;  %1553 = vrot.lane.b32.xlu0 %v1535_v46, %s6259_s19 }
0x108c   : >> { %1547 = vrot.lane.b32.xlu1 %v1536_v43, %s6260_s15  ;;  %1545 = vrot.lane.b32.xlu0 %v1535_v46, %s6260_s15 }
0x1090   : >> { %1539 = vrot.lane.b32.xlu1 %v1536_v43, %s6261_s22  ;;  %1537 = vrot.lane.b32.xlu0 %v1535_v46, %s6261_s22 }
0x10e6   : >> { %v1596_v17 = vpop.permute.xlu1 %1595  ;;  %v1594_v45 = vpop.permute.xlu0 %1593 }
0x10e7   : >> { %v1597_v24 = vsel %vm627_vm0, %v1594_v45, %v1596_v17  ;;  %v1598_v16 = vsel %vm627_vm0, %v1596_v17, %v1594_v45 }
0x10e8   : >> { %v1599_v36 = vmul.f32 %v4906_v15, %v1597_v24  ;;  %v1600_v60 = vmul.f32 %v4909_v18, %v1598_v16 }
0x10ea   : >> { %v1588_v20 = vpop.permute.xlu1 %1587  ;;  %1615 = vmatprep.subr.mxu1 %v1600_v60  ;;  %v1586_v26 = vpop.permute.xlu0 %1585 }
0x10eb   : >> { %v1589_v27 = vsel %vm616_vm1, %v1586_v26, %v1588_v20  ;;  %v1590_v5 = vsel %vm616_vm1, %v1588_v20, %v1586_v26  ;;  %1616 = vmatpush1.msra.mxu1 %v1599_v36 }
0x10ec   : >> { %v1591_v4 = vmul.f32 %v4916_v8, %v1589_v27  ;;  %v1592_v28 = vmul.f32 %v4919_v10, %v1590_v5 }
0x10ee   : >> { %v1580_v14 = vpop.permute.xlu1 %1579  ;;  %1617 = vmatprep.subr.mxu1 %v1592_v28  ;;  %v1578_v13 = vpop.permute.xlu0 %1577 }
0x10ef   : >> { %v1581_v47 = vsel %vm605_vm2, %v1578_v13, %v1580_v14  ;;  %v1582_v49 = vsel %vm605_vm2, %v1580_v14, %v1578_v13  ;;  %1618 = vmatpush1.msra.mxu1 %v1591_v4 }
0x10f0   : >> { %v1583_v23 = vmul.f32 %v4926_v51, %v1581_v47  ;;  %v1584_v50 = vmul.f32 %v4929_v57, %v1582_v49 }
0x10f2   : >> { %v1572_v30 = vpop.permute.xlu1 %1571  ;;  %1619 = vmatprep.subr.mxu1 %v1584_v50  ;;  %v1570_v40 = vpop.permute.xlu0 %1569  ;;  %v5072_v50 = vld [vmem:[#allocation2] sm:$0xff] }
0x10f3   : >> { %v1573_v54 = vsel %vm594_vm3, %v1570_v40, %v1572_v30  ;;  %v1574_v55 = vsel %vm594_vm3, %v1572_v30, %v1570_v40  ;;  %1620 = vmatpush1.msra.mxu1 %v1583_v23 }
0x10f4   : >> { %v1575_v56 = vmul.f32 %v4936_v59, %v1573_v54  ;;  %v1576_v2 = vmul.f32 %v4939_v25, %v1574_v55 }
0x10f6   : >> { %v1564_v6 = vpop.permute.xlu1 %1563  ;;  %1621 = vmatprep.subr.mxu1 %v1576_v2  ;;  %v1562_v3 = vpop.permute.xlu0 %1561 }
0x10f7   : >> { %v1565_v39 = vsel %vm583_vm4, %v1562_v3, %v1564_v6  ;;  %v1566_v34 = vsel %vm583_vm4, %v1564_v6, %v1562_v3  ;;  %1622 = vmatpush1.msra.mxu1 %v1575_v56 }
0x10f8   : >> { %v1567_v9 = vmul.f32 %v4946_v35, %v1566_v34  ;;  %1623 = vmatprep.subr.mxu1 %v1536_v43  ;;  %v1568_v17 = vmul.f32 %v4950_v19, %v1565_v39 }
0x10f9   : >> { %1624 = vmatpush1.msra.mxu1 %v1535_v46 }
0x10fa   : >> { %v1556_v45 = vpop.permute.xlu1 %1555  ;;  %1625 = vmatprep.subr.mxu1 %v1568_v17  ;;  %v1554_v24 = vpop.permute.xlu0 %1553 }
0x10fb   : >> { %v1557_v16 = vsel %vm572_vm5, %v1554_v24, %v1556_v45  ;;  %v1558_v36 = vsel %vm572_vm5, %v1556_v45, %v1554_v24  ;;  %1626 = vmatpush1.msra.mxu1 %v1567_v9 }
0x10fc   : >> { %v1559_v60 = vmul.f32 %v4958_v31, %v1558_v36  ;;  %v1560_v20 = vmul.f32 %v4961_v63, %v1557_v16 }
0x10fe   : >> { %v1548_v26 = vpop.permute.xlu1 %1547  ;;  %1627 = vmatprep.subr.mxu1 %v1560_v20  ;;  %v1546_v43 = vpop.permute.xlu0 %1545 }
0x10ff   : >> { %v1549_v46 = vsel %vm561_vm6, %v1546_v43, %v1548_v26  ;;  %v1550_v27 = vsel %vm561_vm6, %v1548_v26, %v1546_v43  ;;  %1628 = vmatpush1.msra.mxu1 %v1559_v60 }
0x1100   : >> { %v1551_v5 = vmul.f32 %v4968_v44, %v1550_v27  ;;  %v1552_v4 = vmul.f32 %v4971_v33, %v1549_v46  ;;  %v5090_v46 = vld [vmem:[%s6206_s12] sm:$0xff] }
0x1102   : >> { %v1540_v28 = vpop.permute.xlu1 %1539  ;;  %1629 = vmatprep.subr.mxu1 %v1552_v4  ;;  %v1538_v14 = vpop.permute.xlu0 %1537  ;;  %v2090_v4 = vmul.f32 2.0, %v4846_v21 }
0x1103   : >> { %v1541_v13 = vsel %vm550_vm7, %v1538_v14, %v1540_v28  ;;  %v1542_v47 = vsel %vm550_vm7, %v1540_v28, %v1538_v14  ;;  %1630 = vmatpush1.msra.mxu1 %v1551_v5  ;;  %v2091_v28 = vmul.f32 2.0, %v4848_v58 }
0x1104   : >> { %v1543_v49 = vmul.f32 %v4978_v42, %v1542_v47  ;;  %v1544_v23 = vmul.f32 %v4981_v11, %v1541_v13 }
0x1106   : >> { %1631 = vmatprep.subr.mxu1 %v1544_v23 }
0x1107   : >> { %1632 = vmatpush1.msra.mxu1 %v1543_v49 }
0x1108   : >> { %3772 = vmatmul.mubr.msk.f32.vlgmr.msra.gmra.mxu1 %vm641_vm8, %v5072_v50 }
0x1109   : >> { %2047 = vmatprep.mubr.f32.mxu1 %v4179_v29 }
0x11c8   : >> { %v1667_v30 = vpop.f32.mrf.mxu1 }
0x11c9   : >> { %v1668_v40 = vadd.f32 %v1667_v30, %v4653_v7  ;;  %v2092_v30 = vadd.f32 %v2090_v4, %v4671_v61 }
0x11ca   : >> { %v1669_v54 = vpop.f32.mrf.mxu1 }
0x11cb   : >> { %v1672_v55 = vadd.f32 %v1668_v40, %v4834_v22  ;;  %v1670_v56 = vadd.f32 %v1669_v54, %v4653_v7  ;;  %v2093_v40 = vadd.f32 %v2091_v28, %v4673_v62 }
0x11cd   : >> { %v1673_v2 = vadd.f32 %v1670_v56, %v4839_v53  ;;  %v1678_v3 = vmul.f32 %v1672_v55, %v1672_v55  ;;  %v5084_v53 = vld [vmem:[%s6205_s11] sm:$0xff] }
0x11cf   : >> { %v1674_v6 = vadd.f32 %v1673_v2, %v1672_v55  ;;  %v1679_v39 = vmul.f32 %v1673_v2, %v1673_v2 }
0x11d1   : >> { %1675 = vadd.xlane.f32.xlu0 %v1674_v6  ;;  %v1680_v34 = vadd.f32 %v1679_v39, %v1678_v3 }
0x11d3   : >> { %1681 = vadd.xlane.f32.xlu1 %v1680_v34 }
0x125a   : >> { %v1676_v9 = vpop.xlane.xlu0 %1675 }
0x125b   : >> { %v1677_v17 = vmul.f32 0.00390625, %v1676_v9 }
0x125c   : >> { %v1682_v45 = vpop.xlane.xlu1 %1681 }
0x125d   : >> { %v1684_v24 = vmul.f32 %v1677_v17, %v1677_v17  ;;  %v1683_v16 = vmul.f32 0.00390625, %v1682_v45 }
0x125f   : >> { %v1685_v36 = vsub.f32 %v1683_v16, %v1684_v24 }
0x1261   : >> { %v1686_v60 = vmax.f32 %v1685_v36, 0.0 }
0x1263   : >> { %v1687_v20 = vadd.f32 1e-05, %v1686_v60 }
0x1265   : >> { %3904 = vrsqrt.f32 %v1687_v20 }
0x1272   : >> { %v3905_v22 = vpop.eup %3904 }
0x1273   : >> { %v1689_v26 = vmul.f32 %v5084_v53, %v3905_v22 }
0x1275   : >> { %1694 = vperm.xlu0 %3887, %v1689_v26   ;;  %v1690_v43 = vmul.f32 %v1689_v26, %v1677_v17 }
0x1277   : >> { %v1691_v27 = vsub.f32 %v5090_v46, %v1690_v43 }
0x1279   : >> { %1701 = vperm.xlu1 %3886, %v1691_v27  }
0x12f0   : >> { %v1695_v5 = vpop.permute.xlu0 %1694 }
0x12f1   : >> { %v1697_v14 = vmul.f32 %v1695_v5, %v1672_v55  ;;  %v1698_v13 = vmul.f32 %v1695_v5, %v1673_v2 }
0x12f4   : >> { %v1702_v47 = vpop.permute.xlu1 %1701 }
0x12f5   : >> { %v1704_v49 = vadd.f32 %v1702_v47, %v1697_v14  ;;  %v1705_v23 = vadd.f32 %v1702_v47, %v1698_v13 }
0x12f7   : >> { %v1707_v54 = vmul.f32 0.125, %v1704_v49  ;;  %v1708_v56 = vmul.f32 0.125, %v1705_v23  ;;  %v2094_v6 = vmul.f32 2.0, %v1704_v49  ;;  %v2095_v3 = vmul.f32 2.0, %v1705_v23 }
0x12f9   : >> { %v1709_v39 = vadd.f32 %v4160_v0, %v1707_v54  ;;  %v1710_v34 = vadd.f32 %v4156_v1, %v1708_v56  ;;  %v5099_v21 = vadd.f32 %v2094_v6, %v2092_v30  ;;  %v5101_v58 = vadd.f32 %v2095_v3, %v2093_v40 }
0x12fb   : >> { %v1711_v55 = vadd.f32 %v1710_v34, %v1709_v39  ;;  %v1715_v2 = vmul.f32 %v1709_v39, %v1709_v39  ;;  %v1716_v9 = vmul.f32 %v1710_v34, %v1710_v34 }
0x12fd   : >> { %1712 = vadd.xlane.f32.xlu0 %v1711_v55  ;;  %v1717_v17 = vadd.f32 %v1716_v9, %v1715_v2 }
0x12ff   : >> { %1718 = vadd.xlane.f32.xlu1 %v1717_v17 }
0x1386   : >> { %v1713_v61 = vpop.xlane.xlu0 %1712 }
0x1387   : >> { %v1714_v62 = vmul.f32 0.00390625, %v1713_v61 }
0x1388   : >> { %v1719_v45 = vpop.xlane.xlu1 %1718 }
0x1389   : >> { %v1721_v24 = vmul.f32 %v1714_v62, %v1714_v62  ;;  %v1720_v16 = vmul.f32 0.00390625, %v1719_v45 }
0x138b   : >> { %v1722_v36 = vsub.f32 %v1720_v16, %v1721_v24 }
0x138d   : >> { %v1723_v60 = vmax.f32 %v1722_v36, 0.0 }
0x138f   : >> { %v1724_v20 = vadd.f32 1e-05, %v1723_v60 }
0x1391   : >> { %3906 = vrsqrt.f32 %v1724_v20 }
0x139e   : >> { %v3907_v22 = vpop.eup %3906 }
0x139f   : >> { %v1726_v26 = vmul.f32 %v4857_v38, %v3907_v22 }
0x13a1   : >> { %1731 = vperm.xlu0 %3887, %v1726_v26   ;;  %v1727_v43 = vmul.f32 %v1726_v26, %v1714_v62 }
0x13a3   : >> { %v1728_v27 = vsub.f32 %v4863_v12, %v1727_v43 }
0x13a5   : >> { %1738 = vperm.xlu1 %3886, %v1728_v27  }
0x141c   : >> { %v1732_v5 = vpop.permute.xlu0 %1731 }
0x141d   : >> { %v1734_v4 = vmul.f32 %v1732_v5, %v1709_v39  ;;  %v1735_v28 = vmul.f32 %v1732_v5, %v1710_v34 }
0x1420   : >> { %v1739_v14 = vpop.permute.xlu1 %1738 }
0x1421   : >> { %v1741_v13 = vadd.f32 %v1739_v14, %v1734_v4  ;;  %v1742_v47 = vadd.f32 %v1739_v14, %v1735_v28 }
0x1423   : >> { %v1743_v49 = vmax.f32 %v1741_v13, 0.0  ;;  %v1744_v23 = vmax.f32 %v1742_v47, 0.0 }
0x1425   : >> { %1803 = vrot.lane.b32.xlu1 %v1744_v23, %s6263_s2  ;;  %1801 = vrot.lane.b32.xlu0 %v1743_v49, %s6263_s2 }
0x1429   : >> { %1795 = vrot.lane.b32.xlu1 %v1744_v23, %s6258_s18  ;;  %1793 = vrot.lane.b32.xlu0 %v1743_v49, %s6258_s18 }
0x142d   : >> { %1787 = vrot.lane.b32.xlu1 %v1744_v23, %s6264_s28  ;;  %1785 = vrot.lane.b32.xlu0 %v1743_v49, %s6264_s28 }
0x1431   : >> { %1779 = vrot.lane.b32.xlu1 %v1744_v23, %s6256_s25  ;;  %1777 = vrot.lane.b32.xlu0 %v1743_v49, %s6256_s25 }
0x1435   : >> { %1771 = vrot.lane.b32.xlu1 %v1744_v23, %s6257_s27  ;;  %1769 = vrot.lane.b32.xlu0 %v1743_v49, %s6257_s27 }
0x1439   : >> { %1763 = vrot.lane.b32.xlu1 %v1744_v23, %s6259_s19  ;;  %1761 = vrot.lane.b32.xlu0 %v1743_v49, %s6259_s19 }
0x143d   : >> { %1755 = vrot.lane.b32.xlu1 %v1744_v23, %s6260_s15  ;;  %1753 = vrot.lane.b32.xlu0 %v1743_v49, %s6260_s15 }
0x1441   : >> { %1747 = vrot.lane.b32.xlu1 %v1744_v23, %s6261_s22  ;;  %1745 = vrot.lane.b32.xlu0 %v1743_v49, %s6261_s22 }
0x1497   : >> { %v1804_v38 = vpop.permute.xlu1 %1803  ;;  %v1802_v12 = vpop.permute.xlu0 %1801 }
0x1498   : >> { %v1805_v30 = vsel %vm627_vm0, %v1802_v12, %v1804_v38  ;;  %v1806_v40 = vsel %vm627_vm0, %v1804_v38, %v1802_v12 }
0x1499   : >> { %v1807_v54 = vmul.f32 %v4906_v15, %v1805_v30  ;;  %v1808_v56 = vmul.f32 %v4909_v18, %v1806_v40 }
0x149b   : >> { %v1796_v6 = vpop.permute.xlu1 %1795  ;;  %1823 = vmatprep.subr.mxu0 %v1808_v56  ;;  %v1794_v3 = vpop.permute.xlu0 %1793 }
0x149c   : >> { %v1797_v39 = vsel %vm616_vm1, %v1794_v3, %v1796_v6  ;;  %v1798_v34 = vsel %vm616_vm1, %v1796_v6, %v1794_v3  ;;  %1824 = vmatpush1.msra.mxu0 %v1807_v54 }
0x149d   : >> { %v1799_v55 = vmul.f32 %v4916_v8, %v1797_v39  ;;  %v1800_v2 = vmul.f32 %v4919_v10, %v1798_v34 }
0x149f   : >> { %v1788_v9 = vpop.permute.xlu1 %1787  ;;  %1825 = vmatprep.subr.mxu0 %v1800_v2  ;;  %v1786_v17 = vpop.permute.xlu0 %1785 }
0x14a0   : >> { %v1789_v61 = vsel %vm605_vm2, %v1786_v17, %v1788_v9  ;;  %v1790_v62 = vsel %vm605_vm2, %v1788_v9, %v1786_v17  ;;  %1826 = vmatpush1.msra.mxu0 %v1799_v55 }
0x14a1   : >> { %v1791_v45 = vmul.f32 %v4926_v51, %v1789_v61  ;;  %v1792_v24 = vmul.f32 %v4929_v57, %v1790_v62  ;;  %v5173_v61 = vstv %s1706_s24  ;;  %v5178_v62 = vld [vmem:[%s6197_s3] sm:$0xff]  ;;  %s4078_s24 = scalar_lea.vmem (%p498_p12), %s4077_s13, 512 }
0x14a3   : >> { %v1780_v16 = vpop.permute.xlu1 %1779  ;;  %1827 = vmatprep.subr.mxu0 %v1792_v24  ;;  %v1778_v36 = vpop.permute.xlu0 %1777 }
0x14a4   : >> { %v1781_v60 = vsel %vm594_vm3, %v1778_v36, %v1780_v16  ;;  %v1782_v20 = vsel %vm594_vm3, %v1780_v16, %v1778_v36  ;;  %1828 = vmatpush1.msra.mxu0 %v1791_v45  ;;  %v1881_v45 = vmul.f32 %v5178_v62, %v5173_v61 }
0x14a5   : >> { %v1783_v22 = vmul.f32 %v4936_v59, %v1781_v60  ;;  %v1784_v26 = vmul.f32 %v4939_v25, %v1782_v20 }
0x14a7   : >> { %v1772_v43 = vpop.permute.xlu1 %1771  ;;  %1829 = vmatprep.subr.mxu0 %v1784_v26  ;;  %v1770_v27 = vpop.permute.xlu0 %1769 }
0x14a8   : >> { %v1773_v5 = vsel %vm583_vm4, %v1770_v27, %v1772_v43  ;;  %v1774_v4 = vsel %vm583_vm4, %v1772_v43, %v1770_v27  ;;  %1830 = vmatpush1.msra.mxu0 %v1783_v22 }
0x14a9   : >> { %v1775_v28 = vmul.f32 %v4946_v35, %v1774_v4  ;;  %1831 = vmatprep.subr.mxu0 %v1744_v23  ;;  %v1776_v14 = vmul.f32 %v4950_v19, %v1773_v5 }
0x14aa   : >> { %1832 = vmatpush1.msra.mxu0 %v1743_v49 }
0x14ab   : >> { %v1764_v13 = vpop.permute.xlu1 %1763  ;;  %1833 = vmatprep.subr.mxu0 %v1776_v14  ;;  %v1762_v47 = vpop.permute.xlu0 %1761 }
0x14ac   : >> { %v1765_v38 = vsel %vm572_vm5, %v1762_v47, %v1764_v13  ;;  %v1766_v12 = vsel %vm572_vm5, %v1764_v13, %v1762_v47  ;;  %1834 = vmatpush1.msra.mxu0 %v1775_v28 }
0x14ad   : >> { %v1767_v30 = vmul.f32 %v4958_v31, %v1766_v12  ;;  %v1768_v40 = vmul.f32 %v4961_v63, %v1765_v38 }
0x14af   : >> { %v1756_v54 = vpop.permute.xlu1 %1755  ;;  %1835 = vmatprep.subr.mxu0 %v1768_v40  ;;  %v1754_v23 = vpop.permute.xlu0 %1753 }
0x14b0   : >> { %v1757_v49 = vsel %vm561_vm6, %v1754_v23, %v1756_v54  ;;  %v1758_v56 = vsel %vm561_vm6, %v1756_v54, %v1754_v23  ;;  %1836 = vmatpush1.msra.mxu0 %v1767_v30 }
0x14b1   : >> { %v1759_v6 = vmul.f32 %v4968_v44, %v1758_v56  ;;  %v1760_v3 = vmul.f32 %v4971_v33, %v1757_v49 }
0x14b3   : >> { %v1748_v39 = vpop.permute.xlu1 %1747  ;;  %1837 = vmatprep.subr.mxu0 %v1760_v3  ;;  %v1746_v34 = vpop.permute.xlu0 %1745 }
0x14b4   : >> { %v1749_v55 = vsel %vm550_vm7, %v1746_v34, %v1748_v39  ;;  %v1750_v2 = vsel %vm550_vm7, %v1748_v39, %v1746_v34  ;;  %1838 = vmatpush1.msra.mxu0 %v1759_v6 }
0x14b5   : >> { %v1751_v9 = vmul.f32 %v4978_v42, %v1750_v2  ;;  %v1752_v17 = vmul.f32 %v4981_v11, %v1749_v55 }
0x14b7   : >> { %1839 = vmatprep.subr.mxu0 %v1752_v17 }
0x14b8   : >> { %1840 = vmatpush1.msra.mxu0 %v1751_v9 }
0x14b9   : >> { %3773 = vmatmul.mubr.msk.f32.vlgmr.msra.gmra.mxu0 %vm641_vm8, %v4987_v52  ;;  %v5186_v52 = vld [vmem:[%s6197_s3 + $0x8] sm:$0xff] }
0x14ba   : >> { %2269 = vmatprep.mubr.f32.mxu0 %v4179_v29  ;;  %v1882_v36 = vmul.f32 %v5186_v52, %v5173_v61 }
0x1579   : >> { %v1875_v24 = vpop.f32.mrf.mxu0 }
0x157a   : >> { %v1876_v16 = vadd.f32 %v1875_v24, %v4551_v48 }
0x157b   : >> { %v1877_v60 = vpop.f32.mrf.mxu0 }
0x157c   : >> { %v1883_v20 = vadd.f32 %v1881_v45, %v1876_v16  ;;  %v1878_v22 = vadd.f32 %v1877_v60, %v4551_v48 }
0x157e   : >> { %v1884_v26 = vadd.f32 %v1882_v36, %v1878_v22  ;;  %v1889_v27 = vmul.f32 %v1883_v20, %v1883_v20 }
0x1580   : >> { %v1885_v43 = vadd.f32 %v1884_v26, %v1883_v20  ;;  %v1890_v5 = vmul.f32 %v1884_v26, %v1884_v26 }
0x1582   : >> { %1886 = vadd.xlane.f32.xlu0 %v1885_v43  ;;  %v1891_v4 = vadd.f32 %v1890_v5, %v1889_v27 }
0x1584   : >> { %1892 = vadd.xlane.f32.xlu1 %v1891_v4 }
0x160b   : >> { %v1887_v28 = vpop.xlane.xlu0 %1886 }
0x160c   : >> { %v1888_v14 = vmul.f32 0.00390625, %v1887_v28 }
0x160d   : >> { %v1893_v13 = vpop.xlane.xlu1 %1892 }
0x160e   : >> { %v1895_v47 = vmul.f32 %v1888_v14, %v1888_v14  ;;  %v1894_v38 = vmul.f32 0.00390625, %v1893_v13 }
0x1610   : >> { %v1896_v12 = vsub.f32 %v1894_v38, %v1895_v47 }
0x1612   : >> { %v1897_v30 = vmax.f32 %v1896_v12, 0.0 }
0x1614   : >> { %v1898_v40 = vadd.f32 1e-05, %v1897_v30 }
0x1616   : >> { %3908 = vrsqrt.f32 %v1898_v40 }
0x1623   : >> { %v3909_v54 = vpop.eup %3908 }
0x1624   : >> { %v1900_v23 = vmul.f32 %v4999_v37, %v3909_v54 }
0x1626   : >> { %1905 = vperm.xlu0 %3887, %v1900_v23   ;;  %v1901_v49 = vmul.f32 %v1900_v23, %v1888_v14 }
0x1628   : >> { %v1902_v56 = vsub.f32 %v5005_v41, %v1901_v49 }
0x162a   : >> { %1912 = vperm.xlu1 %3886, %v1902_v56  }
0x16a1   : >> { %v1906_v6 = vpop.permute.xlu0 %1905 }
0x16a2   : >> { %v1908_v3 = vmul.f32 %v1906_v6, %v1883_v20  ;;  %v1909_v39 = vmul.f32 %v1906_v6, %v1884_v26 }
0x16a5   : >> { %v1913_v34 = vpop.permute.xlu1 %1912 }
0x16a6   : >> { %v1915_v55 = vadd.f32 %v1913_v34, %v1908_v3  ;;  %v1916_v2 = vadd.f32 %v1913_v34, %v1909_v39 }
0x16a8   : >> { %v1917_v9 = vmax.f32 %v1915_v55, 0.0  ;;  %v1918_v17 = vmax.f32 %v1916_v2, 0.0 }
0x16aa   : >> { %1977 = vrot.lane.b32.xlu1 %v1918_v17, %s6263_s2  ;;  %1975 = vrot.lane.b32.xlu0 %v1917_v9, %s6263_s2 }
0x16ae   : >> { %1969 = vrot.lane.b32.xlu1 %v1918_v17, %s6258_s18  ;;  %1967 = vrot.lane.b32.xlu0 %v1917_v9, %s6258_s18 }
0x16b2   : >> { %1961 = vrot.lane.b32.xlu1 %v1918_v17, %s6264_s28  ;;  %1959 = vrot.lane.b32.xlu0 %v1917_v9, %s6264_s28 }
0x16b6   : >> { %1953 = vrot.lane.b32.xlu1 %v1918_v17, %s6256_s25  ;;  %1951 = vrot.lane.b32.xlu0 %v1917_v9, %s6256_s25 }
0x16ba   : >> { %1945 = vrot.lane.b32.xlu1 %v1918_v17, %s6257_s27  ;;  %1943 = vrot.lane.b32.xlu0 %v1917_v9, %s6257_s27 }
0x16be   : >> { %1937 = vrot.lane.b32.xlu1 %v1918_v17, %s6259_s19  ;;  %1935 = vrot.lane.b32.xlu0 %v1917_v9, %s6259_s19 }
0x16c2   : >> { %1929 = vrot.lane.b32.xlu1 %v1918_v17, %s6260_s15  ;;  %1927 = vrot.lane.b32.xlu0 %v1917_v9, %s6260_s15 }
0x16c6   : >> { %1921 = vrot.lane.b32.xlu1 %v1918_v17, %s6261_s22  ;;  %1919 = vrot.lane.b32.xlu0 %v1917_v9, %s6261_s22 }
0x171c   : >> { %v1978_v37 = vpop.permute.xlu1 %1977  ;;  %v1976_v41 = vpop.permute.xlu0 %1975 }
0x171d   : >> { %v1979_v45 = vsel %vm627_vm0, %v1976_v41, %v1978_v37  ;;  %v1980_v24 = vsel %vm627_vm0, %v1978_v37, %v1976_v41 }
0x171e   : >> { %v1981_v16 = vmul.f32 %v4906_v15, %v1979_v45  ;;  %v1982_v36 = vmul.f32 %v4909_v18, %v1980_v24 }
0x1720   : >> { %v1970_v60 = vpop.permute.xlu1 %1969  ;;  %1997 = vmatprep.subr.mxu1 %v1982_v36  ;;  %v1968_v20 = vpop.permute.xlu0 %1967 }
0x1721   : >> { %v1971_v22 = vsel %vm616_vm1, %v1968_v20, %v1970_v60  ;;  %v1972_v26 = vsel %vm616_vm1, %v1970_v60, %v1968_v20  ;;  %1998 = vmatpush1.msra.mxu1 %v1981_v16 }
0x1722   : >> { %v1973_v43 = vmul.f32 %v4916_v8, %v1971_v22  ;;  %v1974_v27 = vmul.f32 %v4919_v10, %v1972_v26 }
0x1724   : >> { %v1962_v5 = vpop.permute.xlu1 %1961  ;;  %1999 = vmatprep.subr.mxu1 %v1974_v27  ;;  %v1960_v4 = vpop.permute.xlu0 %1959 }
0x1725   : >> { %v1963_v15 = vsel %vm605_vm2, %v1960_v4, %v1962_v5  ;;  %v1964_v18 = vsel %vm605_vm2, %v1962_v5, %v1960_v4  ;;  %2000 = vmatpush1.msra.mxu1 %v1973_v43 }
0x1726   : >> { %v1965_v28 = vmul.f32 %v4926_v51, %v1963_v15  ;;  %v1966_v14 = vmul.f32 %v4929_v57, %v1964_v18 }
0x1728   : >> { %v1954_v13 = vpop.permute.xlu1 %1953  ;;  %2001 = vmatprep.subr.mxu1 %v1966_v14  ;;  %v1952_v47 = vpop.permute.xlu0 %1951 }
0x1729   : >> { %v1955_v8 = vsel %vm594_vm3, %v1952_v47, %v1954_v13  ;;  %v1956_v10 = vsel %vm594_vm3, %v1954_v13, %v1952_v47  ;;  %2002 = vmatpush1.msra.mxu1 %v1965_v28 }
0x172a   : >> { %v1957_v38 = vmul.f32 %v4936_v59, %v1955_v8  ;;  %v1958_v12 = vmul.f32 %v4939_v25, %v1956_v10 }
0x172c   : >> { %v1946_v30 = vpop.permute.xlu1 %1945  ;;  %2003 = vmatprep.subr.mxu1 %v1958_v12  ;;  %v1944_v40 = vpop.permute.xlu0 %1943 }
0x172d   : >> { %v1947_v51 = vsel %vm583_vm4, %v1944_v40, %v1946_v30  ;;  %v1948_v57 = vsel %vm583_vm4, %v1946_v30, %v1944_v40  ;;  %2004 = vmatpush1.msra.mxu1 %v1957_v38 }
0x172e   : >> { %v1949_v54 = vmul.f32 %v4946_v35, %v1948_v57  ;;  %2005 = vmatprep.subr.mxu1 %v1918_v17  ;;  %v1950_v23 = vmul.f32 %v4950_v19, %v1947_v51 }
0x172f   : >> { %2006 = vmatpush1.msra.mxu1 %v1917_v9 }
0x1730   : >> { %v1938_v49 = vpop.permute.xlu1 %1937  ;;  %2007 = vmatprep.subr.mxu1 %v1950_v23  ;;  %v1936_v59 = vpop.permute.xlu0 %1935 }
0x1731   : >> { %v1939_v25 = vsel %vm572_vm5, %v1936_v59, %v1938_v49  ;;  %v1940_v56 = vsel %vm572_vm5, %v1938_v49, %v1936_v59  ;;  %2008 = vmatpush1.msra.mxu1 %v1949_v54 }
0x1732   : >> { %v1941_v6 = vmul.f32 %v4958_v31, %v1940_v56  ;;  %v1942_v3 = vmul.f32 %v4961_v63, %v1939_v25 }
0x1734   : >> { %v1930_v39 = vpop.permute.xlu1 %1929  ;;  %2009 = vmatprep.subr.mxu1 %v1942_v3  ;;  %v1928_v35 = vpop.permute.xlu0 %1927 }
0x1735   : >> { %v1931_v19 = vsel %vm561_vm6, %v1928_v35, %v1930_v39  ;;  %v1932_v34 = vsel %vm561_vm6, %v1930_v39, %v1928_v35  ;;  %2010 = vmatpush1.msra.mxu1 %v1941_v6 }
0x1736   : >> { %v1933_v55 = vmul.f32 %v4968_v44, %v1932_v34  ;;  %v1934_v2 = vmul.f32 %v4971_v33, %v1931_v19  ;;  %v5263_v44 = vld [vmem:[%s6200_s6] sm:$0xff] }
0x1737   : >> { %v2054_v33 = vmul.f32 %v5263_v44, %v5173_v61 }
0x1738   : >> { %v1922_v9 = vpop.permute.xlu1 %1921  ;;  %2011 = vmatprep.subr.mxu1 %v1934_v2  ;;  %v1920_v17 = vpop.permute.xlu0 %1919  ;;  %v5295_v2 = vld [vmem:[%s6201_s7] sm:$0xff] }
0x1739   : >> { %v1923_v31 = vsel %vm550_vm7, %v1920_v17, %v1922_v9  ;;  %v1924_v63 = vsel %vm550_vm7, %v1922_v9, %v1920_v17  ;;  %2012 = vmatpush1.msra.mxu1 %v1933_v55 }
0x173a   : >> { %v1925_v37 = vmul.f32 %v4978_v42, %v1924_v63  ;;  %v1926_v41 = vmul.f32 %v4981_v11, %v1923_v31  ;;  %v5271_v11 = vld [vmem:[%s6200_s6 + $0x8] sm:$0xff]  ;;  %v5301_v31 = vld [vmem:[%s6202_s8] sm:$0xff] }
0x173c   : >> { %2013 = vmatprep.subr.mxu1 %v1926_v41 }
0x173d   : >> { %2014 = vmatpush1.msra.mxu1 %v1925_v37 }
0x173e   : >> { %3774 = vmatmul.mubr.msk.f32.vlgmr.msra.gmra.mxu1 %vm641_vm8, %v5072_v50  ;;  %v2055_v50 = vmul.f32 %v5271_v11, %v5173_v61 }
0x173f   : >> { %2443 = vmatprep.mubr.f32.mxu1 %v4179_v29 }
0x17fe   : >> { %v2049_v45 = vpop.f32.mrf.mxu1 }
0x17ff   : >> { %v2050_v42 = vadd.f32 %v2049_v45, %v4653_v7 }
0x1800   : >> { %v2051_v24 = vpop.f32.mrf.mxu1 }
0x1801   : >> { %v2056_v16 = vadd.f32 %v2054_v33, %v2050_v42  ;;  %v2052_v36 = vadd.f32 %v2051_v24, %v4653_v7 }
0x1803   : >> { %v2057_v60 = vadd.f32 %v2055_v50, %v2052_v36  ;;  %v2062_v22 = vmul.f32 %v2056_v16, %v2056_v16 }
0x1805   : >> { %v2058_v20 = vadd.f32 %v2057_v60, %v2056_v16  ;;  %v2063_v26 = vmul.f32 %v2057_v60, %v2057_v60 }
0x1807   : >> { %2059 = vadd.xlane.f32.xlu0 %v2058_v20  ;;  %v2064_v43 = vadd.f32 %v2063_v26, %v2062_v22  ;;  %v5346_v26 = vld [vmem:[#allocation5 + $0x80] sm:$0xff] }
0x1809   : >> { %2065 = vadd.xlane.f32.xlu1 %v2064_v43 }
0x1890   : >> { %v2060_v27 = vpop.xlane.xlu0 %2059 }
0x1891   : >> { %v2061_v5 = vmul.f32 0.00390625, %v2060_v27  ;;  %v5349_v27 = vld [vmem:[#allocation5 + $0x88] sm:$0xff] }
0x1892   : >> { %v2066_v4 = vpop.xlane.xlu1 %2065 }
0x1893   : >> { %v2068_v15 = vmul.f32 %v2061_v5, %v2061_v5  ;;  %v2067_v18 = vmul.f32 0.00390625, %v2066_v4 }
0x1895   : >> { %v2069_v28 = vsub.f32 %v2067_v18, %v2068_v15 }
0x1897   : >> { %v2070_v14 = vmax.f32 %v2069_v28, 0.0 }
0x1899   : >> { %v2071_v13 = vadd.f32 1e-05, %v2070_v14  ;;  %v5356_v14 = vld [vmem:[#allocation5 + $0x70] sm:$0xff] }
0x189b   : >> { %3910 = vrsqrt.f32 %v2071_v13 }
0x18a8   : >> { %v3911_v61 = vpop.eup %3910 }
0x18a9   : >> { %v2073_v47 = vmul.f32 %v5084_v53, %v3911_v61  ;;  %v5359_v61 = vld [vmem:[#allocation5 + $0x78] sm:$0xff] }
0x18ab   : >> { %2078 = vperm.xlu0 %3887, %v2073_v47   ;;  %v2074_v8 = vmul.f32 %v2073_v47, %v2061_v5 }
0x18ad   : >> { %v2075_v10 = vsub.f32 %v5090_v46, %v2074_v8 }
0x18af   : >> { %2085 = vperm.xlu1 %3886, %v2075_v10  }
0x1926   : >> { %v2079_v38 = vpop.permute.xlu0 %2078 }
0x1927   : >> { %v2081_v12 = vmul.f32 %v2079_v38, %v2056_v16  ;;  %v2082_v30 = vmul.f32 %v2079_v38, %v2057_v60 }
0x192a   : >> { %v2086_v40 = vpop.permute.xlu1 %2085 }
0x192b   : >> { %v2088_v51 = vadd.f32 %v2086_v40, %v2081_v12  ;;  %v2089_v57 = vadd.f32 %v2086_v40, %v2082_v30  ;;  %v5366_v30 = vld [vmem:[#allocation5 + $0x60] sm:$0xff] }
0x192d   : >> { %v2098_v54 = vadd.f32 %v5099_v21, %v2088_v51  ;;  %v2099_v23 = vadd.f32 %v5101_v58, %v2089_v57  ;;  %v5369_v51 = vld [vmem:[#allocation5 + $0x68] sm:$0xff] }
0x192f   : >> { %v2100_v49 = vmul.f32 0.020833334, %v2098_v54  ;;  %v2101_v59 = vmul.f32 0.020833334, %v2099_v23 }
0x1931   : >> { %v5281_v25 = vadd.f32 %v4160_v0, %v2100_v49  ;;  %v5284_v53 = vadd.f32 %v4156_v1, %v2101_v59 }
0x1933   : >> { %v2107_v46 = vadd.f32 %v5284_v53, %v5281_v25  ;;  %v2111_v56 = vmul.f32 %v5281_v25, %v5281_v25  ;;  %v2112_v6 = vmul.f32 %v5284_v53, %v5284_v53 }
0x1935   : >> { %2108 = vadd.xlane.f32.xlu0 %v2107_v46  ;;  %v2113_v21 = vadd.f32 %v2112_v6, %v2111_v56  ;;  %v5376_v46 = vld [vmem:[#allocation5 + $0x50] sm:$0xff]  ;;  %v5379_v6 = vld [vmem:[#allocation5 + $0x58] sm:$0xff] }
0x1937   : >> { %2114 = vadd.xlane.f32.xlu1 %v2113_v21 }
0x19be   : >> { %v2109_v58 = vpop.xlane.xlu0 %2108 }
0x19bf   : >> { %v2110_v3 = vmul.f32 0.00390625, %v2109_v58 }
0x19c0   : >> { %v2115_v39 = vpop.xlane.xlu1 %2114 }
0x19c1   : >> { %v2117_v0 = vmul.f32 %v2110_v3, %v2110_v3  ;;  %v2116_v35 = vmul.f32 0.00390625, %v2115_v39 }
0x19c3   : >> { %v2118_v19 = vsub.f32 %v2116_v35, %v2117_v0  ;;  %v5386_v35 = vld [vmem:[#allocation5 + $0x30] sm:$0xff] }
0x19c5   : >> { %v2119_v1 = vmax.f32 %v2118_v19, 0.0 }
0x19c7   : >> { %v2120_v34 = vadd.f32 1e-05, %v2119_v1  ;;  %v5390_v1 = vld [vmem:[#allocation5 + $0x38] sm:$0xff] }
0x19c9   : >> { %3912 = vrsqrt.f32 %v2120_v34 }
0x19d6   : >> { %v3913_v55 = vpop.eup %3912 }
0x19d7   : >> { %v2122_v9 = vmul.f32 %v5295_v2, %v3913_v55 }
0x19d9   : >> { %2127 = vperm.xlu0 %3887, %v2122_v9   ;;  %v2123_v17 = vmul.f32 %v2122_v9, %v2110_v3 }
0x19db   : >> { %v2124_v63 = vsub.f32 %v5301_v31, %v2123_v17 }
0x19dd   : >> { %2134 = vperm.xlu1 %3886, %v2124_v63  }
0x1a54   : >> { %v2128_v37 = vpop.permute.xlu0 %2127 }
0x1a55   : >> { %v2130_v41 = vmul.f32 %v2128_v37, %v5281_v25  ;;  %v2131_v33 = vmul.f32 %v2128_v37, %v5284_v53  ;;  %v5398_v37 = vld [vmem:[#allocation5 + $0x20] sm:$0xff] }
0x1a58   : >> { %v2135_v45 = vpop.permute.xlu1 %2134 }
0x1a59   : >> { %v2137_v42 = vadd.f32 %v2135_v45, %v2130_v41  ;;  %v2138_v50 = vadd.f32 %v2135_v45, %v2131_v33  ;;  %v5401_v33 = vld [vmem:[#allocation5 + $0x28] sm:$0xff] }
0x1a5b   : >> { %v5306_v24 = vmax.f32 %v2137_v42, 0.0  ;;  %v5308_v16 = vmax.f32 %v2138_v50, 0.0 }
0x1a5d   : >> { %2199 = vrot.lane.b32.xlu1 %v5308_v16, %s6263_s2  ;;  %2197 = vrot.lane.b32.xlu0 %v5306_v24, %s6263_s2 }
0x1a61   : >> { %2191 = vrot.lane.b32.xlu1 %v5308_v16, %s6258_s18  ;;  %2189 = vrot.lane.b32.xlu0 %v5306_v24, %s6258_s18 }
0x1a65   : >> { %2183 = vrot.lane.b32.xlu1 %v5308_v16, %s6264_s28  ;;  %2181 = vrot.lane.b32.xlu0 %v5306_v24, %s6264_s28 }
0x1a69   : >> { %2175 = vrot.lane.b32.xlu1 %v5308_v16, %s6256_s25  ;;  %2173 = vrot.lane.b32.xlu0 %v5306_v24, %s6256_s25 }
0x1a6d   : >> { %2167 = vrot.lane.b32.xlu1 %v5308_v16, %s6257_s27  ;;  %2165 = vrot.lane.b32.xlu0 %v5306_v24, %s6257_s27 }
0x1a71   : >> { %2159 = vrot.lane.b32.xlu1 %v5308_v16, %s6259_s19  ;;  %2157 = vrot.lane.b32.xlu0 %v5306_v24, %s6259_s19 }
0x1a75   : >> { %2151 = vrot.lane.b32.xlu1 %v5308_v16, %s6260_s15  ;;  %2149 = vrot.lane.b32.xlu0 %v5306_v24, %s6260_s15 }
0x1a79   : >> { %2143 = vrot.lane.b32.xlu1 %v5308_v16, %s6261_s22  ;;  %2141 = vrot.lane.b32.xlu0 %v5306_v24, %s6261_s22 }
0x1acf   : >> { %v2200_v36 = vpop.permute.xlu1 %2199  ;;  %v2198_v60 = vpop.permute.xlu0 %2197 }
0x1ad0   : >> { %v2201_v20 = vsel %vm627_vm0, %v2198_v60, %v2200_v36  ;;  %v2202_v22 = vsel %vm627_vm0, %v2200_v36, %v2198_v60  ;;  %v5408_v36 = vld [vmem:[#allocation5 + $0x10] sm:$0xff] }
0x1ad1   : >> { %v2203_v43 = vmul.f32 %v5346_v26, %v2201_v20  ;;  %v2204_v5 = vmul.f32 %v5349_v27, %v2202_v22  ;;  %v5411_v20 = vld [vmem:[#allocation5 + $0x18] sm:$0xff] }
0x1ad3   : >> { %v2192_v4 = vpop.permute.xlu1 %2191  ;;  %2219 = vmatprep.subr.mxu0 %v2204_v5  ;;  %v2190_v15 = vpop.permute.xlu0 %2189 }
0x1ad4   : >> { %v2193_v18 = vsel %vm616_vm1, %v2190_v15, %v2192_v4  ;;  %v2194_v28 = vsel %vm616_vm1, %v2192_v4, %v2190_v15  ;;  %2220 = vmatpush1.msra.mxu0 %v2203_v43 }
0x1ad5   : >> { %v2195_v13 = vmul.f32 %v5356_v14, %v2193_v18  ;;  %v2196_v47 = vmul.f32 %v5359_v61, %v2194_v28  ;;  %v5418_v18 = vld [vmem:[#allocation5] sm:$0xff] }
0x1ad7   : >> { %v2184_v8 = vpop.permute.xlu1 %2183  ;;  %2221 = vmatprep.subr.mxu0 %v2196_v47  ;;  %v2182_v10 = vpop.permute.xlu0 %2181 }
0x1ad8   : >> { %v2185_v38 = vsel %vm605_vm2, %v2182_v10, %v2184_v8  ;;  %v2186_v12 = vsel %vm605_vm2, %v2184_v8, %v2182_v10  ;;  %2222 = vmatpush1.msra.mxu0 %v2195_v13  ;;  %v5421_v13 = vld [vmem:[#allocation5 + $0x8] sm:$0xff]  ;;  %v5427_v8 = vld [vmem:[%s6195_s1] sm:$0xff]  ;;  %v5437_v10 = vstv %s5434_s21  ;;  %s3663_s21 = sshll.u32 (%p498_p12), %s4353_s20, 4  ;;  %s3664_s21 = int_to_ptr.vmem [resolvable:$true] %s3663_s21 }
0x1ad9   : >> { %v2187_v40 = vmul.f32 %v5366_v30, %v2185_v38  ;;  %v2188_v57 = vmul.f32 %v5369_v51, %v2186_v12  ;;  %v2277_v38 = vmul.f32 %v5178_v62, %v5437_v10  ;;  %p4079_p11 = scmp.lt.s32.totalorder (%p498_p12), %s3664_s21, %s4077_s13 }
0x1adb   : >> { %v2176_v54 = vpop.permute.xlu1 %2175  ;;  %2223 = vmatprep.subr.mxu0 %v2188_v57  ;;  %v2174_v23 = vpop.permute.xlu0 %2173  ;;  %v2278_v57 = vmul.f32 %v5186_v52, %v5437_v10 }
0x1adc   : >> { %v2177_v49 = vsel %vm594_vm3, %v2174_v23, %v2176_v54  ;;  %v2178_v59 = vsel %vm594_vm3, %v2176_v54, %v2174_v23  ;;  %2224 = vmatpush1.msra.mxu0 %v2187_v40 }
0x1add   : >> { %v2179_v56 = vmul.f32 %v5376_v46, %v2177_v49  ;;  %v2180_v21 = vmul.f32 %v5379_v6, %v2178_v59 }
0x1adf   : >> { %v2168_v58 = vpop.permute.xlu1 %2167  ;;  %2225 = vmatprep.subr.mxu0 %v2180_v21  ;;  %v2166_v3 = vpop.permute.xlu0 %2165 }
0x1ae0   : >> { %v2169_v39 = vsel %vm583_vm4, %v2166_v3, %v2168_v58  ;;  %v2170_v0 = vsel %vm583_vm4, %v2168_v58, %v2166_v3  ;;  %2226 = vmatpush1.msra.mxu0 %v2179_v56 }
0x1ae1   : >> { %v2171_v19 = vmul.f32 %v5386_v35, %v2170_v0  ;;  %2227 = vmatprep.subr.mxu0 %v5308_v16  ;;  %v2172_v34 = vmul.f32 %v5390_v1, %v2169_v39 }
0x1ae2   : >> { %2228 = vmatpush1.msra.mxu0 %v5306_v24 }
0x1ae3   : >> { %v2160_v55 = vpop.permute.xlu1 %2159  ;;  %2229 = vmatprep.subr.mxu0 %v2172_v34  ;;  %v2158_v9 = vpop.permute.xlu0 %2157 }
0x1ae4   : >> { %v2161_v17 = vsel %vm572_vm5, %v2158_v9, %v2160_v55  ;;  %v2162_v63 = vsel %vm572_vm5, %v2160_v55, %v2158_v9  ;;  %2230 = vmatpush1.msra.mxu0 %v2171_v19 }
0x1ae5   : >> { %v2163_v41 = vmul.f32 %v5398_v37, %v2162_v63  ;;  %v2164_v45 = vmul.f32 %v5401_v33, %v2161_v17  ;;  %v5448_v63 = vld [vmem:[%s6203_s9] sm:$0xff] }
0x1ae7   : >> { %v2152_v42 = vpop.permute.xlu1 %2151  ;;  %2231 = vmatprep.subr.mxu0 %v2164_v45  ;;  %v2150_v50 = vpop.permute.xlu0 %2149 }
0x1ae8   : >> { %v2153_v24 = vsel %vm561_vm6, %v2150_v50, %v2152_v42  ;;  %v2154_v16 = vsel %vm561_vm6, %v2152_v42, %v2150_v50  ;;  %2232 = vmatpush1.msra.mxu0 %v2163_v41  ;;  %v5454_v42 = vld [vmem:[%s6204_s10] sm:$0xff] }
0x1ae9   : >> { %v2155_v60 = vmul.f32 %v5408_v36, %v2154_v16  ;;  %v2156_v22 = vmul.f32 %v5411_v20, %v2153_v24 }
0x1aeb   : >> { %v2144_v43 = vpop.permute.xlu1 %2143  ;;  %2233 = vmatprep.subr.mxu0 %v2156_v22  ;;  %v2142_v5 = vpop.permute.xlu0 %2141 }
0x1aec   : >> { %v2145_v4 = vsel %vm550_vm7, %v2142_v5, %v2144_v43  ;;  %v2146_v15 = vsel %vm550_vm7, %v2144_v43, %v2142_v5  ;;  %2234 = vmatpush1.msra.mxu0 %v2155_v60 }
0x1aed   : >> { %v2147_v28 = vmul.f32 %v5418_v18, %v2146_v15  ;;  %v2148_v47 = vmul.f32 %v5421_v13, %v2145_v4 }
0x1aef   : >> { %2235 = vmatprep.subr.mxu0 %v2148_v47 }
0x1af0   : >> { %2236 = vmatpush1.msra.mxu0 %v2147_v28 }
0x1af1   : >> { %3775 = vmatmul.mubr.msk.f32.vlgmr.msra.gmra.mxu0 %vm641_vm8, %v5427_v8 }
0x1af2   : >> { %2653 = vmatprep.mubr.f32.mxu0 %v4179_v29 }
0x1bb1   : >> { %v2271_v12 = vpop.f32.mrf.mxu0 }
0x1bb2   : >> { %v2272_v40 = vadd.f32 %v2271_v12, %v4551_v48 }
0x1bb3   : >> { %v2273_v54 = vpop.f32.mrf.mxu0 }
0x1bb4   : >> { %v2279_v23 = vadd.f32 %v2277_v38, %v2272_v40  ;;  %v2274_v49 = vadd.f32 %v2273_v54, %v4551_v48 }
0x1bb6   : >> { %v2280_v59 = vadd.f32 %v2278_v57, %v2274_v49  ;;  %v2285_v21 = vmul.f32 %v2279_v23, %v2279_v23 }
0x1bb8   : >> { %v2281_v56 = vadd.f32 %v2280_v59, %v2279_v23  ;;  %v2286_v58 = vmul.f32 %v2280_v59, %v2280_v59 }
0x1bba   : >> { %2282 = vadd.xlane.f32.xlu0 %v2281_v56  ;;  %v2287_v3 = vadd.f32 %v2286_v58, %v2285_v21 }
0x1bbc   : >> { %2288 = vadd.xlane.f32.xlu1 %v2287_v3 }
0x1c43   : >> { %v2283_v39 = vpop.xlane.xlu0 %2282 }
0x1c44   : >> { %v2284_v0 = vmul.f32 0.00390625, %v2283_v39 }
0x1c45   : >> { %v2289_v62 = vpop.xlane.xlu1 %2288 }
0x1c46   : >> { %v2291_v19 = vmul.f32 %v2284_v0, %v2284_v0  ;;  %v2290_v34 = vmul.f32 0.00390625, %v2289_v62 }
0x1c48   : >> { %v2292_v55 = vsub.f32 %v2290_v34, %v2291_v19 }
0x1c4a   : >> { %v2293_v9 = vmax.f32 %v2292_v55, 0.0 }
0x1c4c   : >> { %v2294_v17 = vadd.f32 1e-05, %v2293_v9 }
0x1c4e   : >> { %3914 = vrsqrt.f32 %v2294_v17 }
0x1c5b   : >> { %v3915_v52 = vpop.eup %3914 }
0x1c5c   : >> { %v2296_v41 = vmul.f32 %v5448_v63, %v3915_v52 }
0x1c5e   : >> { %2301 = vperm.xlu0 %3887, %v2296_v41   ;;  %v2297_v45 = vmul.f32 %v2296_v41, %v2284_v0 }
0x1c60   : >> { %v2298_v50 = vsub.f32 %v5454_v42, %v2297_v45 }
0x1c62   : >> { %2308 = vperm.xlu1 %3886, %v2298_v50  }
0x1cd9   : >> { %v2302_v24 = vpop.permute.xlu0 %2301 }
0x1cda   : >> { %v2304_v16 = vmul.f32 %v2302_v24, %v2279_v23  ;;  %v2305_v60 = vmul.f32 %v2302_v24, %v2280_v59 }
0x1cdd   : >> { %v2309_v22 = vpop.permute.xlu1 %2308 }
0x1cde   : >> { %v2311_v43 = vadd.f32 %v2309_v22, %v2304_v16  ;;  %v2312_v5 = vadd.f32 %v2309_v22, %v2305_v60 }
0x1ce0   : >> { %v2313_v4 = vmax.f32 %v2311_v43, 0.0  ;;  %v2314_v15 = vmax.f32 %v2312_v5, 0.0 }
0x1ce2   : >> { %2373 = vrot.lane.b32.xlu1 %v2314_v15, %s6263_s2  ;;  %2371 = vrot.lane.b32.xlu0 %v2313_v4, %s6263_s2 }
0x1ce6   : >> { %2365 = vrot.lane.b32.xlu1 %v2314_v15, %s6258_s18  ;;  %2363 = vrot.lane.b32.xlu0 %v2313_v4, %s6258_s18 }
0x1cea   : >> { %2357 = vrot.lane.b32.xlu1 %v2314_v15, %s6264_s28  ;;  %2355 = vrot.lane.b32.xlu0 %v2313_v4, %s6264_s28 }
0x1cee   : >> { %2349 = vrot.lane.b32.xlu1 %v2314_v15, %s6256_s25  ;;  %2347 = vrot.lane.b32.xlu0 %v2313_v4, %s6256_s25 }
0x1cf2   : >> { %2341 = vrot.lane.b32.xlu1 %v2314_v15, %s6257_s27  ;;  %2339 = vrot.lane.b32.xlu0 %v2313_v4, %s6257_s27 }
0x1cf6   : >> { %2333 = vrot.lane.b32.xlu1 %v2314_v15, %s6259_s19  ;;  %2331 = vrot.lane.b32.xlu0 %v2313_v4, %s6259_s19 }
0x1cfa   : >> { %2325 = vrot.lane.b32.xlu1 %v2314_v15, %s6260_s15  ;;  %2323 = vrot.lane.b32.xlu0 %v2313_v4, %s6260_s15 }
0x1cfe   : >> { %2317 = vrot.lane.b32.xlu1 %v2314_v15, %s6261_s22  ;;  %2315 = vrot.lane.b32.xlu0 %v2313_v4, %s6261_s22 }
0x1d54   : >> { %v2374_v28 = vpop.permute.xlu1 %2373  ;;  %v2372_v47 = vpop.permute.xlu0 %2371 }
0x1d55   : >> { %v2375_v38 = vsel %vm627_vm0, %v2372_v47, %v2374_v28  ;;  %v2376_v12 = vsel %vm627_vm0, %v2374_v28, %v2372_v47 }
0x1d56   : >> { %v2377_v40 = vmul.f32 %v5346_v26, %v2375_v38  ;;  %v2378_v57 = vmul.f32 %v5349_v27, %v2376_v12 }
0x1d58   : >> { %v2366_v54 = vpop.permute.xlu1 %2365  ;;  %2393 = vmatprep.subr.mxu1 %v2378_v57  ;;  %v2364_v23 = vpop.permute.xlu0 %2363 }
0x1d59   : >> { %v2367_v49 = vsel %vm616_vm1, %v2364_v23, %v2366_v54  ;;  %v2368_v59 = vsel %vm616_vm1, %v2366_v54, %v2364_v23  ;;  %2394 = vmatpush1.msra.mxu1 %v2377_v40 }
0x1d5a   : >> { %v2369_v56 = vmul.f32 %v5356_v14, %v2367_v49  ;;  %v2370_v21 = vmul.f32 %v5359_v61, %v2368_v59 }
0x1d5c   : >> { %v2358_v58 = vpop.permute.xlu1 %2357  ;;  %2395 = vmatprep.subr.mxu1 %v2370_v21  ;;  %v2356_v3 = vpop.permute.xlu0 %2355 }
0x1d5d   : >> { %v2359_v39 = vsel %vm605_vm2, %v2356_v3, %v2358_v58  ;;  %v2360_v0 = vsel %vm605_vm2, %v2358_v58, %v2356_v3  ;;  %2396 = vmatpush1.msra.mxu1 %v2369_v56 }
0x1d5e   : >> { %v2361_v62 = vmul.f32 %v5366_v30, %v2359_v39  ;;  %v2362_v19 = vmul.f32 %v5369_v51, %v2360_v0  ;;  %v5521_v39 = vld [vmem:[#allocation2] sm:$0xff]  ;;  %v2450_v0 = vmul.f32 %v5263_v44, %v5437_v10 }
0x1d60   : >> { %v2350_v34 = vpop.permute.xlu1 %2349  ;;  %2397 = vmatprep.subr.mxu1 %v2362_v19  ;;  %v2348_v55 = vpop.permute.xlu0 %2347 }
0x1d61   : >> { %v2351_v9 = vsel %vm594_vm3, %v2348_v55, %v2350_v34  ;;  %v2352_v17 = vsel %vm594_vm3, %v2350_v34, %v2348_v55  ;;  %2398 = vmatpush1.msra.mxu1 %v2361_v62  ;;  %v2451_v34 = vmul.f32 %v5271_v11, %v5437_v10  ;;  %v5535_v10 = vld [vmem:[%s6205_s11] sm:$0xff] }
0x1d62   : >> { %v2353_v52 = vmul.f32 %v5376_v46, %v2351_v9  ;;  %v2354_v41 = vmul.f32 %v5379_v6, %v2352_v17 }
0x1d64   : >> { %v2342_v45 = vpop.permute.xlu1 %2341  ;;  %2399 = vmatprep.subr.mxu1 %v2354_v41  ;;  %v2340_v50 = vpop.permute.xlu0 %2339 }
0x1d65   : >> { %v2343_v24 = vsel %vm583_vm4, %v2340_v50, %v2342_v45  ;;  %v2344_v16 = vsel %vm583_vm4, %v2342_v45, %v2340_v50  ;;  %2400 = vmatpush1.msra.mxu1 %v2353_v52 }
0x1d66   : >> { %v2345_v60 = vmul.f32 %v5386_v35, %v2344_v16  ;;  %2401 = vmatprep.subr.mxu1 %v2314_v15  ;;  %v2346_v22 = vmul.f32 %v5390_v1, %v2343_v24 }
0x1d67   : >> { %2402 = vmatpush1.msra.mxu1 %v2313_v4 }
0x1d68   : >> { %v2334_v43 = vpop.permute.xlu1 %2333  ;;  %2403 = vmatprep.subr.mxu1 %v2346_v22  ;;  %v2332_v5 = vpop.permute.xlu0 %2331 }
0x1d69   : >> { %v2335_v28 = vsel %vm572_vm5, %v2332_v5, %v2334_v43  ;;  %v2336_v47 = vsel %vm572_vm5, %v2334_v43, %v2332_v5  ;;  %2404 = vmatpush1.msra.mxu1 %v2345_v60 }
0x1d6a   : >> { %v2337_v38 = vmul.f32 %v5398_v37, %v2336_v47  ;;  %v2338_v12 = vmul.f32 %v5401_v33, %v2335_v28 }
0x1d6c   : >> { %v2326_v40 = vpop.permute.xlu1 %2325  ;;  %2405 = vmatprep.subr.mxu1 %v2338_v12  ;;  %v2324_v15 = vpop.permute.xlu0 %2323 }
0x1d6d   : >> { %v2327_v4 = vsel %vm561_vm6, %v2324_v15, %v2326_v40  ;;  %v2328_v57 = vsel %vm561_vm6, %v2326_v40, %v2324_v15  ;;  %2406 = vmatpush1.msra.mxu1 %v2337_v38  ;;  %v5541_v40 = vld [vmem:[%s6206_s12] sm:$0xff] }
0x1d6e   : >> { %v2329_v54 = vmul.f32 %v5408_v36, %v2328_v57  ;;  %v2330_v23 = vmul.f32 %v5411_v20, %v2327_v4 }
0x1d70   : >> { %v2318_v49 = vpop.permute.xlu1 %2317  ;;  %2407 = vmatprep.subr.mxu1 %v2330_v23  ;;  %v2316_v59 = vpop.permute.xlu0 %2315 }
0x1d71   : >> { %v2319_v56 = vsel %vm550_vm7, %v2316_v59, %v2318_v49  ;;  %v2320_v21 = vsel %vm550_vm7, %v2318_v49, %v2316_v59  ;;  %2408 = vmatpush1.msra.mxu1 %v2329_v54 }
0x1d72   : >> { %v2321_v58 = vmul.f32 %v5418_v18, %v2320_v21  ;;  %v2322_v3 = vmul.f32 %v5421_v13, %v2319_v56 }
0x1d74   : >> { %2409 = vmatprep.subr.mxu1 %v2322_v3 }
0x1d75   : >> { %2410 = vmatpush1.msra.mxu1 %v2321_v58 }
0x1d76   : >> { %3776 = vmatmul.mubr.msk.f32.vlgmr.msra.gmra.mxu1 %vm641_vm8, %v5521_v39 }
0x1d77   : >> { %2827 = vmatprep.mubr.f32.mxu1 %v4179_v29 }
0x1e36   : >> { %v2445_v62 = vpop.f32.mrf.mxu1 }
0x1e37   : >> { %v2446_v19 = vadd.f32 %v2445_v62, %v4653_v7 }
0x1e38   : >> { %v2447_v55 = vpop.f32.mrf.mxu1 }
0x1e39   : >> { %v2452_v9 = vadd.f32 %v2450_v0, %v2446_v19  ;;  %v2448_v17 = vadd.f32 %v2447_v55, %v4653_v7 }
0x1e3b   : >> { %v2453_v52 = vadd.f32 %v2451_v34, %v2448_v17  ;;  %v2458_v45 = vmul.f32 %v2452_v9, %v2452_v9 }
0x1e3d   : >> { %v2454_v41 = vadd.f32 %v2453_v52, %v2452_v9  ;;  %v2459_v50 = vmul.f32 %v2453_v52, %v2453_v52 }
0x1e3f   : >> { %2455 = vadd.xlane.f32.xlu0 %v2454_v41  ;;  %v2460_v24 = vadd.f32 %v2459_v50, %v2458_v45 }
0x1e41   : >> { %2461 = vadd.xlane.f32.xlu1 %v2460_v24 }
0x1ec8   : >> { %v2456_v16 = vpop.xlane.xlu0 %2455 }
0x1ec9   : >> { %v2457_v60 = vmul.f32 0.00390625, %v2456_v16 }
0x1eca   : >> { %v2462_v44 = vpop.xlane.xlu1 %2461 }
0x1ecb   : >> { %v2464_v22 = vmul.f32 %v2457_v60, %v2457_v60  ;;  %v2463_v43 = vmul.f32 0.00390625, %v2462_v44 }
0x1ecd   : >> { %v2465_v5 = vsub.f32 %v2463_v43, %v2464_v22 }
0x1ecf   : >> { %v2466_v28 = vmax.f32 %v2465_v5, 0.0 }
0x1ed1   : >> { %v2467_v47 = vadd.f32 1e-05, %v2466_v28 }
0x1ed3   : >> { %3916 = vrsqrt.f32 %v2467_v47 }
0x1ee0   : >> { %v3917_v11 = vpop.eup %3916 }
0x1ee1   : >> { %v2469_v38 = vmul.f32 %v5535_v10, %v3917_v11 }
0x1ee3   : >> { %2474 = vperm.xlu0 %3887, %v2469_v38   ;;  %v2470_v12 = vmul.f32 %v2469_v38, %v2457_v60 }
0x1ee5   : >> { %v2471_v15 = vsub.f32 %v5541_v40, %v2470_v12 }
0x1ee7   : >> { %2481 = vperm.xlu1 %3886, %v2471_v15  }
0x1f5e   : >> { %v2475_v4 = vpop.permute.xlu0 %2474 }
0x1f5f   : >> { %v2477_v57 = vmul.f32 %v2475_v4, %v2452_v9  ;;  %v2478_v54 = vmul.f32 %v2475_v4, %v2453_v52 }
0x1f62   : >> { %v2482_v23 = vpop.permute.xlu1 %2481 }
0x1f63   : >> { %v5544_v49 = vadd.f32 %v2482_v23, %v2477_v57  ;;  %v5546_v59 = vadd.f32 %v2482_v23, %v2478_v54 }
0x1f65   : >> { %v2487_v56 = vmul.f32 0.0625, %v5544_v49  ;;  %v2488_v21 = vmul.f32 0.0625, %v5546_v59 }
0x1f67   : >> { %v2489_v58 = vadd.f32 %v2487_v56, %v5281_v25  ;;  %v2490_v3 = vadd.f32 %v2488_v21, %v5284_v53 }
0x1f69   : >> { %v2491_v0 = vadd.f32 %v2490_v3, %v2489_v58  ;;  %v2495_v62 = vmul.f32 %v2489_v58, %v2489_v58  ;;  %v2496_v19 = vmul.f32 %v2490_v3, %v2490_v3 }
0x1f6b   : >> { %2492 = vadd.xlane.f32.xlu0 %v2491_v0  ;;  %v2497_v34 = vadd.f32 %v2496_v19, %v2495_v62 }
0x1f6d   : >> { %2498 = vadd.xlane.f32.xlu1 %v2497_v34 }
0x1ff4   : >> { %v2493_v55 = vpop.xlane.xlu0 %2492 }
0x1ff5   : >> { %v2494_v9 = vmul.f32 0.00390625, %v2493_v55 }
0x1ff6   : >> { %v2499_v17 = vpop.xlane.xlu1 %2498 }
0x1ff7   : >> { %v2501_v52 = vmul.f32 %v2494_v9, %v2494_v9  ;;  %v2500_v41 = vmul.f32 0.00390625, %v2499_v17 }
0x1ff9   : >> { %v2502_v45 = vsub.f32 %v2500_v41, %v2501_v52 }
0x1ffb   : >> { %v2503_v50 = vmax.f32 %v2502_v45, 0.0 }
0x1ffd   : >> { %v2504_v24 = vadd.f32 1e-05, %v2503_v50 }
0x1fff   : >> { %3918 = vrsqrt.f32 %v2504_v24 }
0x200c   : >> { %v3919_v16 = vpop.eup %3918 }
0x200d   : >> { %v2506_v60 = vmul.f32 %v5295_v2, %v3919_v16 }
0x200f   : >> { %2511 = vperm.xlu0 %3887, %v2506_v60   ;;  %v2507_v44 = vmul.f32 %v2506_v60, %v2494_v9 }
0x2011   : >> { %v2508_v22 = vsub.f32 %v5301_v31, %v2507_v44 }
0x2013   : >> { %2518 = vperm.xlu1 %3886, %v2508_v22  }
0x208a   : >> { %v2512_v43 = vpop.permute.xlu0 %2511 }
0x208b   : >> { %v2514_v5 = vmul.f32 %v2512_v43, %v2489_v58  ;;  %v2515_v28 = vmul.f32 %v2512_v43, %v2490_v3 }
0x208e   : >> { %v2519_v47 = vpop.permute.xlu1 %2518 }
0x208f   : >> { %v2521_v11 = vadd.f32 %v2519_v47, %v2514_v5  ;;  %v2522_v38 = vadd.f32 %v2519_v47, %v2515_v28 }
0x2091   : >> { %v2523_v12 = vmax.f32 %v2521_v11, 0.0  ;;  %v2524_v15 = vmax.f32 %v2522_v38, 0.0 }
0x2093   : >> { %2583 = vrot.lane.b32.xlu1 %v2524_v15, %s6263_s2  ;;  %2581 = vrot.lane.b32.xlu0 %v2523_v12, %s6263_s2 }
0x2097   : >> { %2575 = vrot.lane.b32.xlu1 %v2524_v15, %s6258_s18  ;;  %2573 = vrot.lane.b32.xlu0 %v2523_v12, %s6258_s18 }
0x209b   : >> { %2567 = vrot.lane.b32.xlu1 %v2524_v15, %s6264_s28  ;;  %2565 = vrot.lane.b32.xlu0 %v2523_v12, %s6264_s28 }
0x209f   : >> { %2559 = vrot.lane.b32.xlu1 %v2524_v15, %s6256_s25  ;;  %2557 = vrot.lane.b32.xlu0 %v2523_v12, %s6256_s25 }
0x20a3   : >> { %2551 = vrot.lane.b32.xlu1 %v2524_v15, %s6257_s27  ;;  %2549 = vrot.lane.b32.xlu0 %v2523_v12, %s6257_s27 }
0x20a7   : >> { %2543 = vrot.lane.b32.xlu1 %v2524_v15, %s6259_s19  ;;  %2541 = vrot.lane.b32.xlu0 %v2523_v12, %s6259_s19 }
0x20ab   : >> { %2535 = vrot.lane.b32.xlu1 %v2524_v15, %s6260_s15  ;;  %2533 = vrot.lane.b32.xlu0 %v2523_v12, %s6260_s15 }
0x20af   : >> { %2527 = vrot.lane.b32.xlu1 %v2524_v15, %s6261_s22  ;;  %2525 = vrot.lane.b32.xlu0 %v2523_v12, %s6261_s22 }
0x2105   : >> { %v2584_v2 = vpop.permute.xlu1 %2583  ;;  %v2582_v31 = vpop.permute.xlu0 %2581 }
0x2106   : >> { %v2585_v4 = vsel %vm627_vm0, %v2582_v31, %v2584_v2  ;;  %v2586_v57 = vsel %vm627_vm0, %v2584_v2, %v2582_v31 }
0x2107   : >> { %v2587_v54 = vmul.f32 %v5346_v26, %v2585_v4  ;;  %v2588_v23 = vmul.f32 %v5349_v27, %v2586_v57 }
0x2109   : >> { %v2576_v56 = vpop.permute.xlu1 %2575  ;;  %2603 = vmatprep.subr.mxu0 %v2588_v23  ;;  %v2574_v21 = vpop.permute.xlu0 %2573 }
0x210a   : >> { %v2577_v58 = vsel %vm616_vm1, %v2574_v21, %v2576_v56  ;;  %v2578_v3 = vsel %vm616_vm1, %v2576_v56, %v2574_v21  ;;  %2604 = vmatpush1.msra.mxu0 %v2587_v54 }
0x210b   : >> { %v2579_v0 = vmul.f32 %v5356_v14, %v2577_v58  ;;  %v2580_v62 = vmul.f32 %v5359_v61, %v2578_v3 }
0x210d   : >> { %v2568_v19 = vpop.permute.xlu1 %2567  ;;  %2605 = vmatprep.subr.mxu0 %v2580_v62  ;;  %v2566_v34 = vpop.permute.xlu0 %2565 }
0x210e   : >> { %v2569_v55 = vsel %vm605_vm2, %v2566_v34, %v2568_v19  ;;  %v2570_v9 = vsel %vm605_vm2, %v2568_v19, %v2566_v34  ;;  %2606 = vmatpush1.msra.mxu0 %v2579_v0 }
0x210f   : >> { %v2571_v17 = vmul.f32 %v5366_v30, %v2569_v55  ;;  %v2572_v52 = vmul.f32 %v5369_v51, %v2570_v9  ;;  %v5622_v55 = vstv %s2486_s5  ;;  %v3988_v9 = vld [vmem:[%s6197_s3] sm:$0xff]  ;;  %s4072_s5 = scalar_lea.vmem (%p498_p12), %s3664_s21, 256 }
0x2110   : > { %p4073_p13 = scmp.ne.s32.totalorder (%p498_p12), %s3664_s21, %s4072_s5  ;;  %p4080_p0 = scmp.lt.s32.totalorder (%p498_p12), %s4078_s24, %s4072_s5 }
0x2111   : >> { %v2560_v41 = vpop.permute.xlu1 %2559  ;;  %2607 = vmatprep.subr.mxu0 %v2572_v52  ;;  %v2558_v45 = vpop.permute.xlu0 %2557 }
0x2112   : >> { %v2561_v50 = vsel %vm594_vm3, %v2558_v45, %v2560_v41  ;;  %v2562_v24 = vsel %vm594_vm3, %v2560_v41, %v2558_v45  ;;  %2608 = vmatpush1.msra.mxu0 %v2571_v17  ;;  %v5628_v17 = vmul.f32 %v3988_v9, %v5622_v55  ;;  %v3989_v45 = vld [vmem:[%s6197_s3 + $0x8] sm:$0xff]  ;;  %p4074_p7 = pnand (%p498_p12), %p4073_p13, %p6269_p4  ;;  %p4081_p1 = por (%p498_p12), %p4080_p0, %p4079_p11 }
0x2113   : >> { %v2563_v16 = vmul.f32 %v5376_v46, %v2561_v50  ;;  %v2564_v60 = vmul.f32 %v5379_v6, %v2562_v24 }
0x2114   : > { %p4075_p8 = pneg (%p498_p12), %p4074_p7 }
0x2115   : >> { %v2552_v44 = vpop.permute.xlu1 %2551  ;;  %2609 = vmatprep.subr.mxu0 %v2564_v60  ;;  %v2550_v22 = vpop.permute.xlu0 %2549 }
0x2116   : >> { %v2553_v43 = vsel %vm583_vm4, %v2550_v22, %v2552_v44  ;;  %v2554_v5 = vsel %vm583_vm4, %v2552_v44, %v2550_v22  ;;  %2610 = vmatpush1.msra.mxu0 %v2563_v16  ;;  %p4082_p2 = pnand (%p498_p12), %p4081_p1, %p4075_p8 }
0x2117   : >> { %v2555_v28 = vmul.f32 %v5386_v35, %v2554_v5  ;;  %2611 = vmatprep.subr.mxu0 %v2524_v15  ;;  %v2556_v47 = vmul.f32 %v5390_v1, %v2553_v43 }
0x2118   : >> { %2612 = vmatpush1.msra.mxu0 %v2523_v12 }
0x2119   : >> { %v2544_v11 = vpop.permute.xlu1 %2543  ;;  %2613 = vmatprep.subr.mxu0 %v2556_v47  ;;  %v2542_v38 = vpop.permute.xlu0 %2541 }
0x211a   : >> { %v2545_v2 = vsel %vm572_vm5, %v2542_v38, %v2544_v11  ;;  %v2546_v31 = vsel %vm572_vm5, %v2544_v11, %v2542_v38  ;;  %2614 = vmatpush1.msra.mxu0 %v2555_v28 }
0x211b   : >> { %v2547_v4 = vmul.f32 %v5398_v37, %v2546_v31  ;;  %v2548_v57 = vmul.f32 %v5401_v33, %v2545_v2 }
0x211d   : >> { %v2536_v54 = vpop.permute.xlu1 %2535  ;;  %2615 = vmatprep.subr.mxu0 %v2548_v57  ;;  %v2534_v15 = vpop.permute.xlu0 %2533 }
0x211e   : >> { %v2537_v12 = vsel %vm561_vm6, %v2534_v15, %v2536_v54  ;;  %v2538_v23 = vsel %vm561_vm6, %v2536_v54, %v2534_v15  ;;  %2616 = vmatpush1.msra.mxu0 %v2547_v4 }
0x211f   : >> { %v2539_v56 = vmul.f32 %v5408_v36, %v2538_v23  ;;  %v2540_v21 = vmul.f32 %v5411_v20, %v2537_v12 }
0x2121   : >> { %v2528_v58 = vpop.permute.xlu1 %2527  ;;  %2617 = vmatprep.subr.mxu0 %v2540_v21  ;;  %v2526_v3 = vpop.permute.xlu0 %2525 }
0x2122   : >> { %v2529_v0 = vsel %vm550_vm7, %v2526_v3, %v2528_v58  ;;  %v2530_v62 = vsel %vm550_vm7, %v2528_v58, %v2526_v3  ;;  %2618 = vmatpush1.msra.mxu0 %v2539_v56 }
0x2123   : >> { %v2531_v19 = vmul.f32 %v5418_v18, %v2530_v62  ;;  %v2532_v34 = vmul.f32 %v5421_v13, %v2529_v0 }
0x2125   : >> { %2619 = vmatprep.subr.mxu0 %v2532_v34 }
0x2126   : >> { %2620 = vmatpush1.msra.mxu0 %v2531_v19 }
0x2127   : >> { %3777 = vmatmul.mubr.msk.f32.vlgmr.msra.gmra.mxu0 %vm641_vm8, %v5427_v8  ;;  %v5635_v8 = vmul.f32 %v3989_v45, %v5622_v55 }
0x2128   : >> { %3036 = vmatprep.mubr.f32.mxu0 %v4179_v29 }
0x21e7   : >> { %v2655_v52 = vpop.f32.mrf.mxu0 }
0x21e8   : >> { %v2656_v41 = vadd.f32 %v2655_v52, %v4551_v48 }
0x21e9   : >> { %v2657_v50 = vpop.f32.mrf.mxu0 }
0x21ea   : >> { %v2663_v24 = vadd.f32 %v5628_v17, %v2656_v41  ;;  %v2658_v16 = vadd.f32 %v2657_v50, %v4551_v48 }
0x21ec   : >> { %v2664_v60 = vadd.f32 %v5635_v8, %v2658_v16  ;;  %v2669_v22 = vmul.f32 %v2663_v24, %v2663_v24 }
0x21ee   : >> { %v2665_v44 = vadd.f32 %v2664_v60, %v2663_v24  ;;  %v2670_v43 = vmul.f32 %v2664_v60, %v2664_v60 }
0x21f0   : >> { %2666 = vadd.xlane.f32.xlu0 %v2665_v44  ;;  %v2671_v5 = vadd.f32 %v2670_v43, %v2669_v22 }
0x21f2   : >> { %2672 = vadd.xlane.f32.xlu1 %v2671_v5 }
0x2279   : >> { %v2667_v28 = vpop.xlane.xlu0 %2666 }
0x227a   : >> { %v2668_v47 = vmul.f32 0.00390625, %v2667_v28 }
0x227b   : >> { %v2673_v11 = vpop.xlane.xlu1 %2672 }
0x227c   : >> { %v2675_v38 = vmul.f32 %v2668_v47, %v2668_v47  ;;  %v2674_v2 = vmul.f32 0.00390625, %v2673_v11 }
0x227e   : >> { %v2676_v31 = vsub.f32 %v2674_v2, %v2675_v38 }
0x2280   : >> { %v2677_v4 = vmax.f32 %v2676_v31, 0.0 }
0x2282   : >> { %v2678_v57 = vadd.f32 1e-05, %v2677_v4 }
0x2284   : >> { %3920 = vrsqrt.f32 %v2678_v57 }
0x2291   : >> { %v3921_v54 = vpop.eup %3920 }
0x2292   : >> { %v2680_v15 = vmul.f32 %v5448_v63, %v3921_v54 }
0x2294   : >> { %2685 = vperm.xlu0 %3887, %v2680_v15   ;;  %v2681_v12 = vmul.f32 %v2680_v15, %v2668_v47 }
0x2296   : >> { %v2682_v23 = vsub.f32 %v5454_v42, %v2681_v12 }
0x2298   : >> { %2692 = vperm.xlu1 %3886, %v2682_v23  }
0x230f   : >> { %v2686_v56 = vpop.permute.xlu0 %2685 }
0x2310   : >> { %v2688_v21 = vmul.f32 %v2686_v56, %v2663_v24  ;;  %v2689_v58 = vmul.f32 %v2686_v56, %v2664_v60 }
0x2313   : >> { %v2693_v3 = vpop.permute.xlu1 %2692 }
0x2314   : >> { %v2695_v0 = vadd.f32 %v2693_v3, %v2688_v21  ;;  %v2696_v62 = vadd.f32 %v2693_v3, %v2689_v58 }
0x2316   : >> { %v2697_v19 = vmax.f32 %v2695_v0, 0.0  ;;  %v2698_v34 = vmax.f32 %v2696_v62, 0.0 }
0x2318   : >> { %2757 = vrot.lane.b32.xlu1 %v2698_v34, %s6263_s2  ;;  %2755 = vrot.lane.b32.xlu0 %v2697_v19, %s6263_s2 }
0x231c   : >> { %2749 = vrot.lane.b32.xlu1 %v2698_v34, %s6258_s18  ;;  %2747 = vrot.lane.b32.xlu0 %v2697_v19, %s6258_s18 }
0x2320   : >> { %2741 = vrot.lane.b32.xlu1 %v2698_v34, %s6264_s28  ;;  %2739 = vrot.lane.b32.xlu0 %v2697_v19, %s6264_s28 }
0x2324   : >> { %2733 = vrot.lane.b32.xlu1 %v2698_v34, %s6256_s25  ;;  %2731 = vrot.lane.b32.xlu0 %v2697_v19, %s6256_s25 }
0x2328   : >> { %2725 = vrot.lane.b32.xlu1 %v2698_v34, %s6257_s27  ;;  %2723 = vrot.lane.b32.xlu0 %v2697_v19, %s6257_s27 }
0x232c   : >> { %2717 = vrot.lane.b32.xlu1 %v2698_v34, %s6259_s19  ;;  %2715 = vrot.lane.b32.xlu0 %v2697_v19, %s6259_s19 }
0x2330   : >> { %2709 = vrot.lane.b32.xlu1 %v2698_v34, %s6260_s15  ;;  %2707 = vrot.lane.b32.xlu0 %v2697_v19, %s6260_s15 }
0x2334   : >> { %2701 = vrot.lane.b32.xlu1 %v2698_v34, %s6261_s22  ;;  %2699 = vrot.lane.b32.xlu0 %v2697_v19, %s6261_s22 }
0x238a   : >> { %v2758_v63 = vpop.permute.xlu1 %2757  ;;  %v2756_v42 = vpop.permute.xlu0 %2755 }
0x238b   : >> { %v2759_v9 = vsel %vm627_vm0, %v2756_v42, %v2758_v63  ;;  %v2760_v52 = vsel %vm627_vm0, %v2758_v63, %v2756_v42 }
0x238c   : >> { %v2761_v41 = vmul.f32 %v5346_v26, %v2759_v9  ;;  %v2762_v45 = vmul.f32 %v5349_v27, %v2760_v52 }
0x238e   : >> { %v2750_v50 = vpop.permute.xlu1 %2749  ;;  %2777 = vmatprep.subr.mxu1 %v2762_v45  ;;  %v2748_v24 = vpop.permute.xlu0 %2747 }
0x238f   : >> { %v2751_v16 = vsel %vm616_vm1, %v2748_v24, %v2750_v50  ;;  %v2752_v60 = vsel %vm616_vm1, %v2750_v50, %v2748_v24  ;;  %2778 = vmatpush1.msra.mxu1 %v2761_v41 }
0x2390   : >> { %v2753_v44 = vmul.f32 %v5356_v14, %v2751_v16  ;;  %v2754_v22 = vmul.f32 %v5359_v61, %v2752_v60 }
0x2392   : >> { %v2742_v43 = vpop.permute.xlu1 %2741  ;;  %2779 = vmatprep.subr.mxu1 %v2754_v22  ;;  %v2740_v5 = vpop.permute.xlu0 %2739 }
0x2393   : >> { %v2743_v26 = vsel %vm605_vm2, %v2740_v5, %v2742_v43  ;;  %v2744_v27 = vsel %vm605_vm2, %v2742_v43, %v2740_v5  ;;  %2780 = vmatpush1.msra.mxu1 %v2753_v44 }
0x2394   : >> { %v2745_v28 = vmul.f32 %v5366_v30, %v2743_v26  ;;  %v2746_v47 = vmul.f32 %v5369_v51, %v2744_v27 }
0x2396   : >> { %v2734_v11 = vpop.permute.xlu1 %2733  ;;  %2781 = vmatprep.subr.mxu1 %v2746_v47  ;;  %v2732_v38 = vpop.permute.xlu0 %2731 }
0x2397   : >> { %v2735_v14 = vsel %vm594_vm3, %v2732_v38, %v2734_v11  ;;  %v2736_v61 = vsel %vm594_vm3, %v2734_v11, %v2732_v38  ;;  %2782 = vmatpush1.msra.mxu1 %v2745_v28 }
0x2398   : >> { %v2737_v2 = vmul.f32 %v5376_v46, %v2735_v14  ;;  %v2738_v31 = vmul.f32 %v5379_v6, %v2736_v61 }
0x239a   : >> { %v2726_v4 = vpop.permute.xlu1 %2725  ;;  %2783 = vmatprep.subr.mxu1 %v2738_v31  ;;  %v2724_v57 = vpop.permute.xlu0 %2723 }
0x239b   : >> { %v2727_v30 = vsel %vm583_vm4, %v2724_v57, %v2726_v4  ;;  %v2728_v51 = vsel %vm583_vm4, %v2726_v4, %v2724_v57  ;;  %2784 = vmatpush1.msra.mxu1 %v2737_v2 }
0x239c   : >> { %v2729_v54 = vmul.f32 %v5386_v35, %v2728_v51  ;;  %2785 = vmatprep.subr.mxu1 %v2698_v34  ;;  %v2730_v15 = vmul.f32 %v5390_v1, %v2727_v30 }
0x239d   : >> { %2786 = vmatpush1.msra.mxu1 %v2697_v19 }
0x239e   : >> { %v2718_v12 = vpop.permute.xlu1 %2717  ;;  %2787 = vmatprep.subr.mxu1 %v2730_v15  ;;  %v2716_v46 = vpop.permute.xlu0 %2715 }
0x239f   : >> { %v2719_v6 = vsel %vm572_vm5, %v2716_v46, %v2718_v12  ;;  %v2720_v23 = vsel %vm572_vm5, %v2718_v12, %v2716_v46  ;;  %2788 = vmatpush1.msra.mxu1 %v2729_v54 }
0x23a0   : >> { %v2721_v56 = vmul.f32 %v5398_v37, %v2720_v23  ;;  %v2722_v21 = vmul.f32 %v5401_v33, %v2719_v6 }
0x23a2   : >> { %v2710_v58 = vpop.permute.xlu1 %2709  ;;  %2789 = vmatprep.subr.mxu1 %v2722_v21  ;;  %v2708_v35 = vpop.permute.xlu0 %2707 }
0x23a3   : >> { %v2711_v1 = vsel %vm561_vm6, %v2708_v35, %v2710_v58  ;;  %v2712_v3 = vsel %vm561_vm6, %v2710_v58, %v2708_v35  ;;  %2790 = vmatpush1.msra.mxu1 %v2721_v56 }
0x23a4   : >> { %v2713_v0 = vmul.f32 %v5408_v36, %v2712_v3  ;;  %v2714_v62 = vmul.f32 %v5411_v20, %v2711_v1  ;;  %v3990_v36 = vld [vmem:[%s6200_s6] sm:$0xff] }
0x23a5   : >> { %v5713_v20 = vmul.f32 %v3990_v36, %v5622_v55 }
0x23a6   : >> { %v2702_v19 = vpop.permute.xlu1 %2701  ;;  %2791 = vmatprep.subr.mxu1 %v2714_v62  ;;  %v2700_v34 = vpop.permute.xlu0 %2699 }
0x23a7   : >> { %v2703_v37 = vsel %vm550_vm7, %v2700_v34, %v2702_v19  ;;  %v2704_v33 = vsel %vm550_vm7, %v2702_v19, %v2700_v34  ;;  %2792 = vmatpush1.msra.mxu1 %v2713_v0  ;;  %v5738_v34 = vld [vmem:[%s6201_s7] sm:$0xff] }
0x23a8   : >> { %v2705_v63 = vmul.f32 %v5418_v18, %v2704_v33  ;;  %v2706_v42 = vmul.f32 %v5421_v13, %v2703_v37  ;;  %v3991_v18 = vld [vmem:[%s6200_s6 + $0x8] sm:$0xff] }
0x23a9   : >> { %v5720_v13 = vmul.f32 %v3991_v18, %v5622_v55 }
0x23aa   : >> { %2793 = vmatprep.subr.mxu1 %v2706_v42 }
0x23ab   : >> { %2794 = vmatpush1.msra.mxu1 %v2705_v63  ;;  %v5744_v63 = vld [vmem:[%s6202_s8] sm:$0xff] }
0x23ac   : >> { %3778 = vmatmul.mubr.msk.f32.vlgmr.msra.gmra.mxu1 %vm641_vm8, %v5521_v39 }
0x23ad   : >> { %3207 = vmatprep.mubr.f32.mxu1 %v4179_v29 }
0x246c   : >> { %v2829_v9 = vpop.f32.mrf.mxu1 }
0x246d   : >> { %v2830_v52 = vadd.f32 %v2829_v9, %v4653_v7 }
0x246e   : >> { %v2831_v39 = vpop.f32.mrf.mxu1 }
0x246f   : >> { %v2836_v41 = vadd.f32 %v5713_v20, %v2830_v52  ;;  %v2832_v45 = vadd.f32 %v2831_v39, %v4653_v7 }
0x2471   : >> { %v2837_v50 = vadd.f32 %v5720_v13, %v2832_v45  ;;  %v2842_v16 = vmul.f32 %v2836_v41, %v2836_v41 }
0x2473   : >> { %v2838_v24 = vadd.f32 %v2837_v50, %v2836_v41  ;;  %v2843_v60 = vmul.f32 %v2837_v50, %v2837_v50 }
0x2475   : >> { %2839 = vadd.xlane.f32.xlu0 %v2838_v24  ;;  %v2844_v44 = vadd.f32 %v2843_v60, %v2842_v16 }
0x2477   : >> { %2845 = vadd.xlane.f32.xlu1 %v2844_v44 }
0x24fe   : >> { %v2840_v22 = vpop.xlane.xlu0 %2839 }
0x24ff   : >> { %v2841_v43 = vmul.f32 0.00390625, %v2840_v22  ;;  %v5787_v22 = vld [vmem:[#allocation5 + $0x80] sm:$0xff] }
0x2500   : >> { %v2846_v5 = vpop.xlane.xlu1 %2845 }
0x2501   : >> { %v2848_v26 = vmul.f32 %v2841_v43, %v2841_v43  ;;  %v2847_v27 = vmul.f32 0.00390625, %v2846_v5  ;;  %v5790_v5 = vld [vmem:[#allocation5 + $0x88] sm:$0xff] }
0x2503   : >> { %v2849_v55 = vsub.f32 %v2847_v27, %v2848_v26 }
0x2505   : >> { %v2850_v28 = vmax.f32 %v2849_v55, 0.0 }
0x2507   : >> { %v2851_v47 = vadd.f32 1e-05, %v2850_v28 }
0x2509   : >> { %3922 = vrsqrt.f32 %v2851_v47 }
0x2516   : >> { %v3923_v11 = vpop.eup %3922 }
0x2517   : >> { %v2853_v38 = vmul.f32 %v5535_v10, %v3923_v11  ;;  %v5797_v11 = vld [vmem:[#allocation5 + $0x70] sm:$0xff] }
0x2519   : >> { %2858 = vperm.xlu0 %3887, %v2853_v38   ;;  %v2854_v14 = vmul.f32 %v2853_v38, %v2841_v43 }
0x251b   : >> { %v2855_v61 = vsub.f32 %v5541_v40, %v2854_v14  ;;  %v5800_v14 = vld [vmem:[#allocation5 + $0x78] sm:$0xff] }
0x251d   : >> { %2865 = vperm.xlu1 %3886, %v2855_v61  }
0x2594   : >> { %v2859_v2 = vpop.permute.xlu0 %2858 }
0x2595   : >> { %v2861_v31 = vmul.f32 %v2859_v2, %v2836_v41  ;;  %v2862_v4 = vmul.f32 %v2859_v2, %v2837_v50 }
0x2598   : >> { %v2866_v57 = vpop.permute.xlu1 %2865 }
0x2599   : >> { %v5727_v30 = vadd.f32 %v2866_v57, %v2861_v31  ;;  %v5729_v51 = vadd.f32 %v2866_v57, %v2862_v4 }
0x259b   : >> { %v2870_v54 = vmul.f32 0.0625, %v5727_v30  ;;  %v2871_v15 = vmul.f32 0.0625, %v5729_v51 }
0x259d   : >> { %v2872_v12 = vadd.f32 %v2870_v54, %v5281_v25  ;;  %v2873_v10 = vadd.f32 %v2871_v15, %v5284_v53  ;;  %v5807_v54 = vld [vmem:[#allocation5 + $0x60] sm:$0xff] }
0x259f   : >> { %v2874_v46 = vadd.f32 %v2873_v10, %v2872_v12  ;;  %v2878_v6 = vmul.f32 %v2872_v12, %v2872_v12  ;;  %v2879_v40 = vmul.f32 %v2873_v10, %v2873_v10 }
0x25a1   : >> { %2875 = vadd.xlane.f32.xlu0 %v2874_v46  ;;  %v2880_v23 = vadd.f32 %v2879_v40, %v2878_v6 }
0x25a3   : >> { %2881 = vadd.xlane.f32.xlu1 %v2880_v23 }
0x262a   : >> { %v2876_v56 = vpop.xlane.xlu0 %2875 }
0x262b   : >> { %v2877_v21 = vmul.f32 0.00390625, %v2876_v56  ;;  %v5817_v56 = vld [vmem:[#allocation5 + $0x50] sm:$0xff] }
0x262c   : >> { %v2882_v58 = vpop.xlane.xlu1 %2881 }
0x262d   : >> { %v2884_v35 = vmul.f32 %v2877_v21, %v2877_v21  ;;  %v2883_v1 = vmul.f32 0.00390625, %v2882_v58  ;;  %v5820_v58 = vld [vmem:[#allocation5 + $0x58] sm:$0xff] }
0x262f   : >> { %v2885_v3 = vsub.f32 %v2883_v1, %v2884_v35 }
0x2631   : >> { %v2886_v0 = vmax.f32 %v2885_v3, 0.0 }
0x2633   : >> { %v2887_v62 = vadd.f32 1e-05, %v2886_v0 }
0x2635   : >> { %3924 = vrsqrt.f32 %v2887_v62 }
0x2642   : >> { %v3925_v19 = vpop.eup %3924 }
0x2643   : >> { %v2889_v37 = vmul.f32 %v5738_v34, %v3925_v19  ;;  %v5827_v19 = vld [vmem:[#allocation5 + $0x30] sm:$0xff] }
0x2645   : >> { %2894 = vperm.xlu0 %3887, %v2889_v37   ;;  %v2890_v33 = vmul.f32 %v2889_v37, %v2877_v21 }
0x2647   : >> { %v2891_v42 = vsub.f32 %v5744_v63, %v2890_v33  ;;  %v5830_v33 = vld [vmem:[#allocation5 + $0x38] sm:$0xff] }
0x2649   : >> { %2901 = vperm.xlu1 %3886, %v2891_v42  }
0x26c0   : >> { %v2895_v36 = vpop.permute.xlu0 %2894 }
0x26c1   : >> { %v2897_v9 = vmul.f32 %v2895_v36, %v2872_v12  ;;  %v2898_v52 = vmul.f32 %v2895_v36, %v2873_v10  ;;  %v5810_v12 = vld [vmem:[#allocation5 + $0x68] sm:$0xff] }
0x26c4   : >> { %v2902_v18 = vpop.permute.xlu1 %2901 }
0x26c5   : >> { %v2904_v39 = vadd.f32 %v2902_v18, %v2897_v9  ;;  %v2905_v41 = vadd.f32 %v2902_v18, %v2898_v52 }
0x26c7   : >> { %v5747_v45 = vmax.f32 %v2904_v39, 0.0  ;;  %v5749_v50 = vmax.f32 %v2905_v41, 0.0  ;;  %v5839_v39 = vld [vmem:[#allocation5 + $0x20] sm:$0xff] }
0x26c9   : >> { %2966 = vrot.lane.b32.xlu1 %v5749_v50, %s6263_s2  ;;  %2964 = vrot.lane.b32.xlu0 %v5747_v45, %s6263_s2 }
0x26cd   : >> { %2958 = vrot.lane.b32.xlu1 %v5749_v50, %s6258_s18  ;;  %2956 = vrot.lane.b32.xlu0 %v5747_v45, %s6258_s18 }
0x26d1   : >> { %2950 = vrot.lane.b32.xlu1 %v5749_v50, %s6264_s28  ;;  %2948 = vrot.lane.b32.xlu0 %v5747_v45, %s6264_s28 }
0x26d5   : >> { %2942 = vrot.lane.b32.xlu1 %v5749_v50, %s6256_s25  ;;  %2940 = vrot.lane.b32.xlu0 %v5747_v45, %s6256_s25 }
0x26d9   : >> { %2934 = vrot.lane.b32.xlu1 %v5749_v50, %s6257_s27  ;;  %2932 = vrot.lane.b32.xlu0 %v5747_v45, %s6257_s27 }
0x26dd   : >> { %2926 = vrot.lane.b32.xlu1 %v5749_v50, %s6259_s19  ;;  %2924 = vrot.lane.b32.xlu0 %v5747_v45, %s6259_s19 }
0x26e1   : >> { %2918 = vrot.lane.b32.xlu1 %v5749_v50, %s6260_s15  ;;  %2916 = vrot.lane.b32.xlu0 %v5747_v45, %s6260_s15 }
0x26e5   : >> { %2910 = vrot.lane.b32.xlu1 %v5749_v50, %s6261_s22  ;;  %2908 = vrot.lane.b32.xlu0 %v5747_v45, %s6261_s22 }
0x273b   : >> { %v2967_v24 = vpop.permute.xlu1 %2966  ;;  %v2965_v16 = vpop.permute.xlu0 %2964 }
0x273c   : >> { %v2968_v60 = vsel %vm627_vm0, %v2965_v16, %v2967_v24  ;;  %v2969_v44 = vsel %vm627_vm0, %v2967_v24, %v2965_v16  ;;  %v5842_v24 = vld [vmem:[#allocation5 + $0x28] sm:$0xff] }
0x273d   : >> { %v2970_v43 = vmul.f32 %v5787_v22, %v2968_v60  ;;  %v2971_v26 = vmul.f32 %v5790_v5, %v2969_v44 }
0x273f   : >> { %v2959_v27 = vpop.permute.xlu1 %2958  ;;  %2986 = vmatprep.subr.mxu0 %v2971_v26  ;;  %v2957_v55 = vpop.permute.xlu0 %2956 }
0x2740   : >> { %v2960_v28 = vsel %vm616_vm1, %v2957_v55, %v2959_v27  ;;  %v2961_v47 = vsel %vm616_vm1, %v2959_v27, %v2957_v55  ;;  %2987 = vmatpush1.msra.mxu0 %v2970_v43  ;;  %v5849_v43 = vld [vmem:[#allocation5 + $0x10] sm:$0xff]  ;;  %v5852_v27 = vld [vmem:[#allocation5 + $0x18] sm:$0xff] }
0x2741   : >> { %v2962_v38 = vmul.f32 %v5797_v11, %v2960_v28  ;;  %v2963_v61 = vmul.f32 %v5800_v14, %v2961_v47 }
0x2743   : >> { %v2951_v2 = vpop.permute.xlu1 %2950  ;;  %2988 = vmatprep.subr.mxu0 %v2963_v61  ;;  %v2949_v31 = vpop.permute.xlu0 %2948 }
0x2744   : >> { %v2952_v4 = vsel %vm605_vm2, %v2949_v31, %v2951_v2  ;;  %v2953_v57 = vsel %vm605_vm2, %v2951_v2, %v2949_v31  ;;  %2989 = vmatpush1.msra.mxu0 %v2962_v38  ;;  %v5859_v2 = vld [vmem:[#allocation5] sm:$0xff] }
0x2745   : >> { %v2954_v15 = vmul.f32 %v5807_v54, %v2952_v4  ;;  %v2955_v10 = vmul.f32 %v5810_v12, %v2953_v57  ;;  %v5862_v4 = vld [vmem:[#allocation5 + $0x8] sm:$0xff] }
0x2747   : >> { %v2943_v46 = vpop.permute.xlu1 %2942  ;;  %2990 = vmatprep.subr.mxu0 %v2955_v10  ;;  %v2941_v6 = vpop.permute.xlu0 %2940 }
0x2748   : >> { %v2944_v40 = vsel %vm594_vm3, %v2941_v6, %v2943_v46  ;;  %v2945_v23 = vsel %vm594_vm3, %v2943_v46, %v2941_v6  ;;  %2991 = vmatpush1.msra.mxu0 %v2954_v15  ;;  %v5868_v15 = vld [vmem:[%s6195_s1] sm:$0xff] }
0x2749   : >> { %v2946_v21 = vmul.f32 %v5817_v56, %v2944_v40  ;;  %v2947_v35 = vmul.f32 %v5820_v58, %v2945_v23 }
0x274b   : >> { %v2935_v1 = vpop.permute.xlu1 %2934  ;;  %2992 = vmatprep.subr.mxu0 %v2947_v35  ;;  %v2933_v3 = vpop.permute.xlu0 %2932 }
0x274c   : >> { %v2936_v0 = vsel %vm583_vm4, %v2933_v3, %v2935_v1  ;;  %v2937_v62 = vsel %vm583_vm4, %v2935_v1, %v2933_v3  ;;  %2993 = vmatpush1.msra.mxu0 %v2946_v21 }
0x274d   : >> { %v2938_v37 = vmul.f32 %v5827_v19, %v2937_v62  ;;  %v2939_v42 = vmul.f32 %v5830_v33, %v2936_v0  ;;  %2994 = vmatprep.subr.mxu0 %v5749_v50 }
0x274e   : >> { %2995 = vmatpush1.msra.mxu0 %v5747_v45 }
0x274f   : >> { %v2927_v36 = vpop.permute.xlu1 %2926  ;;  %2996 = vmatprep.subr.mxu0 %v2939_v42  ;;  %v2925_v9 = vpop.permute.xlu0 %2924 }
0x2750   : >> { %v2928_v52 = vsel %vm572_vm5, %v2925_v9, %v2927_v36  ;;  %v2929_v18 = vsel %vm572_vm5, %v2927_v36, %v2925_v9  ;;  %2997 = vmatpush1.msra.mxu0 %v2938_v37 }
0x2751   : >> { %v2930_v41 = vmul.f32 %v5839_v39, %v2929_v18  ;;  %v2931_v50 = vmul.f32 %v5842_v24, %v2928_v52 }
0x2753   : >> { %v2919_v16 = vpop.permute.xlu1 %2918  ;;  %2998 = vmatprep.subr.mxu0 %v2931_v50  ;;  %v2917_v45 = vpop.permute.xlu0 %2916 }
0x2754   : >> { %v2920_v60 = vsel %vm561_vm6, %v2917_v45, %v2919_v16  ;;  %v2921_v44 = vsel %vm561_vm6, %v2919_v16, %v2917_v45  ;;  %2999 = vmatpush1.msra.mxu0 %v2930_v41  ;;  %v5886_v45 = vld [vmem:[%s6204_s10] sm:$0xff] }
0x2755   : >> { %v2922_v26 = vmul.f32 %v5849_v43, %v2921_v44  ;;  %v2923_v55 = vmul.f32 %v5852_v27, %v2920_v60 }
0x2757   : >> { %v2911_v28 = vpop.permute.xlu1 %2910  ;;  %3000 = vmatprep.subr.mxu0 %v2923_v55  ;;  %v2909_v47 = vpop.permute.xlu0 %2908 }
0x2758   : >> { %v2912_v38 = vsel %vm550_vm7, %v2909_v47, %v2911_v28  ;;  %v2913_v61 = vsel %vm550_vm7, %v2911_v28, %v2909_v47  ;;  %3001 = vmatpush1.msra.mxu0 %v2922_v26 }
0x2759   : >> { %v2914_v31 = vmul.f32 %v5859_v2, %v2913_v61  ;;  %v2915_v57 = vmul.f32 %v5862_v4, %v2912_v38 }
0x275b   : >> { %3002 = vmatprep.subr.mxu0 %v2915_v57 }
0x275c   : >> { %3003 = vmatpush1.msra.mxu0 %v2914_v31 }
0x275d   : >> { %3779 = vmatmul.mubr.msk.f32.vlgmr.msra.gmra.mxu0 %vm641_vm8, %v5868_v15 }
0x275e   : >> { %3415 = vmatprep.mubr.f32.mxu0 %v4179_v29 }
0x281d   : >> { %v3038_v10 = vpop.f32.mrf.mxu0 }
0x281e   : >> { %v3039_v46 = vadd.f32 %v3038_v10, %v4551_v48 }
0x281f   : >> { %v3040_v6 = vpop.f32.mrf.mxu0 }
0x2820   : >> { %v3043_v40 = vadd.f32 %v3039_v46, %v5628_v17  ;;  %v3041_v23 = vadd.f32 %v3040_v6, %v4551_v48 }
0x2822   : >> { %v3044_v21 = vadd.f32 %v3041_v23, %v5635_v8  ;;  %v3049_v1 = vmul.f32 %v3043_v40, %v3043_v40  ;;  %v5880_v8 = vld [vmem:[%s6203_s9] sm:$0xff] }
0x2824   : >> { %v3045_v35 = vadd.f32 %v3044_v21, %v3043_v40  ;;  %v3050_v3 = vmul.f32 %v3044_v21, %v3044_v21 }
0x2826   : >> { %3046 = vadd.xlane.f32.xlu0 %v3045_v35  ;;  %v3051_v0 = vadd.f32 %v3050_v3, %v3049_v1 }
0x2828   : >> { %3052 = vadd.xlane.f32.xlu1 %v3051_v0 }
0x28af   : >> { %v3047_v62 = vpop.xlane.xlu0 %3046 }
0x28b0   : >> { %v3048_v37 = vmul.f32 0.00390625, %v3047_v62 }
0x28b1   : >> { %v3053_v42 = vpop.xlane.xlu1 %3052 }
0x28b2   : >> { %v3055_v36 = vmul.f32 %v3048_v37, %v3048_v37  ;;  %v3054_v9 = vmul.f32 0.00390625, %v3053_v42 }
0x28b4   : >> { %v3056_v52 = vsub.f32 %v3054_v9, %v3055_v36 }
0x28b6   : >> { %v3057_v18 = vmax.f32 %v3056_v52, 0.0 }
0x28b8   : >> { %v3058_v41 = vadd.f32 1e-05, %v3057_v18 }
0x28ba   : >> { %3926 = vrsqrt.f32 %v3058_v41 }
0x28c7   : >> { %v3927_v17 = vpop.eup %3926 }
0x28c8   : >> { %v3060_v50 = vmul.f32 %v5880_v8, %v3927_v17 }
0x28ca   : >> { %3065 = vperm.xlu0 %3887, %v3060_v50   ;;  %v3061_v16 = vmul.f32 %v3060_v50, %v3048_v37 }
0x28cc   : >> { %v3062_v60 = vsub.f32 %v5886_v45, %v3061_v16 }
0x28ce   : >> { %3072 = vperm.xlu1 %3886, %v3062_v60  }
0x2945   : >> { %v3066_v44 = vpop.permute.xlu0 %3065 }
0x2946   : >> { %v3068_v26 = vmul.f32 %v3066_v44, %v3043_v40  ;;  %v3069_v55 = vmul.f32 %v3066_v44, %v3044_v21 }
0x2949   : >> { %v3073_v28 = vpop.permute.xlu1 %3072 }
0x294a   : >> { %v3075_v47 = vadd.f32 %v3073_v28, %v3068_v26  ;;  %v3076_v38 = vadd.f32 %v3073_v28, %v3069_v55 }
0x294c   : >> { %v3077_v61 = vmax.f32 %v3075_v47, 0.0  ;;  %v3078_v31 = vmax.f32 %v3076_v38, 0.0 }
0x294e   : >> { %3137 = vrot.lane.b32.xlu1 %v3078_v31, %s6263_s2  ;;  %3135 = vrot.lane.b32.xlu0 %v3077_v61, %s6263_s2 }
0x2952   : >> { %3129 = vrot.lane.b32.xlu1 %v3078_v31, %s6258_s18  ;;  %3127 = vrot.lane.b32.xlu0 %v3077_v61, %s6258_s18 }
0x2956   : >> { %3121 = vrot.lane.b32.xlu1 %v3078_v31, %s6264_s28  ;;  %3119 = vrot.lane.b32.xlu0 %v3077_v61, %s6264_s28 }
0x295a   : >> { %3113 = vrot.lane.b32.xlu1 %v3078_v31, %s6256_s25  ;;  %3111 = vrot.lane.b32.xlu0 %v3077_v61, %s6256_s25 }
0x295e   : >> { %3105 = vrot.lane.b32.xlu1 %v3078_v31, %s6257_s27  ;;  %3103 = vrot.lane.b32.xlu0 %v3077_v61, %s6257_s27 }
0x2962   : >> { %3097 = vrot.lane.b32.xlu1 %v3078_v31, %s6259_s19  ;;  %3095 = vrot.lane.b32.xlu0 %v3077_v61, %s6259_s19 }
0x2966   : >> { %3089 = vrot.lane.b32.xlu1 %v3078_v31, %s6260_s15  ;;  %3087 = vrot.lane.b32.xlu0 %v3077_v61, %s6260_s15 }
0x296a   : >> { %3081 = vrot.lane.b32.xlu1 %v3078_v31, %s6261_s22  ;;  %3079 = vrot.lane.b32.xlu0 %v3077_v61, %s6261_s22 }
0x29c0   : >> { %v3138_v57 = vpop.permute.xlu1 %3137  ;;  %v3136_v10 = vpop.permute.xlu0 %3135 }
0x29c1   : >> { %v3139_v46 = vsel %vm627_vm0, %v3136_v10, %v3138_v57  ;;  %v3140_v6 = vsel %vm627_vm0, %v3138_v57, %v3136_v10 }
0x29c2   : >> { %v3141_v40 = vmul.f32 %v5787_v22, %v3139_v46  ;;  %v3142_v23 = vmul.f32 %v5790_v5, %v3140_v6 }
0x29c4   : >> { %v3130_v21 = vpop.permute.xlu1 %3129  ;;  %3157 = vmatprep.subr.mxu1 %v3142_v23  ;;  %v3128_v35 = vpop.permute.xlu0 %3127 }
0x29c5   : >> { %v3131_v1 = vsel %vm616_vm1, %v3128_v35, %v3130_v21  ;;  %v3132_v3 = vsel %vm616_vm1, %v3130_v21, %v3128_v35  ;;  %3158 = vmatpush1.msra.mxu1 %v3141_v40 }
0x29c6   : >> { %v3133_v0 = vmul.f32 %v5797_v11, %v3131_v1  ;;  %v3134_v62 = vmul.f32 %v5800_v14, %v3132_v3 }
0x29c8   : >> { %v3122_v37 = vpop.permute.xlu1 %3121  ;;  %3159 = vmatprep.subr.mxu1 %v3134_v62  ;;  %v3120_v42 = vpop.permute.xlu0 %3119 }
0x29c9   : >> { %v3123_v36 = vsel %vm605_vm2, %v3120_v42, %v3122_v37  ;;  %v3124_v9 = vsel %vm605_vm2, %v3122_v37, %v3120_v42  ;;  %3160 = vmatpush1.msra.mxu1 %v3133_v0 }
0x29ca   : >> { %v3125_v52 = vmul.f32 %v5807_v54, %v3123_v36  ;;  %v3126_v18 = vmul.f32 %v5810_v12, %v3124_v9 }
0x29cc   : >> { %v3114_v41 = vpop.permute.xlu1 %3113  ;;  %3161 = vmatprep.subr.mxu1 %v3126_v18  ;;  %v3112_v17 = vpop.permute.xlu0 %3111  ;;  %v5953_v18 = vld [vmem:[#allocation2] sm:$0xff] }
0x29cd   : >> { %v3115_v50 = vsel %vm594_vm3, %v3112_v17, %v3114_v41  ;;  %v3116_v16 = vsel %vm594_vm3, %v3114_v41, %v3112_v17  ;;  %3162 = vmatpush1.msra.mxu1 %v3125_v52 }
0x29ce   : >> { %v3117_v60 = vmul.f32 %v5817_v56, %v3115_v50  ;;  %v3118_v44 = vmul.f32 %v5820_v58, %v3116_v16 }
0x29d0   : >> { %v3106_v26 = vpop.permute.xlu1 %3105  ;;  %3163 = vmatprep.subr.mxu1 %v3118_v44  ;;  %v3104_v55 = vpop.permute.xlu0 %3103 }
0x29d1   : >> { %v3107_v28 = vsel %vm583_vm4, %v3104_v55, %v3106_v26  ;;  %v3108_v47 = vsel %vm583_vm4, %v3106_v26, %v3104_v55  ;;  %3164 = vmatpush1.msra.mxu1 %v3117_v60 }
0x29d2   : >> { %v3109_v38 = vmul.f32 %v5827_v19, %v3108_v47  ;;  %v3110_v57 = vmul.f32 %v5830_v33, %v3107_v28  ;;  %3165 = vmatprep.subr.mxu1 %v3078_v31 }
0x29d3   : >> { %3166 = vmatpush1.msra.mxu1 %v3077_v61 }
0x29d4   : >> { %v3098_v10 = vpop.permute.xlu1 %3097  ;;  %3167 = vmatprep.subr.mxu1 %v3110_v57  ;;  %v3096_v46 = vpop.permute.xlu0 %3095 }
0x29d5   : >> { %v3099_v6 = vsel %vm572_vm5, %v3096_v46, %v3098_v10  ;;  %v3100_v40 = vsel %vm572_vm5, %v3098_v10, %v3096_v46  ;;  %3168 = vmatpush1.msra.mxu1 %v3109_v38 }
0x29d6   : >> { %v3101_v23 = vmul.f32 %v5839_v39, %v3100_v40  ;;  %v3102_v21 = vmul.f32 %v5842_v24, %v3099_v6 }
0x29d8   : >> { %v3090_v35 = vpop.permute.xlu1 %3089  ;;  %3169 = vmatprep.subr.mxu1 %v3102_v21  ;;  %v3088_v1 = vpop.permute.xlu0 %3087 }
0x29d9   : >> { %v3091_v61 = vsel %vm561_vm6, %v3088_v1, %v3090_v35  ;;  %v3092_v31 = vsel %vm561_vm6, %v3090_v35, %v3088_v1  ;;  %3170 = vmatpush1.msra.mxu1 %v3101_v23  ;;  %v5971_v1 = vld [vmem:[%s6206_s12] sm:$0xff] }
0x29da   : >> { %v3093_v3 = vmul.f32 %v5849_v43, %v3092_v31  ;;  %v3094_v0 = vmul.f32 %v5852_v27, %v3091_v61 }
0x29dc   : >> { %v3082_v62 = vpop.permute.xlu1 %3081  ;;  %3171 = vmatprep.subr.mxu1 %v3094_v0  ;;  %v3080_v37 = vpop.permute.xlu0 %3079  ;;  %v3633_v0 = vmul.f32 2.0, %v5729_v51 }
0x29dd   : >> { %v3083_v42 = vsel %vm550_vm7, %v3080_v37, %v3082_v62  ;;  %v3084_v36 = vsel %vm550_vm7, %v3082_v62, %v3080_v37  ;;  %3172 = vmatpush1.msra.mxu1 %v3093_v3  ;;  %v3632_v3 = vmul.f32 2.0, %v5727_v30 }
0x29de   : >> { %v3085_v9 = vmul.f32 %v5859_v2, %v3084_v36  ;;  %v3086_v52 = vmul.f32 %v5862_v4, %v3083_v42 }
0x29e0   : >> { %3173 = vmatprep.subr.mxu1 %v3086_v52  ;;  %v3634_v52 = vadd.f32 %v3632_v3, %v5544_v49 }
0x29e1   : >> { %3174 = vmatpush1.msra.mxu1 %v3085_v9 }
0x29e2   : >> { %3780 = vmatmul.mubr.msk.f32.vlgmr.msra.gmra.mxu1 %vm641_vm8, %v5953_v18 }
0x29e3   : >> { %3589 = vmatprep.mubr.f32.mxu1 %v4179_v29 }
0x2aa2   : >> { %v3209_v41 = vpop.f32.mrf.mxu1 }
0x2aa3   : >> { %v3210_v17 = vadd.f32 %v3209_v41, %v4653_v7  ;;  %v3635_v41 = vadd.f32 %v3633_v0, %v5546_v59 }
0x2aa4   : >> { %v3211_v50 = vpop.f32.mrf.mxu1 }
0x2aa5   : >> { %v3214_v16 = vadd.f32 %v3210_v17, %v5713_v20  ;;  %v3212_v60 = vadd.f32 %v3211_v50, %v4653_v7 }
0x2aa7   : >> { %v3215_v44 = vadd.f32 %v3212_v60, %v5720_v13  ;;  %v3220_v55 = vmul.f32 %v3214_v16, %v3214_v16  ;;  %v5965_v13 = vld [vmem:[%s6205_s11] sm:$0xff] }
0x2aa9   : >> { %v3216_v26 = vadd.f32 %v3215_v44, %v3214_v16  ;;  %v3221_v28 = vmul.f32 %v3215_v44, %v3215_v44 }
0x2aab   : >> { %3217 = vadd.xlane.f32.xlu0 %v3216_v26  ;;  %v3222_v47 = vadd.f32 %v3221_v28, %v3220_v55 }
0x2aad   : >> { %3223 = vadd.xlane.f32.xlu1 %v3222_v47 }
0x2b34   : >> { %v3218_v38 = vpop.xlane.xlu0 %3217 }
0x2b35   : >> { %v3219_v57 = vmul.f32 0.00390625, %v3218_v38 }
0x2b36   : >> { %v3224_v10 = vpop.xlane.xlu1 %3223 }
0x2b37   : >> { %v3226_v29 = vmul.f32 %v3219_v57, %v3219_v57  ;;  %v3225_v46 = vmul.f32 0.00390625, %v3224_v10 }
0x2b39   : >> { %v3227_v6 = vsub.f32 %v3225_v46, %v3226_v29 }
0x2b3b   : >> { %v3228_v40 = vmax.f32 %v3227_v6, 0.0 }
0x2b3d   : >> { %v3229_v23 = vadd.f32 1e-05, %v3228_v40 }
0x2b3f   : >> { %3928 = vrsqrt.f32 %v3229_v23 }
0x2b4c   : >> { %v3929_v20 = vpop.eup %3928 }
0x2b4d   : >> { %v3231_v21 = vmul.f32 %v5965_v13, %v3929_v20 }
0x2b4f   : >> { %3236 = vperm.xlu0 %3887, %v3231_v21   ;;  %v3232_v35 = vmul.f32 %v3231_v21, %v3219_v57 }
0x2b51   : >> { %v3233_v61 = vsub.f32 %v5971_v1, %v3232_v35 }
0x2b53   : >> { %3243 = vperm.xlu1 %3886, %v3233_v61  }
0x2bca   : >> { %v3237_v31 = vpop.permute.xlu0 %3236 }
0x2bcb   : >> { %v3239_v62 = vmul.f32 %v3237_v31, %v3214_v16  ;;  %v3240_v37 = vmul.f32 %v3237_v31, %v3215_v44 }
0x2bce   : >> { %v3244_v42 = vpop.permute.xlu1 %3243 }
0x2bcf   : >> { %v3246_v36 = vadd.f32 %v3244_v42, %v3239_v62  ;;  %v3247_v9 = vadd.f32 %v3244_v42, %v3240_v37 }
0x2bd1   : >> { %v3249_v17 = vmul.f32 0.125, %v3246_v36  ;;  %v3250_v50 = vmul.f32 0.125, %v3247_v9  ;;  %v3636_v60 = vmul.f32 2.0, %v3246_v36  ;;  %v3637_v26 = vmul.f32 2.0, %v3247_v9 }
0x2bd3   : >> { %v3251_v55 = vadd.f32 %v3249_v17, %v5281_v25  ;;  %v3252_v28 = vadd.f32 %v3250_v50, %v5284_v53  ;;  %v5980_v30 = vadd.f32 %v3636_v60, %v3634_v52  ;;  %v5982_v51 = vadd.f32 %v3637_v26, %v3635_v41 }
0x2bd5   : >> { %v3253_v16 = vadd.f32 %v3252_v28, %v3251_v55  ;;  %v3257_v44 = vmul.f32 %v3251_v55, %v3251_v55  ;;  %v3258_v47 = vmul.f32 %v3252_v28, %v3252_v28 }
0x2bd7   : >> { %3254 = vadd.xlane.f32.xlu0 %v3253_v16  ;;  %v3259_v38 = vadd.f32 %v3258_v47, %v3257_v44 }
0x2bd9   : >> { %3260 = vadd.xlane.f32.xlu1 %v3259_v38 }
0x2c60   : >> { %v3255_v49 = vpop.xlane.xlu0 %3254 }
0x2c61   : >> { %v3256_v59 = vmul.f32 0.00390625, %v3255_v49 }
0x2c62   : >> { %v3261_v57 = vpop.xlane.xlu1 %3260 }
0x2c63   : >> { %v3263_v10 = vmul.f32 %v3256_v59, %v3256_v59  ;;  %v3262_v29 = vmul.f32 0.00390625, %v3261_v57 }
0x2c65   : >> { %v3264_v46 = vsub.f32 %v3262_v29, %v3263_v10 }
0x2c67   : >> { %v3265_v6 = vmax.f32 %v3264_v46, 0.0 }
0x2c69   : >> { %v3266_v40 = vadd.f32 1e-05, %v3265_v6 }
0x2c6b   : >> { %3930 = vrsqrt.f32 %v3266_v40 }
0x2c78   : >> { %v3931_v23 = vpop.eup %3930 }
0x2c79   : >> { %v3268_v20 = vmul.f32 %v5738_v34, %v3931_v23 }
0x2c7b   : >> { %3273 = vperm.xlu0 %3887, %v3268_v20   ;;  %v3269_v21 = vmul.f32 %v3268_v20, %v3256_v59 }
0x2c7d   : >> { %v3270_v35 = vsub.f32 %v5744_v63, %v3269_v21 }
0x2c7f   : >> { %3280 = vperm.xlu1 %3886, %v3270_v35  }
0x2cf6   : >> { %v3274_v61 = vpop.permute.xlu0 %3273 }
0x2cf7   : >> { %v3276_v31 = vmul.f32 %v3274_v61, %v3251_v55  ;;  %v3277_v3 = vmul.f32 %v3274_v61, %v3252_v28 }
0x2cfa   : >> { %v3281_v0 = vpop.permute.xlu1 %3280 }
0x2cfb   : >> { %v3283_v62 = vadd.f32 %v3281_v0, %v3276_v31  ;;  %v3284_v37 = vadd.f32 %v3281_v0, %v3277_v3 }
0x2cfd   : >> { %v3285_v42 = vmax.f32 %v3283_v62, 0.0  ;;  %v3286_v36 = vmax.f32 %v3284_v37, 0.0 }
0x2cff   : >> { %3345 = vrot.lane.b32.xlu1 %v3286_v36, %s6263_s2  ;;  %3343 = vrot.lane.b32.xlu0 %v3285_v42, %s6263_s2 }
0x2d03   : >> { %3337 = vrot.lane.b32.xlu1 %v3286_v36, %s6258_s18  ;;  %3335 = vrot.lane.b32.xlu0 %v3285_v42, %s6258_s18 }
0x2d07   : >> { %3329 = vrot.lane.b32.xlu1 %v3286_v36, %s6264_s28  ;;  %3327 = vrot.lane.b32.xlu0 %v3285_v42, %s6264_s28 }
0x2d0b   : >> { %3321 = vrot.lane.b32.xlu1 %v3286_v36, %s6256_s25  ;;  %3319 = vrot.lane.b32.xlu0 %v3285_v42, %s6256_s25 }
0x2d0f   : >> { %3313 = vrot.lane.b32.xlu1 %v3286_v36, %s6257_s27  ;;  %3311 = vrot.lane.b32.xlu0 %v3285_v42, %s6257_s27 }
0x2d13   : >> { %3305 = vrot.lane.b32.xlu1 %v3286_v36, %s6259_s19  ;;  %3303 = vrot.lane.b32.xlu0 %v3285_v42, %s6259_s19 }
0x2d17   : >> { %3297 = vrot.lane.b32.xlu1 %v3286_v36, %s6260_s15  ;;  %3295 = vrot.lane.b32.xlu0 %v3285_v42, %s6260_s15 }
0x2d1b   : >> { %3289 = vrot.lane.b32.xlu1 %v3286_v36, %s6261_s22  ;;  %3287 = vrot.lane.b32.xlu0 %v3285_v42, %s6261_s22 }
0x2d71   : >> { %v3346_v34 = vpop.permute.xlu1 %3345  ;;  %v3344_v63 = vpop.permute.xlu0 %3343 }
0x2d72   : >> { %v3347_v9 = vsel %vm627_vm0, %v3344_v63, %v3346_v34  ;;  %v3348_v52 = vsel %vm627_vm0, %v3346_v34, %v3344_v63 }
0x2d73   : >> { %v3349_v41 = vmul.f32 %v5787_v22, %v3347_v9  ;;  %v3350_v17 = vmul.f32 %v5790_v5, %v3348_v52 }
0x2d75   : >> { %v3338_v50 = vpop.permute.xlu1 %3337  ;;  %3365 = vmatprep.subr.mxu0 %v3350_v17  ;;  %v3336_v60 = vpop.permute.xlu0 %3335 }
0x2d76   : >> { %v3339_v26 = vsel %vm616_vm1, %v3336_v60, %v3338_v50  ;;  %v3340_v55 = vsel %vm616_vm1, %v3338_v50, %v3336_v60  ;;  %3366 = vmatpush1.msra.mxu0 %v3349_v41 }
0x2d77   : >> { %v3341_v28 = vmul.f32 %v5797_v11, %v3339_v26  ;;  %v3342_v16 = vmul.f32 %v5800_v14, %v3340_v55 }
0x2d79   : >> { %v3330_v44 = vpop.permute.xlu1 %3329  ;;  %3367 = vmatprep.subr.mxu0 %v3342_v16  ;;  %v3328_v47 = vpop.permute.xlu0 %3327 }
0x2d7a   : >> { %v3331_v38 = vsel %vm605_vm2, %v3328_v47, %v3330_v44  ;;  %v3332_v49 = vsel %vm605_vm2, %v3330_v44, %v3328_v47  ;;  %3368 = vmatpush1.msra.mxu0 %v3341_v28  ;;  %v6053_v47 = vstv %s3248_s0  ;;  %s6268_s0 = sand.u32 (%p498_p12), 1, %s4144_s30  }
0x2d7b   : >> { %v3333_v59 = vmul.f32 %v5807_v54, %v3331_v38  ;;  %v3334_v57 = vmul.f32 %v5810_v12, %v3332_v49  ;;  %v4016_v38 = vld [vmem:[%s6197_s3] sm:$0xff]  ;;  %s3649_s4 = scalar_lea.sflag (%p498_p12), [#allocation4], %s6268_s0 }
0x2d7c   : >> { %v3423_v49 = vmul.f32 %v4016_v38, %v6053_v47 }
0x2d7d   : >> { %v3322_v10 = vpop.permute.xlu1 %3321  ;;  %3369 = vmatprep.subr.mxu0 %v3334_v57  ;;  %v3320_v29 = vpop.permute.xlu0 %3319 }
0x2d7e   : >> { %v3323_v46 = vsel %vm594_vm3, %v3320_v29, %v3322_v10  ;;  %v3324_v6 = vsel %vm594_vm3, %v3322_v10, %v3320_v29  ;;  %3370 = vmatpush1.msra.mxu0 %v3333_v59  ;;  %v4017_v10 = vld [vmem:[%s6197_s3 + $0x8] sm:$0xff] }
0x2d7f   : >> { %v3325_v40 = vmul.f32 %v5817_v56, %v3323_v46  ;;  %v3326_v23 = vmul.f32 %v5820_v58, %v3324_v6  ;;  %v3424_v29 = vmul.f32 %v4017_v10, %v6053_v47 }
0x2d81   : >> { %v3314_v20 = vpop.permute.xlu1 %3313  ;;  %3371 = vmatprep.subr.mxu0 %v3326_v23  ;;  %v3312_v21 = vpop.permute.xlu0 %3311 }
0x2d82   : >> { %v3315_v35 = vsel %vm583_vm4, %v3312_v21, %v3314_v20  ;;  %v3316_v61 = vsel %vm583_vm4, %v3314_v20, %v3312_v21  ;;  %3372 = vmatpush1.msra.mxu0 %v3325_v40 }
0x2d83   : >> { %v3317_v31 = vmul.f32 %v5827_v19, %v3316_v61  ;;  %v3318_v3 = vmul.f32 %v5830_v33, %v3315_v35  ;;  %3373 = vmatprep.subr.mxu0 %v3286_v36 }
0x2d84   : >> { %3374 = vmatpush1.msra.mxu0 %v3285_v42 }
0x2d85   : >> { %v3306_v0 = vpop.permute.xlu1 %3305  ;;  %3375 = vmatprep.subr.mxu0 %v3318_v3  ;;  %v3304_v62 = vpop.permute.xlu0 %3303 }
0x2d86   : >> { %v3307_v37 = vsel %vm572_vm5, %v3304_v62, %v3306_v0  ;;  %v3308_v34 = vsel %vm572_vm5, %v3306_v0, %v3304_v62  ;;  %3376 = vmatpush1.msra.mxu0 %v3317_v31 }
0x2d87   : >> { %v3309_v63 = vmul.f32 %v5839_v39, %v3308_v34  ;;  %v3310_v9 = vmul.f32 %v5842_v24, %v3307_v37 }
0x2d89   : >> { %v3298_v52 = vpop.permute.xlu1 %3297  ;;  %3377 = vmatprep.subr.mxu0 %v3310_v9  ;;  %v3296_v41 = vpop.permute.xlu0 %3295 }
0x2d8a   : >> { %v3299_v42 = vsel %vm561_vm6, %v3296_v41, %v3298_v52  ;;  %v3300_v36 = vsel %vm561_vm6, %v3298_v52, %v3296_v41  ;;  %3378 = vmatpush1.msra.mxu0 %v3309_v63 }
0x2d8b   : >> { %v3301_v17 = vmul.f32 %v5849_v43, %v3300_v36  ;;  %v3302_v50 = vmul.f32 %v5852_v27, %v3299_v42 }
0x2d8d   : >> { %v3290_v60 = vpop.permute.xlu1 %3289  ;;  %3379 = vmatprep.subr.mxu0 %v3302_v50  ;;  %v3288_v26 = vpop.permute.xlu0 %3287 }
0x2d8e   : >> { %v3291_v55 = vsel %vm550_vm7, %v3288_v26, %v3290_v60  ;;  %v3292_v28 = vsel %vm550_vm7, %v3290_v60, %v3288_v26  ;;  %3380 = vmatpush1.msra.mxu0 %v3301_v17 }
0x2d8f   : >> { %v3293_v16 = vmul.f32 %v5859_v2, %v3292_v28  ;;  %v3294_v44 = vmul.f32 %v5862_v4, %v3291_v55 }
0x2d91   : >> { %3381 = vmatprep.subr.mxu0 %v3294_v44 }
0x2d92   : >> { %3382 = vmatpush1.msra.mxu0 %v3293_v16 }
0x2d93   : >> { %3781 = vmatmul.mubr.msk.f32.vlgmr.msra.gmra.mxu0 %vm641_vm8, %v5868_v15 }
0x2e53   : >> { %v3417_v59 = vpop.f32.mrf.mxu0 }
0x2e54   : >> { %v3418_v57 = vadd.f32 %v3417_v59, %v4551_v48 }
0x2e55   : >> { %v3419_v46 = vpop.f32.mrf.mxu0 }
0x2e56   : >> { %v3425_v15 = vadd.f32 %v3423_v49, %v3418_v57  ;;  %v3420_v6 = vadd.f32 %v3419_v46, %v4551_v48 }
0x2e58   : >> { %v3426_v40 = vadd.f32 %v3424_v29, %v3420_v6  ;;  %v3431_v20 = vmul.f32 %v3425_v15, %v3425_v15 }
0x2e5a   : >> { %v3427_v23 = vadd.f32 %v3426_v40, %v3425_v15  ;;  %v3432_v21 = vmul.f32 %v3426_v40, %v3426_v40 }
0x2e5c   : >> { %3428 = vadd.xlane.f32.xlu0 %v3427_v23  ;;  %v3433_v35 = vadd.f32 %v3432_v21, %v3431_v20 }
0x2e5e   : >> { %3434 = vadd.xlane.f32.xlu1 %v3433_v35 }
0x2ee5   : >> { %v3429_v61 = vpop.xlane.xlu0 %3428 }
0x2ee6   : >> { %v3430_v31 = vmul.f32 0.00390625, %v3429_v61 }
0x2ee7   : >> { %v3435_v3 = vpop.xlane.xlu1 %3434 }
0x2ee8   : >> { %v3437_v0 = vmul.f32 %v3430_v31, %v3430_v31  ;;  %v3436_v62 = vmul.f32 0.00390625, %v3435_v3 }
0x2eea   : >> { %v3438_v37 = vsub.f32 %v3436_v62, %v3437_v0 }
0x2eec   : >> { %v3439_v34 = vmax.f32 %v3438_v37, 0.0 }
0x2eee   : >> { %v3440_v63 = vadd.f32 1e-05, %v3439_v34 }
0x2ef0   : >> { %3932 = vrsqrt.f32 %v3440_v63 }
0x2efd   : >> { %v3933_v9 = vpop.eup %3932 }
0x2efe   : >> { %v3442_v52 = vmul.f32 %v5880_v8, %v3933_v9 }
0x2f00   : >> { %3447 = vperm.xlu0 %3887, %v3442_v52   ;;  %v3443_v48 = vmul.f32 %v3442_v52, %v3430_v31 }
0x2f02   : >> { %v3444_v41 = vsub.f32 %v5886_v45, %v3443_v48 }
0x2f04   : >> { %3454 = vperm.xlu1 %3886, %v3444_v41  }
0x2f7b   : >> { %v3448_v42 = vpop.permute.xlu0 %3447 }
0x2f7c   : >> { %v3450_v36 = vmul.f32 %v3448_v42, %v3425_v15  ;;  %v3451_v17 = vmul.f32 %v3448_v42, %v3426_v40 }
0x2f7f   : >> { %v3455_v50 = vpop.permute.xlu1 %3454 }
0x2f80   : >> { %v3457_v60 = vadd.f32 %v3455_v50, %v3450_v36  ;;  %v3458_v26 = vadd.f32 %v3455_v50, %v3451_v17 }
0x2f82   : >> { %v3459_v55 = vmax.f32 %v3457_v60, 0.0  ;;  %v3460_v28 = vmax.f32 %v3458_v26, 0.0 }
0x2f84   : >> { %3519 = vrot.lane.b32.xlu1 %v3460_v28, %s6263_s2  ;;  %3517 = vrot.lane.b32.xlu0 %v3459_v55, %s6263_s2 }
0x2f88   : >> { %3511 = vrot.lane.b32.xlu1 %v3460_v28, %s6258_s18  ;;  %3509 = vrot.lane.b32.xlu0 %v3459_v55, %s6258_s18 }
0x2f8c   : >> { %3503 = vrot.lane.b32.xlu1 %v3460_v28, %s6264_s28  ;;  %3501 = vrot.lane.b32.xlu0 %v3459_v55, %s6264_s28 }
0x2f90   : >> { %3495 = vrot.lane.b32.xlu1 %v3460_v28, %s6256_s25  ;;  %3493 = vrot.lane.b32.xlu0 %v3459_v55, %s6256_s25 }
0x2f94   : >> { %3487 = vrot.lane.b32.xlu1 %v3460_v28, %s6257_s27  ;;  %3485 = vrot.lane.b32.xlu0 %v3459_v55, %s6257_s27 }
0x2f98   : >> { %3479 = vrot.lane.b32.xlu1 %v3460_v28, %s6259_s19  ;;  %3477 = vrot.lane.b32.xlu0 %v3459_v55, %s6259_s19  ;;  %s3789_s19 = sshll.u32 (%p498_p12), %s4277_s17, 8 }
0x2f99   : > { %s3661_s28 = scalar_lea.hbm (%p498_p12), %s6208_s14, %s3789_s19 }
0x2f9c   : >> { %3471 = vrot.lane.b32.xlu1 %v3460_v28, %s6260_s15  ;;  %3469 = vrot.lane.b32.xlu0 %v3459_v55, %s6260_s15 }
0x2fa0   : >> { %3463 = vrot.lane.b32.xlu1 %v3460_v28, %s6261_s22  ;;  %3461 = vrot.lane.b32.xlu0 %v3459_v55, %s6261_s22 }
0x2ff6   : >> { %v3520_v8 = vpop.permute.xlu1 %3519  ;;  %v3518_v45 = vpop.permute.xlu0 %3517 }
0x2ff7   : >> { %v3521_v16 = vsel %vm627_vm0, %v3518_v45, %v3520_v8  ;;  %v3522_v44 = vsel %vm627_vm0, %v3520_v8, %v3518_v45 }
0x2ff8   : >> { %v3523_v38 = vmul.f32 %v5787_v22, %v3521_v16  ;;  %v3524_v49 = vmul.f32 %v5790_v5, %v3522_v44 }
0x2ffa   : >> { %v3512_v59 = vpop.permute.xlu1 %3511  ;;  %3539 = vmatprep.subr.mxu1 %v3524_v49  ;;  %v3510_v57 = vpop.permute.xlu0 %3509 }
0x2ffb   : >> { %v3513_v10 = vsel %vm616_vm1, %v3510_v57, %v3512_v59  ;;  %v3514_v29 = vsel %vm616_vm1, %v3512_v59, %v3510_v57  ;;  %3540 = vmatpush1.msra.mxu1 %v3523_v38 }
0x2ffc   : >> { %v3515_v46 = vmul.f32 %v5797_v11, %v3513_v10  ;;  %v3516_v15 = vmul.f32 %v5800_v14, %v3514_v29 }
0x2ffe   : >> { %v3504_v6 = vpop.permute.xlu1 %3503  ;;  %3541 = vmatprep.subr.mxu1 %v3516_v15  ;;  %v3502_v40 = vpop.permute.xlu0 %3501 }
0x2fff   : >> { %v3505_v22 = vsel %vm605_vm2, %v3502_v40, %v3504_v6  ;;  %v3506_v5 = vsel %vm605_vm2, %v3504_v6, %v3502_v40  ;;  %3542 = vmatpush1.msra.mxu1 %v3515_v46 }
0x3000   : >> { %v3507_v23 = vmul.f32 %v5807_v54, %v3505_v22  ;;  %v3508_v20 = vmul.f32 %v5810_v12, %v3506_v5 }
0x3002   : >> { %v3496_v21 = vpop.permute.xlu1 %3495  ;;  %3543 = vmatprep.subr.mxu1 %v3508_v20  ;;  %v3494_v35 = vpop.permute.xlu0 %3493 }
0x3003   : >> { %v3497_v11 = vsel %vm594_vm3, %v3494_v35, %v3496_v21  ;;  %v3498_v14 = vsel %vm594_vm3, %v3496_v21, %v3494_v35  ;;  %3544 = vmatpush1.msra.mxu1 %v3507_v23 }
0x3004   : >> { %v3499_v61 = vmul.f32 %v5817_v56, %v3497_v11  ;;  %v3500_v31 = vmul.f32 %v5820_v58, %v3498_v14 }
0x3006   : >> { %v3488_v3 = vpop.permute.xlu1 %3487  ;;  %3545 = vmatprep.subr.mxu1 %v3500_v31  ;;  %v3486_v0 = vpop.permute.xlu0 %3485 }
0x3007   : >> { %v3489_v54 = vsel %vm583_vm4, %v3486_v0, %v3488_v3  ;;  %v3490_v12 = vsel %vm583_vm4, %v3488_v3, %v3486_v0  ;;  %3546 = vmatpush1.msra.mxu1 %v3499_v61 }
0x3008   : >> { %v3491_v62 = vmul.f32 %v5827_v19, %v3490_v12  ;;  %v3492_v37 = vmul.f32 %v5830_v33, %v3489_v54  ;;  %3547 = vmatprep.subr.mxu1 %v3460_v28 }
0x3009   : >> { %3548 = vmatpush1.msra.mxu1 %v3459_v55 }
0x300a   : >> { %v3480_v34 = vpop.permute.xlu1 %3479  ;;  %3549 = vmatprep.subr.mxu1 %v3492_v37  ;;  %v3478_v56 = vpop.permute.xlu0 %3477 }
0x300b   : >> { %v3481_v58 = vsel %vm572_vm5, %v3478_v56, %v3480_v34  ;;  %v3482_v63 = vsel %vm572_vm5, %v3480_v34, %v3478_v56  ;;  %3550 = vmatpush1.msra.mxu1 %v3491_v62 }
0x300c   : >> { %v3483_v9 = vmul.f32 %v5839_v39, %v3482_v63  ;;  %v3484_v52 = vmul.f32 %v5842_v24, %v3481_v58 }
0x300e   : >> { %v3472_v48 = vpop.permute.xlu1 %3471  ;;  %3551 = vmatprep.subr.mxu1 %v3484_v52  ;;  %v3470_v19 = vpop.permute.xlu0 %3469 }
0x300f   : >> { %v3473_v33 = vsel %vm561_vm6, %v3470_v19, %v3472_v48  ;;  %v3474_v41 = vsel %vm561_vm6, %v3472_v48, %v3470_v19  ;;  %3552 = vmatpush1.msra.mxu1 %v3483_v9 }
0x3010   : >> { %v3475_v42 = vmul.f32 %v5849_v43, %v3474_v41  ;;  %v3476_v36 = vmul.f32 %v5852_v27, %v3473_v33  ;;  %v4018_v43 = vld [vmem:[%s6200_s6] sm:$0xff] }
0x3011   : >> { %v3596_v27 = vmul.f32 %v4018_v43, %v6053_v47 }
0x3012   : >> { %v3464_v17 = vpop.permute.xlu1 %3463  ;;  %3553 = vmatprep.subr.mxu1 %v3476_v36  ;;  %v3462_v50 = vpop.permute.xlu0 %3461 }
0x3013   : >> { %v3465_v39 = vsel %vm550_vm7, %v3462_v50, %v3464_v17  ;;  %v3466_v24 = vsel %vm550_vm7, %v3464_v17, %v3462_v50  ;;  %3554 = vmatpush1.msra.mxu1 %v3475_v42 }
0x3014   : >> { %v3467_v60 = vmul.f32 %v5859_v2, %v3466_v24  ;;  %v3468_v26 = vmul.f32 %v5862_v4, %v3465_v39  ;;  %v4019_v2 = vld [vmem:[%s6200_s6 + $0x8] sm:$0xff] }
0x3015   : >> { %v3597_v4 = vmul.f32 %v4019_v2, %v6053_v47 }
0x3016   : >> { %3555 = vmatprep.subr.mxu1 %v3468_v26 }
0x3017   : >> { %3556 = vmatpush1.msra.mxu1 %v3467_v60 }
0x3018   : >> { %3782 = vmatmul.mubr.msk.f32.vlgmr.msra.gmra.mxu1 %vm641_vm8, %v5953_v18 }
0x30d8   : >> { %v3591_v55 = vpop.f32.mrf.mxu1 }
0x30d9   : >> { %v3592_v32 = vadd.f32 %v3591_v55, %v4653_v7 }
0x30da   : >> { %v3593_v28 = vpop.f32.mrf.mxu1 }
0x30db   : >> { %v3598_v8 = vadd.f32 %v3596_v27, %v3592_v32  ;;  %v3594_v45 = vadd.f32 %v3593_v28, %v4653_v7 }
0x30dd   : >> { %v3599_v18 = vadd.f32 %v3597_v4, %v3594_v45  ;;  %v3604_v44 = vmul.f32 %v3598_v8, %v3598_v8 }
0x30df   : >> { %v3600_v16 = vadd.f32 %v3599_v18, %v3598_v8  ;;  %v3605_v38 = vmul.f32 %v3599_v18, %v3599_v18 }
0x30e1   : >> { %3601 = vadd.xlane.f32.xlu0 %v3600_v16  ;;  %v3606_v49 = vadd.f32 %v3605_v38, %v3604_v44 }
0x30e3   : >> { %3607 = vadd.xlane.f32.xlu1 %v3606_v49 }
0x316a   : >> { %v3602_v59 = vpop.xlane.xlu0 %3601 }
0x316b   : >> { %v3603_v57 = vmul.f32 0.00390625, %v3602_v59 }
0x316c   : >> { %v3608_v10 = vpop.xlane.xlu1 %3607 }
0x316d   : >> { %v3610_v29 = vmul.f32 %v3603_v57, %v3603_v57  ;;  %v3609_v46 = vmul.f32 0.00390625, %v3608_v10 }
0x316f   : >> { %v3611_v15 = vsub.f32 %v3609_v46, %v3610_v29 }
0x3171   : >> { %v3612_v6 = vmax.f32 %v3611_v15, 0.0 }
0x3173   : >> { %v3613_v40 = vadd.f32 1e-05, %v3612_v6 }
0x3175   : >> { %3934 = vrsqrt.f32 %v3613_v40 }
0x3182   : >> { %v3935_v47 = vpop.eup %3934 }
0x3183   : >> { %v3615_v22 = vmul.f32 %v5965_v13, %v3935_v47 }
0x3185   : >> { %3620 = vperm.xlu0 %3887, %v3615_v22   ;;  %v3616_v7 = vmul.f32 %v3615_v22, %v3603_v57 }
0x3187   : >> { %v3617_v5 = vsub.f32 %v5971_v1, %v3616_v7 }
0x3189   : >> { %3627 = vperm.xlu1 %3886, %v3617_v5  }
0x3200   : >> { %v3621_v23 = vpop.permute.xlu0 %3620 }
0x3201   : >> { %v3623_v20 = vmul.f32 %v3621_v23, %v3598_v8  ;;  %v3624_v21 = vmul.f32 %v3621_v23, %v3599_v18 }
0x3204   : >> { %v3628_v35 = vpop.permute.xlu1 %3627 }
0x3205   : >> { %v3630_v11 = vadd.f32 %v3628_v35, %v3623_v20  ;;  %v3631_v14 = vadd.f32 %v3628_v35, %v3624_v21 }
0x3207   : >> { %v3640_v61 = vadd.f32 %v5980_v30, %v3630_v11  ;;  %v3641_v31 = vadd.f32 %v5982_v51, %v3631_v14 }
0x3209   : >> { %v3642_v3 = vmul.f32 0.020833334, %v3640_v61  ;;  %v3643_v0 = vmul.f32 0.020833334, %v3641_v31  ;;  %500 = sbr.rel (!%p498_p12) target bundleno = 71 (0x47), region = 127 }
0x320b   : >> { %v3644_v54 = vadd.f32 %v3642_v3, %v5281_v25   ;;  %v3645_v13 = vadd.f32 %v3643_v0, %v5284_v53  }
0x320d   : >> { %v6266_v1 = vmov %v3645_v13  ;;  %v6267_v0 = vmov %v3644_v54  ;;  %3646 = vst [vmem:[%s4353_s20] sm:$0xff] (%p498_p12), %v3644_v54  ;;  %3647 = vst [vmem:[%s4353_s20 + $0x8] sm:$0xff] (%p498_p12), %v3645_v13 }
0x320e   : > { %4085 = shalt.err (!%p4082_p2)
}
0x320f   : > { %s4086_s17 = scalar_lea.hbm %s3661_s28, 256  ;;  %s4090_s25 = scalar_lea.hbm %s6208_s14, 512 }
0x3210   : > { %p4087_p3 = scmp.ne.s32.totalorder %s3661_s28, %s4086_s17  ;;  %p4091_p6 = scmp.lt.s32.totalorder %s3661_s28, %s6208_s14 }
0x3211   : > { %p4092_p10 = scmp.lt.s32.totalorder %s4090_s25, %s4086_s17 }
0x3212   : > { %p4088_p9 = pnand %p4087_p3, %p6269_p4 }
0x3213   : > { %p4093_p12 = por %p4092_p10, %p4091_p6 }
0x3214   : > { %p4089_p5 = pneg %p4088_p9 }
0x3216   : > { %p4094_p13 = pnand %p4093_p12, %p4089_p5 }
0x3218   : > { %4097 = shalt.err (!%p4094_p13)
}
0x3219   : > { %3798 = dma.vmem_to_hbm [thread:$0]  (%p6269_p4), %s3664_s21, 256, %s3661_s28, %s3649_s4  }
0x321a PF: > { %s6270_s19 = sld [smem:[#allocation14_spill]]  ;;  %p3815_p7 = scmp.ge.s32.totalorder %s4152_s16, 2 }
0x321b   : > { %s3675_s15 = sand.u32 1, %s4140_s29  }
0x321c   : > { %s3676_s2 = scalar_lea.sflag [#allocation4], %s3675_s15 }
0x3220   : > { %p6271_p8 = scmp.ne.s32.totalorder %s6270_s19, 0 }
0x3222   : > { %p3808_p11 = pnand %p3815_p7, %p6271_p8 }
0x3224   : > { %p3809_p0 = pneg %p3808_p11 }
0x3226   : > { %4135 = dma.done.wait (%p3809_p0), %s3676_s2, 256  }
0x3227   : > { %4137 = vsyncadd (%p3809_p0), %s3676_s2, 4294967040  ;;  %s6272_s16 = sld [smem:[#allocation12_spill]]  ;;  %s6275_s29 = smov %s4144_s30 }
0x3228   : > { %s6273_s0 = sld [smem:[#allocation11_spill]] }
0x3229   : > { %s6274_s15 = sld [smem:[#allocation13_spill]] }
0x322d   : > { %p26_p1 = scmp.ge.s32.totalorder %s6272_s16, 4  }
0x322e   : > { %s6276_s30 = smov %s6273_s0 }
0x322f   :  { %28 = sbr.rel (!%p26_p1) target bundleno = 11 (0xb), region = 138 }
0x3234   :  { %3681 = vsyncpa [#allocation3], 1 }
0x3235   :  { %3683 = vsyncpa [#allocation3 + $0x1], 1 }
0x3236   :  { %3684 = vsyncpa [#allocation6], 1 }
0x3237   :  { %3685 = vsyncpa [#allocation4], 1 }
0x3238   :  { %3687 = vsyncpa [#allocation4 + $0x1], 1 }

</bundles_post_ra>
